<compile_context>
chip_gen: v7x
topology: tpu7x:2x2x1
jax: 0.10.0
libtpu: 0.0.40
codegen_flags: <defaults>
</compile_context>

<pallas_src>
import functools

import jax
import jax.numpy as jnp
from jax.experimental import pallas as pl
from jax.experimental.pallas import tpu as pltpu

LANE = 128


def _round_up(x, m):
    return ((x + m - 1) // m) * m


# ----------------------------------------------------------------------------
# Pallas kernels
# ----------------------------------------------------------------------------
def _conv_bn_kernel(p_ref, w_ref, b_ref, o_ref, acc_ref, *, relu):
    """Tiled matmul: (TM,TK)x(TK,TN) bf16 -> f32 acc; epilogue adds folded-BN
    bias and (optionally) ReLU, then stores bf16."""
    k = pl.program_id(2)

    @pl.when(k == 0)
    def _():
        acc_ref[...] = jnp.zeros_like(acc_ref)

    acc_ref[...] += jnp.dot(p_ref[...], w_ref[...],
                            preferred_element_type=jnp.float32)

    @pl.when(k == pl.num_programs(2) - 1)
    def _():
        y = acc_ref[...] + b_ref[...]
        if relu:
            y = jnp.maximum(y, 0.0)
        o_ref[...] = y.astype(o_ref.dtype)


def _conv_bn_res_kernel(p_ref, w_ref, b_ref, r_ref, o_ref, acc_ref):
    """Last conv of a bottleneck: bias + residual add + ReLU fused in the
    epilogue of the tiled matmul."""
    k = pl.program_id(2)

    @pl.when(k == 0)
    def _():
        acc_ref[...] = jnp.zeros_like(acc_ref)

    acc_ref[...] += jnp.dot(p_ref[...], w_ref[...],
                            preferred_element_type=jnp.float32)

    @pl.when(k == pl.num_programs(2) - 1)
    def _():
        y = acc_ref[...] + b_ref[...] + r_ref[...].astype(jnp.float32)
        o_ref[...] = jnp.maximum(y, 0.0).astype(o_ref.dtype)


def _maxpool_kernel(x_ref, o_ref):
    # x_ref: (9, TM, C) -- the 9 shifted windows of the 3x3/s2 pool, tiled
    # over M with lane-dense (C % 128 == 0) channels.
    m = x_ref[0]
    for i in range(1, 9):
        m = jnp.maximum(m, x_ref[i])
    o_ref[...] = m


# ----------------------------------------------------------------------------
# Tiled pallas_call wrappers
# ----------------------------------------------------------------------------
def _choose_tile_k(k):
    for t in (512, 256, 128):
        if k % t == 0:
            return t
    return k  # K is always padded to a multiple of 128, so not reached.


def _choose_tile_m(m):
    if m >= 256:
        return 256, _round_up(m, 256)
    return m, m  # full-extent block (exempt from the (8,128) divisibility rule)


def _tiled_conv_matmul(p, w, b, *, relu, residual=None):
    """p:(M,Kp) bf16, w:(Kp,Np) bf16 (BN folded), b:(1,Np) f32,
    residual:(M,Np) bf16 or None.  Returns (M,Np) bf16."""
    m, kp = p.shape
    kp2, np_ = w.shape
    assert kp == kp2 and np_ % LANE == 0 and kp % LANE == 0

    tile_n = LANE
    tile_k = _choose_tile_k(kp)
    tile_m, m_pad = _choose_tile_m(m)
    if m_pad != m:
        p = jnp.pad(p, ((0, m_pad - m), (0, 0)))
        if residual is not None:
            residual = jnp.pad(residual, ((0, m_pad - m), (0, 0)))

    grid = (m_pad // tile_m, np_ // tile_n, kp // tile_k)
    p_spec = pl.BlockSpec((tile_m, tile_k), lambda i, j, k: (i, k))
    w_spec = pl.BlockSpec((tile_k, tile_n), lambda i, j, k: (k, j))
    b_spec = pl.BlockSpec((1, tile_n), lambda i, j, k: (0, j))
    o_spec = pl.BlockSpec((tile_m, tile_n), lambda i, j, k: (i, j))
    scratch = [pltpu.VMEM((tile_m, tile_n), jnp.float32)]
    cparams = pltpu.CompilerParams(
        dimension_semantics=("parallel", "parallel", "arbitrary"))
    out_shape = jax.ShapeDtypeStruct((m_pad, np_), jnp.bfloat16)

    if residual is None:
        out = pl.pallas_call(
            functools.partial(_conv_bn_kernel, relu=relu),
            out_shape=out_shape,
            grid_spec=pltpu.PrefetchScalarGridSpec(
                num_scalar_prefetch=0, grid=grid,
                in_specs=[p_spec, w_spec, b_spec],
                out_specs=o_spec, scratch_shapes=scratch),
            compiler_params=cparams,
        )(p, w, b)
    else:
        r_spec = pl.BlockSpec((tile_m, tile_n), lambda i, j, k: (i, j))
        out = pl.pallas_call(
            _conv_bn_res_kernel,
            out_shape=out_shape,
            grid_spec=pltpu.PrefetchScalarGridSpec(
                num_scalar_prefetch=0, grid=grid,
                in_specs=[p_spec, w_spec, b_spec, r_spec],
                out_specs=o_spec, scratch_shapes=scratch),
            compiler_params=cparams,
        )(p, w, b, residual)
    return out[:m] if m_pad != m else out


def _im2col(x, kh, kw, stride, pad):
    """x: NHWC -> (N*OH*OW, kh*kw*C) patches (ordering: kh, kw, c)."""
    n, h, w, c = x.shape
    if pad > 0:
        x = jnp.pad(x, ((0, 0), (pad, pad), (pad, pad), (0, 0)))
    hp, wp = h + 2 * pad, w + 2 * pad
    oh = (hp - kh) // stride + 1
    ow = (wp - kw) // stride + 1
    cols = []
    for i in range(kh):
        for j in range(kw):
            cols.append(x[:, i:i + stride * (oh - 1) + 1:stride,
                          j:j + stride * (ow - 1) + 1:stride, :])
    p = jnp.concatenate(cols, axis=-1)  # (N, OH, OW, kh*kw*C)
    return p.reshape(n * oh * ow, kh * kw * c), (n, oh, ow)


def fused_conv_bn(x, cp, *, stride, pad, relu, residual=None):
    """conv(no bias) + folded BN (+ residual) (+ ReLU).
    x: NHWC bf16 with channel-padded (carried) lanes; cp: prepped params."""
    kh, kw = cp["kh"], cp["kw"]
    n = x.shape[0]
    if kh == 1 and kw == 1:
        assert pad == 0
        if stride > 1:
            x = x[:, ::stride, ::stride, :]      # 1x1 conv: no im2col needed
        _, oh, ow, c = x.shape
        p = x.reshape(n * oh * ow, c)
        k_real = c
    else:
        p, (n, oh, ow) = _im2col(x, kh, kw, stride, pad)
        k_real = p.shape[1]

    k_pad, oc_pad = cp["w"].shape
    if k_pad != k_real:
        p = jnp.pad(p, ((0, 0), (0, k_pad - k_real)))
    p = p.astype(jnp.bfloat16)

    r = None
    if residual is not None:
        r = residual.reshape(n * oh * ow, oc_pad).astype(jnp.bfloat16)

    out = _tiled_conv_matmul(p, cp["w"], cp["b"], relu=relu, residual=r)
    return out.reshape(n, oh, ow, oc_pad)


def maxpool_3x3_s2_p1(x):
    """PyTorch nn.MaxPool2d(kernel_size=3, stride=2, padding=1). x: NHWC."""
    n, h, w, c = x.shape
    s = 2
    xp = jnp.pad(x, ((0, 0), (1, 1), (1, 1), (0, 0)),
                 constant_values=-jnp.inf)
    oh = (h + 2 - 3) // s + 1
    ow = (w + 2 - 3) // s + 1
    wins = []
    for i in range(3):
        for j in range(3):
            wins.append(xp[:, i:i + s * (oh - 1) + 1:s,
                           j:j + s * (ow - 1) + 1:s, :])
    m = n * oh * ow
    stacked = jnp.stack(wins, axis=0).reshape(9, m, c)
    tile_m, m_pad = _choose_tile_m(m)
    if m_pad != m:
        stacked = jnp.pad(stacked, ((0, 0), (0, m_pad - m), (0, 0)))
    out = pl.pallas_call(
        _maxpool_kernel,
        out_shape=jax.ShapeDtypeStruct((m_pad, c), x.dtype),
        grid_spec=pltpu.PrefetchScalarGridSpec(
            num_scalar_prefetch=0, grid=(m_pad // tile_m,),
            in_specs=[pl.BlockSpec((9, tile_m, c), lambda i: (0, i, 0))],
            out_specs=pl.BlockSpec((tile_m, c), lambda i: (i, 0))),
        compiler_params=pltpu.CompilerParams(
            dimension_semantics=("parallel",)),
    )(stacked)
    out = out[:m] if m_pad != m else out
    return out.reshape(n, oh, ow, c)


# ----------------------------------------------------------------------------
# Parameter construction (deterministic, synthetic, matmul-ready)
# ----------------------------------------------------------------------------
class _Keys:
    def __init__(self, seed=0):
        self._key = jax.random.PRNGKey(seed)

    def __call__(self):
        self._key, sub = jax.random.split(self._key)
        return sub


def _prep_conv_bn(kg, oc, ic, kh, kw, carried_ic, eps=1e-5):
    """Synthesize conv + eval-mode BN, fold BN scale into the weight, and
    pre-transpose / channel-pad to lane-dense (K_pad, OC_pad) bf16."""
    w = jax.random.normal(kg(), (oc, ic, kh, kw), jnp.float32) * 0.05
    gamma = 1.0 + 0.05 * jax.random.normal(kg(), (oc,), jnp.float32)
    beta = 0.05 * jax.random.normal(kg(), (oc,), jnp.float32)
    mean = 0.05 * jax.random.normal(kg(), (oc,), jnp.float32)
    var = 1.0 + jnp.abs(0.05 * jax.random.normal(kg(), (oc,), jnp.float32))
    scale = gamma / jnp.sqrt(var + eps)            # folded eval-mode BN
    bias = beta - mean * scale

    wf = w * scale[:, None, None, None]            # fold scale into weights
    wt = jnp.transpose(wf, (2, 3, 1, 0))           # (kh, kw, ic, oc)
    if carried_ic > ic:                            # match carried (padded) C
        wt = jnp.pad(wt, ((0, 0), (0, 0), (0, carried_ic - ic), (0, 0)))
    k = kh * kw * carried_ic
    k_pad = _round_up(k, LANE)
    oc_pad = _round_up(oc, LANE)
    wm = wt.reshape(k, oc)
    wm = jnp.pad(wm, ((0, k_pad - k), (0, oc_pad - oc)))
    b = jnp.pad(bias, (0, oc_pad - oc)).reshape(1, oc_pad)
    return {"w": wm.astype(jnp.bfloat16), "b": b.astype(jnp.float32),
            "kh": kh, "kw": kw, "oc": oc}


def make_resnet50_params(base_width=32, in_ch=3, seed=0):
    """Width-reduced torchvision resnet50: blocks [3,4,6,3], expansion 4."""
    kg = _Keys(seed)
    exp = 4
    params = {
        "conv1": _prep_conv_bn(kg, base_width, in_ch, 7, 7, carried_ic=in_ch),
        "layers": [],
    }
    cfg = [(base_width, 3, 1), (2 * base_width, 4, 2),
           (4 * base_width, 6, 2), (8 * base_width, 3, 2)]
    inplanes = base_width
    for planes, nblocks, layer_stride in cfg:
        layer = []
        for bidx in range(nblocks):
            stride = layer_stride if bidx == 0 else 1
            cin = _round_up(inplanes, LANE)    # carried channels of the input
            cmid = _round_up(planes, LANE)
            blk = {
                "stride": stride,
                "conv1": _prep_conv_bn(kg, planes, inplanes, 1, 1, cin),
                "conv2": _prep_conv_bn(kg, planes, planes, 3, 3, cmid),
                "conv3": _prep_conv_bn(kg, planes * exp, planes, 1, 1, cmid),
            }
            if stride != 1 or inplanes != planes * exp:
                blk["down"] = _prep_conv_bn(kg, planes * exp, inplanes, 1, 1,
                                            cin)
            layer.append(blk)
            inplanes = planes * exp
        params["layers"].append(layer)
    params["out_channels"] = inplanes
    return params


# ----------------------------------------------------------------------------
# Forward pass (matches ResNet.forward: conv1/bn1/relu/maxpool/layer1..4)
# ----------------------------------------------------------------------------
def _bottleneck(x, blk):
    stride = blk["stride"]
    identity = x
    out = fused_conv_bn(x, blk["conv1"], stride=1, pad=0, relu=True)
    out = fused_conv_bn(out, blk["conv2"], stride=stride, pad=1, relu=True)
    if "down" in blk:
        identity = fused_conv_bn(x, blk["down"], stride=stride, pad=0,
                                 relu=False)
    # conv3: bias + residual add + ReLU all fused in the kernel epilogue.
    out = fused_conv_bn(out, blk["conv3"], stride=1, pad=0, relu=True,
                        residual=identity)
    return out


def resnet_forward(x_nchw, params):
    # Accepts NCHW like the PyTorch module; returns NCHW feature map (f32).
    x = jnp.transpose(x_nchw, (0, 2, 3, 1)).astype(jnp.bfloat16)  # -> NHWC
    x = fused_conv_bn(x, params["conv1"], stride=2, pad=3, relu=True)
    x = maxpool_3x3_s2_p1(x)
    for layer in params["layers"]:
        for blk in layer:
            x = _bottleneck(x, blk)
    x = x[..., :params["out_channels"]]            # drop lane padding
    return jnp.transpose(x, (0, 3, 1, 2)).astype(jnp.float32)  # -> NCHW


# ----------------------------------------------------------------------------
if __name__ == "__main__":
    key = jax.random.PRNGKey(0)
    x = jax.random.normal(key, (2, 3, 32, 32), jnp.float32)   # NCHW input

    params = make_resnet50_params(base_width=32, in_ch=3, seed=0)

    fwd = jax.jit(lambda inp: resnet_forward(inp, params))
    out = fwd(x)
    jax.block_until_ready(out)

    # sanity: width-reduced resnet50 -> out_channels = 8*base_width*4 = 1024,
    # spatial 32 -> /2 (conv1) -> /2 (maxpool) -> /2 /2 /2 (layers 2..4) = 1
    assert out.shape == (2, 1024, 1, 1), out.shape
    assert bool(jnp.all(jnp.isfinite(out)))
    print("KERNEL_OK")
</pallas_src>

<mosaic_0001>
module attributes {stable_mosaic.version = 11 : i64} {
  func.func @_conv_bn_kernel(%arg0: i32, %arg1: i32, %arg2: i32, %arg3: memref<256x256xbf16, #tpu.memory_space<vmem>>, %arg4: memref<256x128xbf16, #tpu.memory_space<vmem>>, %arg5: memref<1x128xf32, #tpu.memory_space<vmem>>, %arg6: memref<256x128xbf16, #tpu.memory_space<vmem>>, %arg7: memref<256x128xf32, #tpu.memory_space<vmem>>) attributes {dimension_semantics = [#tpu.dimension_semantics<parallel>, #tpu.dimension_semantics<parallel>, #tpu.dimension_semantics<arbitrary>], iteration_bounds = array<i64: 2, 1, 1>, scalar_prefetch = 0 : i64, scratch_operands = 1 : i64, tpu.core_type = #tpu.core_type<tc>, window_params = [{transform_indices = @transform_0, window_bounds = array<i64: 256, 256>}, {transform_indices = @transform_1, window_bounds = array<i64: 256, 128>}, {transform_indices = @transform_2, window_bounds = array<i64: 1, 128>}, {transform_indices = @transform_3, window_bounds = array<i64: 256, 128>}]} {
    %c0_i32 = arith.constant 0 : i32
    %0 = arith.cmpi eq, %arg2, %c0_i32 : i32
    %1 = arith.extui %0 : i1 to i32
    %c0_i32_0 = arith.constant 0 : i32
    %2 = arith.cmpi ne, %1, %c0_i32_0 : i32
    scf.if %2 {
      %cst_10 = arith.constant 0.000000e+00 : f32
      %12 = vector.broadcast %cst_10 : f32 to vector<256x128xf32>
      %c0_11 = arith.constant 0 : index
      %c0_12 = arith.constant 0 : index
      %13 = vector.load %arg7[%c0_11, %c0_12] : memref<256x128xf32, #tpu.memory_space<vmem>>, vector<256x128xf32>
      tpu.vector_store %arg7[%c0_11, %c0_12], %12 {strides = array<i32>} : memref<256x128xf32, #tpu.memory_space<vmem>>, vector<256x128xf32>,
    } else {
    }
    %c0 = arith.constant 0 : index
    %c0_1 = arith.constant 0 : index
    %3 = vector.load %arg7[%c0, %c0_1] : memref<256x128xf32, #tpu.memory_space<vmem>>, vector<256x128xf32>
    %c0_2 = arith.constant 0 : index
    %c0_3 = arith.constant 0 : index
    %4 = vector.load %arg3[%c0_2, %c0_3] : memref<256x256xbf16, #tpu.memory_space<vmem>>, vector<256x256xbf16>
    %c0_4 = arith.constant 0 : index
    %c0_5 = arith.constant 0 : index
    %5 = vector.load %arg4[%c0_4, %c0_5] : memref<256x128xbf16, #tpu.memory_space<vmem>>, vector<256x128xbf16>
    %cst = arith.constant dense<0.000000e+00> : vector<256x128xf32>
    %6 = tpu.matmul %4, %5, %cst {dimension_numbers = #tpu.dot_dimension_numbers<[1], [0], [0], [1], [0, 0, 1, 1], [], []>} : vector<256x256xbf16>, vector<256x128xbf16>, vector<256x128xf32> -> vector<256x128xf32>
    %7 = arith.addf %3, %6 : vector<256x128xf32>
    %c0_6 = arith.constant 0 : index
    %c0_7 = arith.constant 0 : index
    %8 = vector.load %arg7[%c0_6, %c0_7] : memref<256x128xf32, #tpu.memory_space<vmem>>, vector<256x128xf32>
    tpu.vector_store %arg7[%c0_6, %c0_7], %7 {strides = array<i32>} : memref<256x128xf32, #tpu.memory_space<vmem>>, vector<256x128xf32>,
    %c0_i32_8 = arith.constant 0 : i32
    %9 = arith.cmpi eq, %arg2, %c0_i32_8 : i32
    %10 = arith.extui %9 : i1 to i32
    %c0_i32_9 = arith.constant 0 : i32
    %11 = arith.cmpi ne, %10, %c0_i32_9 : i32
    scf.if %11 {
      %c0_10 = arith.constant 0 : index
      %c0_11 = arith.constant 0 : index
      %12 = vector.load %arg7[%c0_10, %c0_11] : memref<256x128xf32, #tpu.memory_space<vmem>>, vector<256x128xf32>
      %c0_12 = arith.constant 0 : index
      %c0_13 = arith.constant 0 : index
      %13 = vector.load %arg5[%c0_12, %c0_13] : memref<1x128xf32, #tpu.memory_space<vmem>>, vector<1x128xf32>
      %14 = vector.broadcast %13 : vector<1x128xf32> to vector<256x128xf32>
      %15 = arith.addf %12, %14 : vector<256x128xf32>
      %cst_14 = arith.constant 0.000000e+00 : f32
      %16 = vector.broadcast %cst_14 : f32 to vector<256x128xf32>
      %17 = arith.maximumf %15, %16 : vector<256x128xf32>
      %18 = arith.truncf %17 : vector<256x128xf32> to vector<256x128xbf16>
      %c0_15 = arith.constant 0 : index
      %c0_16 = arith.constant 0 : index
      %19 = vector.load %arg6[%c0_15, %c0_16] : memref<256x128xbf16, #tpu.memory_space<vmem>>, vector<256x128xbf16>
      tpu.vector_store %arg6[%c0_15, %c0_16], %18 {strides = array<i32>} : memref<256x128xbf16, #tpu.memory_space<vmem>>, vector<256x128xbf16>,
    } else {
    }
    return
  }
  func.func @transform_0(%arg0: i32, %arg1: i32, %arg2: i32) -> (i32, i32) {
    %c0_i32 = arith.constant 0 : i32
    return %arg0, %arg2 : i32, i32
  }
  func.func @transform_1(%arg0: i32, %arg1: i32, %arg2: i32) -> (i32, i32) {
    %c0_i32 = arith.constant 0 : i32
    return %arg2, %arg1 : i32, i32
  }
  func.func @transform_2(%arg0: i32, %arg1: i32, %arg2: i32) -> (i32, i32) {
    %c0_i32 = arith.constant 0 : i32
    %c0_i32_0 = arith.constant 0 : i32
    return %c0_i32, %arg1 : i32, i32
  }
  func.func @transform_3(%arg0: i32, %arg1: i32, %arg2: i32) -> (i32, i32) {
    %c0_i32 = arith.constant 0 : i32
    return %arg0, %arg1 : i32, i32
  }
}

module attributes {stable_mosaic.version = 11 : i64} {
  func.func @_maxpool_kernel(%arg0: i32, %arg1: memref<9x128x128xbf16, #tpu.memory_space<vmem>>, %arg2: memref<128x128xbf16, #tpu.memory_space<vmem>>) attributes {dimension_semantics = [#tpu.dimension_semantics<parallel>], iteration_bounds = array<i64: 1>, scalar_prefetch = 0 : i64, scratch_operands = 0 : i64, tpu.core_type = #tpu.core_type<tc>, window_params = [{transform_indices = @transform_0, window_bounds = array<i64: 9, 128, 128>}, {transform_indices = @transform_1, window_bounds = array<i64: 128, 128>}]} {
    %c0 = arith.constant 0 : index
    %c0_0 = arith.constant 0 : index
    %c0_1 = arith.constant 0 : index
    %0 = vector.load %arg1[%c0, %c0_0, %c0_1] : memref<9x128x128xbf16, #tpu.memory_space<vmem>>, vector<1x128x128xbf16>
    %1 = vector.shape_cast %0 : vector<1x128x128xbf16> to vector<128x128xbf16>
    %c1 = arith.constant 1 : index
    %c0_2 = arith.constant 0 : index
    %c0_3 = arith.constant 0 : index
    %2 = vector.load %arg1[%c1, %c0_2, %c0_3] : memref<9x128x128xbf16, #tpu.memory_space<vmem>>, vector<1x128x128xbf16>
    %3 = vector.shape_cast %2 : vector<1x128x128xbf16> to vector<128x128xbf16>
    %4 = arith.maximumf %1, %3 : vector<128x128xbf16>
    %c2 = arith.constant 2 : index
    %c0_4 = arith.constant 0 : index
    %c0_5 = arith.constant 0 : index
    %5 = vector.load %arg1[%c2, %c0_4, %c0_5] : memref<9x128x128xbf16, #tpu.memory_space<vmem>>, vector<1x128x128xbf16>
    %6 = vector.shape_cast %5 : vector<1x128x128xbf16> to vector<128x128xbf16>
    %7 = arith.maximumf %4, %6 : vector<128x128xbf16>
    %c3 = arith.constant 3 : index
    %c0_6 = arith.constant 0 : index
    %c0_7 = arith.constant 0 : index
    %8 = vector.load %arg1[%c3, %c0_6, %c0_7] : memref<9x128x128xbf16, #tpu.memory_space<vmem>>, vector<1x128x128xbf16>
    %9 = vector.shape_cast %8 : vector<1x128x128xbf16> to vector<128x128xbf16>
    %10 = arith.maximumf %7, %9 : vector<128x128xbf16>
    %c4 = arith.constant 4 : index
    %c0_8 = arith.constant 0 : index
    %c0_9 = arith.constant 0 : index
    %11 = vector.load %arg1[%c4, %c0_8, %c0_9] : memref<9x128x128xbf16, #tpu.memory_space<vmem>>, vector<1x128x128xbf16>
    %12 = vector.shape_cast %11 : vector<1x128x128xbf16> to vector<128x128xbf16>
    %13 = arith.maximumf %10, %12 : vector<128x128xbf16>
    %c5 = arith.constant 5 : index
    %c0_10 = arith.constant 0 : index
    %c0_11 = arith.constant 0 : index
    %14 = vector.load %arg1[%c5, %c0_10, %c0_11] : memref<9x128x128xbf16, #tpu.memory_space<vmem>>, vector<1x128x128xbf16>
    %15 = vector.shape_cast %14 : vector<1x128x128xbf16> to vector<128x128xbf16>
    %16 = arith.maximumf %13, %15 : vector<128x128xbf16>
    %c6 = arith.constant 6 : index
    %c0_12 = arith.constant 0 : index
    %c0_13 = arith.constant 0 : index
    %17 = vector.load %arg1[%c6, %c0_12, %c0_13] : memref<9x128x128xbf16, #tpu.memory_space<vmem>>, vector<1x128x128xbf16>
    %18 = vector.shape_cast %17 : vector<1x128x128xbf16> to vector<128x128xbf16>
    %19 = arith.maximumf %16, %18 : vector<128x128xbf16>
    %c7 = arith.constant 7 : index
    %c0_14 = arith.constant 0 : index
    %c0_15 = arith.constant 0 : index
    %20 = vector.load %arg1[%c7, %c0_14, %c0_15] : memref<9x128x128xbf16, #tpu.memory_space<vmem>>, vector<1x128x128xbf16>
    %21 = vector.shape_cast %20 : vector<1x128x128xbf16> to vector<128x128xbf16>
    %22 = arith.maximumf %19, %21 : vector<128x128xbf16>
    %c8 = arith.constant 8 : index
    %c0_16 = arith.constant 0 : index
    %c0_17 = arith.constant 0 : index
    %23 = vector.load %arg1[%c8, %c0_16, %c0_17] : memref<9x128x128xbf16, #tpu.memory_space<vmem>>, vector<1x128x128xbf16>
    %24 = vector.shape_cast %23 : vector<1x128x128xbf16> to vector<128x128xbf16>
    %25 = arith.maximumf %22, %24 : vector<128x128xbf16>
    %c0_18 = arith.constant 0 : index
    %c0_19 = arith.constant 0 : index
    %26 = vector.load %arg2[%c0_18, %c0_19] : memref<128x128xbf16, #tpu.memory_space<vmem>>, vector<128x128xbf16>
    tpu.vector_store %arg2[%c0_18, %c0_19], %25 {strides = array<i32>} : memref<128x128xbf16, #tpu.memory_space<vmem>>, vector<128x128xbf16>,
    return
  }
  func.func @transform_0(%arg0: i32) -> (i32, i32, i32) {
    %c0_i32 = arith.constant 0 : i32
    %c0_i32_0 = arith.constant 0 : i32
    %c0_i32_1 = arith.constant 0 : i32
    return %c0_i32, %arg0, %c0_i32_0 : i32, i32, i32
  }
  func.func @transform_1(%arg0: i32) -> (i32, i32) {
    %c0_i32 = arith.constant 0 : i32
    %c0_i32_0 = arith.constant 0 : i32
    return %arg0, %c0_i32 : i32, i32
  }
}

module attributes {stable_mosaic.version = 11 : i64} {
  func.func @_conv_bn_kernel(%arg0: i32, %arg1: i32, %arg2: i32, %arg3: memref<128x128xbf16, #tpu.memory_space<vmem>>, %arg4: memref<128x128xbf16, #tpu.memory_space<vmem>>, %arg5: memref<1x128xf32, #tpu.memory_space<vmem>>, %arg6: memref<128x128xbf16, #tpu.memory_space<vmem>>, %arg7: memref<128x128xf32, #tpu.memory_space<vmem>>) attributes {dimension_semantics = [#tpu.dimension_semantics<parallel>, #tpu.dimension_semantics<parallel>, #tpu.dimension_semantics<arbitrary>], iteration_bounds = array<i64: 1, 1, 1>, scalar_prefetch = 0 : i64, scratch_operands = 1 : i64, tpu.core_type = #tpu.core_type<tc>, window_params = [{transform_indices = @transform_0, window_bounds = array<i64: 128, 128>}, {transform_indices = @transform_1, window_bounds = array<i64: 128, 128>}, {transform_indices = @transform_2, window_bounds = array<i64: 1, 128>}, {transform_indices = @transform_3, window_bounds = array<i64: 128, 128>}]} {
    %c0_i32 = arith.constant 0 : i32
    %0 = arith.cmpi eq, %arg2, %c0_i32 : i32
    %1 = arith.extui %0 : i1 to i32
    %c0_i32_0 = arith.constant 0 : i32
    %2 = arith.cmpi ne, %1, %c0_i32_0 : i32
    scf.if %2 {
      %cst_10 = arith.constant 0.000000e+00 : f32
      %12 = vector.broadcast %cst_10 : f32 to vector<128x128xf32>
      %c0_11 = arith.constant 0 : index
      %c0_12 = arith.constant 0 : index
      %13 = vector.load %arg7[%c0_11, %c0_12] : memref<128x128xf32, #tpu.memory_space<vmem>>, vector<128x128xf32>
      tpu.vector_store %arg7[%c0_11, %c0_12], %12 {strides = array<i32>} : memref<128x128xf32, #tpu.memory_space<vmem>>, vector<128x128xf32>,
    } else {
    }
    %c0 = arith.constant 0 : index
    %c0_1 = arith.constant 0 : index
    %3 = vector.load %arg7[%c0, %c0_1] : memref<128x128xf32, #tpu.memory_space<vmem>>, vector<128x128xf32>
    %c0_2 = arith.constant 0 : index
    %c0_3 = arith.constant 0 : index
    %4 = vector.load %arg3[%c0_2, %c0_3] : memref<128x128xbf16, #tpu.memory_space<vmem>>, vector<128x128xbf16>
    %c0_4 = arith.constant 0 : index
    %c0_5 = arith.constant 0 : index
    %5 = vector.load %arg4[%c0_4, %c0_5] : memref<128x128xbf16, #tpu.memory_space<vmem>>, vector<128x128xbf16>
    %cst = arith.constant dense<0.000000e+00> : vector<128x128xf32>
    %6 = tpu.matmul %4, %5, %cst {dimension_numbers = #tpu.dot_dimension_numbers<[1], [0], [0], [1], [0, 0, 1, 1], [], []>} : vector<128x128xbf16>, vector<128x128xbf16>, vector<128x128xf32> -> vector<128x128xf32>
    %7 = arith.addf %3, %6 : vector<128x128xf32>
    %c0_6 = arith.constant 0 : index
    %c0_7 = arith.constant 0 : index
    %8 = vector.load %arg7[%c0_6, %c0_7] : memref<128x128xf32, #tpu.memory_space<vmem>>, vector<128x128xf32>
    tpu.vector_store %arg7[%c0_6, %c0_7], %7 {strides = array<i32>} : memref<128x128xf32, #tpu.memory_space<vmem>>, vector<128x128xf32>,
    %c0_i32_8 = arith.constant 0 : i32
    %9 = arith.cmpi eq, %arg2, %c0_i32_8 : i32
    %10 = arith.extui %9 : i1 to i32
    %c0_i32_9 = arith.constant 0 : i32
    %11 = arith.cmpi ne, %10, %c0_i32_9 : i32
    scf.if %11 {
      %c0_10 = arith.constant 0 : index
      %c0_11 = arith.constant 0 : index
      %12 = vector.load %arg7[%c0_10, %c0_11] : memref<128x128xf32, #tpu.memory_space<vmem>>, vector<128x128xf32>
      %c0_12 = arith.constant 0 : index
      %c0_13 = arith.constant 0 : index
      %13 = vector.load %arg5[%c0_12, %c0_13] : memref<1x128xf32, #tpu.memory_space<vmem>>, vector<1x128xf32>
      %14 = vector.broadcast %13 : vector<1x128xf32> to vector<128x128xf32>
      %15 = arith.addf %12, %14 : vector<128x128xf32>
      %cst_14 = arith.constant 0.000000e+00 : f32
      %16 = vector.broadcast %cst_14 : f32 to vector<128x128xf32>
      %17 = arith.maximumf %15, %16 : vector<128x128xf32>
      %18 = arith.truncf %17 : vector<128x128xf32> to vector<128x128xbf16>
      %c0_15 = arith.constant 0 : index
      %c0_16 = arith.constant 0 : index
      %19 = vector.load %arg6[%c0_15, %c0_16] : memref<128x128xbf16, #tpu.memory_space<vmem>>, vector<128x128xbf16>
      tpu.vector_store %arg6[%c0_15, %c0_16], %18 {strides = array<i32>} : memref<128x128xbf16, #tpu.memory_space<vmem>>, vector<128x128xbf16>,
    } else {
    }
    return
  }
  func.func @transform_0(%arg0: i32, %arg1: i32, %arg2: i32) -> (i32, i32) {
    %c0_i32 = arith.constant 0 : i32
    return %arg0, %arg2 : i32, i32
  }
  func.func @transform_1(%arg0: i32, %arg1: i32, %arg2: i32) -> (i32, i32) {
    %c0_i32 = arith.constant 0 : i32
    return %arg2, %arg1 : i32, i32
  }
  func.func @transform_2(%arg0: i32, %arg1: i32, %arg2: i32) -> (i32, i32) {
    %c0_i32 = arith.constant 0 : i32
    %c0_i32_0 = arith.constant 0 : i32
    return %c0_i32, %arg1 : i32, i32
  }
  func.func @transform_3(%arg0: i32, %arg1: i32, %arg2: i32) -> (i32, i32) {
    %c0_i32 = arith.constant 0 : i32
    return %arg0, %arg1 : i32, i32
  }
}

module attributes {stable_mosaic.version = 11 : i64} {
  func.func @_conv_bn_kernel(%arg0: i32, %arg1: i32, %arg2: i32, %arg3: memref<128x128xbf16, #tpu.memory_space<vmem>>, %arg4: memref<128x128xbf16, #tpu.memory_space<vmem>>, %arg5: memref<1x128xf32, #tpu.memory_space<vmem>>, %arg6: memref<128x128xbf16, #tpu.memory_space<vmem>>, %arg7: memref<128x128xf32, #tpu.memory_space<vmem>>) attributes {dimension_semantics = [#tpu.dimension_semantics<parallel>, #tpu.dimension_semantics<parallel>, #tpu.dimension_semantics<arbitrary>], iteration_bounds = array<i64: 1, 1, 9>, scalar_prefetch = 0 : i64, scratch_operands = 1 : i64, tpu.core_type = #tpu.core_type<tc>, window_params = [{transform_indices = @transform_0, window_bounds = array<i64: 128, 128>}, {transform_indices = @transform_1, window_bounds = array<i64: 128, 128>}, {transform_indices = @transform_2, window_bounds = array<i64: 1, 128>}, {transform_indices = @transform_3, window_bounds = array<i64: 128, 128>}]} {
    %c0_i32 = arith.constant 0 : i32
    %0 = arith.cmpi eq, %arg2, %c0_i32 : i32
    %1 = arith.extui %0 : i1 to i32
    %c0_i32_0 = arith.constant 0 : i32
    %2 = arith.cmpi ne, %1, %c0_i32_0 : i32
    scf.if %2 {
      %cst_9 = arith.constant 0.000000e+00 : f32
      %12 = vector.broadcast %cst_9 : f32 to vector<128x128xf32>
      %c0_10 = arith.constant 0 : index
      %c0_11 = arith.constant 0 : index
      %13 = vector.load %arg7[%c0_10, %c0_11] : memref<128x128xf32, #tpu.memory_space<vmem>>, vector<128x128xf32>
      tpu.vector_store %arg7[%c0_10, %c0_11], %12 {strides = array<i32>} : memref<128x128xf32, #tpu.memory_space<vmem>>, vector<128x128xf32>,
    } else {
    }
    %c0 = arith.constant 0 : index
    %c0_1 = arith.constant 0 : index
    %3 = vector.load %arg7[%c0, %c0_1] : memref<128x128xf32, #tpu.memory_space<vmem>>, vector<128x128xf32>
    %c0_2 = arith.constant 0 : index
    %c0_3 = arith.constant 0 : index
    %4 = vector.load %arg3[%c0_2, %c0_3] : memref<128x128xbf16, #tpu.memory_space<vmem>>, vector<128x128xbf16>
    %c0_4 = arith.constant 0 : index
    %c0_5 = arith.constant 0 : index
    %5 = vector.load %arg4[%c0_4, %c0_5] : memref<128x128xbf16, #tpu.memory_space<vmem>>, vector<128x128xbf16>
    %cst = arith.constant dense<0.000000e+00> : vector<128x128xf32>
    %6 = tpu.matmul %4, %5, %cst {dimension_numbers = #tpu.dot_dimension_numbers<[1], [0], [0], [1], [0, 0, 1, 1], [], []>} : vector<128x128xbf16>, vector<128x128xbf16>, vector<128x128xf32> -> vector<128x128xf32>
    %7 = arith.addf %3, %6 : vector<128x128xf32>
    %c0_6 = arith.constant 0 : index
    %c0_7 = arith.constant 0 : index
    %8 = vector.load %arg7[%c0_6, %c0_7] : memref<128x128xf32, #tpu.memory_space<vmem>>, vector<128x128xf32>
    tpu.vector_store %arg7[%c0_6, %c0_7], %7 {strides = array<i32>} : memref<128x128xf32, #tpu.memory_space<vmem>>, vector<128x128xf32>,
    %c8_i32 = arith.constant 8 : i32
    %9 = arith.cmpi eq, %arg2, %c8_i32 : i32
    %10 = arith.extui %9 : i1 to i32
    %c0_i32_8 = arith.constant 0 : i32
    %11 = arith.cmpi ne, %10, %c0_i32_8 : i32
    scf.if %11 {
      %c0_9 = arith.constant 0 : index
      %c0_10 = arith.constant 0 : index
      %12 = vector.load %arg7[%c0_9, %c0_10] : memref<128x128xf32, #tpu.memory_space<vmem>>, vector<128x128xf32>
      %c0_11 = arith.constant 0 : index
      %c0_12 = arith.constant 0 : index
      %13 = vector.load %arg5[%c0_11, %c0_12] : memref<1x128xf32, #tpu.memory_space<vmem>>, vector<1x128xf32>
      %14 = vector.broadcast %13 : vector<1x128xf32> to vector<128x128xf32>
      %15 = arith.addf %12, %14 : vector<128x128xf32>
      %cst_13 = arith.constant 0.000000e+00 : f32
      %16 = vector.broadcast %cst_13 : f32 to vector<128x128xf32>
      %17 = arith.maximumf %15, %16 : vector<128x128xf32>
      %18 = arith.truncf %17 : vector<128x128xf32> to vector<128x128xbf16>
      %c0_14 = arith.constant 0 : index
      %c0_15 = arith.constant 0 : index
      %19 = vector.load %arg6[%c0_14, %c0_15] : memref<128x128xbf16, #tpu.memory_space<vmem>>, vector<128x128xbf16>
      tpu.vector_store %arg6[%c0_14, %c0_15], %18 {strides = array<i32>} : memref<128x128xbf16, #tpu.memory_space<vmem>>, vector<128x128xbf16>,
    } else {
    }
    return
  }
  func.func @transform_0(%arg0: i32, %arg1: i32, %arg2: i32) -> (i32, i32) {
    %c0_i32 = arith.constant 0 : i32
    return %arg0, %arg2 : i32, i32
  }
  func.func @transform_1(%arg0: i32, %arg1: i32, %arg2: i32) -> (i32, i32) {
    %c0_i32 = arith.constant 0 : i32
    return %arg2, %arg1 : i32, i32
  }
  func.func @transform_2(%arg0: i32, %arg1: i32, %arg2: i32) -> (i32, i32) {
    %c0_i32 = arith.constant 0 : i32
    %c0_i32_0 = arith.constant 0 : i32
    return %c0_i32, %arg1 : i32, i32
  }
  func.func @transform_3(%arg0: i32, %arg1: i32, %arg2: i32) -> (i32, i32) {
    %c0_i32 = arith.constant 0 : i32
    return %arg0, %arg1 : i32, i32
  }
}

module attributes {stable_mosaic.version = 11 : i64} {
  func.func @_conv_bn_kernel(%arg0: i32, %arg1: i32, %arg2: i32, %arg3: memref<128x128xbf16, #tpu.memory_space<vmem>>, %arg4: memref<128x128xbf16, #tpu.memory_space<vmem>>, %arg5: memref<1x128xf32, #tpu.memory_space<vmem>>, %arg6: memref<128x128xbf16, #tpu.memory_space<vmem>>, %arg7: memref<128x128xf32, #tpu.memory_space<vmem>>) attributes {dimension_semantics = [#tpu.dimension_semantics<parallel>, #tpu.dimension_semantics<parallel>, #tpu.dimension_semantics<arbitrary>], iteration_bounds = array<i64: 1, 1, 1>, scalar_prefetch = 0 : i64, scratch_operands = 1 : i64, tpu.core_type = #tpu.core_type<tc>, window_params = [{transform_indices = @transform_0, window_bounds = array<i64: 128, 128>}, {transform_indices = @transform_1, window_bounds = array<i64: 128, 128>}, {transform_indices = @transform_2, window_bounds = array<i64: 1, 128>}, {transform_indices = @transform_3, window_bounds = array<i64: 128, 128>}]} {
    %c0_i32 = arith.constant 0 : i32
    %0 = arith.cmpi eq, %arg2, %c0_i32 : i32
    %1 = arith.extui %0 : i1 to i32
    %c0_i32_0 = arith.constant 0 : i32
    %2 = arith.cmpi ne, %1, %c0_i32_0 : i32
    scf.if %2 {
      %cst_10 = arith.constant 0.000000e+00 : f32
      %12 = vector.broadcast %cst_10 : f32 to vector<128x128xf32>
      %c0_11 = arith.constant 0 : index
      %c0_12 = arith.constant 0 : index
      %13 = vector.load %arg7[%c0_11, %c0_12] : memref<128x128xf32, #tpu.memory_space<vmem>>, vector<128x128xf32>
      tpu.vector_store %arg7[%c0_11, %c0_12], %12 {strides = array<i32>} : memref<128x128xf32, #tpu.memory_space<vmem>>, vector<128x128xf32>,
    } else {
    }
    %c0 = arith.constant 0 : index
    %c0_1 = arith.constant 0 : index
    %3 = vector.load %arg7[%c0, %c0_1] : memref<128x128xf32, #tpu.memory_space<vmem>>, vector<128x128xf32>
    %c0_2 = arith.constant 0 : index
    %c0_3 = arith.constant 0 : index
    %4 = vector.load %arg3[%c0_2, %c0_3] : memref<128x128xbf16, #tpu.memory_space<vmem>>, vector<128x128xbf16>
    %c0_4 = arith.constant 0 : index
    %c0_5 = arith.constant 0 : index
    %5 = vector.load %arg4[%c0_4, %c0_5] : memref<128x128xbf16, #tpu.memory_space<vmem>>, vector<128x128xbf16>
    %cst = arith.constant dense<0.000000e+00> : vector<128x128xf32>
    %6 = tpu.matmul %4, %5, %cst {dimension_numbers = #tpu.dot_dimension_numbers<[1], [0], [0], [1], [0, 0, 1, 1], [], []>} : vector<128x128xbf16>, vector<128x128xbf16>, vector<128x128xf32> -> vector<128x128xf32>
    %7 = arith.addf %3, %6 : vector<128x128xf32>
    %c0_6 = arith.constant 0 : index
    %c0_7 = arith.constant 0 : index
    %8 = vector.load %arg7[%c0_6, %c0_7] : memref<128x128xf32, #tpu.memory_space<vmem>>, vector<128x128xf32>
    tpu.vector_store %arg7[%c0_6, %c0_7], %7 {strides = array<i32>} : memref<128x128xf32, #tpu.memory_space<vmem>>, vector<128x128xf32>,
    %c0_i32_8 = arith.constant 0 : i32
    %9 = arith.cmpi eq, %arg2, %c0_i32_8 : i32
    %10 = arith.extui %9 : i1 to i32
    %c0_i32_9 = arith.constant 0 : i32
    %11 = arith.cmpi ne, %10, %c0_i32_9 : i32
    scf.if %11 {
      %c0_10 = arith.constant 0 : index
      %c0_11 = arith.constant 0 : index
      %12 = vector.load %arg7[%c0_10, %c0_11] : memref<128x128xf32, #tpu.memory_space<vmem>>, vector<128x128xf32>
      %c0_12 = arith.constant 0 : index
      %c0_13 = arith.constant 0 : index
      %13 = vector.load %arg5[%c0_12, %c0_13] : memref<1x128xf32, #tpu.memory_space<vmem>>, vector<1x128xf32>
      %14 = vector.broadcast %13 : vector<1x128xf32> to vector<128x128xf32>
      %15 = arith.addf %12, %14 : vector<128x128xf32>
      %16 = arith.truncf %15 : vector<128x128xf32> to vector<128x128xbf16>
      %c0_14 = arith.constant 0 : index
      %c0_15 = arith.constant 0 : index
      %17 = vector.load %arg6[%c0_14, %c0_15] : memref<128x128xbf16, #tpu.memory_space<vmem>>, vector<128x128xbf16>
      tpu.vector_store %arg6[%c0_14, %c0_15], %16 {strides = array<i32>} : memref<128x128xbf16, #tpu.memory_space<vmem>>, vector<128x128xbf16>,
    } else {
    }
    return
  }
  func.func @transform_0(%arg0: i32, %arg1: i32, %arg2: i32) -> (i32, i32) {
    %c0_i32 = arith.constant 0 : i32
    return %arg0, %arg2 : i32, i32
  }
  func.func @transform_1(%arg0: i32, %arg1: i32, %arg2: i32) -> (i32, i32) {
    %c0_i32 = arith.constant 0 : i32
    return %arg2, %arg1 : i32, i32
  }
  func.func @transform_2(%arg0: i32, %arg1: i32, %arg2: i32) -> (i32, i32) {
    %c0_i32 = arith.constant 0 : i32
    %c0_i32_0 = arith.constant 0 : i32
    return %c0_i32, %arg1 : i32, i32
  }
  func.func @transform_3(%arg0: i32, %arg1: i32, %arg2: i32) -> (i32, i32) {
    %c0_i32 = arith.constant 0 : i32
    return %arg0, %arg1 : i32, i32
  }
}

module attributes {stable_mosaic.version = 11 : i64} {
  func.func @_conv_bn_res_kernel(%arg0: i32, %arg1: i32, %arg2: i32, %arg3: memref<128x128xbf16, #tpu.memory_space<vmem>>, %arg4: memref<128x128xbf16, #tpu.memory_space<vmem>>, %arg5: memref<1x128xf32, #tpu.memory_space<vmem>>, %arg6: memref<128x128xbf16, #tpu.memory_space<vmem>>, %arg7: memref<128x128xbf16, #tpu.memory_space<vmem>>, %arg8: memref<128x128xf32, #tpu.memory_space<vmem>>) attributes {dimension_semantics = [#tpu.dimension_semantics<parallel>, #tpu.dimension_semantics<parallel>, #tpu.dimension_semantics<arbitrary>], iteration_bounds = array<i64: 1, 1, 1>, scalar_prefetch = 0 : i64, scratch_operands = 1 : i64, tpu.core_type = #tpu.core_type<tc>, window_params = [{transform_indices = @transform_0, window_bounds = array<i64: 128, 128>}, {transform_indices = @transform_1, window_bounds = array<i64: 128, 128>}, {transform_indices = @transform_2, window_bounds = array<i64: 1, 128>}, {transform_indices = @transform_3, window_bounds = array<i64: 128, 128>}, {transform_indices = @transform_4, window_bounds = array<i64: 128, 128>}]} {
    %c0_i32 = arith.constant 0 : i32
    %0 = arith.cmpi eq, %arg2, %c0_i32 : i32
    %1 = arith.extui %0 : i1 to i32
    %c0_i32_0 = arith.constant 0 : i32
    %2 = arith.cmpi ne, %1, %c0_i32_0 : i32
    scf.if %2 {
      %cst_10 = arith.constant 0.000000e+00 : f32
      %12 = vector.broadcast %cst_10 : f32 to vector<128x128xf32>
      %c0_11 = arith.constant 0 : index
      %c0_12 = arith.constant 0 : index
      %13 = vector.load %arg8[%c0_11, %c0_12] : memref<128x128xf32, #tpu.memory_space<vmem>>, vector<128x128xf32>
      tpu.vector_store %arg8[%c0_11, %c0_12], %12 {strides = array<i32>} : memref<128x128xf32, #tpu.memory_space<vmem>>, vector<128x128xf32>,
    } else {
    }
    %c0 = arith.constant 0 : index
    %c0_1 = arith.constant 0 : index
    %3 = vector.load %arg8[%c0, %c0_1] : memref<128x128xf32, #tpu.memory_space<vmem>>, vector<128x128xf32>
    %c0_2 = arith.constant 0 : index
    %c0_3 = arith.constant 0 : index
    %4 = vector.load %arg3[%c0_2, %c0_3] : memref<128x128xbf16, #tpu.memory_space<vmem>>, vector<128x128xbf16>
    %c0_4 = arith.constant 0 : index
    %c0_5 = arith.constant 0 : index
    %5 = vector.load %arg4[%c0_4, %c0_5] : memref<128x128xbf16, #tpu.memory_space<vmem>>, vector<128x128xbf16>
    %cst = arith.constant dense<0.000000e+00> : vector<128x128xf32>
    %6 = tpu.matmul %4, %5, %cst {dimension_numbers = #tpu.dot_dimension_numbers<[1], [0], [0], [1], [0, 0, 1, 1], [], []>} : vector<128x128xbf16>, vector<128x128xbf16>, vector<128x128xf32> -> vector<128x128xf32>
    %7 = arith.addf %3, %6 : vector<128x128xf32>
    %c0_6 = arith.constant 0 : index
    %c0_7 = arith.constant 0 : index
    %8 = vector.load %arg8[%c0_6, %c0_7] : memref<128x128xf32, #tpu.memory_space<vmem>>, vector<128x128xf32>
    tpu.vector_store %arg8[%c0_6, %c0_7], %7 {strides = array<i32>} : memref<128x128xf32, #tpu.memory_space<vmem>>, vector<128x128xf32>,
    %c0_i32_8 = arith.constant 0 : i32
    %9 = arith.cmpi eq, %arg2, %c0_i32_8 : i32
    %10 = arith.extui %9 : i1 to i32
    %c0_i32_9 = arith.constant 0 : i32
    %11 = arith.cmpi ne, %10, %c0_i32_9 : i32
    scf.if %11 {
      %c0_10 = arith.constant 0 : index
      %c0_11 = arith.constant 0 : index
      %12 = vector.load %arg8[%c0_10, %c0_11] : memref<128x128xf32, #tpu.memory_space<vmem>>, vector<128x128xf32>
      %c0_12 = arith.constant 0 : index
      %c0_13 = arith.constant 0 : index
      %13 = vector.load %arg5[%c0_12, %c0_13] : memref<1x128xf32, #tpu.memory_space<vmem>>, vector<1x128xf32>
      %14 = vector.broadcast %13 : vector<1x128xf32> to vector<128x128xf32>
      %15 = arith.addf %12, %14 : vector<128x128xf32>
      %c0_14 = arith.constant 0 : index
      %c0_15 = arith.constant 0 : index
      %16 = vector.load %arg6[%c0_14, %c0_15] : memref<128x128xbf16, #tpu.memory_space<vmem>>, vector<128x128xbf16>
      %17 = arith.extf %16 : vector<128x128xbf16> to vector<128x128xf32>
      %18 = arith.addf %15, %17 : vector<128x128xf32>
      %cst_16 = arith.constant 0.000000e+00 : f32
      %19 = vector.broadcast %cst_16 : f32 to vector<128x128xf32>
      %20 = arith.maximumf %18, %19 : vector<128x128xf32>
      %21 = arith.truncf %20 : vector<128x128xf32> to vector<128x128xbf16>
      %c0_17 = arith.constant 0 : index
      %c0_18 = arith.constant 0 : index
      %22 = vector.load %arg7[%c0_17, %c0_18] : memref<128x128xbf16, #tpu.memory_space<vmem>>, vector<128x128xbf16>
      tpu.vector_store %arg7[%c0_17, %c0_18], %21 {strides = array<i32>} : memref<128x128xbf16, #tpu.memory_space<vmem>>, vector<128x128xbf16>,
    } else {
    }
    return
  }
  func.func @transform_0(%arg0: i32, %arg1: i32, %arg2: i32) -> (i32, i32) {
    %c0_i32 = arith.constant 0 : i32
    return %arg0, %arg2 : i32, i32
  }
  func.func @transform_1(%arg0: i32, %arg1: i32, %arg2: i32) -> (i32, i32) {
    %c0_i32 = arith.constant 0 : i32
    return %arg2, %arg1 : i32, i32
  }
  func.func @transform_2(%arg0: i32, %arg1: i32, %arg2: i32) -> (i32, i32) {
    %c0_i32 = arith.constant 0 : i32
    %c0_i32_0 = arith.constant 0 : i32
    return %c0_i32, %arg1 : i32, i32
  }
  func.func @transform_3(%arg0: i32, %arg1: i32, %arg2: i32) -> (i32, i32) {
    %c0_i32 = arith.constant 0 : i32
    return %arg0, %arg1 : i32, i32
  }
  func.func @transform_4(%arg0: i32, %arg1: i32, %arg2: i32) -> (i32, i32) {
    %c0_i32 = arith.constant 0 : i32
    return %arg0, %arg1 : i32, i32
  }
}

module attributes {stable_mosaic.version = 11 : i64} {
  func.func @_conv_bn_kernel(%arg0: i32, %arg1: i32, %arg2: i32, %arg3: memref<32x128xbf16, #tpu.memory_space<vmem>>, %arg4: memref<128x128xbf16, #tpu.memory_space<vmem>>, %arg5: memref<1x128xf32, #tpu.memory_space<vmem>>, %arg6: memref<32x128xbf16, #tpu.memory_space<vmem>>, %arg7: memref<32x128xf32, #tpu.memory_space<vmem>>) attributes {dimension_semantics = [#tpu.dimension_semantics<parallel>, #tpu.dimension_semantics<parallel>, #tpu.dimension_semantics<arbitrary>], iteration_bounds = array<i64: 1, 1, 9>, scalar_prefetch = 0 : i64, scratch_operands = 1 : i64, tpu.core_type = #tpu.core_type<tc>, window_params = [{transform_indices = @transform_0, window_bounds = array<i64: 32, 128>}, {transform_indices = @transform_1, window_bounds = array<i64: 128, 128>}, {transform_indices = @transform_2, window_bounds = array<i64: 1, 128>}, {transform_indices = @transform_3, window_bounds = array<i64: 32, 128>}]} {
    %c0_i32 = arith.constant 0 : i32
    %0 = arith.cmpi eq, %arg2, %c0_i32 : i32
    %1 = arith.extui %0 : i1 to i32
    %c0_i32_0 = arith.constant 0 : i32
    %2 = arith.cmpi ne, %1, %c0_i32_0 : i32
    scf.if %2 {
      %cst_9 = arith.constant 0.000000e+00 : f32
      %12 = vector.broadcast %cst_9 : f32 to vector<32x128xf32>
      %c0_10 = arith.constant 0 : index
      %c0_11 = arith.constant 0 : index
      %13 = vector.load %arg7[%c0_10, %c0_11] : memref<32x128xf32, #tpu.memory_space<vmem>>, vector<32x128xf32>
      tpu.vector_store %arg7[%c0_10, %c0_11], %12 {strides = array<i32>} : memref<32x128xf32, #tpu.memory_space<vmem>>, vector<32x128xf32>,
    } else {
    }
    %c0 = arith.constant 0 : index
    %c0_1 = arith.constant 0 : index
    %3 = vector.load %arg7[%c0, %c0_1] : memref<32x128xf32, #tpu.memory_space<vmem>>, vector<32x128xf32>
    %c0_2 = arith.constant 0 : index
    %c0_3 = arith.constant 0 : index
    %4 = vector.load %arg3[%c0_2, %c0_3] : memref<32x128xbf16, #tpu.memory_space<vmem>>, vector<32x128xbf16>
    %c0_4 = arith.constant 0 : index
    %c0_5 = arith.constant 0 : index
    %5 = vector.load %arg4[%c0_4, %c0_5] : memref<128x128xbf16, #tpu.memory_space<vmem>>, vector<128x128xbf16>
    %cst = arith.constant dense<0.000000e+00> : vector<32x128xf32>
    %6 = tpu.matmul %4, %5, %cst {dimension_numbers = #tpu.dot_dimension_numbers<[1], [0], [0], [1], [0, 0, 1, 1], [], []>} : vector<32x128xbf16>, vector<128x128xbf16>, vector<32x128xf32> -> vector<32x128xf32>
    %7 = arith.addf %3, %6 : vector<32x128xf32>
    %c0_6 = arith.constant 0 : index
    %c0_7 = arith.constant 0 : index
    %8 = vector.load %arg7[%c0_6, %c0_7] : memref<32x128xf32, #tpu.memory_space<vmem>>, vector<32x128xf32>
    tpu.vector_store %arg7[%c0_6, %c0_7], %7 {strides = array<i32>} : memref<32x128xf32, #tpu.memory_space<vmem>>, vector<32x128xf32>,
    %c8_i32 = arith.constant 8 : i32
    %9 = arith.cmpi eq, %arg2, %c8_i32 : i32
    %10 = arith.extui %9 : i1 to i32
    %c0_i32_8 = arith.constant 0 : i32
    %11 = arith.cmpi ne, %10, %c0_i32_8 : i32
    scf.if %11 {
      %c0_9 = arith.constant 0 : index
      %c0_10 = arith.constant 0 : index
      %12 = vector.load %arg7[%c0_9, %c0_10] : memref<32x128xf32, #tpu.memory_space<vmem>>, vector<32x128xf32>
      %c0_11 = arith.constant 0 : index
      %c0_12 = arith.constant 0 : index
      %13 = vector.load %arg5[%c0_11, %c0_12] : memref<1x128xf32, #tpu.memory_space<vmem>>, vector<1x128xf32>
      %14 = vector.broadcast %13 : vector<1x128xf32> to vector<32x128xf32>
      %15 = arith.addf %12, %14 : vector<32x128xf32>
      %cst_13 = arith.constant 0.000000e+00 : f32
      %16 = vector.broadcast %cst_13 : f32 to vector<32x128xf32>
      %17 = arith.maximumf %15, %16 : vector<32x128xf32>
      %18 = arith.truncf %17 : vector<32x128xf32> to vector<32x128xbf16>
      %c0_14 = arith.constant 0 : index
      %c0_15 = arith.constant 0 : index
      %19 = vector.load %arg6[%c0_14, %c0_15] : memref<32x128xbf16, #tpu.memory_space<vmem>>, vector<32x128xbf16>
      tpu.vector_store %arg6[%c0_14, %c0_15], %18 {strides = array<i32>} : memref<32x128xbf16, #tpu.memory_space<vmem>>, vector<32x128xbf16>,
    } else {
    }
    return
  }
  func.func @transform_0(%arg0: i32, %arg1: i32, %arg2: i32) -> (i32, i32) {
    %c0_i32 = arith.constant 0 : i32
    return %arg0, %arg2 : i32, i32
  }
  func.func @transform_1(%arg0: i32, %arg1: i32, %arg2: i32) -> (i32, i32) {
    %c0_i32 = arith.constant 0 : i32
    return %arg2, %arg1 : i32, i32
  }
  func.func @transform_2(%arg0: i32, %arg1: i32, %arg2: i32) -> (i32, i32) {
    %c0_i32 = arith.constant 0 : i32
    %c0_i32_0 = arith.constant 0 : i32
    return %c0_i32, %arg1 : i32, i32
  }
  func.func @transform_3(%arg0: i32, %arg1: i32, %arg2: i32) -> (i32, i32) {
    %c0_i32 = arith.constant 0 : i32
    return %arg0, %arg1 : i32, i32
  }
}

module attributes {stable_mosaic.version = 11 : i64} {
  func.func @_conv_bn_kernel(%arg0: i32, %arg1: i32, %arg2: i32, %arg3: memref<32x128xbf16, #tpu.memory_space<vmem>>, %arg4: memref<128x128xbf16, #tpu.memory_space<vmem>>, %arg5: memref<1x128xf32, #tpu.memory_space<vmem>>, %arg6: memref<32x128xbf16, #tpu.memory_space<vmem>>, %arg7: memref<32x128xf32, #tpu.memory_space<vmem>>) attributes {dimension_semantics = [#tpu.dimension_semantics<parallel>, #tpu.dimension_semantics<parallel>, #tpu.dimension_semantics<arbitrary>], iteration_bounds = array<i64: 1, 2, 1>, scalar_prefetch = 0 : i64, scratch_operands = 1 : i64, tpu.core_type = #tpu.core_type<tc>, window_params = [{transform_indices = @transform_0, window_bounds = array<i64: 32, 128>}, {transform_indices = @transform_1, window_bounds = array<i64: 128, 128>}, {transform_indices = @transform_2, window_bounds = array<i64: 1, 128>}, {transform_indices = @transform_3, window_bounds = array<i64: 32, 128>}]} {
    %c0_i32 = arith.constant 0 : i32
    %0 = arith.cmpi eq, %arg2, %c0_i32 : i32
    %1 = arith.extui %0 : i1 to i32
    %c0_i32_0 = arith.constant 0 : i32
    %2 = arith.cmpi ne, %1, %c0_i32_0 : i32
    scf.if %2 {
      %cst_10 = arith.constant 0.000000e+00 : f32
      %12 = vector.broadcast %cst_10 : f32 to vector<32x128xf32>
      %c0_11 = arith.constant 0 : index
      %c0_12 = arith.constant 0 : index
      %13 = vector.load %arg7[%c0_11, %c0_12] : memref<32x128xf32, #tpu.memory_space<vmem>>, vector<32x128xf32>
      tpu.vector_store %arg7[%c0_11, %c0_12], %12 {strides = array<i32>} : memref<32x128xf32, #tpu.memory_space<vmem>>, vector<32x128xf32>,
    } else {
    }
    %c0 = arith.constant 0 : index
    %c0_1 = arith.constant 0 : index
    %3 = vector.load %arg7[%c0, %c0_1] : memref<32x128xf32, #tpu.memory_space<vmem>>, vector<32x128xf32>
    %c0_2 = arith.constant 0 : index
    %c0_3 = arith.constant 0 : index
    %4 = vector.load %arg3[%c0_2, %c0_3] : memref<32x128xbf16, #tpu.memory_space<vmem>>, vector<32x128xbf16>
    %c0_4 = arith.constant 0 : index
    %c0_5 = arith.constant 0 : index
    %5 = vector.load %arg4[%c0_4, %c0_5] : memref<128x128xbf16, #tpu.memory_space<vmem>>, vector<128x128xbf16>
    %cst = arith.constant dense<0.000000e+00> : vector<32x128xf32>
    %6 = tpu.matmul %4, %5, %cst {dimension_numbers = #tpu.dot_dimension_numbers<[1], [0], [0], [1], [0, 0, 1, 1], [], []>} : vector<32x128xbf16>, vector<128x128xbf16>, vector<32x128xf32> -> vector<32x128xf32>
    %7 = arith.addf %3, %6 : vector<32x128xf32>
    %c0_6 = arith.constant 0 : index
    %c0_7 = arith.constant 0 : index
    %8 = vector.load %arg7[%c0_6, %c0_7] : memref<32x128xf32, #tpu.memory_space<vmem>>, vector<32x128xf32>
    tpu.vector_store %arg7[%c0_6, %c0_7], %7 {strides = array<i32>} : memref<32x128xf32, #tpu.memory_space<vmem>>, vector<32x128xf32>,
    %c0_i32_8 = arith.constant 0 : i32
    %9 = arith.cmpi eq, %arg2, %c0_i32_8 : i32
    %10 = arith.extui %9 : i1 to i32
    %c0_i32_9 = arith.constant 0 : i32
    %11 = arith.cmpi ne, %10, %c0_i32_9 : i32
    scf.if %11 {
      %c0_10 = arith.constant 0 : index
      %c0_11 = arith.constant 0 : index
      %12 = vector.load %arg7[%c0_10, %c0_11] : memref<32x128xf32, #tpu.memory_space<vmem>>, vector<32x128xf32>
      %c0_12 = arith.constant 0 : index
      %c0_13 = arith.constant 0 : index
      %13 = vector.load %arg5[%c0_12, %c0_13] : memref<1x128xf32, #tpu.memory_space<vmem>>, vector<1x128xf32>
      %14 = vector.broadcast %13 : vector<1x128xf32> to vector<32x128xf32>
      %15 = arith.addf %12, %14 : vector<32x128xf32>
      %16 = arith.truncf %15 : vector<32x128xf32> to vector<32x128xbf16>
      %c0_14 = arith.constant 0 : index
      %c0_15 = arith.constant 0 : index
      %17 = vector.load %arg6[%c0_14, %c0_15] : memref<32x128xbf16, #tpu.memory_space<vmem>>, vector<32x128xbf16>
      tpu.vector_store %arg6[%c0_14, %c0_15], %16 {strides = array<i32>} : memref<32x128xbf16, #tpu.memory_space<vmem>>, vector<32x128xbf16>,
    } else {
    }
    return
  }
  func.func @transform_0(%arg0: i32, %arg1: i32, %arg2: i32) -> (i32, i32) {
    %c0_i32 = arith.constant 0 : i32
    return %arg0, %arg2 : i32, i32
  }
  func.func @transform_1(%arg0: i32, %arg1: i32, %arg2: i32) -> (i32, i32) {
    %c0_i32 = arith.constant 0 : i32
    return %arg2, %arg1 : i32, i32
  }
  func.func @transform_2(%arg0: i32, %arg1: i32, %arg2: i32) -> (i32, i32) {
    %c0_i32 = arith.constant 0 : i32
    %c0_i32_0 = arith.constant 0 : i32
    return %c0_i32, %arg1 : i32, i32
  }
  func.func @transform_3(%arg0: i32, %arg1: i32, %arg2: i32) -> (i32, i32) {
    %c0_i32 = arith.constant 0 : i32
    return %arg0, %arg1 : i32, i32
  }
}

module attributes {stable_mosaic.version = 11 : i64} {
  func.func @_conv_bn_res_kernel(%arg0: i32, %arg1: i32, %arg2: i32, %arg3: memref<32x128xbf16, #tpu.memory_space<vmem>>, %arg4: memref<128x128xbf16, #tpu.memory_space<vmem>>, %arg5: memref<1x128xf32, #tpu.memory_space<vmem>>, %arg6: memref<32x128xbf16, #tpu.memory_space<vmem>>, %arg7: memref<32x128xbf16, #tpu.memory_space<vmem>>, %arg8: memref<32x128xf32, #tpu.memory_space<vmem>>) attributes {dimension_semantics = [#tpu.dimension_semantics<parallel>, #tpu.dimension_semantics<parallel>, #tpu.dimension_semantics<arbitrary>], iteration_bounds = array<i64: 1, 2, 1>, scalar_prefetch = 0 : i64, scratch_operands = 1 : i64, tpu.core_type = #tpu.core_type<tc>, window_params = [{transform_indices = @transform_0, window_bounds = array<i64: 32, 128>}, {transform_indices = @transform_1, window_bounds = array<i64: 128, 128>}, {transform_indices = @transform_2, window_bounds = array<i64: 1, 128>}, {transform_indices = @transform_3, window_bounds = array<i64: 32, 128>}, {transform_indices = @transform_4, window_bounds = array<i64: 32, 128>}]} {
    %c0_i32 = arith.constant 0 : i32
    %0 = arith.cmpi eq, %arg2, %c0_i32 : i32
    %1 = arith.extui %0 : i1 to i32
    %c0_i32_0 = arith.constant 0 : i32
    %2 = arith.cmpi ne, %1, %c0_i32_0 : i32
    scf.if %2 {
      %cst_10 = arith.constant 0.000000e+00 : f32
      %12 = vector.broadcast %cst_10 : f32 to vector<32x128xf32>
      %c0_11 = arith.constant 0 : index
      %c0_12 = arith.constant 0 : index
      %13 = vector.load %arg8[%c0_11, %c0_12] : memref<32x128xf32, #tpu.memory_space<vmem>>, vector<32x128xf32>
      tpu.vector_store %arg8[%c0_11, %c0_12], %12 {strides = array<i32>} : memref<32x128xf32, #tpu.memory_space<vmem>>, vector<32x128xf32>,
    } else {
    }
    %c0 = arith.constant 0 : index
    %c0_1 = arith.constant 0 : index
    %3 = vector.load %arg8[%c0, %c0_1] : memref<32x128xf32, #tpu.memory_space<vmem>>, vector<32x128xf32>
    %c0_2 = arith.constant 0 : index
    %c0_3 = arith.constant 0 : index
    %4 = vector.load %arg3[%c0_2, %c0_3] : memref<32x128xbf16, #tpu.memory_space<vmem>>, vector<32x128xbf16>
    %c0_4 = arith.constant 0 : index
    %c0_5 = arith.constant 0 : index
    %5 = vector.load %arg4[%c0_4, %c0_5] : memref<128x128xbf16, #tpu.memory_space<vmem>>, vector<128x128xbf16>
    %cst = arith.constant dense<0.000000e+00> : vector<32x128xf32>
    %6 = tpu.matmul %4, %5, %cst {dimension_numbers = #tpu.dot_dimension_numbers<[1], [0], [0], [1], [0, 0, 1, 1], [], []>} : vector<32x128xbf16>, vector<128x128xbf16>, vector<32x128xf32> -> vector<32x128xf32>
    %7 = arith.addf %3, %6 : vector<32x128xf32>
    %c0_6 = arith.constant 0 : index
    %c0_7 = arith.constant 0 : index
    %8 = vector.load %arg8[%c0_6, %c0_7] : memref<32x128xf32, #tpu.memory_space<vmem>>, vector<32x128xf32>
    tpu.vector_store %arg8[%c0_6, %c0_7], %7 {strides = array<i32>} : memref<32x128xf32, #tpu.memory_space<vmem>>, vector<32x128xf32>,
    %c0_i32_8 = arith.constant 0 : i32
    %9 = arith.cmpi eq, %arg2, %c0_i32_8 : i32
    %10 = arith.extui %9 : i1 to i32
    %c0_i32_9 = arith.constant 0 : i32
    %11 = arith.cmpi ne, %10, %c0_i32_9 : i32
    scf.if %11 {
      %c0_10 = arith.constant 0 : index
      %c0_11 = arith.constant 0 : index
      %12 = vector.load %arg8[%c0_10, %c0_11] : memref<32x128xf32, #tpu.memory_space<vmem>>, vector<32x128xf32>
      %c0_12 = arith.constant 0 : index
      %c0_13 = arith.constant 0 : index
      %13 = vector.load %arg5[%c0_12, %c0_13] : memref<1x128xf32, #tpu.memory_space<vmem>>, vector<1x128xf32>
      %14 = vector.broadcast %13 : vector<1x128xf32> to vector<32x128xf32>
      %15 = arith.addf %12, %14 : vector<32x128xf32>
      %c0_14 = arith.constant 0 : index
      %c0_15 = arith.constant 0 : index
      %16 = vector.load %arg6[%c0_14, %c0_15] : memref<32x128xbf16, #tpu.memory_space<vmem>>, vector<32x128xbf16>
      %17 = arith.extf %16 : vector<32x128xbf16> to vector<32x128xf32>
      %18 = arith.addf %15, %17 : vector<32x128xf32>
      %cst_16 = arith.constant 0.000000e+00 : f32
      %19 = vector.broadcast %cst_16 : f32 to vector<32x128xf32>
      %20 = arith.maximumf %18, %19 : vector<32x128xf32>
      %21 = arith.truncf %20 : vector<32x128xf32> to vector<32x128xbf16>
      %c0_17 = arith.constant 0 : index
      %c0_18 = arith.constant 0 : index
      %22 = vector.load %arg7[%c0_17, %c0_18] : memref<32x128xbf16, #tpu.memory_space<vmem>>, vector<32x128xbf16>
      tpu.vector_store %arg7[%c0_17, %c0_18], %21 {strides = array<i32>} : memref<32x128xbf16, #tpu.memory_space<vmem>>, vector<32x128xbf16>,
    } else {
    }
    return
  }
  func.func @transform_0(%arg0: i32, %arg1: i32, %arg2: i32) -> (i32, i32) {
    %c0_i32 = arith.constant 0 : i32
    return %arg0, %arg2 : i32, i32
  }
  func.func @transform_1(%arg0: i32, %arg1: i32, %arg2: i32) -> (i32, i32) {
    %c0_i32 = arith.constant 0 : i32
    return %arg2, %arg1 : i32, i32
  }
  func.func @transform_2(%arg0: i32, %arg1: i32, %arg2: i32) -> (i32, i32) {
    %c0_i32 = arith.constant 0 : i32
    %c0_i32_0 = arith.constant 0 : i32
    return %c0_i32, %arg1 : i32, i32
  }
  func.func @transform_3(%arg0: i32, %arg1: i32, %arg2: i32) -> (i32, i32) {
    %c0_i32 = arith.constant 0 : i32
    return %arg0, %arg1 : i32, i32
  }
  func.func @transform_4(%arg0: i32, %arg1: i32, %arg2: i32) -> (i32, i32) {
    %c0_i32 = arith.constant 0 : i32
    return %arg0, %arg1 : i32, i32
  }
}

module attributes {stable_mosaic.version = 11 : i64} {
  func.func @_conv_bn_kernel(%arg0: i32, %arg1: i32, %arg2: i32, %arg3: memref<32x256xbf16, #tpu.memory_space<vmem>>, %arg4: memref<256x128xbf16, #tpu.memory_space<vmem>>, %arg5: memref<1x128xf32, #tpu.memory_space<vmem>>, %arg6: memref<32x128xbf16, #tpu.memory_space<vmem>>, %arg7: memref<32x128xf32, #tpu.memory_space<vmem>>) attributes {dimension_semantics = [#tpu.dimension_semantics<parallel>, #tpu.dimension_semantics<parallel>, #tpu.dimension_semantics<arbitrary>], iteration_bounds = array<i64: 1, 1, 1>, scalar_prefetch = 0 : i64, scratch_operands = 1 : i64, tpu.core_type = #tpu.core_type<tc>, window_params = [{transform_indices = @transform_0, window_bounds = array<i64: 32, 256>}, {transform_indices = @transform_1, window_bounds = array<i64: 256, 128>}, {transform_indices = @transform_2, window_bounds = array<i64: 1, 128>}, {transform_indices = @transform_3, window_bounds = array<i64: 32, 128>}]} {
    %c0_i32 = arith.constant 0 : i32
    %0 = arith.cmpi eq, %arg2, %c0_i32 : i32
    %1 = arith.extui %0 : i1 to i32
    %c0_i32_0 = arith.constant 0 : i32
    %2 = arith.cmpi ne, %1, %c0_i32_0 : i32
    scf.if %2 {
      %cst_10 = arith.constant 0.000000e+00 : f32
      %12 = vector.broadcast %cst_10 : f32 to vector<32x128xf32>
      %c0_11 = arith.constant 0 : index
      %c0_12 = arith.constant 0 : index
      %13 = vector.load %arg7[%c0_11, %c0_12] : memref<32x128xf32, #tpu.memory_space<vmem>>, vector<32x128xf32>
      tpu.vector_store %arg7[%c0_11, %c0_12], %12 {strides = array<i32>} : memref<32x128xf32, #tpu.memory_space<vmem>>, vector<32x128xf32>,
    } else {
    }
    %c0 = arith.constant 0 : index
    %c0_1 = arith.constant 0 : index
    %3 = vector.load %arg7[%c0, %c0_1] : memref<32x128xf32, #tpu.memory_space<vmem>>, vector<32x128xf32>
    %c0_2 = arith.constant 0 : index
    %c0_3 = arith.constant 0 : index
    %4 = vector.load %arg3[%c0_2, %c0_3] : memref<32x256xbf16, #tpu.memory_space<vmem>>, vector<32x256xbf16>
    %c0_4 = arith.constant 0 : index
    %c0_5 = arith.constant 0 : index
    %5 = vector.load %arg4[%c0_4, %c0_5] : memref<256x128xbf16, #tpu.memory_space<vmem>>, vector<256x128xbf16>
    %cst = arith.constant dense<0.000000e+00> : vector<32x128xf32>
    %6 = tpu.matmul %4, %5, %cst {dimension_numbers = #tpu.dot_dimension_numbers<[1], [0], [0], [1], [0, 0, 1, 1], [], []>} : vector<32x256xbf16>, vector<256x128xbf16>, vector<32x128xf32> -> vector<32x128xf32>
    %7 = arith.addf %3, %6 : vector<32x128xf32>
    %c0_6 = arith.constant 0 : index
    %c0_7 = arith.constant 0 : index
    %8 = vector.load %arg7[%c0_6, %c0_7] : memref<32x128xf32, #tpu.memory_space<vmem>>, vector<32x128xf32>
    tpu.vector_store %arg7[%c0_6, %c0_7], %7 {strides = array<i32>} : memref<32x128xf32, #tpu.memory_space<vmem>>, vector<32x128xf32>,
    %c0_i32_8 = arith.constant 0 : i32
    %9 = arith.cmpi eq, %arg2, %c0_i32_8 : i32
    %10 = arith.extui %9 : i1 to i32
    %c0_i32_9 = arith.constant 0 : i32
    %11 = arith.cmpi ne, %10, %c0_i32_9 : i32
    scf.if %11 {
      %c0_10 = arith.constant 0 : index
      %c0_11 = arith.constant 0 : index
      %12 = vector.load %arg7[%c0_10, %c0_11] : memref<32x128xf32, #tpu.memory_space<vmem>>, vector<32x128xf32>
      %c0_12 = arith.constant 0 : index
      %c0_13 = arith.constant 0 : index
      %13 = vector.load %arg5[%c0_12, %c0_13] : memref<1x128xf32, #tpu.memory_space<vmem>>, vector<1x128xf32>
      %14 = vector.broadcast %13 : vector<1x128xf32> to vector<32x128xf32>
      %15 = arith.addf %12, %14 : vector<32x128xf32>
      %cst_14 = arith.constant 0.000000e+00 : f32
      %16 = vector.broadcast %cst_14 : f32 to vector<32x128xf32>
      %17 = arith.maximumf %15, %16 : vector<32x128xf32>
      %18 = arith.truncf %17 : vector<32x128xf32> to vector<32x128xbf16>
      %c0_15 = arith.constant 0 : index
      %c0_16 = arith.constant 0 : index
      %19 = vector.load %arg6[%c0_15, %c0_16] : memref<32x128xbf16, #tpu.memory_space<vmem>>, vector<32x128xbf16>
      tpu.vector_store %arg6[%c0_15, %c0_16], %18 {strides = array<i32>} : memref<32x128xbf16, #tpu.memory_space<vmem>>, vector<32x128xbf16>,
    } else {
    }
    return
  }
  func.func @transform_0(%arg0: i32, %arg1: i32, %arg2: i32) -> (i32, i32) {
    %c0_i32 = arith.constant 0 : i32
    return %arg0, %arg2 : i32, i32
  }
  func.func @transform_1(%arg0: i32, %arg1: i32, %arg2: i32) -> (i32, i32) {
    %c0_i32 = arith.constant 0 : i32
    return %arg2, %arg1 : i32, i32
  }
  func.func @transform_2(%arg0: i32, %arg1: i32, %arg2: i32) -> (i32, i32) {
    %c0_i32 = arith.constant 0 : i32
    %c0_i32_0 = arith.constant 0 : i32
    return %c0_i32, %arg1 : i32, i32
  }
  func.func @transform_3(%arg0: i32, %arg1: i32, %arg2: i32) -> (i32, i32) {
    %c0_i32 = arith.constant 0 : i32
    return %arg0, %arg1 : i32, i32
  }
}

module attributes {stable_mosaic.version = 11 : i64} {
  func.func @_conv_bn_kernel(%arg0: i32, %arg1: i32, %arg2: i32, %arg3: memref<8x256xbf16, #tpu.memory_space<vmem>>, %arg4: memref<256x128xbf16, #tpu.memory_space<vmem>>, %arg5: memref<1x128xf32, #tpu.memory_space<vmem>>, %arg6: memref<8x128xbf16, #tpu.memory_space<vmem>>, %arg7: memref<8x128xf32, #tpu.memory_space<vmem>>) attributes {dimension_semantics = [#tpu.dimension_semantics<parallel>, #tpu.dimension_semantics<parallel>, #tpu.dimension_semantics<arbitrary>], iteration_bounds = array<i64: 1, 4, 1>, scalar_prefetch = 0 : i64, scratch_operands = 1 : i64, tpu.core_type = #tpu.core_type<tc>, window_params = [{transform_indices = @transform_0, window_bounds = array<i64: 8, 256>}, {transform_indices = @transform_1, window_bounds = array<i64: 256, 128>}, {transform_indices = @transform_2, window_bounds = array<i64: 1, 128>}, {transform_indices = @transform_3, window_bounds = array<i64: 8, 128>}]} {
    %c0_i32 = arith.constant 0 : i32
    %0 = arith.cmpi eq, %arg2, %c0_i32 : i32
    %1 = arith.extui %0 : i1 to i32
    %c0_i32_0 = arith.constant 0 : i32
    %2 = arith.cmpi ne, %1, %c0_i32_0 : i32
    scf.if %2 {
      %cst_10 = arith.constant 0.000000e+00 : f32
      %12 = vector.broadcast %cst_10 : f32 to vector<8x128xf32>
      %c0_11 = arith.constant 0 : index
      %c0_12 = arith.constant 0 : index
      %13 = vector.load %arg7[%c0_11, %c0_12] : memref<8x128xf32, #tpu.memory_space<vmem>>, vector<8x128xf32>
      tpu.vector_store %arg7[%c0_11, %c0_12], %12 {strides = array<i32>} : memref<8x128xf32, #tpu.memory_space<vmem>>, vector<8x128xf32>,
    } else {
    }
    %c0 = arith.constant 0 : index
    %c0_1 = arith.constant 0 : index
    %3 = vector.load %arg7[%c0, %c0_1] : memref<8x128xf32, #tpu.memory_space<vmem>>, vector<8x128xf32>
    %c0_2 = arith.constant 0 : index
    %c0_3 = arith.constant 0 : index
    %4 = vector.load %arg3[%c0_2, %c0_3] : memref<8x256xbf16, #tpu.memory_space<vmem>>, vector<8x256xbf16>
    %c0_4 = arith.constant 0 : index
    %c0_5 = arith.constant 0 : index
    %5 = vector.load %arg4[%c0_4, %c0_5] : memref<256x128xbf16, #tpu.memory_space<vmem>>, vector<256x128xbf16>
    %cst = arith.constant dense<0.000000e+00> : vector<8x128xf32>
    %6 = tpu.matmul %4, %5, %cst {dimension_numbers = #tpu.dot_dimension_numbers<[1], [0], [0], [1], [0, 0, 1, 1], [], []>} : vector<8x256xbf16>, vector<256x128xbf16>, vector<8x128xf32> -> vector<8x128xf32>
    %7 = arith.addf %3, %6 : vector<8x128xf32>
    %c0_6 = arith.constant 0 : index
    %c0_7 = arith.constant 0 : index
    %8 = vector.load %arg7[%c0_6, %c0_7] : memref<8x128xf32, #tpu.memory_space<vmem>>, vector<8x128xf32>
    tpu.vector_store %arg7[%c0_6, %c0_7], %7 {strides = array<i32>} : memref<8x128xf32, #tpu.memory_space<vmem>>, vector<8x128xf32>,
    %c0_i32_8 = arith.constant 0 : i32
    %9 = arith.cmpi eq, %arg2, %c0_i32_8 : i32
    %10 = arith.extui %9 : i1 to i32
    %c0_i32_9 = arith.constant 0 : i32
    %11 = arith.cmpi ne, %10, %c0_i32_9 : i32
    scf.if %11 {
      %c0_10 = arith.constant 0 : index
      %c0_11 = arith.constant 0 : index
      %12 = vector.load %arg7[%c0_10, %c0_11] : memref<8x128xf32, #tpu.memory_space<vmem>>, vector<8x128xf32>
      %c0_12 = arith.constant 0 : index
      %c0_13 = arith.constant 0 : index
      %13 = vector.load %arg5[%c0_12, %c0_13] : memref<1x128xf32, #tpu.memory_space<vmem>>, vector<1x128xf32>
      %14 = vector.broadcast %13 : vector<1x128xf32> to vector<8x128xf32>
      %15 = arith.addf %12, %14 : vector<8x128xf32>
      %16 = arith.truncf %15 : vector<8x128xf32> to vector<8x128xbf16>
      %c0_14 = arith.constant 0 : index
      %c0_15 = arith.constant 0 : index
      %17 = vector.load %arg6[%c0_14, %c0_15] : memref<8x128xbf16, #tpu.memory_space<vmem>>, vector<8x128xbf16>
      tpu.vector_store %arg6[%c0_14, %c0_15], %16 {strides = array<i32>} : memref<8x128xbf16, #tpu.memory_space<vmem>>, vector<8x128xbf16>,
    } else {
    }
    return
  }
  func.func @transform_0(%arg0: i32, %arg1: i32, %arg2: i32) -> (i32, i32) {
    %c0_i32 = arith.constant 0 : i32
    return %arg0, %arg2 : i32, i32
  }
  func.func @transform_1(%arg0: i32, %arg1: i32, %arg2: i32) -> (i32, i32) {
    %c0_i32 = arith.constant 0 : i32
    return %arg2, %arg1 : i32, i32
  }
  func.func @transform_2(%arg0: i32, %arg1: i32, %arg2: i32) -> (i32, i32) {
    %c0_i32 = arith.constant 0 : i32
    %c0_i32_0 = arith.constant 0 : i32
    return %c0_i32, %arg1 : i32, i32
  }
  func.func @transform_3(%arg0: i32, %arg1: i32, %arg2: i32) -> (i32, i32) {
    %c0_i32 = arith.constant 0 : i32
    return %arg0, %arg1 : i32, i32
  }
}

module attributes {stable_mosaic.version = 11 : i64} {
  func.func @_conv_bn_kernel(%arg0: i32, %arg1: i32, %arg2: i32, %arg3: memref<8x128xbf16, #tpu.memory_space<vmem>>, %arg4: memref<128x128xbf16, #tpu.memory_space<vmem>>, %arg5: memref<1x128xf32, #tpu.memory_space<vmem>>, %arg6: memref<8x128xbf16, #tpu.memory_space<vmem>>, %arg7: memref<8x128xf32, #tpu.memory_space<vmem>>) attributes {dimension_semantics = [#tpu.dimension_semantics<parallel>, #tpu.dimension_semantics<parallel>, #tpu.dimension_semantics<arbitrary>], iteration_bounds = array<i64: 1, 1, 9>, scalar_prefetch = 0 : i64, scratch_operands = 1 : i64, tpu.core_type = #tpu.core_type<tc>, window_params = [{transform_indices = @transform_0, window_bounds = array<i64: 8, 128>}, {transform_indices = @transform_1, window_bounds = array<i64: 128, 128>}, {transform_indices = @transform_2, window_bounds = array<i64: 1, 128>}, {transform_indices = @transform_3, window_bounds = array<i64: 8, 128>}]} {
    %c0_i32 = arith.constant 0 : i32
    %0 = arith.cmpi eq, %arg2, %c0_i32 : i32
    %1 = arith.extui %0 : i1 to i32
    %c0_i32_0 = arith.constant 0 : i32
    %2 = arith.cmpi ne, %1, %c0_i32_0 : i32
    scf.if %2 {
      %cst_9 = arith.constant 0.000000e+00 : f32
      %12 = vector.broadcast %cst_9 : f32 to vector<8x128xf32>
      %c0_10 = arith.constant 0 : index
      %c0_11 = arith.constant 0 : index
      %13 = vector.load %arg7[%c0_10, %c0_11] : memref<8x128xf32, #tpu.memory_space<vmem>>, vector<8x128xf32>
      tpu.vector_store %arg7[%c0_10, %c0_11], %12 {strides = array<i32>} : memref<8x128xf32, #tpu.memory_space<vmem>>, vector<8x128xf32>,
    } else {
    }
    %c0 = arith.constant 0 : index
    %c0_1 = arith.constant 0 : index
    %3 = vector.load %arg7[%c0, %c0_1] : memref<8x128xf32, #tpu.memory_space<vmem>>, vector<8x128xf32>
    %c0_2 = arith.constant 0 : index
    %c0_3 = arith.constant 0 : index
    %4 = vector.load %arg3[%c0_2, %c0_3] : memref<8x128xbf16, #tpu.memory_space<vmem>>, vector<8x128xbf16>
    %c0_4 = arith.constant 0 : index
    %c0_5 = arith.constant 0 : index
    %5 = vector.load %arg4[%c0_4, %c0_5] : memref<128x128xbf16, #tpu.memory_space<vmem>>, vector<128x128xbf16>
    %cst = arith.constant dense<0.000000e+00> : vector<8x128xf32>
    %6 = tpu.matmul %4, %5, %cst {dimension_numbers = #tpu.dot_dimension_numbers<[1], [0], [0], [1], [0, 0, 1, 1], [], []>} : vector<8x128xbf16>, vector<128x128xbf16>, vector<8x128xf32> -> vector<8x128xf32>
    %7 = arith.addf %3, %6 : vector<8x128xf32>
    %c0_6 = arith.constant 0 : index
    %c0_7 = arith.constant 0 : index
    %8 = vector.load %arg7[%c0_6, %c0_7] : memref<8x128xf32, #tpu.memory_space<vmem>>, vector<8x128xf32>
    tpu.vector_store %arg7[%c0_6, %c0_7], %7 {strides = array<i32>} : memref<8x128xf32, #tpu.memory_space<vmem>>, vector<8x128xf32>,
    %c8_i32 = arith.constant 8 : i32
    %9 = arith.cmpi eq, %arg2, %c8_i32 : i32
    %10 = arith.extui %9 : i1 to i32
    %c0_i32_8 = arith.constant 0 : i32
    %11 = arith.cmpi ne, %10, %c0_i32_8 : i32
    scf.if %11 {
      %c0_9 = arith.constant 0 : index
      %c0_10 = arith.constant 0 : index
      %12 = vector.load %arg7[%c0_9, %c0_10] : memref<8x128xf32, #tpu.memory_space<vmem>>, vector<8x128xf32>
      %c0_11 = arith.constant 0 : index
      %c0_12 = arith.constant 0 : index
      %13 = vector.load %arg5[%c0_11, %c0_12] : memref<1x128xf32, #tpu.memory_space<vmem>>, vector<1x128xf32>
      %14 = vector.broadcast %13 : vector<1x128xf32> to vector<8x128xf32>
      %15 = arith.addf %12, %14 : vector<8x128xf32>
      %cst_13 = arith.constant 0.000000e+00 : f32
      %16 = vector.broadcast %cst_13 : f32 to vector<8x128xf32>
      %17 = arith.maximumf %15, %16 : vector<8x128xf32>
      %18 = arith.truncf %17 : vector<8x128xf32> to vector<8x128xbf16>
      %c0_14 = arith.constant 0 : index
      %c0_15 = arith.constant 0 : index
      %19 = vector.load %arg6[%c0_14, %c0_15] : memref<8x128xbf16, #tpu.memory_space<vmem>>, vector<8x128xbf16>
      tpu.vector_store %arg6[%c0_14, %c0_15], %18 {strides = array<i32>} : memref<8x128xbf16, #tpu.memory_space<vmem>>, vector<8x128xbf16>,
    } else {
    }
    return
  }
  func.func @transform_0(%arg0: i32, %arg1: i32, %arg2: i32) -> (i32, i32) {
    %c0_i32 = arith.constant 0 : i32
    return %arg0, %arg2 : i32, i32
  }
  func.func @transform_1(%arg0: i32, %arg1: i32, %arg2: i32) -> (i32, i32) {
    %c0_i32 = arith.constant 0 : i32
    return %arg2, %arg1 : i32, i32
  }
  func.func @transform_2(%arg0: i32, %arg1: i32, %arg2: i32) -> (i32, i32) {
    %c0_i32 = arith.constant 0 : i32
    %c0_i32_0 = arith.constant 0 : i32
    return %c0_i32, %arg1 : i32, i32
  }
  func.func @transform_3(%arg0: i32, %arg1: i32, %arg2: i32) -> (i32, i32) {
    %c0_i32 = arith.constant 0 : i32
    return %arg0, %arg1 : i32, i32
  }
}

module attributes {stable_mosaic.version = 11 : i64} {
  func.func @_conv_bn_res_kernel(%arg0: i32, %arg1: i32, %arg2: i32, %arg3: memref<8x128xbf16, #tpu.memory_space<vmem>>, %arg4: memref<128x128xbf16, #tpu.memory_space<vmem>>, %arg5: memref<1x128xf32, #tpu.memory_space<vmem>>, %arg6: memref<8x128xbf16, #tpu.memory_space<vmem>>, %arg7: memref<8x128xbf16, #tpu.memory_space<vmem>>, %arg8: memref<8x128xf32, #tpu.memory_space<vmem>>) attributes {dimension_semantics = [#tpu.dimension_semantics<parallel>, #tpu.dimension_semantics<parallel>, #tpu.dimension_semantics<arbitrary>], iteration_bounds = array<i64: 1, 4, 1>, scalar_prefetch = 0 : i64, scratch_operands = 1 : i64, tpu.core_type = #tpu.core_type<tc>, window_params = [{transform_indices = @transform_0, window_bounds = array<i64: 8, 128>}, {transform_indices = @transform_1, window_bounds = array<i64: 128, 128>}, {transform_indices = @transform_2, window_bounds = array<i64: 1, 128>}, {transform_indices = @transform_3, window_bounds = array<i64: 8, 128>}, {transform_indices = @transform_4, window_bounds = array<i64: 8, 128>}]} {
    %c0_i32 = arith.constant 0 : i32
    %0 = arith.cmpi eq, %arg2, %c0_i32 : i32
    %1 = arith.extui %0 : i1 to i32
    %c0_i32_0 = arith.constant 0 : i32
    %2 = arith.cmpi ne, %1, %c0_i32_0 : i32
    scf.if %2 {
      %cst_10 = arith.constant 0.000000e+00 : f32
      %12 = vector.broadcast %cst_10 : f32 to vector<8x128xf32>
      %c0_11 = arith.constant 0 : index
      %c0_12 = arith.constant 0 : index
      %13 = vector.load %arg8[%c0_11, %c0_12] : memref<8x128xf32, #tpu.memory_space<vmem>>, vector<8x128xf32>
      tpu.vector_store %arg8[%c0_11, %c0_12], %12 {strides = array<i32>} : memref<8x128xf32, #tpu.memory_space<vmem>>, vector<8x128xf32>,
    } else {
    }
    %c0 = arith.constant 0 : index
    %c0_1 = arith.constant 0 : index
    %3 = vector.load %arg8[%c0, %c0_1] : memref<8x128xf32, #tpu.memory_space<vmem>>, vector<8x128xf32>
    %c0_2 = arith.constant 0 : index
    %c0_3 = arith.constant 0 : index
    %4 = vector.load %arg3[%c0_2, %c0_3] : memref<8x128xbf16, #tpu.memory_space<vmem>>, vector<8x128xbf16>
    %c0_4 = arith.constant 0 : index
    %c0_5 = arith.constant 0 : index
    %5 = vector.load %arg4[%c0_4, %c0_5] : memref<128x128xbf16, #tpu.memory_space<vmem>>, vector<128x128xbf16>
    %cst = arith.constant dense<0.000000e+00> : vector<8x128xf32>
    %6 = tpu.matmul %4, %5, %cst {dimension_numbers = #tpu.dot_dimension_numbers<[1], [0], [0], [1], [0, 0, 1, 1], [], []>} : vector<8x128xbf16>, vector<128x128xbf16>, vector<8x128xf32> -> vector<8x128xf32>
    %7 = arith.addf %3, %6 : vector<8x128xf32>
    %c0_6 = arith.constant 0 : index
    %c0_7 = arith.constant 0 : index
    %8 = vector.load %arg8[%c0_6, %c0_7] : memref<8x128xf32, #tpu.memory_space<vmem>>, vector<8x128xf32>
    tpu.vector_store %arg8[%c0_6, %c0_7], %7 {strides = array<i32>} : memref<8x128xf32, #tpu.memory_space<vmem>>, vector<8x128xf32>,
    %c0_i32_8 = arith.constant 0 : i32
    %9 = arith.cmpi eq, %arg2, %c0_i32_8 : i32
    %10 = arith.extui %9 : i1 to i32
    %c0_i32_9 = arith.constant 0 : i32
    %11 = arith.cmpi ne, %10, %c0_i32_9 : i32
    scf.if %11 {
      %c0_10 = arith.constant 0 : index
      %c0_11 = arith.constant 0 : index
      %12 = vector.load %arg8[%c0_10, %c0_11] : memref<8x128xf32, #tpu.memory_space<vmem>>, vector<8x128xf32>
      %c0_12 = arith.constant 0 : index
      %c0_13 = arith.constant 0 : index
      %13 = vector.load %arg5[%c0_12, %c0_13] : memref<1x128xf32, #tpu.memory_space<vmem>>, vector<1x128xf32>
      %14 = vector.broadcast %13 : vector<1x128xf32> to vector<8x128xf32>
      %15 = arith.addf %12, %14 : vector<8x128xf32>
      %c0_14 = arith.constant 0 : index
      %c0_15 = arith.constant 0 : index
      %16 = vector.load %arg6[%c0_14, %c0_15] : memref<8x128xbf16, #tpu.memory_space<vmem>>, vector<8x128xbf16>
      %17 = arith.extf %16 : vector<8x128xbf16> to vector<8x128xf32>
      %18 = arith.addf %15, %17 : vector<8x128xf32>
      %cst_16 = arith.constant 0.000000e+00 : f32
      %19 = vector.broadcast %cst_16 : f32 to vector<8x128xf32>
      %20 = arith.maximumf %18, %19 : vector<8x128xf32>
      %21 = arith.truncf %20 : vector<8x128xf32> to vector<8x128xbf16>
      %c0_17 = arith.constant 0 : index
      %c0_18 = arith.constant 0 : index
      %22 = vector.load %arg7[%c0_17, %c0_18] : memref<8x128xbf16, #tpu.memory_space<vmem>>, vector<8x128xbf16>
      tpu.vector_store %arg7[%c0_17, %c0_18], %21 {strides = array<i32>} : memref<8x128xbf16, #tpu.memory_space<vmem>>, vector<8x128xbf16>,
    } else {
    }
    return
  }
  func.func @transform_0(%arg0: i32, %arg1: i32, %arg2: i32) -> (i32, i32) {
    %c0_i32 = arith.constant 0 : i32
    return %arg0, %arg2 : i32, i32
  }
  func.func @transform_1(%arg0: i32, %arg1: i32, %arg2: i32) -> (i32, i32) {
    %c0_i32 = arith.constant 0 : i32
    return %arg2, %arg1 : i32, i32
  }
  func.func @transform_2(%arg0: i32, %arg1: i32, %arg2: i32) -> (i32, i32) {
    %c0_i32 = arith.constant 0 : i32
    %c0_i32_0 = arith.constant 0 : i32
    return %c0_i32, %arg1 : i32, i32
  }
  func.func @transform_3(%arg0: i32, %arg1: i32, %arg2: i32) -> (i32, i32) {
    %c0_i32 = arith.constant 0 : i32
    return %arg0, %arg1 : i32, i32
  }
  func.func @transform_4(%arg0: i32, %arg1: i32, %arg2: i32) -> (i32, i32) {
    %c0_i32 = arith.constant 0 : i32
    return %arg0, %arg1 : i32, i32
  }
}

module attributes {stable_mosaic.version = 11 : i64} {
  func.func @_conv_bn_kernel(%arg0: i32, %arg1: i32, %arg2: i32, %arg3: memref<8x512xbf16, #tpu.memory_space<vmem>>, %arg4: memref<512x128xbf16, #tpu.memory_space<vmem>>, %arg5: memref<1x128xf32, #tpu.memory_space<vmem>>, %arg6: memref<8x128xbf16, #tpu.memory_space<vmem>>, %arg7: memref<8x128xf32, #tpu.memory_space<vmem>>) attributes {dimension_semantics = [#tpu.dimension_semantics<parallel>, #tpu.dimension_semantics<parallel>, #tpu.dimension_semantics<arbitrary>], iteration_bounds = array<i64: 1, 1, 1>, scalar_prefetch = 0 : i64, scratch_operands = 1 : i64, tpu.core_type = #tpu.core_type<tc>, window_params = [{transform_indices = @transform_0, window_bounds = array<i64: 8, 512>}, {transform_indices = @transform_1, window_bounds = array<i64: 512, 128>}, {transform_indices = @transform_2, window_bounds = array<i64: 1, 128>}, {transform_indices = @transform_3, window_bounds = array<i64: 8, 128>}]} {
    %c0_i32 = arith.constant 0 : i32
    %0 = arith.cmpi eq, %arg2, %c0_i32 : i32
    %1 = arith.extui %0 : i1 to i32
    %c0_i32_0 = arith.constant 0 : i32
    %2 = arith.cmpi ne, %1, %c0_i32_0 : i32
    scf.if %2 {
      %cst_10 = arith.constant 0.000000e+00 : f32
      %12 = vector.broadcast %cst_10 : f32 to vector<8x128xf32>
      %c0_11 = arith.constant 0 : index
      %c0_12 = arith.constant 0 : index
      %13 = vector.load %arg7[%c0_11, %c0_12] : memref<8x128xf32, #tpu.memory_space<vmem>>, vector<8x128xf32>
      tpu.vector_store %arg7[%c0_11, %c0_12], %12 {strides = array<i32>} : memref<8x128xf32, #tpu.memory_space<vmem>>, vector<8x128xf32>,
    } else {
    }
    %c0 = arith.constant 0 : index
    %c0_1 = arith.constant 0 : index
    %3 = vector.load %arg7[%c0, %c0_1] : memref<8x128xf32, #tpu.memory_space<vmem>>, vector<8x128xf32>
    %c0_2 = arith.constant 0 : index
    %c0_3 = arith.constant 0 : index
    %4 = vector.load %arg3[%c0_2, %c0_3] : memref<8x512xbf16, #tpu.memory_space<vmem>>, vector<8x512xbf16>
    %c0_4 = arith.constant 0 : index
    %c0_5 = arith.constant 0 : index
    %5 = vector.load %arg4[%c0_4, %c0_5] : memref<512x128xbf16, #tpu.memory_space<vmem>>, vector<512x128xbf16>
    %cst = arith.constant dense<0.000000e+00> : vector<8x128xf32>
    %6 = tpu.matmul %4, %5, %cst {dimension_numbers = #tpu.dot_dimension_numbers<[1], [0], [0], [1], [0, 0, 1, 1], [], []>} : vector<8x512xbf16>, vector<512x128xbf16>, vector<8x128xf32> -> vector<8x128xf32>
    %7 = arith.addf %3, %6 : vector<8x128xf32>
    %c0_6 = arith.constant 0 : index
    %c0_7 = arith.constant 0 : index
    %8 = vector.load %arg7[%c0_6, %c0_7] : memref<8x128xf32, #tpu.memory_space<vmem>>, vector<8x128xf32>
    tpu.vector_store %arg7[%c0_6, %c0_7], %7 {strides = array<i32>} : memref<8x128xf32, #tpu.memory_space<vmem>>, vector<8x128xf32>,
    %c0_i32_8 = arith.constant 0 : i32
    %9 = arith.cmpi eq, %arg2, %c0_i32_8 : i32
    %10 = arith.extui %9 : i1 to i32
    %c0_i32_9 = arith.constant 0 : i32
    %11 = arith.cmpi ne, %10, %c0_i32_9 : i32
    scf.if %11 {
      %c0_10 = arith.constant 0 : index
      %c0_11 = arith.constant 0 : index
      %12 = vector.load %arg7[%c0_10, %c0_11] : memref<8x128xf32, #tpu.memory_space<vmem>>, vector<8x128xf32>
      %c0_12 = arith.constant 0 : index
      %c0_13 = arith.constant 0 : index
      %13 = vector.load %arg5[%c0_12, %c0_13] : memref<1x128xf32, #tpu.memory_space<vmem>>, vector<1x128xf32>
      %14 = vector.broadcast %13 : vector<1x128xf32> to vector<8x128xf32>
      %15 = arith.addf %12, %14 : vector<8x128xf32>
      %cst_14 = arith.constant 0.000000e+00 : f32
      %16 = vector.broadcast %cst_14 : f32 to vector<8x128xf32>
      %17 = arith.maximumf %15, %16 : vector<8x128xf32>
      %18 = arith.truncf %17 : vector<8x128xf32> to vector<8x128xbf16>
      %c0_15 = arith.constant 0 : index
      %c0_16 = arith.constant 0 : index
      %19 = vector.load %arg6[%c0_15, %c0_16] : memref<8x128xbf16, #tpu.memory_space<vmem>>, vector<8x128xbf16>
      tpu.vector_store %arg6[%c0_15, %c0_16], %18 {strides = array<i32>} : memref<8x128xbf16, #tpu.memory_space<vmem>>, vector<8x128xbf16>,
    } else {
    }
    return
  }
  func.func @transform_0(%arg0: i32, %arg1: i32, %arg2: i32) -> (i32, i32) {
    %c0_i32 = arith.constant 0 : i32
    return %arg0, %arg2 : i32, i32
  }
  func.func @transform_1(%arg0: i32, %arg1: i32, %arg2: i32) -> (i32, i32) {
    %c0_i32 = arith.constant 0 : i32
    return %arg2, %arg1 : i32, i32
  }
  func.func @transform_2(%arg0: i32, %arg1: i32, %arg2: i32) -> (i32, i32) {
    %c0_i32 = arith.constant 0 : i32
    %c0_i32_0 = arith.constant 0 : i32
    return %c0_i32, %arg1 : i32, i32
  }
  func.func @transform_3(%arg0: i32, %arg1: i32, %arg2: i32) -> (i32, i32) {
    %c0_i32 = arith.constant 0 : i32
    return %arg0, %arg1 : i32, i32
  }
}

module attributes {stable_mosaic.version = 11 : i64} {
  func.func @_conv_bn_kernel(%arg0: i32, %arg1: i32, %arg2: i32, %arg3: memref<8x512xbf16, #tpu.memory_space<vmem>>, %arg4: memref<512x128xbf16, #tpu.memory_space<vmem>>, %arg5: memref<1x128xf32, #tpu.memory_space<vmem>>, %arg6: memref<8x128xbf16, #tpu.memory_space<vmem>>, %arg7: memref<8x128xf32, #tpu.memory_space<vmem>>) attributes {dimension_semantics = [#tpu.dimension_semantics<parallel>, #tpu.dimension_semantics<parallel>, #tpu.dimension_semantics<arbitrary>], iteration_bounds = array<i64: 1, 2, 1>, scalar_prefetch = 0 : i64, scratch_operands = 1 : i64, tpu.core_type = #tpu.core_type<tc>, window_params = [{transform_indices = @transform_0, window_bounds = array<i64: 8, 512>}, {transform_indices = @transform_1, window_bounds = array<i64: 512, 128>}, {transform_indices = @transform_2, window_bounds = array<i64: 1, 128>}, {transform_indices = @transform_3, window_bounds = array<i64: 8, 128>}]} {
    %c0_i32 = arith.constant 0 : i32
    %0 = arith.cmpi eq, %arg2, %c0_i32 : i32
    %1 = arith.extui %0 : i1 to i32
    %c0_i32_0 = arith.constant 0 : i32
    %2 = arith.cmpi ne, %1, %c0_i32_0 : i32
    scf.if %2 {
      %cst_10 = arith.constant 0.000000e+00 : f32
      %12 = vector.broadcast %cst_10 : f32 to vector<8x128xf32>
      %c0_11 = arith.constant 0 : index
      %c0_12 = arith.constant 0 : index
      %13 = vector.load %arg7[%c0_11, %c0_12] : memref<8x128xf32, #tpu.memory_space<vmem>>, vector<8x128xf32>
      tpu.vector_store %arg7[%c0_11, %c0_12], %12 {strides = array<i32>} : memref<8x128xf32, #tpu.memory_space<vmem>>, vector<8x128xf32>,
    } else {
    }
    %c0 = arith.constant 0 : index
    %c0_1 = arith.constant 0 : index
    %3 = vector.load %arg7[%c0, %c0_1] : memref<8x128xf32, #tpu.memory_space<vmem>>, vector<8x128xf32>
    %c0_2 = arith.constant 0 : index
    %c0_3 = arith.constant 0 : index
    %4 = vector.load %arg3[%c0_2, %c0_3] : memref<8x512xbf16, #tpu.memory_space<vmem>>, vector<8x512xbf16>
    %c0_4 = arith.constant 0 : index
    %c0_5 = arith.constant 0 : index
    %5 = vector.load %arg4[%c0_4, %c0_5] : memref<512x128xbf16, #tpu.memory_space<vmem>>, vector<512x128xbf16>
    %cst = arith.constant dense<0.000000e+00> : vector<8x128xf32>
    %6 = tpu.matmul %4, %5, %cst {dimension_numbers = #tpu.dot_dimension_numbers<[1], [0], [0], [1], [0, 0, 1, 1], [], []>} : vector<8x512xbf16>, vector<512x128xbf16>, vector<8x128xf32> -> vector<8x128xf32>
    %7 = arith.addf %3, %6 : vector<8x128xf32>
    %c0_6 = arith.constant 0 : index
    %c0_7 = arith.constant 0 : index
    %8 = vector.load %arg7[%c0_6, %c0_7] : memref<8x128xf32, #tpu.memory_space<vmem>>, vector<8x128xf32>
    tpu.vector_store %arg7[%c0_6, %c0_7], %7 {strides = array<i32>} : memref<8x128xf32, #tpu.memory_space<vmem>>, vector<8x128xf32>,
    %c0_i32_8 = arith.constant 0 : i32
    %9 = arith.cmpi eq, %arg2, %c0_i32_8 : i32
    %10 = arith.extui %9 : i1 to i32
    %c0_i32_9 = arith.constant 0 : i32
    %11 = arith.cmpi ne, %10, %c0_i32_9 : i32
    scf.if %11 {
      %c0_10 = arith.constant 0 : index
      %c0_11 = arith.constant 0 : index
      %12 = vector.load %arg7[%c0_10, %c0_11] : memref<8x128xf32, #tpu.memory_space<vmem>>, vector<8x128xf32>
      %c0_12 = arith.constant 0 : index
      %c0_13 = arith.constant 0 : index
      %13 = vector.load %arg5[%c0_12, %c0_13] : memref<1x128xf32, #tpu.memory_space<vmem>>, vector<1x128xf32>
      %14 = vector.broadcast %13 : vector<1x128xf32> to vector<8x128xf32>
      %15 = arith.addf %12, %14 : vector<8x128xf32>
      %cst_14 = arith.constant 0.000000e+00 : f32
      %16 = vector.broadcast %cst_14 : f32 to vector<8x128xf32>
      %17 = arith.maximumf %15, %16 : vector<8x128xf32>
      %18 = arith.truncf %17 : vector<8x128xf32> to vector<8x128xbf16>
      %c0_15 = arith.constant 0 : index
      %c0_16 = arith.constant 0 : index
      %19 = vector.load %arg6[%c0_15, %c0_16] : memref<8x128xbf16, #tpu.memory_space<vmem>>, vector<8x128xbf16>
      tpu.vector_store %arg6[%c0_15, %c0_16], %18 {strides = array<i32>} : memref<8x128xbf16, #tpu.memory_space<vmem>>, vector<8x128xbf16>,
    } else {
    }
    return
  }
  func.func @transform_0(%arg0: i32, %arg1: i32, %arg2: i32) -> (i32, i32) {
    %c0_i32 = arith.constant 0 : i32
    return %arg0, %arg2 : i32, i32
  }
  func.func @transform_1(%arg0: i32, %arg1: i32, %arg2: i32) -> (i32, i32) {
    %c0_i32 = arith.constant 0 : i32
    return %arg2, %arg1 : i32, i32
  }
  func.func @transform_2(%arg0: i32, %arg1: i32, %arg2: i32) -> (i32, i32) {
    %c0_i32 = arith.constant 0 : i32
    %c0_i32_0 = arith.constant 0 : i32
    return %c0_i32, %arg1 : i32, i32
  }
  func.func @transform_3(%arg0: i32, %arg1: i32, %arg2: i32) -> (i32, i32) {
    %c0_i32 = arith.constant 0 : i32
    return %arg0, %arg1 : i32, i32
  }
}

module attributes {stable_mosaic.version = 11 : i64} {
  func.func @_conv_bn_kernel(%arg0: i32, %arg1: i32, %arg2: i32, %arg3: memref<2x256xbf16, #tpu.memory_space<vmem>>, %arg4: memref<256x128xbf16, #tpu.memory_space<vmem>>, %arg5: memref<1x128xf32, #tpu.memory_space<vmem>>, %arg6: memref<2x128xbf16, #tpu.memory_space<vmem>>, %arg7: memref<2x128xf32, #tpu.memory_space<vmem>>) attributes {dimension_semantics = [#tpu.dimension_semantics<parallel>, #tpu.dimension_semantics<parallel>, #tpu.dimension_semantics<arbitrary>], iteration_bounds = array<i64: 1, 2, 9>, scalar_prefetch = 0 : i64, scratch_operands = 1 : i64, tpu.core_type = #tpu.core_type<tc>, window_params = [{transform_indices = @transform_0, window_bounds = array<i64: 2, 256>}, {transform_indices = @transform_1, window_bounds = array<i64: 256, 128>}, {transform_indices = @transform_2, window_bounds = array<i64: 1, 128>}, {transform_indices = @transform_3, window_bounds = array<i64: 2, 128>}]} {
    %c0_i32 = arith.constant 0 : i32
    %0 = arith.cmpi eq, %arg2, %c0_i32 : i32
    %1 = arith.extui %0 : i1 to i32
    %c0_i32_0 = arith.constant 0 : i32
    %2 = arith.cmpi ne, %1, %c0_i32_0 : i32
    scf.if %2 {
      %cst_9 = arith.constant 0.000000e+00 : f32
      %12 = vector.broadcast %cst_9 : f32 to vector<2x128xf32>
      %c0_10 = arith.constant 0 : index
      %c0_11 = arith.constant 0 : index
      %13 = vector.load %arg7[%c0_10, %c0_11] : memref<2x128xf32, #tpu.memory_space<vmem>>, vector<2x128xf32>
      tpu.vector_store %arg7[%c0_10, %c0_11], %12 {strides = array<i32>} : memref<2x128xf32, #tpu.memory_space<vmem>>, vector<2x128xf32>,
    } else {
    }
    %c0 = arith.constant 0 : index
    %c0_1 = arith.constant 0 : index
    %3 = vector.load %arg7[%c0, %c0_1] : memref<2x128xf32, #tpu.memory_space<vmem>>, vector<2x128xf32>
    %c0_2 = arith.constant 0 : index
    %c0_3 = arith.constant 0 : index
    %4 = vector.load %arg3[%c0_2, %c0_3] : memref<2x256xbf16, #tpu.memory_space<vmem>>, vector<2x256xbf16>
    %c0_4 = arith.constant 0 : index
    %c0_5 = arith.constant 0 : index
    %5 = vector.load %arg4[%c0_4, %c0_5] : memref<256x128xbf16, #tpu.memory_space<vmem>>, vector<256x128xbf16>
    %cst = arith.constant dense<0.000000e+00> : vector<2x128xf32>
    %6 = tpu.matmul %4, %5, %cst {dimension_numbers = #tpu.dot_dimension_numbers<[1], [0], [0], [1], [0, 0, 1, 1], [], []>} : vector<2x256xbf16>, vector<256x128xbf16>, vector<2x128xf32> -> vector<2x128xf32>
    %7 = arith.addf %3, %6 : vector<2x128xf32>
    %c0_6 = arith.constant 0 : index
    %c0_7 = arith.constant 0 : index
    %8 = vector.load %arg7[%c0_6, %c0_7] : memref<2x128xf32, #tpu.memory_space<vmem>>, vector<2x128xf32>
    tpu.vector_store %arg7[%c0_6, %c0_7], %7 {strides = array<i32>} : memref<2x128xf32, #tpu.memory_space<vmem>>, vector<2x128xf32>,
    %c8_i32 = arith.constant 8 : i32
    %9 = arith.cmpi eq, %arg2, %c8_i32 : i32
    %10 = arith.extui %9 : i1 to i32
    %c0_i32_8 = arith.constant 0 : i32
    %11 = arith.cmpi ne, %10, %c0_i32_8 : i32
    scf.if %11 {
      %c0_9 = arith.constant 0 : index
      %c0_10 = arith.constant 0 : index
      %12 = vector.load %arg7[%c0_9, %c0_10] : memref<2x128xf32, #tpu.memory_space<vmem>>, vector<2x128xf32>
      %c0_11 = arith.constant 0 : index
      %c0_12 = arith.constant 0 : index
      %13 = vector.load %arg5[%c0_11, %c0_12] : memref<1x128xf32, #tpu.memory_space<vmem>>, vector<1x128xf32>
      %14 = vector.broadcast %13 : vector<1x128xf32> to vector<2x128xf32>
      %15 = arith.addf %12, %14 : vector<2x128xf32>
      %cst_13 = arith.constant 0.000000e+00 : f32
      %16 = vector.broadcast %cst_13 : f32 to vector<2x128xf32>
      %17 = arith.maximumf %15, %16 : vector<2x128xf32>
      %18 = arith.truncf %17 : vector<2x128xf32> to vector<2x128xbf16>
      %c0_14 = arith.constant 0 : index
      %c0_15 = arith.constant 0 : index
      %19 = vector.load %arg6[%c0_14, %c0_15] : memref<2x128xbf16, #tpu.memory_space<vmem>>, vector<2x128xbf16>
      tpu.vector_store %arg6[%c0_14, %c0_15], %18 {strides = array<i32>} : memref<2x128xbf16, #tpu.memory_space<vmem>>, vector<2x128xbf16>,
    } else {
    }
    return
  }
  func.func @transform_0(%arg0: i32, %arg1: i32, %arg2: i32) -> (i32, i32) {
    %c0_i32 = arith.constant 0 : i32
    return %arg0, %arg2 : i32, i32
  }
  func.func @transform_1(%arg0: i32, %arg1: i32, %arg2: i32) -> (i32, i32) {
    %c0_i32 = arith.constant 0 : i32
    return %arg2, %arg1 : i32, i32
  }
  func.func @transform_2(%arg0: i32, %arg1: i32, %arg2: i32) -> (i32, i32) {
    %c0_i32 = arith.constant 0 : i32
    %c0_i32_0 = arith.constant 0 : i32
    return %c0_i32, %arg1 : i32, i32
  }
  func.func @transform_3(%arg0: i32, %arg1: i32, %arg2: i32) -> (i32, i32) {
    %c0_i32 = arith.constant 0 : i32
    return %arg0, %arg1 : i32, i32
  }
}

module attributes {stable_mosaic.version = 11 : i64} {
  func.func @_conv_bn_kernel(%arg0: i32, %arg1: i32, %arg2: i32, %arg3: memref<2x512xbf16, #tpu.memory_space<vmem>>, %arg4: memref<512x128xbf16, #tpu.memory_space<vmem>>, %arg5: memref<1x128xf32, #tpu.memory_space<vmem>>, %arg6: memref<2x128xbf16, #tpu.memory_space<vmem>>, %arg7: memref<2x128xf32, #tpu.memory_space<vmem>>) attributes {dimension_semantics = [#tpu.dimension_semantics<parallel>, #tpu.dimension_semantics<parallel>, #tpu.dimension_semantics<arbitrary>], iteration_bounds = array<i64: 1, 8, 1>, scalar_prefetch = 0 : i64, scratch_operands = 1 : i64, tpu.core_type = #tpu.core_type<tc>, window_params = [{transform_indices = @transform_0, window_bounds = array<i64: 2, 512>}, {transform_indices = @transform_1, window_bounds = array<i64: 512, 128>}, {transform_indices = @transform_2, window_bounds = array<i64: 1, 128>}, {transform_indices = @transform_3, window_bounds = array<i64: 2, 128>}]} {
    %c0_i32 = arith.constant 0 : i32
    %0 = arith.cmpi eq, %arg2, %c0_i32 : i32
    %1 = arith.extui %0 : i1 to i32
    %c0_i32_0 = arith.constant 0 : i32
    %2 = arith.cmpi ne, %1, %c0_i32_0 : i32
    scf.if %2 {
      %cst_10 = arith.constant 0.000000e+00 : f32
      %12 = vector.broadcast %cst_10 : f32 to vector<2x128xf32>
      %c0_11 = arith.constant 0 : index
      %c0_12 = arith.constant 0 : index
      %13 = vector.load %arg7[%c0_11, %c0_12] : memref<2x128xf32, #tpu.memory_space<vmem>>, vector<2x128xf32>
      tpu.vector_store %arg7[%c0_11, %c0_12], %12 {strides = array<i32>} : memref<2x128xf32, #tpu.memory_space<vmem>>, vector<2x128xf32>,
    } else {
    }
    %c0 = arith.constant 0 : index
    %c0_1 = arith.constant 0 : index
    %3 = vector.load %arg7[%c0, %c0_1] : memref<2x128xf32, #tpu.memory_space<vmem>>, vector<2x128xf32>
    %c0_2 = arith.constant 0 : index
    %c0_3 = arith.constant 0 : index
    %4 = vector.load %arg3[%c0_2, %c0_3] : memref<2x512xbf16, #tpu.memory_space<vmem>>, vector<2x512xbf16>
    %c0_4 = arith.constant 0 : index
    %c0_5 = arith.constant 0 : index
    %5 = vector.load %arg4[%c0_4, %c0_5] : memref<512x128xbf16, #tpu.memory_space<vmem>>, vector<512x128xbf16>
    %cst = arith.constant dense<0.000000e+00> : vector<2x128xf32>
    %6 = tpu.matmul %4, %5, %cst {dimension_numbers = #tpu.dot_dimension_numbers<[1], [0], [0], [1], [0, 0, 1, 1], [], []>} : vector<2x512xbf16>, vector<512x128xbf16>, vector<2x128xf32> -> vector<2x128xf32>
    %7 = arith.addf %3, %6 : vector<2x128xf32>
    %c0_6 = arith.constant 0 : index
    %c0_7 = arith.constant 0 : index
    %8 = vector.load %arg7[%c0_6, %c0_7] : memref<2x128xf32, #tpu.memory_space<vmem>>, vector<2x128xf32>
    tpu.vector_store %arg7[%c0_6, %c0_7], %7 {strides = array<i32>} : memref<2x128xf32, #tpu.memory_space<vmem>>, vector<2x128xf32>,
    %c0_i32_8 = arith.constant 0 : i32
    %9 = arith.cmpi eq, %arg2, %c0_i32_8 : i32
    %10 = arith.extui %9 : i1 to i32
    %c0_i32_9 = arith.constant 0 : i32
    %11 = arith.cmpi ne, %10, %c0_i32_9 : i32
    scf.if %11 {
      %c0_10 = arith.constant 0 : index
      %c0_11 = arith.constant 0 : index
      %12 = vector.load %arg7[%c0_10, %c0_11] : memref<2x128xf32, #tpu.memory_space<vmem>>, vector<2x128xf32>
      %c0_12 = arith.constant 0 : index
      %c0_13 = arith.constant 0 : index
      %13 = vector.load %arg5[%c0_12, %c0_13] : memref<1x128xf32, #tpu.memory_space<vmem>>, vector<1x128xf32>
      %14 = vector.broadcast %13 : vector<1x128xf32> to vector<2x128xf32>
      %15 = arith.addf %12, %14 : vector<2x128xf32>
      %16 = arith.truncf %15 : vector<2x128xf32> to vector<2x128xbf16>
      %c0_14 = arith.constant 0 : index
      %c0_15 = arith.constant 0 : index
      %17 = vector.load %arg6[%c0_14, %c0_15] : memref<2x128xbf16, #tpu.memory_space<vmem>>, vector<2x128xbf16>
      tpu.vector_store %arg6[%c0_14, %c0_15], %16 {strides = array<i32>} : memref<2x128xbf16, #tpu.memory_space<vmem>>, vector<2x128xbf16>,
    } else {
    }
    return
  }
  func.func @transform_0(%arg0: i32, %arg1: i32, %arg2: i32) -> (i32, i32) {
    %c0_i32 = arith.constant 0 : i32
    return %arg0, %arg2 : i32, i32
  }
  func.func @transform_1(%arg0: i32, %arg1: i32, %arg2: i32) -> (i32, i32) {
    %c0_i32 = arith.constant 0 : i32
    return %arg2, %arg1 : i32, i32
  }
  func.func @transform_2(%arg0: i32, %arg1: i32, %arg2: i32) -> (i32, i32) {
    %c0_i32 = arith.constant 0 : i32
    %c0_i32_0 = arith.constant 0 : i32
    return %c0_i32, %arg1 : i32, i32
  }
  func.func @transform_3(%arg0: i32, %arg1: i32, %arg2: i32) -> (i32, i32) {
    %c0_i32 = arith.constant 0 : i32
    return %arg0, %arg1 : i32, i32
  }
}

module attributes {stable_mosaic.version = 11 : i64} {
  func.func @_conv_bn_res_kernel(%arg0: i32, %arg1: i32, %arg2: i32, %arg3: memref<2x256xbf16, #tpu.memory_space<vmem>>, %arg4: memref<256x128xbf16, #tpu.memory_space<vmem>>, %arg5: memref<1x128xf32, #tpu.memory_space<vmem>>, %arg6: memref<2x128xbf16, #tpu.memory_space<vmem>>, %arg7: memref<2x128xbf16, #tpu.memory_space<vmem>>, %arg8: memref<2x128xf32, #tpu.memory_space<vmem>>) attributes {dimension_semantics = [#tpu.dimension_semantics<parallel>, #tpu.dimension_semantics<parallel>, #tpu.dimension_semantics<arbitrary>], iteration_bounds = array<i64: 1, 8, 1>, scalar_prefetch = 0 : i64, scratch_operands = 1 : i64, tpu.core_type = #tpu.core_type<tc>, window_params = [{transform_indices = @transform_0, window_bounds = array<i64: 2, 256>}, {transform_indices = @transform_1, window_bounds = array<i64: 256, 128>}, {transform_indices = @transform_2, window_bounds = array<i64: 1, 128>}, {transform_indices = @transform_3, window_bounds = array<i64: 2, 128>}, {transform_indices = @transform_4, window_bounds = array<i64: 2, 128>}]} {
    %c0_i32 = arith.constant 0 : i32
    %0 = arith.cmpi eq, %arg2, %c0_i32 : i32
    %1 = arith.extui %0 : i1 to i32
    %c0_i32_0 = arith.constant 0 : i32
    %2 = arith.cmpi ne, %1, %c0_i32_0 : i32
    scf.if %2 {
      %cst_10 = arith.constant 0.000000e+00 : f32
      %12 = vector.broadcast %cst_10 : f32 to vector<2x128xf32>
      %c0_11 = arith.constant 0 : index
      %c0_12 = arith.constant 0 : index
      %13 = vector.load %arg8[%c0_11, %c0_12] : memref<2x128xf32, #tpu.memory_space<vmem>>, vector<2x128xf32>
      tpu.vector_store %arg8[%c0_11, %c0_12], %12 {strides = array<i32>} : memref<2x128xf32, #tpu.memory_space<vmem>>, vector<2x128xf32>,
    } else {
    }
    %c0 = arith.constant 0 : index
    %c0_1 = arith.constant 0 : index
    %3 = vector.load %arg8[%c0, %c0_1] : memref<2x128xf32, #tpu.memory_space<vmem>>, vector<2x128xf32>
    %c0_2 = arith.constant 0 : index
    %c0_3 = arith.constant 0 : index
    %4 = vector.load %arg3[%c0_2, %c0_3] : memref<2x256xbf16, #tpu.memory_space<vmem>>, vector<2x256xbf16>
    %c0_4 = arith.constant 0 : index
    %c0_5 = arith.constant 0 : index
    %5 = vector.load %arg4[%c0_4, %c0_5] : memref<256x128xbf16, #tpu.memory_space<vmem>>, vector<256x128xbf16>
    %cst = arith.constant dense<0.000000e+00> : vector<2x128xf32>
    %6 = tpu.matmul %4, %5, %cst {dimension_numbers = #tpu.dot_dimension_numbers<[1], [0], [0], [1], [0, 0, 1, 1], [], []>} : vector<2x256xbf16>, vector<256x128xbf16>, vector<2x128xf32> -> vector<2x128xf32>
    %7 = arith.addf %3, %6 : vector<2x128xf32>
    %c0_6 = arith.constant 0 : index
    %c0_7 = arith.constant 0 : index
    %8 = vector.load %arg8[%c0_6, %c0_7] : memref<2x128xf32, #tpu.memory_space<vmem>>, vector<2x128xf32>
    tpu.vector_store %arg8[%c0_6, %c0_7], %7 {strides = array<i32>} : memref<2x128xf32, #tpu.memory_space<vmem>>, vector<2x128xf32>,
    %c0_i32_8 = arith.constant 0 : i32
    %9 = arith.cmpi eq, %arg2, %c0_i32_8 : i32
    %10 = arith.extui %9 : i1 to i32
    %c0_i32_9 = arith.constant 0 : i32
    %11 = arith.cmpi ne, %10, %c0_i32_9 : i32
    scf.if %11 {
      %c0_10 = arith.constant 0 : index
      %c0_11 = arith.constant 0 : index
      %12 = vector.load %arg8[%c0_10, %c0_11] : memref<2x128xf32, #tpu.memory_space<vmem>>, vector<2x128xf32>
      %c0_12 = arith.constant 0 : index
      %c0_13 = arith.constant 0 : index
      %13 = vector.load %arg5[%c0_12, %c0_13] : memref<1x128xf32, #tpu.memory_space<vmem>>, vector<1x128xf32>
      %14 = vector.broadcast %13 : vector<1x128xf32> to vector<2x128xf32>
      %15 = arith.addf %12, %14 : vector<2x128xf32>
      %c0_14 = arith.constant 0 : index
      %c0_15 = arith.constant 0 : index
      %16 = vector.load %arg6[%c0_14, %c0_15] : memref<2x128xbf16, #tpu.memory_space<vmem>>, vector<2x128xbf16>
      %17 = arith.extf %16 : vector<2x128xbf16> to vector<2x128xf32>
      %18 = arith.addf %15, %17 : vector<2x128xf32>
      %cst_16 = arith.constant 0.000000e+00 : f32
      %19 = vector.broadcast %cst_16 : f32 to vector<2x128xf32>
      %20 = arith.maximumf %18, %19 : vector<2x128xf32>
      %21 = arith.truncf %20 : vector<2x128xf32> to vector<2x128xbf16>
      %c0_17 = arith.constant 0 : index
      %c0_18 = arith.constant 0 : index
      %22 = vector.load %arg7[%c0_17, %c0_18] : memref<2x128xbf16, #tpu.memory_space<vmem>>, vector<2x128xbf16>
      tpu.vector_store %arg7[%c0_17, %c0_18], %21 {strides = array<i32>} : memref<2x128xbf16, #tpu.memory_space<vmem>>, vector<2x128xbf16>,
    } else {
    }
    return
  }
  func.func @transform_0(%arg0: i32, %arg1: i32, %arg2: i32) -> (i32, i32) {
    %c0_i32 = arith.constant 0 : i32
    return %arg0, %arg2 : i32, i32
  }
  func.func @transform_1(%arg0: i32, %arg1: i32, %arg2: i32) -> (i32, i32) {
    %c0_i32 = arith.constant 0 : i32
    return %arg2, %arg1 : i32, i32
  }
  func.func @transform_2(%arg0: i32, %arg1: i32, %arg2: i32) -> (i32, i32) {
    %c0_i32 = arith.constant 0 : i32
    %c0_i32_0 = arith.constant 0 : i32
    return %c0_i32, %arg1 : i32, i32
  }
  func.func @transform_3(%arg0: i32, %arg1: i32, %arg2: i32) -> (i32, i32) {
    %c0_i32 = arith.constant 0 : i32
    return %arg0, %arg1 : i32, i32
  }
  func.func @transform_4(%arg0: i32, %arg1: i32, %arg2: i32) -> (i32, i32) {
    %c0_i32 = arith.constant 0 : i32
    return %arg0, %arg1 : i32, i32
  }
}

module attributes {stable_mosaic.version = 11 : i64} {
  func.func @_conv_bn_kernel(%arg0: i32, %arg1: i32, %arg2: i32, %arg3: memref<2x512xbf16, #tpu.memory_space<vmem>>, %arg4: memref<512x128xbf16, #tpu.memory_space<vmem>>, %arg5: memref<1x128xf32, #tpu.memory_space<vmem>>, %arg6: memref<2x128xbf16, #tpu.memory_space<vmem>>, %arg7: memref<2x128xf32, #tpu.memory_space<vmem>>) attributes {dimension_semantics = [#tpu.dimension_semantics<parallel>, #tpu.dimension_semantics<parallel>, #tpu.dimension_semantics<arbitrary>], iteration_bounds = array<i64: 1, 2, 2>, scalar_prefetch = 0 : i64, scratch_operands = 1 : i64, tpu.core_type = #tpu.core_type<tc>, window_params = [{transform_indices = @transform_0, window_bounds = array<i64: 2, 512>}, {transform_indices = @transform_1, window_bounds = array<i64: 512, 128>}, {transform_indices = @transform_2, window_bounds = array<i64: 1, 128>}, {transform_indices = @transform_3, window_bounds = array<i64: 2, 128>}]} {
    %c0_i32 = arith.constant 0 : i32
    %0 = arith.cmpi eq, %arg2, %c0_i32 : i32
    %1 = arith.extui %0 : i1 to i32
    %c0_i32_0 = arith.constant 0 : i32
    %2 = arith.cmpi ne, %1, %c0_i32_0 : i32
    scf.if %2 {
      %cst_9 = arith.constant 0.000000e+00 : f32
      %12 = vector.broadcast %cst_9 : f32 to vector<2x128xf32>
      %c0_10 = arith.constant 0 : index
      %c0_11 = arith.constant 0 : index
      %13 = vector.load %arg7[%c0_10, %c0_11] : memref<2x128xf32, #tpu.memory_space<vmem>>, vector<2x128xf32>
      tpu.vector_store %arg7[%c0_10, %c0_11], %12 {strides = array<i32>} : memref<2x128xf32, #tpu.memory_space<vmem>>, vector<2x128xf32>,
    } else {
    }
    %c0 = arith.constant 0 : index
    %c0_1 = arith.constant 0 : index
    %3 = vector.load %arg7[%c0, %c0_1] : memref<2x128xf32, #tpu.memory_space<vmem>>, vector<2x128xf32>
    %c0_2 = arith.constant 0 : index
    %c0_3 = arith.constant 0 : index
    %4 = vector.load %arg3[%c0_2, %c0_3] : memref<2x512xbf16, #tpu.memory_space<vmem>>, vector<2x512xbf16>
    %c0_4 = arith.constant 0 : index
    %c0_5 = arith.constant 0 : index
    %5 = vector.load %arg4[%c0_4, %c0_5] : memref<512x128xbf16, #tpu.memory_space<vmem>>, vector<512x128xbf16>
    %cst = arith.constant dense<0.000000e+00> : vector<2x128xf32>
    %6 = tpu.matmul %4, %5, %cst {dimension_numbers = #tpu.dot_dimension_numbers<[1], [0], [0], [1], [0, 0, 1, 1], [], []>} : vector<2x512xbf16>, vector<512x128xbf16>, vector<2x128xf32> -> vector<2x128xf32>
    %7 = arith.addf %3, %6 : vector<2x128xf32>
    %c0_6 = arith.constant 0 : index
    %c0_7 = arith.constant 0 : index
    %8 = vector.load %arg7[%c0_6, %c0_7] : memref<2x128xf32, #tpu.memory_space<vmem>>, vector<2x128xf32>
    tpu.vector_store %arg7[%c0_6, %c0_7], %7 {strides = array<i32>} : memref<2x128xf32, #tpu.memory_space<vmem>>, vector<2x128xf32>,
    %c1_i32 = arith.constant 1 : i32
    %9 = arith.cmpi eq, %arg2, %c1_i32 : i32
    %10 = arith.extui %9 : i1 to i32
    %c0_i32_8 = arith.constant 0 : i32
    %11 = arith.cmpi ne, %10, %c0_i32_8 : i32
    scf.if %11 {
      %c0_9 = arith.constant 0 : index
      %c0_10 = arith.constant 0 : index
      %12 = vector.load %arg7[%c0_9, %c0_10] : memref<2x128xf32, #tpu.memory_space<vmem>>, vector<2x128xf32>
      %c0_11 = arith.constant 0 : index
      %c0_12 = arith.constant 0 : index
      %13 = vector.load %arg5[%c0_11, %c0_12] : memref<1x128xf32, #tpu.memory_space<vmem>>, vector<1x128xf32>
      %14 = vector.broadcast %13 : vector<1x128xf32> to vector<2x128xf32>
      %15 = arith.addf %12, %14 : vector<2x128xf32>
      %cst_13 = arith.constant 0.000000e+00 : f32
      %16 = vector.broadcast %cst_13 : f32 to vector<2x128xf32>
      %17 = arith.maximumf %15, %16 : vector<2x128xf32>
      %18 = arith.truncf %17 : vector<2x128xf32> to vector<2x128xbf16>
      %c0_14 = arith.constant 0 : index
      %c0_15 = arith.constant 0 : index
      %19 = vector.load %arg6[%c0_14, %c0_15] : memref<2x128xbf16, #tpu.memory_space<vmem>>, vector<2x128xbf16>
      tpu.vector_store %arg6[%c0_14, %c0_15], %18 {strides = array<i32>} : memref<2x128xbf16, #tpu.memory_space<vmem>>, vector<2x128xbf16>,
    } else {
    }
    return
  }
  func.func @transform_0(%arg0: i32, %arg1: i32, %arg2: i32) -> (i32, i32) {
    %c0_i32 = arith.constant 0 : i32
    return %arg0, %arg2 : i32, i32
  }
  func.func @transform_1(%arg0: i32, %arg1: i32, %arg2: i32) -> (i32, i32) {
    %c0_i32 = arith.constant 0 : i32
    return %arg2, %arg1 : i32, i32
  }
  func.func @transform_2(%arg0: i32, %arg1: i32, %arg2: i32) -> (i32, i32) {
    %c0_i32 = arith.constant 0 : i32
    %c0_i32_0 = arith.constant 0 : i32
    return %c0_i32, %arg1 : i32, i32
  }
  func.func @transform_3(%arg0: i32, %arg1: i32, %arg2: i32) -> (i32, i32) {
    %c0_i32 = arith.constant 0 : i32
    return %arg0, %arg1 : i32, i32
  }
}

</mosaic_0001>

<bundles_post_ra>
// kernel: _lambda_.54
= control target key start
LH: loop header
LB: loop body
LE: loop exit
PB: predicated region body
PF: predicated region fallthrough
CT: control target
= control target key end

     0   :  { %s1744_s12 = smov 0   ;;  %s1746_s13 = smov 0   ;;  %s1918_s0 = inlined_call_operand.vmem [shape: bf16[512,256], index: 0, kind: input, shape index: {}]   ;;  %s1919_s1 = inlined_call_operand.vmem [shape: bf16[256,128], index: 1, kind: input, shape index: {}]   ;;  %s1920_s2 = inlined_call_operand.vmem [shape: f32[1,128], index: 2, kind: input, shape index: {}]   ;;  %s1921_s3 = inlined_call_operand.vmem [shape: bf16[512,128], index: 3, kind: output, shape index: {}]  }
   0x1   :  { %s1748_s14 = smov 0  }
   0x2 LB: > { %s32_s15 = sadd.s32 1, %s1718_s13  ;;  %p1267_p0 = scmp.ge.s32.totalorder %s1722_s14, 1  ;;  %s1722_s14 = sphi %s1748_s14, %s13_s14   ;;  %s1718_s13 = sphi %s1746_s13, %s1923_s13   ;;  %s1714_s12 = sphi %s1744_s12, %s1922_s12  }
   0x3   : > { %p34_p1 = scmp.ge.s32.totalorder %s32_s15, 2  ;;  %p191_p2 = scmp.lt.s32.totalorder %s1722_s14, 3 }
   0x5   : > { %s1925_s15 = smov (%p34_p1, %s32_s15), 0  ;;  %p192_p3 = pnand %p1267_p0, %p191_p2 }
   0x6   : > { %v1636_v0 = vld [vmem:[%s1919_s1 + $0x40] sm:$0xff] (!%p192_p3)   ;;  %s1268_s18 = sshll.u32 (!%p192_p3), %s1714_s12, 5  ;;  %v1638_v2 = vld [vmem:[%s1919_s1 + $0x48] sm:$0xff] (!%p192_p3)   ;;  %v1640_v4 = vld [vmem:[%s1919_s1 + $0x50] sm:$0xff] (!%p192_p3)  }
   0x7   : > { %195 = sbr.rel (%p192_p3) target bundleno = 320 (0x140), region = 32  ;;  %v1637_v1 = vld [vmem:[%s1919_s1] sm:$0xff] (!%p192_p3)   ;;  %1484 = vmatprep.subr.bf16.mxu0 (!%p192_p3), %v1636_v0  ;;  %1596 = vmatprep.subr.bf16.mxu1 (!%p192_p3), %v1636_v0  ;;  %v1639_v3 = vld [vmem:[%s1919_s1 + $0x8] sm:$0xff] (!%p192_p3)   ;;  %p236_p4 = scmp.lt.s32.totalorder (!%p192_p3), %s1268_s18, 63  ;;  %v1641_v5 = vld [vmem:[%s1919_s1 + $0x10] sm:$0xff] (!%p192_p3)  }
   0x8   : > { %1485 = vmatpush3.bf16.msra.mxu0 (!%p192_p3), %v1637_v1  ;;  %1604 = vmatpush3.bf16.msra.mxu1 (!%p192_p3), %v1637_v1  ;;  %v1642_v6 = vld [vmem:[%s1919_s1 + $0x58] sm:$0xff] (!%p192_p3)   ;;  %v1644_v8 = vld [vmem:[%s1919_s1 + $0x60] sm:$0xff] (!%p192_p3)   ;;  %v1646_v10 = vld [vmem:[%s1919_s1 + $0x68] sm:$0xff] (!%p192_p3)  }
   0x9   : > { %1486 = vmatprep.subr.bf16.mxu0 (!%p192_p3), %v1638_v2  ;;  %1597 = vmatprep.subr.bf16.mxu1 (!%p192_p3), %v1638_v2  ;;  %v1643_v7 = vld [vmem:[%s1919_s1 + $0x18] sm:$0xff] (!%p192_p3)   ;;  %v1645_v9 = vld [vmem:[%s1919_s1 + $0x20] sm:$0xff] (!%p192_p3)   ;;  %v1647_v13 = vld [vmem:[%s1919_s1 + $0x28] sm:$0xff] (!%p192_p3)  }
   0xa   : > { %v1648_v14 = vld [vmem:[%s1919_s1 + $0x70] sm:$0xff] (!%p192_p3)   ;;  %v1650_v16 = vld [vmem:[%s1919_s1 + $0x78] sm:$0xff] (!%p192_p3)   ;;  %v1853_v51 = vld [vmem:[%s1920_s2] ss:$0 sm:$0xff] (!%p192_p3) }
   0xb   : > { %v1649_v15 = vld [vmem:[%s1919_s1 + $0x30] sm:$0xff] (!%p192_p3)   ;;  %v1651_v17 = vld [vmem:[%s1919_s1 + $0x38] sm:$0xff] (!%p192_p3)  }
   0xc   : > { %1487 = vmatpush3.bf16.msra.mxu0 (!%p192_p3), %v1639_v3  ;;  %1605 = vmatpush3.bf16.msra.mxu1 (!%p192_p3), %v1639_v3 }
   0xd   : > { %1488 = vmatprep.subr.bf16.mxu0 (!%p192_p3), %v1640_v4  ;;  %1598 = vmatprep.subr.bf16.mxu1 (!%p192_p3), %v1640_v4 }
   0xe   : > { %s1927_s18 = smov (!%p236_p4, %s1268_s18), 63 }
   0xf   : > { %s1356_s6 = sshll.u32 %s1927_s18, 3  ;;  %s1272_s5 = sshll.u32 %s1927_s18, 2 }
  0x10   : > { %1489 = vmatpush3.bf16.msra.mxu0 %v1641_v5  ;;  %1606 = vmatpush3.bf16.msra.mxu1 %v1641_v5  ;;  %s1795_s11 = scalar_lea.vmem %s1918_s0, %s1356_s6  ;;  %s1863_s8 = scalar_lea.vmem %s1921_s3, %s1272_s5 }
  0x11   : > { %1490 = vmatprep.subr.bf16.mxu0 %v1642_v6  ;;  %1599 = vmatprep.subr.bf16.mxu1 %v1642_v6  ;;  %v1654_v11 = vld [vmem:[%s1795_s11 + $0x4] ss:$8 sps:$4 sm:$0xff]   ;;  %v1652_v18 = vld [vmem:[%s1795_s11] ss:$8 sps:$4 sm:$0xff]   ;;  %v1658_v20 = vld [vmem:[%s1795_s11 + $0x14] ss:$8 sps:$4 sm:$0xff]  }
  0x12   : > { %v1657_v12 = vld [vmem:[%s1795_s11 + $0x84] ss:$8 sps:$4 sm:$0xff]   ;;  %688 = vmatprep.mubr.bf16.mxu0 %v1654_v11  ;;  %v1655_v19 = vld [vmem:[%s1795_s11 + $0x80] ss:$8 sps:$4 sm:$0xff]   ;;  %v1660_v21 = vld [vmem:[%s1795_s11 + $0x94] ss:$8 sps:$4 sm:$0xff]  }
  0x13   : > { %752 = vmatprep.mubr.bf16.mxu1 %v1657_v12  ;;  %v1662_v22 = vld [vmem:[%s1795_s11 + $0x10] ss:$8 sps:$4 sm:$0xff]   ;;  %v1664_v24 = vld [vmem:[%s1795_s11 + $0x24] ss:$8 sps:$4 sm:$0xff]   ;;  %v1668_v26 = vld [vmem:[%s1795_s11 + $0x20] ss:$8 sps:$4 sm:$0xff]  }
  0x14   : > { %1491 = vmatpush3.bf16.msra.mxu0 %v1643_v7  ;;  %1607 = vmatpush3.bf16.msra.mxu1 %v1643_v7  ;;  %v1663_v23 = vld [vmem:[%s1795_s11 + $0x90] ss:$8 sps:$4 sm:$0xff]   ;;  %v1666_v25 = vld [vmem:[%s1795_s11 + $0xa4] ss:$8 sps:$4 sm:$0xff]   ;;  %v1669_v27 = vld [vmem:[%s1795_s11 + $0xa0] ss:$8 sps:$4 sm:$0xff]  }
  0x15   : > { %1492 = vmatprep.subr.bf16.mxu0 %v1644_v8  ;;  %1600 = vmatprep.subr.bf16.mxu1 %v1644_v8  ;;  %v1670_v28 = vld [vmem:[%s1795_s11 + $0x34] ss:$8 sps:$4 sm:$0xff]   ;;  %v1674_v30 = vld [vmem:[%s1795_s11 + $0x30] ss:$8 sps:$4 sm:$0xff]   ;;  %v1676_v32 = vld [vmem:[%s1795_s11 + $0x44] ss:$8 sps:$4 sm:$0xff]  }
  0x16   : > { %v1672_v29 = vld [vmem:[%s1795_s11 + $0xb4] ss:$8 sps:$4 sm:$0xff]   ;;  %v1675_v31 = vld [vmem:[%s1795_s11 + $0xb0] ss:$8 sps:$4 sm:$0xff]   ;;  %v1678_v33 = vld [vmem:[%s1795_s11 + $0xc4] ss:$8 sps:$4 sm:$0xff]  }
  0x17   : > { %v1680_v34 = vld [vmem:[%s1795_s11 + $0x40] ss:$8 sps:$4 sm:$0xff]   ;;  %v1682_v36 = vld [vmem:[%s1795_s11 + $0x54] ss:$8 sps:$4 sm:$0xff]   ;;  %v1686_v38 = vld [vmem:[%s1795_s11 + $0x50] ss:$8 sps:$4 sm:$0xff]  }
  0x18   : > { %1493 = vmatpush3.bf16.msra.mxu0 %v1645_v9  ;;  %1608 = vmatpush3.bf16.msra.mxu1 %v1645_v9  ;;  %v1681_v35 = vld [vmem:[%s1795_s11 + $0xc0] ss:$8 sps:$4 sm:$0xff]   ;;  %v1684_v37 = vld [vmem:[%s1795_s11 + $0xd4] ss:$8 sps:$4 sm:$0xff]   ;;  %v1687_v39 = vld [vmem:[%s1795_s11 + $0xd0] ss:$8 sps:$4 sm:$0xff]  }
  0x19   : > { %1494 = vmatprep.subr.bf16.mxu0 %v1646_v10  ;;  %1601 = vmatprep.subr.bf16.mxu1 %v1646_v10  ;;  %v1688_v40 = vld [vmem:[%s1795_s11 + $0x64] ss:$8 sps:$4 sm:$0xff]   ;;  %v1692_v42 = vld [vmem:[%s1795_s11 + $0x60] ss:$8 sps:$4 sm:$0xff]   ;;  %v1694_v44 = vld [vmem:[%s1795_s11 + $0x74] ss:$8 sps:$4 sm:$0xff]  }
  0x1a   : > { %v1690_v41 = vld [vmem:[%s1795_s11 + $0xe4] ss:$8 sps:$4 sm:$0xff]   ;;  %v1693_v43 = vld [vmem:[%s1795_s11 + $0xe0] ss:$8 sps:$4 sm:$0xff]   ;;  %v1696_v45 = vld [vmem:[%s1795_s11 + $0xf4] ss:$8 sps:$4 sm:$0xff]  }
  0x1b   : > { %v1698_v46 = vld [vmem:[%s1795_s11 + $0x70] ss:$8 sps:$4 sm:$0xff]  }
  0x1c   : > { %1495 = vmatpush3.bf16.msra.mxu0 %v1647_v13  ;;  %1609 = vmatpush3.bf16.msra.mxu1 %v1647_v13  ;;  %v1699_v47 = vld [vmem:[%s1795_s11 + $0xf0] ss:$8 sps:$4 sm:$0xff]  }
  0x1d   : > { %1496 = vmatprep.subr.bf16.mxu0 %v1648_v14  ;;  %1602 = vmatprep.subr.bf16.mxu1 %v1648_v14 }
  0x20   : > { %1497 = vmatpush3.bf16.msra.mxu0 %v1649_v15  ;;  %1610 = vmatpush3.bf16.msra.mxu1 %v1649_v15 }
  0x21   : > { %1498 = vmatprep.subr.bf16.mxu0 %v1650_v16  ;;  %1603 = vmatprep.subr.bf16.mxu1 %v1650_v16 }
  0x24   : > { %1499 = vmatpush3.bf16.msra.mxu0 %v1651_v17  ;;  %1611 = vmatpush3.bf16.msra.mxu1 %v1651_v17 }
  0x27   : > { %689 = vmatmul.mubr.bf16.vlgmr.msra.gmra.mrb[0].mxu0 %v1652_v18  ;;  %753 = vmatmul.mubr.bf16.vlgmr.msra.gmra.mrb[0].mxu1 %v1655_v19 }
  0x28   : > { %696 = vmatprep.mubr.bf16.mxu0 %v1658_v20  ;;  %760 = vmatprep.mubr.bf16.mxu1 %v1660_v21 }
  0x2f   : > { %697 = vmatmul.mubr.bf16.gmra.mrb[4].mxu0 %v1662_v22  ;;  %761 = vmatmul.mubr.bf16.gmra.mrb[4].mxu1 %v1663_v23 }
  0x30   : > { %704 = vmatprep.mubr.bf16.mxu0 %v1664_v24  ;;  %768 = vmatprep.mubr.bf16.mxu1 %v1666_v25 }
  0x37   : > { %705 = vmatmul.mubr.bf16.gmra.mrb[8].mxu0 %v1668_v26  ;;  %769 = vmatmul.mubr.bf16.gmra.mrb[8].mxu1 %v1669_v27 }
  0x38   : > { %712 = vmatprep.mubr.bf16.mxu0 %v1670_v28  ;;  %776 = vmatprep.mubr.bf16.mxu1 %v1672_v29 }
  0x3f   : > { %713 = vmatmul.mubr.bf16.gmra.mrb[12].mxu0 %v1674_v30  ;;  %777 = vmatmul.mubr.bf16.gmra.mrb[12].mxu1 %v1675_v31 }
  0x40   : > { %720 = vmatprep.mubr.bf16.mxu0 %v1676_v32  ;;  %784 = vmatprep.mubr.bf16.mxu1 %v1678_v33 }
  0x47   : > { %721 = vmatmul.mubr.bf16.gmra.mrb[16].mxu0 %v1680_v34  ;;  %785 = vmatmul.mubr.bf16.gmra.mrb[16].mxu1 %v1681_v35 }
  0x48   : > { %728 = vmatprep.mubr.bf16.mxu0 %v1682_v36  ;;  %792 = vmatprep.mubr.bf16.mxu1 %v1684_v37 }
  0x4f   : > { %729 = vmatmul.mubr.bf16.gmra.mrb[20].mxu0 %v1686_v38  ;;  %793 = vmatmul.mubr.bf16.gmra.mrb[20].mxu1 %v1687_v39 }
  0x50   : > { %736 = vmatprep.mubr.bf16.mxu0 %v1688_v40  ;;  %800 = vmatprep.mubr.bf16.mxu1 %v1690_v41 }
  0x57   : > { %737 = vmatmul.mubr.bf16.gmra.mrb[24].mxu0 %v1692_v42  ;;  %801 = vmatmul.mubr.bf16.gmra.mrb[24].mxu1 %v1693_v43 }
  0x58   : > { %744 = vmatprep.mubr.bf16.mxu0 %v1694_v44  ;;  %808 = vmatprep.mubr.bf16.mxu1 %v1696_v45 }
  0x5f   : > { %745 = vmatmul.mubr.bf16.gmra.mrb[28].mxu0 %v1698_v46  ;;  %809 = vmatmul.mubr.bf16.gmra.mrb[28].mxu1 %v1699_v47 }
  0xfa   : > { %v1500_v48 = vpop.f32.mrb[0].mxu0  ;;  %v1548_v49 = vpop.f32.mrb[0].mxu1 }
  0xfb   : > { %v1501_v50 = vpop.f32.mrb[1].mxu0  ;;  %v1549_v52 = vpop.f32.mrb[1].mxu1 }
  0xfc   : > { %v1502_v53 = vadd.f32 %v1501_v50, %v1500_v48  ;;  %v1550_v54 = vadd.f32 %v1549_v52, %v1548_v49  ;;  %v1503_v55 = vpop.f32.mrb[2].mxu0  ;;  %v1551_v56 = vpop.f32.mrb[2].mxu1 }
  0xfd   : > { %v1504_v57 = vpop.f32.mrb[3].mxu0  ;;  %v1552_v58 = vpop.f32.mrb[3].mxu1 }
  0xfe   : > { %v923_v59 = vadd.f32 %v1502_v53, %v1853_v51  ;;  %v939_v60 = vadd.f32 %v1550_v54, %v1853_v51  ;;  %v1505_v61 = vadd.f32 %v1504_v57, %v1503_v55  ;;  %v1553_v62 = vadd.f32 %v1552_v58, %v1551_v56 }
 0x100   : > { %v924_v63 = vadd.f32 %v1505_v61, %v1853_v51  ;;  %v940_v0 = vadd.f32 %v1553_v62, %v1853_v51  ;;  %v955_v1 = vmax.f32 %v923_v59, 0.0  ;;  %v971_v2 = vmax.f32 %v939_v60, 0.0 }
 0x102   : > { %v956_v3 = vmax.f32 %v924_v63, 0.0  ;;  %v972_v4 = vmax.f32 %v940_v0, 0.0  ;;  %v1506_v5 = vpop.f32.mrb[4].mxu0  ;;  %v1554_v6 = vpop.f32.mrb[4].mxu1 }
 0x103   : > { %v1507_v7 = vpop.f32.mrb[5].mxu0  ;;  %v1555_v8 = vpop.f32.mrb[5].mxu1 }
 0x104   : > { %v1392_v9 = vpack.c.bf16 %v956_v3, %v955_v1  ;;  %v1432_v10 = vpack.c.bf16 %v972_v4, %v971_v2  ;;  %v1508_v11 = vadd.f32 %v1507_v7, %v1506_v5  ;;  %v1556_v12 = vadd.f32 %v1555_v8, %v1554_v6  ;;  %v1509_v13 = vpop.f32.mrb[6].mxu0  ;;  %v1557_v14 = vpop.f32.mrb[6].mxu1 }
 0x105   : > { %v1510_v15 = vpop.f32.mrb[7].mxu0  ;;  %v1558_v16 = vpop.f32.mrb[7].mxu1 }
 0x106   : > { %1393 = vst [vmem:[%s1863_s8] sm:$0xff] %v1392_v9   ;;  %1476 = vst [vmem:[%s1863_s8 + $0x40] sm:$0xff] %v1432_v10   ;;  %v925_v17 = vadd.f32 %v1508_v11, %v1853_v51  ;;  %v941_v18 = vadd.f32 %v1556_v12, %v1853_v51  ;;  %v1511_v19 = vadd.f32 %v1510_v15, %v1509_v13 }
 0x107   : > { %v1559_v20 = vadd.f32 %v1558_v16, %v1557_v14 }
 0x108   : > { %v926_v21 = vadd.f32 %v1511_v19, %v1853_v51  ;;  %v957_v23 = vmax.f32 %v925_v17, 0.0  ;;  %v973_v24 = vmax.f32 %v941_v18, 0.0 }
 0x109   : > { %v942_v22 = vadd.f32 %v1559_v20, %v1853_v51 }
 0x10a   : > { %v958_v25 = vmax.f32 %v926_v21, 0.0  ;;  %v1512_v27 = vpop.f32.mrb[8].mxu0  ;;  %v1560_v28 = vpop.f32.mrb[8].mxu1 }
 0x10b   : > { %v974_v26 = vmax.f32 %v942_v22, 0.0  ;;  %v1513_v29 = vpop.f32.mrb[9].mxu0  ;;  %v1561_v30 = vpop.f32.mrb[9].mxu1 }
 0x10c   : > { %v1397_v31 = vpack.c.bf16 %v958_v25, %v957_v23  ;;  %v1514_v33 = vadd.f32 %v1513_v29, %v1512_v27  ;;  %v1562_v34 = vadd.f32 %v1561_v30, %v1560_v28  ;;  %v1515_v35 = vpop.f32.mrb[10].mxu0  ;;  %v1563_v36 = vpop.f32.mrb[10].mxu1 }
 0x10d   : > { %v1437_v32 = vpack.c.bf16 %v974_v26, %v973_v24  ;;  %v1516_v37 = vpop.f32.mrb[11].mxu0  ;;  %v1564_v38 = vpop.f32.mrb[11].mxu1 }
 0x10e   : > { %1469 = vst [vmem:[%s1863_s8 + $0x8] sm:$0xff] %v1397_v31   ;;  %v927_v39 = vadd.f32 %v1514_v33, %v1853_v51  ;;  %v943_v40 = vadd.f32 %v1562_v34, %v1853_v51  ;;  %v1517_v41 = vadd.f32 %v1516_v37, %v1515_v35  ;;  %v1565_v42 = vadd.f32 %v1564_v38, %v1563_v36 }
 0x10f   : > { %1477 = vst [vmem:[%s1863_s8 + $0x48] sm:$0xff] %v1437_v32  }
 0x110   : > { %v928_v43 = vadd.f32 %v1517_v41, %v1853_v51  ;;  %v944_v44 = vadd.f32 %v1565_v42, %v1853_v51  ;;  %v959_v45 = vmax.f32 %v927_v39, 0.0  ;;  %v975_v46 = vmax.f32 %v943_v40, 0.0 }
 0x112   : > { %v960_v47 = vmax.f32 %v928_v43, 0.0  ;;  %v976_v48 = vmax.f32 %v944_v44, 0.0  ;;  %v1518_v49 = vpop.f32.mrb[12].mxu0  ;;  %v1566_v50 = vpop.f32.mrb[12].mxu1 }
 0x113   : > { %v1519_v52 = vpop.f32.mrb[13].mxu0  ;;  %v1567_v53 = vpop.f32.mrb[13].mxu1 }
 0x114   : > { %v1402_v54 = vpack.c.bf16 %v960_v47, %v959_v45  ;;  %v1442_v55 = vpack.c.bf16 %v976_v48, %v975_v46  ;;  %v1520_v56 = vadd.f32 %v1519_v52, %v1518_v49  ;;  %v1568_v57 = vadd.f32 %v1567_v53, %v1566_v50  ;;  %v1521_v58 = vpop.f32.mrb[14].mxu0  ;;  %v1569_v59 = vpop.f32.mrb[14].mxu1 }
 0x115   : > { %v1522_v60 = vpop.f32.mrb[15].mxu0  ;;  %v1570_v61 = vpop.f32.mrb[15].mxu1 }
 0x116   : > { %1470 = vst [vmem:[%s1863_s8 + $0x10] sm:$0xff] %v1402_v54   ;;  %1478 = vst [vmem:[%s1863_s8 + $0x50] sm:$0xff] %v1442_v55   ;;  %v929_v62 = vadd.f32 %v1520_v56, %v1853_v51  ;;  %v945_v63 = vadd.f32 %v1568_v57, %v1853_v51  ;;  %v1523_v0 = vadd.f32 %v1522_v60, %v1521_v58 }
 0x117   : > { %v1571_v1 = vadd.f32 %v1570_v61, %v1569_v59 }
 0x118   : > { %v930_v2 = vadd.f32 %v1523_v0, %v1853_v51  ;;  %v961_v4 = vmax.f32 %v929_v62, 0.0  ;;  %v977_v5 = vmax.f32 %v945_v63, 0.0 }
 0x119   : > { %v946_v3 = vadd.f32 %v1571_v1, %v1853_v51 }
 0x11a   : > { %v962_v6 = vmax.f32 %v930_v2, 0.0  ;;  %v1524_v8 = vpop.f32.mrb[16].mxu0  ;;  %v1572_v9 = vpop.f32.mrb[16].mxu1 }
 0x11b   : > { %v978_v7 = vmax.f32 %v946_v3, 0.0  ;;  %v1525_v10 = vpop.f32.mrb[17].mxu0  ;;  %v1573_v11 = vpop.f32.mrb[17].mxu1 }
 0x11c   : > { %v1407_v12 = vpack.c.bf16 %v962_v6, %v961_v4  ;;  %v1526_v14 = vadd.f32 %v1525_v10, %v1524_v8  ;;  %v1574_v15 = vadd.f32 %v1573_v11, %v1572_v9  ;;  %v1527_v16 = vpop.f32.mrb[18].mxu0  ;;  %v1575_v17 = vpop.f32.mrb[18].mxu1 }
 0x11d   : > { %v1447_v13 = vpack.c.bf16 %v978_v7, %v977_v5  ;;  %v1528_v18 = vpop.f32.mrb[19].mxu0  ;;  %v1576_v19 = vpop.f32.mrb[19].mxu1 }
 0x11e   : > { %1471 = vst [vmem:[%s1863_s8 + $0x18] sm:$0xff] %v1407_v12   ;;  %v931_v20 = vadd.f32 %v1526_v14, %v1853_v51  ;;  %v947_v21 = vadd.f32 %v1574_v15, %v1853_v51  ;;  %v1529_v22 = vadd.f32 %v1528_v18, %v1527_v16  ;;  %v1577_v23 = vadd.f32 %v1576_v19, %v1575_v17 }
 0x11f   : > { %1479 = vst [vmem:[%s1863_s8 + $0x58] sm:$0xff] %v1447_v13  }
 0x120   : > { %v932_v24 = vadd.f32 %v1529_v22, %v1853_v51  ;;  %v948_v25 = vadd.f32 %v1577_v23, %v1853_v51  ;;  %v963_v26 = vmax.f32 %v931_v20, 0.0  ;;  %v979_v27 = vmax.f32 %v947_v21, 0.0 }
 0x122   : > { %v964_v28 = vmax.f32 %v932_v24, 0.0  ;;  %v980_v29 = vmax.f32 %v948_v25, 0.0  ;;  %v1530_v30 = vpop.f32.mrb[20].mxu0  ;;  %v1578_v31 = vpop.f32.mrb[20].mxu1 }
 0x123   : > { %v1531_v32 = vpop.f32.mrb[21].mxu0  ;;  %v1579_v33 = vpop.f32.mrb[21].mxu1 }
 0x124   : > { %v1412_v34 = vpack.c.bf16 %v964_v28, %v963_v26  ;;  %v1452_v35 = vpack.c.bf16 %v980_v29, %v979_v27  ;;  %v1532_v36 = vadd.f32 %v1531_v32, %v1530_v30  ;;  %v1580_v37 = vadd.f32 %v1579_v33, %v1578_v31  ;;  %v1533_v38 = vpop.f32.mrb[22].mxu0  ;;  %v1581_v39 = vpop.f32.mrb[22].mxu1 }
 0x125   : > { %v1534_v40 = vpop.f32.mrb[23].mxu0  ;;  %v1582_v41 = vpop.f32.mrb[23].mxu1 }
 0x126   : > { %1472 = vst [vmem:[%s1863_s8 + $0x20] sm:$0xff] %v1412_v34   ;;  %1480 = vst [vmem:[%s1863_s8 + $0x60] sm:$0xff] %v1452_v35   ;;  %v933_v42 = vadd.f32 %v1532_v36, %v1853_v51  ;;  %v949_v43 = vadd.f32 %v1580_v37, %v1853_v51  ;;  %v1535_v44 = vadd.f32 %v1534_v40, %v1533_v38 }
 0x127   : > { %v1583_v45 = vadd.f32 %v1582_v41, %v1581_v39 }
 0x128   : > { %v934_v46 = vadd.f32 %v1535_v44, %v1853_v51  ;;  %v965_v48 = vmax.f32 %v933_v42, 0.0  ;;  %v981_v49 = vmax.f32 %v949_v43, 0.0 }
 0x129   : > { %v950_v47 = vadd.f32 %v1583_v45, %v1853_v51 }
 0x12a   : > { %v966_v50 = vmax.f32 %v934_v46, 0.0  ;;  %v1536_v53 = vpop.f32.mrb[24].mxu0  ;;  %v1584_v54 = vpop.f32.mrb[24].mxu1 }
 0x12b   : > { %v982_v52 = vmax.f32 %v950_v47, 0.0  ;;  %v1537_v55 = vpop.f32.mrb[25].mxu0  ;;  %v1585_v56 = vpop.f32.mrb[25].mxu1 }
 0x12c   : > { %v1417_v57 = vpack.c.bf16 %v966_v50, %v965_v48  ;;  %v1538_v59 = vadd.f32 %v1537_v55, %v1536_v53  ;;  %v1586_v60 = vadd.f32 %v1585_v56, %v1584_v54  ;;  %v1539_v61 = vpop.f32.mrb[26].mxu0  ;;  %v1587_v62 = vpop.f32.mrb[26].mxu1 }
 0x12d   : > { %v1457_v58 = vpack.c.bf16 %v982_v52, %v981_v49  ;;  %v1540_v63 = vpop.f32.mrb[27].mxu0  ;;  %v1588_v0 = vpop.f32.mrb[27].mxu1 }
 0x12e   : > { %1473 = vst [vmem:[%s1863_s8 + $0x28] sm:$0xff] %v1417_v57   ;;  %v935_v1 = vadd.f32 %v1538_v59, %v1853_v51  ;;  %v951_v2 = vadd.f32 %v1586_v60, %v1853_v51  ;;  %v1541_v3 = vadd.f32 %v1540_v63, %v1539_v61  ;;  %v1589_v4 = vadd.f32 %v1588_v0, %v1587_v62 }
 0x12f   : > { %1481 = vst [vmem:[%s1863_s8 + $0x68] sm:$0xff] %v1457_v58  }
 0x130   : > { %v936_v5 = vadd.f32 %v1541_v3, %v1853_v51  ;;  %v952_v6 = vadd.f32 %v1589_v4, %v1853_v51  ;;  %v967_v7 = vmax.f32 %v935_v1, 0.0  ;;  %v983_v8 = vmax.f32 %v951_v2, 0.0 }
 0x132   : > { %v968_v9 = vmax.f32 %v936_v5, 0.0  ;;  %v984_v10 = vmax.f32 %v952_v6, 0.0  ;;  %v1542_v11 = vpop.f32.mrb[28].mxu0  ;;  %v1590_v12 = vpop.f32.mrb[28].mxu1 }
 0x133   : > { %v1543_v13 = vpop.f32.mrb[29].mxu0  ;;  %v1591_v14 = vpop.f32.mrb[29].mxu1 }
 0x134   : > { %v1422_v15 = vpack.c.bf16 %v968_v9, %v967_v7  ;;  %v1462_v16 = vpack.c.bf16 %v984_v10, %v983_v8  ;;  %v1544_v17 = vadd.f32 %v1543_v13, %v1542_v11  ;;  %v1592_v18 = vadd.f32 %v1591_v14, %v1590_v12  ;;  %v1545_v19 = vpop.f32.mrb[30].mxu0  ;;  %v1593_v20 = vpop.f32.mrb[30].mxu1 }
 0x135   : > { %v1546_v21 = vpop.f32.mrb[31].mxu0  ;;  %v1594_v22 = vpop.f32.mrb[31].mxu1 }
 0x136   : > { %1474 = vst [vmem:[%s1863_s8 + $0x30] sm:$0xff] %v1422_v15   ;;  %1482 = vst [vmem:[%s1863_s8 + $0x70] sm:$0xff] %v1462_v16   ;;  %v937_v23 = vadd.f32 %v1544_v17, %v1853_v51  ;;  %v953_v24 = vadd.f32 %v1592_v18, %v1853_v51  ;;  %v1547_v25 = vadd.f32 %v1546_v21, %v1545_v19 }
 0x137   : > { %v1595_v26 = vadd.f32 %v1594_v22, %v1593_v20 }
 0x138   : > { %v938_v27 = vadd.f32 %v1547_v25, %v1853_v51  ;;  %v969_v29 = vmax.f32 %v937_v23, 0.0  ;;  %v985_v30 = vmax.f32 %v953_v24, 0.0 }
 0x139   : > { %v954_v28 = vadd.f32 %v1595_v26, %v1853_v51 }
 0x13a   : > { %v970_v31 = vmax.f32 %v938_v27, 0.0 }
 0x13b   : > { %v986_v32 = vmax.f32 %v954_v28, 0.0 }
 0x13c   : > { %v1427_v33 = vpack.c.bf16 %v970_v31, %v969_v29 }
 0x13d   : > { %v1467_v34 = vpack.c.bf16 %v986_v32, %v985_v30 }
 0x13e   : > { %1475 = vst [vmem:[%s1863_s8 + $0x38] sm:$0xff] %v1427_v33  }
 0x13f   : > { %1483 = vst [vmem:[%s1863_s8 + $0x78] sm:$0xff] %v1467_v34  }
 0x140 PF: > { %s13_s14 = sadd.s32 1, %s1722_s14   ;;  %s1922_s12 = smov %s1718_s13 }
 0x141   : > { %p10_p5 = scmp.ge.s32.totalorder %s13_s14, 4   ;;  %s1923_s13 = smov %s1925_s15 }
 0x143   :  { %12 = sbr.rel (!%p10_p5) target bundleno = 2 (0x2), region = 76 }

// kernel: _lambda_.55
= control target key start
LH: loop header
LB: loop body
LE: loop exit
PB: predicated region body
PF: predicated region fallthrough
CT: control target
= control target key end

     0   :  { %s957_s0 = inlined_call_operand.vmem [shape: bf16[9,128,128], index: 0, kind: input, shape index: {}]   ;;  %s958_s1 = inlined_call_operand.vmem [shape: bf16[128,128], index: 1, kind: output, shape index: {}]  }
   0x1   :  { %v8_v0 = vld [vmem:[%s957_s0] sm:$0xf]  ;;  %v9_v1 = vld [vmem:[%s957_s0 + $0x4] sm:$0xf]  ;;  %v10_v18 = vld [vmem:[%s957_s0 + $0x8] sm:$0xf] }
   0x2   :  { %v308_v2 = vld [vmem:[%s957_s0 + $0x40] sm:$0xf]  ;;  %v309_v3 = vld [vmem:[%s957_s0 + $0x44] sm:$0xf]  ;;  %v11_v19 = vld [vmem:[%s957_s0 + $0xc] sm:$0xf] }
   0x3   :  { %v41_v4 = vmax.bf16 %v308_v2, %v8_v0  ;;  %v324_v5 = vld [vmem:[%s957_s0 + $0x80] sm:$0xf]  ;;  %v325_v6 = vld [vmem:[%s957_s0 + $0x84] sm:$0xf]  ;;  %v42_v7 = vmax.bf16 %v309_v3, %v9_v1  ;;  %v310_v20 = vld [vmem:[%s957_s0 + $0x48] sm:$0xf] }
   0x4   :  { %v340_v8 = vld [vmem:[%s957_s0 + $0xc0] sm:$0xf]  ;;  %v341_v10 = vld [vmem:[%s957_s0 + $0xc4] sm:$0xf]  ;;  %v311_v22 = vld [vmem:[%s957_s0 + $0x4c] sm:$0xf]  ;;  %v43_v23 = vmax.bf16 %v310_v20, %v10_v18 }
   0x5   :  { %v74_v9 = vmax.bf16 %v324_v5, %v41_v4  ;;  %v75_v11 = vmax.bf16 %v325_v6, %v42_v7  ;;  %v356_v12 = vld [vmem:[%s957_s0 + $0x100] sm:$0xf]  ;;  %v357_v14 = vld [vmem:[%s957_s0 + $0x104] sm:$0xf]  ;;  %v326_v24 = vld [vmem:[%s957_s0 + $0x88] sm:$0xf]  ;;  %v44_v28 = vmax.bf16 %v311_v22, %v11_v19 }
   0x6   :  { %v372_v15 = vld [vmem:[%s957_s0 + $0x140] sm:$0xf]  ;;  %v373_v16 = vld [vmem:[%s957_s0 + $0x144] sm:$0xf]  ;;  %v327_v25 = vld [vmem:[%s957_s0 + $0x8c] sm:$0xf]  ;;  %v76_v33 = vmax.bf16 %v326_v24, %v43_v23 }
   0x7   :  { %v107_v13 = vmax.bf16 %v340_v8, %v74_v9  ;;  %v108_v17 = vmax.bf16 %v341_v10, %v75_v11  ;;  %v388_v27 = vld [vmem:[%s957_s0 + $0x180] sm:$0xf]  ;;  %v342_v29 = vld [vmem:[%s957_s0 + $0xc8] sm:$0xf]  ;;  %v389_v31 = vld [vmem:[%s957_s0 + $0x184] sm:$0xf]  ;;  %v77_v38 = vmax.bf16 %v327_v25, %v44_v28 }
   0x8   :  { %v404_v32 = vld [vmem:[%s957_s0 + $0x1c0] sm:$0xf]  ;;  %v343_v34 = vld [vmem:[%s957_s0 + $0xcc] sm:$0xf]  ;;  %v405_v36 = vld [vmem:[%s957_s0 + $0x1c4] sm:$0xf]  ;;  %v109_v42 = vmax.bf16 %v342_v29, %v76_v33 }
   0x9   :  { %v140_v21 = vmax.bf16 %v356_v12, %v107_v13  ;;  %v141_v26 = vmax.bf16 %v357_v14, %v108_v17  ;;  %v420_v37 = vld [vmem:[%s957_s0 + $0x200] sm:$0xf]  ;;  %v358_v39 = vld [vmem:[%s957_s0 + $0x108] sm:$0xf]  ;;  %v421_v41 = vld [vmem:[%s957_s0 + $0x204] sm:$0xf]  ;;  %v110_v47 = vmax.bf16 %v343_v34, %v77_v38 }
   0xa   :  { %v359_v43 = vld [vmem:[%s957_s0 + $0x10c] sm:$0xf]  ;;  %v374_v44 = vld [vmem:[%s957_s0 + $0x148] sm:$0xf]  ;;  %v12_v48 = vld [vmem:[%s957_s0 + $0x10] sm:$0xf]  ;;  %v142_v52 = vmax.bf16 %v358_v39, %v109_v42 }
   0xb   :  { %v173_v30 = vmax.bf16 %v372_v15, %v140_v21  ;;  %v174_v35 = vmax.bf16 %v373_v16, %v141_v26  ;;  %v375_v45 = vld [vmem:[%s957_s0 + $0x14c] sm:$0xf]  ;;  %v13_v49 = vld [vmem:[%s957_s0 + $0x14] sm:$0xf]  ;;  %v312_v50 = vld [vmem:[%s957_s0 + $0x50] sm:$0xf]  ;;  %v143_v58 = vmax.bf16 %v359_v43, %v110_v47 }
   0xc   :  { %v313_v53 = vld [vmem:[%s957_s0 + $0x54] sm:$0xf]  ;;  %v45_v54 = vmax.bf16 %v312_v50, %v12_v48  ;;  %v328_v55 = vld [vmem:[%s957_s0 + $0x90] sm:$0xf]  ;;  %v390_v59 = vld [vmem:[%s957_s0 + $0x188] sm:$0xf]  ;;  %v175_v63 = vmax.bf16 %v374_v44, %v142_v52 }
   0xd   :  { %v206_v40 = vmax.bf16 %v388_v27, %v173_v30  ;;  %v207_v46 = vmax.bf16 %v389_v31, %v174_v35  ;;  %v329_v56 = vld [vmem:[%s957_s0 + $0x94] sm:$0xf]  ;;  %v46_v60 = vmax.bf16 %v313_v53, %v13_v49  ;;  %v344_v61 = vld [vmem:[%s957_s0 + $0xd0] sm:$0xf]  ;;  %v391_v0 = vld [vmem:[%s957_s0 + $0x18c] sm:$0xf]  ;;  %v176_v5 = vmax.bf16 %v375_v45, %v143_v58 }
   0xe   :  { %v406_v1 = vld [vmem:[%s957_s0 + $0x1c8] sm:$0xf]  ;;  %v78_v2 = vmax.bf16 %v328_v55, %v45_v54  ;;  %v345_v3 = vld [vmem:[%s957_s0 + $0xd4] sm:$0xf]  ;;  %v407_v6 = vld [vmem:[%s957_s0 + $0x1cc] sm:$0xf]  ;;  %v208_v10 = vmax.bf16 %v390_v59, %v175_v63 }
   0xf   :  { %v239_v51 = vmax.bf16 %v404_v32, %v206_v40  ;;  %v240_v57 = vmax.bf16 %v405_v36, %v207_v46  ;;  %v422_v7 = vld [vmem:[%s957_s0 + $0x208] sm:$0xf]  ;;  %v79_v8 = vmax.bf16 %v329_v56, %v46_v60  ;;  %v360_v9 = vld [vmem:[%s957_s0 + $0x110] sm:$0xf]  ;;  %v423_v11 = vld [vmem:[%s957_s0 + $0x20c] sm:$0xf]  ;;  %v209_v17 = vmax.bf16 %v391_v0, %v176_v5 }
  0x10   :  { %v111_v12 = vmax.bf16 %v344_v61, %v78_v2  ;;  %v361_v13 = vld [vmem:[%s957_s0 + $0x114] sm:$0xf]  ;;  %v376_v14 = vld [vmem:[%s957_s0 + $0x150] sm:$0xf]  ;;  %v14_v19 = vld [vmem:[%s957_s0 + $0x18] sm:$0xf]  ;;  %v241_v22 = vmax.bf16 %v406_v1, %v208_v10 }
  0x11   :  { %v272_v62 = vmax.bf16 %v420_v37, %v239_v51  ;;  %v273_v4 = vmax.bf16 %v421_v41, %v240_v57  ;;  %v377_v15 = vld [vmem:[%s957_s0 + $0x154] sm:$0xf]  ;;  %v112_v18 = vmax.bf16 %v345_v3, %v79_v8  ;;  %v15_v20 = vld [vmem:[%s957_s0 + $0x1c] sm:$0xf]  ;;  %v314_v21 = vld [vmem:[%s957_s0 + $0x58] sm:$0xf]  ;;  %v242_v28 = vmax.bf16 %v407_v6, %v209_v17 }
  0x12   :  { %v144_v23 = vmax.bf16 %v360_v9, %v111_v12  ;;  %v315_v24 = vld [vmem:[%s957_s0 + $0x5c] sm:$0xf]  ;;  %v47_v25 = vmax.bf16 %v314_v21, %v14_v19  ;;  %v330_v26 = vld [vmem:[%s957_s0 + $0x98] sm:$0xf]  ;;  %v392_v30 = vld [vmem:[%s957_s0 + $0x190] sm:$0xf]  ;;  %v274_v33 = vmax.bf16 %v422_v7, %v241_v22 }
  0x13   :  { %v476_v16 = vcombine.low %v272_v62, %v273_v4  ;;  %v331_v27 = vld [vmem:[%s957_s0 + $0x9c] sm:$0xf]  ;;  %v145_v29 = vmax.bf16 %v361_v13, %v112_v18  ;;  %v48_v31 = vmax.bf16 %v315_v24, %v15_v20  ;;  %v346_v32 = vld [vmem:[%s957_s0 + $0xd8] sm:$0xf]  ;;  %v393_v35 = vld [vmem:[%s957_s0 + $0x194] sm:$0xf]  ;;  %v275_v39 = vmax.bf16 %v423_v11, %v242_v28 }
  0x14   :  { %v177_v34 = vmax.bf16 %v376_v14, %v144_v23  ;;  %v408_v36 = vld [vmem:[%s957_s0 + $0x1d0] sm:$0xf]  ;;  %v80_v37 = vmax.bf16 %v330_v26, %v47_v25  ;;  %v347_v38 = vld [vmem:[%s957_s0 + $0xdc] sm:$0xf]  ;;  %v409_v41 = vld [vmem:[%s957_s0 + $0x1d4] sm:$0xf] }
  0x15   :  { %440 = vst [vmem:[%s958_s1] sm:$0xff] %v476_v16   ;;  %v178_v40 = vmax.bf16 %v377_v15, %v145_v29  ;;  %v424_v42 = vld [vmem:[%s957_s0 + $0x210] sm:$0xf]  ;;  %v81_v43 = vmax.bf16 %v331_v27, %v48_v31  ;;  %v362_v44 = vld [vmem:[%s957_s0 + $0x118] sm:$0xf]  ;;  %v425_v46 = vld [vmem:[%s957_s0 + $0x214] sm:$0xf]  ;;  %v477_v51 = vcombine.low %v274_v33, %v275_v39 }
  0x16   :  { %v210_v45 = vmax.bf16 %v392_v30, %v177_v34  ;;  %v113_v47 = vmax.bf16 %v346_v32, %v80_v37  ;;  %v363_v48 = vld [vmem:[%s957_s0 + $0x11c] sm:$0xf]  ;;  %v378_v49 = vld [vmem:[%s957_s0 + $0x158] sm:$0xf]  ;;  %v16_v54 = vld [vmem:[%s957_s0 + $0x20] sm:$0xf] }
  0x17   :  { %v379_v50 = vld [vmem:[%s957_s0 + $0x15c] sm:$0xf]  ;;  %v211_v52 = vmax.bf16 %v393_v35, %v178_v40  ;;  %v114_v53 = vmax.bf16 %v347_v38, %v81_v43  ;;  %v17_v55 = vld [vmem:[%s957_s0 + $0x24] sm:$0xf]  ;;  %v316_v56 = vld [vmem:[%s957_s0 + $0x60] sm:$0xf] }
  0x18   :  { %v243_v57 = vmax.bf16 %v408_v36, %v210_v45  ;;  %v146_v58 = vmax.bf16 %v362_v44, %v113_v47  ;;  %v317_v59 = vld [vmem:[%s957_s0 + $0x64] sm:$0xf]  ;;  %v49_v60 = vmax.bf16 %v316_v56, %v16_v54  ;;  %v332_v61 = vld [vmem:[%s957_s0 + $0xa0] sm:$0xf]  ;;  %478 = vst [vmem:[%s958_s1 + $0x8] sm:$0xff] %v477_v51  }
  0x19   :  { %v333_v62 = vld [vmem:[%s957_s0 + $0xa4] sm:$0xf]  ;;  %v244_v63 = vmax.bf16 %v409_v41, %v211_v52  ;;  %v147_v0 = vmax.bf16 %v363_v48, %v114_v53  ;;  %v394_v1 = vld [vmem:[%s957_s0 + $0x198] sm:$0xf]  ;;  %v50_v2 = vmax.bf16 %v317_v59, %v17_v55  ;;  %v348_v3 = vld [vmem:[%s957_s0 + $0xe0] sm:$0xf] }
  0x1a   :  { %v276_v4 = vmax.bf16 %v424_v42, %v243_v57  ;;  %v179_v5 = vmax.bf16 %v378_v49, %v146_v58  ;;  %v395_v6 = vld [vmem:[%s957_s0 + $0x19c] sm:$0xf]  ;;  %v410_v7 = vld [vmem:[%s957_s0 + $0x1d8] sm:$0xf]  ;;  %v82_v8 = vmax.bf16 %v332_v61, %v49_v60  ;;  %v349_v9 = vld [vmem:[%s957_s0 + $0xe4] sm:$0xf] }
  0x1b   :  { %v277_v10 = vmax.bf16 %v425_v46, %v244_v63  ;;  %v180_v11 = vmax.bf16 %v379_v50, %v147_v0  ;;  %v411_v12 = vld [vmem:[%s957_s0 + $0x1dc] sm:$0xf]  ;;  %v426_v13 = vld [vmem:[%s957_s0 + $0x218] sm:$0xf]  ;;  %v83_v14 = vmax.bf16 %v333_v62, %v50_v2  ;;  %v364_v15 = vld [vmem:[%s957_s0 + $0x120] sm:$0xf] }
  0x1c   :  { %v212_v16 = vmax.bf16 %v394_v1, %v179_v5  ;;  %v427_v17 = vld [vmem:[%s957_s0 + $0x21c] sm:$0xf]  ;;  %v115_v18 = vmax.bf16 %v348_v3, %v82_v8  ;;  %v365_v19 = vld [vmem:[%s957_s0 + $0x124] sm:$0xf]  ;;  %v380_v20 = vld [vmem:[%s957_s0 + $0x160] sm:$0xf] }
  0x1d   :  { %v381_v21 = vld [vmem:[%s957_s0 + $0x164] sm:$0xf]  ;;  %v479_v22 = vcombine.low %v276_v4, %v277_v10  ;;  %v213_v23 = vmax.bf16 %v395_v6, %v180_v11  ;;  %v116_v24 = vmax.bf16 %v349_v9, %v83_v14  ;;  %v18_v25 = vld [vmem:[%s957_s0 + $0x28] sm:$0xf]  ;;  %v19_v26 = vld [vmem:[%s957_s0 + $0x2c] sm:$0xf] }
  0x1e   :  { %v318_v27 = vld [vmem:[%s957_s0 + $0x68] sm:$0xf]  ;;  %v245_v28 = vmax.bf16 %v410_v7, %v212_v16  ;;  %v148_v29 = vmax.bf16 %v364_v15, %v115_v18  ;;  %v319_v30 = vld [vmem:[%s957_s0 + $0x6c] sm:$0xf]  ;;  %v396_v36 = vld [vmem:[%s957_s0 + $0x1a0] sm:$0xf] }
  0x1f   :  { %v51_v31 = vmax.bf16 %v318_v27, %v18_v25  ;;  %v334_v32 = vld [vmem:[%s957_s0 + $0xa8] sm:$0xf]  ;;  %v335_v33 = vld [vmem:[%s957_s0 + $0xac] sm:$0xf]  ;;  %480 = vst [vmem:[%s958_s1 + $0x10] sm:$0xff] %v479_v22   ;;  %v246_v34 = vmax.bf16 %v411_v12, %v213_v23  ;;  %v149_v35 = vmax.bf16 %v365_v19, %v116_v24  ;;  %v52_v37 = vmax.bf16 %v319_v30, %v19_v26 }
  0x20   :  { %v350_v38 = vld [vmem:[%s957_s0 + $0xe8] sm:$0xf]  ;;  %v278_v39 = vmax.bf16 %v426_v13, %v245_v28  ;;  %v181_v40 = vmax.bf16 %v380_v20, %v148_v29  ;;  %v397_v41 = vld [vmem:[%s957_s0 + $0x1a4] sm:$0xf]  ;;  %v412_v42 = vld [vmem:[%s957_s0 + $0x1e0] sm:$0xf] }
  0x21   :  { %v84_v43 = vmax.bf16 %v334_v32, %v51_v31  ;;  %v351_v44 = vld [vmem:[%s957_s0 + $0xec] sm:$0xf]  ;;  %v279_v45 = vmax.bf16 %v427_v17, %v246_v34  ;;  %v182_v46 = vmax.bf16 %v381_v21, %v149_v35  ;;  %v413_v47 = vld [vmem:[%s957_s0 + $0x1e4] sm:$0xf]  ;;  %v428_v48 = vld [vmem:[%s957_s0 + $0x220] sm:$0xf]  ;;  %v85_v49 = vmax.bf16 %v335_v33, %v52_v37 }
  0x22   :  { %v366_v50 = vld [vmem:[%s957_s0 + $0x128] sm:$0xf]  ;;  %v214_v51 = vmax.bf16 %v396_v36, %v181_v40  ;;  %v429_v52 = vld [vmem:[%s957_s0 + $0x224] sm:$0xf]  ;;  %v367_v54 = vld [vmem:[%s957_s0 + $0x12c] sm:$0xf] }
  0x23   :  { %v117_v53 = vmax.bf16 %v350_v38, %v84_v43  ;;  %v382_v55 = vld [vmem:[%s957_s0 + $0x168] sm:$0xf]  ;;  %v383_v56 = vld [vmem:[%s957_s0 + $0x16c] sm:$0xf]  ;;  %v481_v57 = vcombine.low %v278_v39, %v279_v45  ;;  %v215_v58 = vmax.bf16 %v397_v41, %v182_v46  ;;  %v118_v59 = vmax.bf16 %v351_v44, %v85_v49  ;;  %v20_v60 = vld [vmem:[%s957_s0 + $0x30] sm:$0xf] }
  0x24   :  { %v21_v61 = vld [vmem:[%s957_s0 + $0x34] sm:$0xf]  ;;  %v320_v62 = vld [vmem:[%s957_s0 + $0x70] sm:$0xf]  ;;  %v247_v63 = vmax.bf16 %v412_v42, %v214_v51  ;;  %v398_v7 = vld [vmem:[%s957_s0 + $0x1a8] sm:$0xf] }
  0x25   :  { %v150_v0 = vmax.bf16 %v366_v50, %v117_v53  ;;  %v321_v1 = vld [vmem:[%s957_s0 + $0x74] sm:$0xf]  ;;  %v53_v2 = vmax.bf16 %v320_v62, %v20_v60  ;;  %v336_v3 = vld [vmem:[%s957_s0 + $0xb0] sm:$0xf]  ;;  %482 = vst [vmem:[%s958_s1 + $0x18] sm:$0xff] %v481_v57   ;;  %v248_v5 = vmax.bf16 %v413_v47, %v215_v58  ;;  %v151_v6 = vmax.bf16 %v367_v54, %v118_v59 }
  0x26   :  { %v337_v4 = vld [vmem:[%s957_s0 + $0xb4] sm:$0xf]  ;;  %v54_v8 = vmax.bf16 %v321_v1, %v21_v61  ;;  %v352_v9 = vld [vmem:[%s957_s0 + $0xf0] sm:$0xf]  ;;  %v280_v10 = vmax.bf16 %v428_v48, %v247_v63  ;;  %v399_v12 = vld [vmem:[%s957_s0 + $0x1ac] sm:$0xf] }
  0x27   :  { %v183_v11 = vmax.bf16 %v382_v55, %v150_v0  ;;  %v414_v13 = vld [vmem:[%s957_s0 + $0x1e8] sm:$0xf]  ;;  %v86_v14 = vmax.bf16 %v336_v3, %v53_v2  ;;  %v353_v15 = vld [vmem:[%s957_s0 + $0xf4] sm:$0xf]  ;;  %v281_v16 = vmax.bf16 %v429_v52, %v248_v5  ;;  %v184_v17 = vmax.bf16 %v383_v56, %v151_v6  ;;  %v415_v18 = vld [vmem:[%s957_s0 + $0x1ec] sm:$0xf] }
  0x28   :  { %v430_v19 = vld [vmem:[%s957_s0 + $0x228] sm:$0xf]  ;;  %v87_v20 = vmax.bf16 %v337_v4, %v54_v8  ;;  %v368_v21 = vld [vmem:[%s957_s0 + $0x130] sm:$0xf]  ;;  %v431_v23 = vld [vmem:[%s957_s0 + $0x22c] sm:$0xf] }
  0x29   :  { %v216_v22 = vmax.bf16 %v398_v7, %v183_v11  ;;  %v119_v24 = vmax.bf16 %v352_v9, %v86_v14  ;;  %v369_v25 = vld [vmem:[%s957_s0 + $0x134] sm:$0xf]  ;;  %v384_v26 = vld [vmem:[%s957_s0 + $0x170] sm:$0xf]  ;;  %v483_v28 = vcombine.low %v280_v10, %v281_v16  ;;  %v217_v29 = vmax.bf16 %v399_v12, %v184_v17  ;;  %v22_v31 = vld [vmem:[%s957_s0 + $0x38] sm:$0xf] }
  0x2a   :  { %v385_v27 = vld [vmem:[%s957_s0 + $0x174] sm:$0xf]  ;;  %v120_v30 = vmax.bf16 %v353_v15, %v87_v20  ;;  %v23_v32 = vld [vmem:[%s957_s0 + $0x3c] sm:$0xf]  ;;  %v322_v33 = vld [vmem:[%s957_s0 + $0x78] sm:$0xf] }
  0x2b   :  { %v249_v34 = vmax.bf16 %v414_v13, %v216_v22  ;;  %v152_v35 = vmax.bf16 %v368_v21, %v119_v24  ;;  %v323_v36 = vld [vmem:[%s957_s0 + $0x7c] sm:$0xf]  ;;  %v55_v37 = vmax.bf16 %v322_v33, %v22_v31  ;;  %v338_v38 = vld [vmem:[%s957_s0 + $0xb8] sm:$0xf]  ;;  %484 = vst [vmem:[%s958_s1 + $0x20] sm:$0xff] %v483_v28   ;;  %v250_v40 = vmax.bf16 %v415_v18, %v217_v29 }
  0x2c   :  { %v339_v39 = vld [vmem:[%s957_s0 + $0xbc] sm:$0xf]  ;;  %v153_v41 = vmax.bf16 %v369_v25, %v120_v30  ;;  %v400_v42 = vld [vmem:[%s957_s0 + $0x1b0] sm:$0xf]  ;;  %v56_v43 = vmax.bf16 %v323_v36, %v23_v32  ;;  %v354_v44 = vld [vmem:[%s957_s0 + $0xf8] sm:$0xf] }
  0x2d   :  { %v282_v45 = vmax.bf16 %v430_v19, %v249_v34  ;;  %v185_v46 = vmax.bf16 %v384_v26, %v152_v35  ;;  %v401_v47 = vld [vmem:[%s957_s0 + $0x1b4] sm:$0xf]  ;;  %v88_v48 = vmax.bf16 %v338_v38, %v55_v37  ;;  %v355_v49 = vld [vmem:[%s957_s0 + $0xfc] sm:$0xf]  ;;  %v283_v50 = vmax.bf16 %v431_v23, %v250_v40  ;;  %v416_v52 = vld [vmem:[%s957_s0 + $0x1f0] sm:$0xf] }
  0x2e   :  { %v186_v51 = vmax.bf16 %v385_v27, %v153_v41  ;;  %v89_v53 = vmax.bf16 %v339_v39, %v56_v43  ;;  %v370_v54 = vld [vmem:[%s957_s0 + $0x138] sm:$0xf]  ;;  %v417_v56 = vld [vmem:[%s957_s0 + $0x1f4] sm:$0xf]  ;;  %v371_v58 = vld [vmem:[%s957_s0 + $0x13c] sm:$0xf] }
  0x2f   :  { %v218_v55 = vmax.bf16 %v400_v42, %v185_v46  ;;  %v121_v57 = vmax.bf16 %v354_v44, %v88_v48  ;;  %v485_v59 = vcombine.low %v282_v45, %v283_v50  ;;  %v432_v61 = vld [vmem:[%s957_s0 + $0x230] sm:$0xf]  ;;  %v386_v63 = vld [vmem:[%s957_s0 + $0x178] sm:$0xf]  ;;  %v433_v1 = vld [vmem:[%s957_s0 + $0x234] sm:$0xf] }
  0x30   :  { %v219_v60 = vmax.bf16 %v401_v47, %v186_v51  ;;  %v122_v62 = vmax.bf16 %v355_v49, %v89_v53  ;;  %v387_v3 = vld [vmem:[%s957_s0 + $0x17c] sm:$0xf]  ;;  %v402_v6 = vld [vmem:[%s957_s0 + $0x1b8] sm:$0xf] }
  0x31   :  { %v251_v0 = vmax.bf16 %v416_v52, %v218_v55  ;;  %v154_v2 = vmax.bf16 %v370_v54, %v121_v57  ;;  %486 = vst [vmem:[%s958_s1 + $0x28] sm:$0xff] %v485_v59   ;;  %v403_v9 = vld [vmem:[%s957_s0 + $0x1bc] sm:$0xf]  ;;  %v418_v12 = vld [vmem:[%s957_s0 + $0x1f8] sm:$0xf] }
  0x32   :  { %v252_v4 = vmax.bf16 %v417_v56, %v219_v60  ;;  %v155_v5 = vmax.bf16 %v371_v58, %v122_v62  ;;  %v419_v14 = vld [vmem:[%s957_s0 + $0x1fc] sm:$0xf]  ;;  %v434_v17 = vld [vmem:[%s957_s0 + $0x238] sm:$0xf] }
  0x33   :  { %v284_v7 = vmax.bf16 %v432_v61, %v251_v0  ;;  %v187_v8 = vmax.bf16 %v386_v63, %v154_v2  ;;  %v435_v19 = vld [vmem:[%s957_s0 + $0x23c] sm:$0xf] }
  0x34   :  { %v285_v10 = vmax.bf16 %v433_v1, %v252_v4  ;;  %v188_v11 = vmax.bf16 %v387_v3, %v155_v5 }
  0x35   :  { %v220_v13 = vmax.bf16 %v402_v6, %v187_v8 }
  0x36   :  { %v487_v15 = vcombine.low %v284_v7, %v285_v10  ;;  %v221_v16 = vmax.bf16 %v403_v9, %v188_v11 }
  0x37   :  { %v253_v18 = vmax.bf16 %v418_v12, %v220_v13 }
  0x38   :  { %488 = vst [vmem:[%s958_s1 + $0x30] sm:$0xff] %v487_v15   ;;  %v254_v20 = vmax.bf16 %v419_v14, %v221_v16 }
  0x39   :  { %v286_v21 = vmax.bf16 %v434_v17, %v253_v18 }
  0x3a   :  { %v287_v22 = vmax.bf16 %v435_v19, %v254_v20 }
  0x3c   :  { %v489_v23 = vcombine.low %v286_v21, %v287_v22 }
  0x3e   :  { %490 = vst [vmem:[%s958_s1 + $0x38] sm:$0xff] %v489_v23  }

// kernel: _lambda_.56
= control target key start
LH: loop header
LB: loop body
LE: loop exit
PB: predicated region body
PF: predicated region fallthrough
CT: control target
= control target key end

     0   :  { %s721_s1 = inlined_call_operand.vmem [shape: bf16[128,128], index: 1, kind: input, shape index: {}]   ;;  %s722_s0 = inlined_call_operand.vmem [shape: bf16[128,128], index: 0, kind: input, shape index: {}]   ;;  %s723_s2 = inlined_call_operand.vmem [shape: f32[1,128], index: 2, kind: input, shape index: {}]   ;;  %s724_s3 = inlined_call_operand.vmem [shape: bf16[128,128], index: 3, kind: output, shape index: {}]  }
   0x1   :  { %v610_v0 = vld [vmem:[%s721_s1] sm:$0xff]   ;;  %v611_v1 = vld [vmem:[%s721_s1 + $0x8] sm:$0xff]   ;;  %v612_v2 = vld [vmem:[%s721_s1 + $0x10] sm:$0xff]  }
   0x2   :  { %562 = vmatprep.subr.bf16.mxu0 %v610_v0  ;;  %594 = vmatprep.subr.bf16.mxu1 %v610_v0  ;;  %v613_v3 = vld [vmem:[%s721_s1 + $0x18] sm:$0xff]   ;;  %v618_v4 = vld [vmem:[%s722_s0] sm:$0xff]   ;;  %v615_v7 = vld [vmem:[%s721_s1 + $0x28] sm:$0xff]  }
   0x3   :  { %563 = vmatpush3.bf16.msra.mxu0 %v610_v0  ;;  %602 = vmatpush3.bf16.msra.mxu1 %v610_v0  ;;  %v619_v5 = vld [vmem:[%s722_s0 + $0x20] sm:$0xff]   ;;  %v616_v8 = vld [vmem:[%s721_s1 + $0x30] sm:$0xff]   ;;  %v617_v9 = vld [vmem:[%s721_s1 + $0x38] sm:$0xff]  }
   0x4   :  { %564 = vmatprep.subr.bf16.mxu0 %v611_v1  ;;  %595 = vmatprep.subr.bf16.mxu1 %v611_v1  ;;  %v614_v6 = vld [vmem:[%s721_s1 + $0x20] sm:$0xff]   ;;  %v620_v10 = vld [vmem:[%s722_s0 + $0x8] sm:$0xff]   ;;  %v622_v12 = vld [vmem:[%s722_s0 + $0x10] sm:$0xff]  }
   0x5   :  { %578 = vmatprep.mubr.bf16.mxu0 %v618_v4  ;;  %586 = vmatprep.mubr.bf16.mxu1 %v619_v5  ;;  %v621_v11 = vld [vmem:[%s722_s0 + $0x28] sm:$0xff]   ;;  %v623_v13 = vld [vmem:[%s722_s0 + $0x30] sm:$0xff]   ;;  %v624_v14 = vld [vmem:[%s722_s0 + $0x18] sm:$0xff]  }
   0x6   :  { %v625_v15 = vld [vmem:[%s722_s0 + $0x38] sm:$0xff]   ;;  %v466_v16 = vld [vmem:[%s723_s2] ss:$0 sm:$0xff] }
   0x7   :  { %565 = vmatpush3.bf16.msra.mxu0 %v611_v1  ;;  %603 = vmatpush3.bf16.msra.mxu1 %v611_v1 }
   0x8   :  { %566 = vmatprep.subr.bf16.mxu0 %v612_v2  ;;  %596 = vmatprep.subr.bf16.mxu1 %v612_v2 }
   0xb   :  { %567 = vmatpush3.bf16.msra.mxu0 %v612_v2  ;;  %604 = vmatpush3.bf16.msra.mxu1 %v612_v2 }
   0xc   :  { %568 = vmatprep.subr.bf16.mxu0 %v613_v3  ;;  %597 = vmatprep.subr.bf16.mxu1 %v613_v3 }
   0xf   :  { %569 = vmatpush3.bf16.msra.mxu0 %v613_v3  ;;  %605 = vmatpush3.bf16.msra.mxu1 %v613_v3 }
  0x10   :  { %570 = vmatprep.subr.bf16.mxu0 %v614_v6  ;;  %598 = vmatprep.subr.bf16.mxu1 %v614_v6 }
  0x13   :  { %571 = vmatpush3.bf16.msra.mxu0 %v614_v6  ;;  %606 = vmatpush3.bf16.msra.mxu1 %v614_v6 }
  0x14   :  { %572 = vmatprep.subr.bf16.mxu0 %v615_v7  ;;  %599 = vmatprep.subr.bf16.mxu1 %v615_v7 }
  0x17   :  { %573 = vmatpush3.bf16.msra.mxu0 %v615_v7  ;;  %607 = vmatpush3.bf16.msra.mxu1 %v615_v7 }
  0x18   :  { %574 = vmatprep.subr.bf16.mxu0 %v616_v8  ;;  %600 = vmatprep.subr.bf16.mxu1 %v616_v8 }
  0x1b   :  { %575 = vmatpush3.bf16.msra.mxu0 %v616_v8  ;;  %608 = vmatpush3.bf16.msra.mxu1 %v616_v8 }
  0x1c   :  { %576 = vmatprep.subr.bf16.mxu0 %v617_v9  ;;  %601 = vmatprep.subr.bf16.mxu1 %v617_v9 }
  0x1f   :  { %577 = vmatpush3.bf16.msra.mxu0 %v617_v9  ;;  %609 = vmatpush3.bf16.msra.mxu1 %v617_v9 }
  0x22   :  { %579 = vmatmul.mubr.bf16.vlgmr.msra.gmra.mrb[0].mxu0 %v620_v10  ;;  %587 = vmatmul.mubr.bf16.vlgmr.msra.gmra.mrb[0].mxu1 %v621_v11 }
  0x23   :  { %582 = vmatprep.mubr.bf16.mxu0 %v622_v12  ;;  %590 = vmatprep.mubr.bf16.mxu1 %v623_v13 }
  0x2a   :  { %583 = vmatmul.mubr.bf16.gmra.mrb[4].mxu0 %v624_v14  ;;  %591 = vmatmul.mubr.bf16.gmra.mrb[4].mxu1 %v625_v15 }
  0xf5   :  { %v580_v17 = vpop.f32.mrb[0].mxu0  ;;  %v588_v18 = vpop.f32.mrb[0].mxu1 }
  0xf6   :  { %v336_v19 = vadd.f32 %v580_v17, %v466_v16  ;;  %v344_v20 = vadd.f32 %v588_v18, %v466_v16  ;;  %v213_v21 = vpop.f32.mrb[1].mxu0  ;;  %v245_v22 = vpop.f32.mrb[1].mxu1 }
  0xf7   :  { %v334_v23 = vadd.f32 %v466_v16, %v213_v21  ;;  %v342_v24 = vadd.f32 %v466_v16, %v245_v22  ;;  %v581_v25 = vpop.f32.mrb[2].mxu0  ;;  %v589_v26 = vpop.f32.mrb[2].mxu1 }
  0xf8   :  { %v337_v27 = vadd.f32 %v581_v25, %v466_v16  ;;  %v345_v28 = vadd.f32 %v589_v26, %v466_v16  ;;  %v216_v29 = vpop.f32.mrb[3].mxu0  ;;  %v248_v30 = vpop.f32.mrb[3].mxu1  ;;  %v352_v33 = vmax.f32 %v336_v19, 0.0  ;;  %v360_v34 = vmax.f32 %v344_v20, 0.0 }
  0xf9   :  { %v335_v31 = vadd.f32 %v466_v16, %v216_v29  ;;  %v343_v32 = vadd.f32 %v466_v16, %v248_v30  ;;  %v350_v37 = vmax.f32 %v334_v23, 0.0  ;;  %v358_v38 = vmax.f32 %v342_v24, 0.0 }
  0xfa   :  { %v353_v35 = vmax.f32 %v337_v27, 0.0  ;;  %v361_v36 = vmax.f32 %v345_v28, 0.0 }
  0xfb   :  { %v351_v39 = vmax.f32 %v335_v31, 0.0  ;;  %v359_v40 = vmax.f32 %v343_v32, 0.0 }
  0xfc   :  { %v507_v41 = vpack.c.bf16 %v353_v35, %v352_v33  ;;  %v527_v42 = vpack.c.bf16 %v361_v36, %v360_v34 }
  0xfd   :  { %v502_v43 = vpack.c.bf16 %v351_v39, %v350_v37  ;;  %v522_v44 = vpack.c.bf16 %v359_v40, %v358_v38  ;;  %v584_v45 = vpop.f32.mrb[4].mxu0  ;;  %v592_v46 = vpop.f32.mrb[4].mxu1 }
  0xfe   :  { %539 = vst [vmem:[%s724_s3 + $0x8] sm:$0xff] %v507_v41   ;;  %543 = vst [vmem:[%s724_s3 + $0x28] sm:$0xff] %v527_v42   ;;  %v340_v47 = vadd.f32 %v584_v45, %v466_v16  ;;  %v348_v48 = vadd.f32 %v592_v46, %v466_v16  ;;  %v229_v49 = vpop.f32.mrb[5].mxu0  ;;  %v261_v50 = vpop.f32.mrb[5].mxu1 }
  0xff   :  { %503 = vst [vmem:[%s724_s3] sm:$0xff] %v502_v43   ;;  %542 = vst [vmem:[%s724_s3 + $0x20] sm:$0xff] %v522_v44   ;;  %v338_v51 = vadd.f32 %v466_v16, %v229_v49  ;;  %v346_v52 = vadd.f32 %v466_v16, %v261_v50  ;;  %v585_v53 = vpop.f32.mrb[6].mxu0  ;;  %v593_v54 = vpop.f32.mrb[6].mxu1 }
 0x100   :  { %v341_v55 = vadd.f32 %v585_v53, %v466_v16  ;;  %v349_v56 = vadd.f32 %v593_v54, %v466_v16  ;;  %v232_v57 = vpop.f32.mrb[7].mxu0  ;;  %v264_v58 = vpop.f32.mrb[7].mxu1  ;;  %v356_v61 = vmax.f32 %v340_v47, 0.0  ;;  %v364_v62 = vmax.f32 %v348_v48, 0.0 }
 0x101   :  { %v339_v59 = vadd.f32 %v466_v16, %v232_v57  ;;  %v347_v60 = vadd.f32 %v466_v16, %v264_v58  ;;  %v354_v1 = vmax.f32 %v338_v51, 0.0  ;;  %v362_v2 = vmax.f32 %v346_v52, 0.0 }
 0x102   :  { %v357_v63 = vmax.f32 %v341_v55, 0.0  ;;  %v365_v0 = vmax.f32 %v349_v56, 0.0 }
 0x103   :  { %v355_v3 = vmax.f32 %v339_v59, 0.0  ;;  %v363_v4 = vmax.f32 %v347_v60, 0.0 }
 0x104   :  { %v517_v5 = vpack.c.bf16 %v357_v63, %v356_v61  ;;  %v537_v6 = vpack.c.bf16 %v365_v0, %v364_v62 }
 0x105   :  { %v512_v7 = vpack.c.bf16 %v355_v3, %v354_v1  ;;  %v532_v8 = vpack.c.bf16 %v363_v4, %v362_v2 }
 0x106   :  { %541 = vst [vmem:[%s724_s3 + $0x18] sm:$0xff] %v517_v5   ;;  %545 = vst [vmem:[%s724_s3 + $0x38] sm:$0xff] %v537_v6  }
 0x107   :  { %540 = vst [vmem:[%s724_s3 + $0x10] sm:$0xff] %v512_v7   ;;  %544 = vst [vmem:[%s724_s3 + $0x30] sm:$0xff] %v532_v8  }

// kernel: _lambda_.57
= control target key start
LH: loop header
LB: loop body
LE: loop exit
PB: predicated region body
PF: predicated region fallthrough
CT: control target
= control target key end

     0   :  { %s1190_s12 = smov 0   ;;  %s1192_s13 = smov 0   ;;  %s1322_s0 = inlined_call_operand.vmem [shape: bf16[128,1152], index: 0, kind: input, shape index: {}]   ;;  %s1323_s1 = inlined_call_operand.vmem [shape: bf16[1152,128], index: 1, kind: input, shape index: {}]   ;;  %s1324_s2 = inlined_call_operand.vmem [shape: f32[1,128], index: 2, kind: input, shape index: {}]   ;;  %s1325_s3 = inlined_call_operand.vmem [shape: bf16[128,128], index: 3, kind: output, shape index: {}]  }
   0x1   :  { %s1194_s14 = smov 0   ;;  %s1196_s15 = smov 0  }
   0x2   :  { %s1198_s16 = smov 0  }
   0x3 LB: > { %s25_s17 = sadd.s32 1, %s1163_s15  ;;  %p48_p1 = scmp.ne.s32.totalorder %s1155_s13, %s1151_s12  ;;  %s1167_s16 = sphi %s1198_s16, %s13_s16   ;;  %s1163_s15 = sphi %s1196_s15, %s1329_s15   ;;  %s1159_s14 = sphi %s1194_s14, %s1328_s14   ;;  %s1155_s13 = sphi %s1192_s13, %s1327_s13   ;;  %s1151_s12 = sphi %s1190_s12, %s1326_s12  }
   0x4   : > { %p26_p0 = scmp.ge.s32.totalorder %s25_s17, 9  ;;  %p49_p2 = scmp.eq.s32.totalorder %s1167_s16, 0 }
   0x5   : > { %s41_s19 = sadd.s32 1, %s1155_s13  ;;  %p899_p5 = scmp.ge.s32.totalorder %s1167_s16, 9 }
   0x6   : > { %s1331_s17 = smov (%p26_p0, %s25_s17), 0  ;;  %p50_p3 = por %p49_p2, %p48_p1 }
   0x7   : > { %s37_s18 = ssub.s32 %s1163_s15, %s1331_s17  ;;  %162 = sbr.rel (%p899_p5) target bundleno = 28 (0x1c), region = 20 }
   0x8   : > { %p39_p4 = scmp.eq.s32.totalorder %s37_s18, 0 }
   0xa   : > { %s1225_s20 = scalar_select %p39_p4, %s1155_s13, %s41_s19  }
   0xe   : > { %165 = sbr.rel (!%p50_p3) target bundleno = 28 (0x1c), region = 24  ;;  %s167_s21 = sand.u32 (%p50_p3), 1, %s1155_s13  }
   0xf   : > { %s901_s22 = sshll.u32 (%p50_p3), %s1163_s15, 2  ;;  %s900_s23 = sshll.u32 (%p50_p3), %s167_s21, 6 }
  0x10   : > { %s1233_s26 = scalar_lea.vmem (%p50_p3), %s1322_s0, %s901_s22  ;;  %s169_s27 = scalar_lea.vmem (%p50_p3), [#allocation3], %s900_s23 }
  0x11   : > { %v190_v0 = vld [vmem:[%s1233_s26] sm:$0xf] (%p50_p3)  ;;  %v192_v1 = vld [vmem:[%s1233_s26 + $0x24] sm:$0xf] (%p50_p3)  ;;  %v194_v2 = vld [vmem:[%s1233_s26 + $0x48] sm:$0xf] (%p50_p3) }
  0x12   : > { %191 = vst [vmem:[%s169_s27] sm:$0xf] (%p50_p3), %v190_v0  ;;  %193 = vst [vmem:[%s169_s27 + $0x4] sm:$0xf] (%p50_p3), %v192_v1  ;;  %v196_v3 = vld [vmem:[%s1233_s26 + $0x6c] sm:$0xf] (%p50_p3) }
  0x13   : > { %v198_v4 = vld [vmem:[%s1233_s26 + $0x90] sm:$0xf] (%p50_p3)  ;;  %195 = vst [vmem:[%s169_s27 + $0x8] sm:$0xf] (%p50_p3), %v194_v2  ;;  %197 = vst [vmem:[%s169_s27 + $0xc] sm:$0xf] (%p50_p3), %v196_v3 }
  0x14   : > { %199 = vst [vmem:[%s169_s27 + $0x10] sm:$0xf] (%p50_p3), %v198_v4  ;;  %v200_v5 = vld [vmem:[%s1233_s26 + $0xb4] sm:$0xf] (%p50_p3)  ;;  %v202_v6 = vld [vmem:[%s1233_s26 + $0xd8] sm:$0xf] (%p50_p3) }
  0x15   : > { %v204_v7 = vld [vmem:[%s1233_s26 + $0xfc] sm:$0xf]  ;;  %201 = vst [vmem:[%s169_s27 + $0x14] sm:$0xf] %v200_v5  ;;  %203 = vst [vmem:[%s169_s27 + $0x18] sm:$0xf] %v202_v6 }
  0x16   : > { %205 = vst [vmem:[%s169_s27 + $0x1c] sm:$0xf] %v204_v7  ;;  %v206_v8 = vld [vmem:[%s1233_s26 + $0x120] sm:$0xf]  ;;  %v208_v9 = vld [vmem:[%s1233_s26 + $0x144] sm:$0xf] }
  0x17   : > { %v210_v10 = vld [vmem:[%s1233_s26 + $0x168] sm:$0xf]  ;;  %207 = vst [vmem:[%s169_s27 + $0x20] sm:$0xf] %v206_v8  ;;  %209 = vst [vmem:[%s169_s27 + $0x24] sm:$0xf] %v208_v9 }
  0x18   : > { %211 = vst [vmem:[%s169_s27 + $0x28] sm:$0xf] %v210_v10  ;;  %v212_v11 = vld [vmem:[%s1233_s26 + $0x18c] sm:$0xf]  ;;  %v214_v12 = vld [vmem:[%s1233_s26 + $0x1b0] sm:$0xf] }
  0x19   : > { %v216_v13 = vld [vmem:[%s1233_s26 + $0x1d4] sm:$0xf]  ;;  %213 = vst [vmem:[%s169_s27 + $0x2c] sm:$0xf] %v212_v11  ;;  %215 = vst [vmem:[%s169_s27 + $0x30] sm:$0xf] %v214_v12 }
  0x1a   : > { %217 = vst [vmem:[%s169_s27 + $0x34] sm:$0xf] %v216_v13  ;;  %v218_v14 = vld [vmem:[%s1233_s26 + $0x1f8] sm:$0xf]  ;;  %v220_v15 = vld [vmem:[%s1233_s26 + $0x21c] sm:$0xf] }
  0x1b   : > { %219 = vst [vmem:[%s169_s27 + $0x38] sm:$0xf] %v218_v14  ;;  %221 = vst [vmem:[%s169_s27 + $0x3c] sm:$0xf] %v220_v15 }
  0x1c PF: > { %p902_p6 = scmp.ge.s32.totalorder %s1167_s16, 1  ;;  %p287_p7 = scmp.lt.s32.totalorder %s1167_s16, 10 }
  0x1e   : > { %p288_p8 = pnand %p902_p6, %p287_p7 }
  0x1f   : > { %s294_s28 = sand.u32 (!%p288_p8), 1, %s1151_s12   ;;  %s904_s29 = sshll.u32 (!%p288_p8), %s1159_s14, 4 }
  0x20   : > { %291 = sbr.rel (%p288_p8) target bundleno = 323 (0x143), region = 69  ;;  %s903_s30 = sshll.u32 (!%p288_p8), %s294_s28, 6 }
  0x21   : > { %p333_p9 = scmp.lt.s32.totalorder (!%p288_p8), %s904_s29, 143  ;;  %s1260_s8 = scalar_lea.vmem (!%p288_p8), [#allocation3], %s903_s30 }
  0x22   : > { %p906_p10 = scmp.ne.s32.totalorder (!%p288_p8), %s1159_s14, 0 }
  0x27   : > { %s1333_s29 = smov (!%p333_p9, %s904_s29), 143  ;;  %357 = sbr.rel (%p906_p10) target bundleno = 49 (0x31), region = 77 }
  0x28   : > { %s905_s4 = sshll.u32 %s1333_s29, 2  ;;  %v1169_v16 = vmov (!%p906_p10), 0.0  }
  0x29   : > { %s1258_s7 = scalar_lea.vmem %s1323_s1, %s905_s4  ;;  %358 = vst [vmem:[#allocation2] sm:$0xff] (!%p906_p10), %v1169_v16  ;;  %359 = vst [vmem:[#allocation2 + $0x8] sm:$0xff] (!%p906_p10), %v1169_v16 }
  0x2a   : > { %360 = vst [vmem:[#allocation2 + $0x10] sm:$0xff] (!%p906_p10), %v1169_v16  ;;  %361 = vst [vmem:[#allocation2 + $0x18] sm:$0xff] (!%p906_p10), %v1169_v16 }
  0x2b   : > { %362 = vst [vmem:[#allocation2 + $0x20] sm:$0xff] (!%p906_p10), %v1169_v16  ;;  %363 = vst [vmem:[#allocation2 + $0x28] sm:$0xff] (!%p906_p10), %v1169_v16 }
  0x2c   : > { %364 = vst [vmem:[#allocation2 + $0x30] sm:$0xff] (!%p906_p10), %v1169_v16  ;;  %365 = vst [vmem:[#allocation2 + $0x38] sm:$0xff] (!%p906_p10), %v1169_v16 }
  0x2d   : > { %366 = vst [vmem:[#allocation2 + $0x40] sm:$0xff] (!%p906_p10), %v1169_v16  ;;  %367 = vst [vmem:[#allocation2 + $0x48] sm:$0xff] (!%p906_p10), %v1169_v16 }
  0x2e   : > { %368 = vst [vmem:[#allocation2 + $0x50] sm:$0xff] %v1169_v16  ;;  %369 = vst [vmem:[#allocation2 + $0x58] sm:$0xff] %v1169_v16 }
  0x2f   : > { %370 = vst [vmem:[#allocation2 + $0x60] sm:$0xff] %v1169_v16  ;;  %371 = vst [vmem:[#allocation2 + $0x68] sm:$0xff] %v1169_v16 }
  0x30   : > { %372 = vst [vmem:[#allocation2 + $0x70] sm:$0xff] %v1169_v16  ;;  %373 = vst [vmem:[#allocation2 + $0x78] sm:$0xff] %v1169_v16 }
  0x31 PF: > { %v1113_v17 = vld [vmem:[%s1258_s7] sm:$0xff]   ;;  %v1114_v18 = vld [vmem:[%s1258_s7 + $0x8] sm:$0xff]   ;;  %v1115_v19 = vld [vmem:[%s1258_s7 + $0x10] sm:$0xff]   ;;  %p923_p11 = scmp.ne.s32.totalorder %s1159_s14, 8 }
  0x32   : > { %1024 = vmatprep.subr.bf16.mxu0 %v1113_v17  ;;  %1056 = vmatprep.subr.bf16.mxu1 %v1113_v17  ;;  %v1116_v20 = vld [vmem:[%s1258_s7 + $0x18] sm:$0xff]   ;;  %v1121_v21 = vld [vmem:[%s1260_s8] sm:$0xff]   ;;  %v1118_v24 = vld [vmem:[%s1258_s7 + $0x28] sm:$0xff]  }
  0x33   : > { %1025 = vmatpush3.bf16.msra.mxu0 %v1113_v17  ;;  %1064 = vmatpush3.bf16.msra.mxu1 %v1113_v17  ;;  %v1122_v22 = vld [vmem:[%s1260_s8 + $0x20] sm:$0xff]   ;;  %v1119_v25 = vld [vmem:[%s1258_s7 + $0x30] sm:$0xff]   ;;  %v1120_v26 = vld [vmem:[%s1258_s7 + $0x38] sm:$0xff]  }
  0x34   : > { %1026 = vmatprep.subr.bf16.mxu0 %v1114_v18  ;;  %1057 = vmatprep.subr.bf16.mxu1 %v1114_v18  ;;  %v1117_v23 = vld [vmem:[%s1258_s7 + $0x20] sm:$0xff]   ;;  %v1123_v27 = vld [vmem:[%s1260_s8 + $0x8] sm:$0xff]   ;;  %v1125_v29 = vld [vmem:[%s1260_s8 + $0x10] sm:$0xff]  }
  0x35   : > { %1040 = vmatprep.mubr.bf16.mxu0 %v1121_v21  ;;  %1048 = vmatprep.mubr.bf16.mxu1 %v1122_v22  ;;  %v1124_v28 = vld [vmem:[%s1260_s8 + $0x28] sm:$0xff]   ;;  %v1126_v30 = vld [vmem:[%s1260_s8 + $0x30] sm:$0xff]   ;;  %v1127_v31 = vld [vmem:[%s1260_s8 + $0x18] sm:$0xff]  }
  0x36   : > { %v1128_v32 = vld [vmem:[%s1260_s8 + $0x38] sm:$0xff]   ;;  %v376_v33 = vld [vmem:[#allocation2 + $0x10] sm:$0xff]  ;;  %v374_v35 = vld [vmem:[#allocation2] sm:$0xff] }
  0x37   : > { %1027 = vmatpush3.bf16.msra.mxu0 %v1114_v18  ;;  %1065 = vmatpush3.bf16.msra.mxu1 %v1114_v18  ;;  %v384_v34 = vld [vmem:[#allocation2 + $0x50] sm:$0xff]  ;;  %v382_v36 = vld [vmem:[#allocation2 + $0x40] sm:$0xff]  ;;  %v377_v39 = vld [vmem:[#allocation2 + $0x18] sm:$0xff] }
  0x38   : > { %1028 = vmatprep.subr.bf16.mxu0 %v1115_v19  ;;  %1058 = vmatprep.subr.bf16.mxu1 %v1115_v19  ;;  %v385_v40 = vld [vmem:[#allocation2 + $0x58] sm:$0xff]  ;;  %v375_v45 = vld [vmem:[#allocation2 + $0x8] sm:$0xff]  ;;  %v380_v57 = vld [vmem:[#allocation2 + $0x30] sm:$0xff] }
  0x39   : > { %v383_v46 = vld [vmem:[#allocation2 + $0x48] sm:$0xff]  ;;  %v388_v58 = vld [vmem:[#allocation2 + $0x70] sm:$0xff]  ;;  %v378_v59 = vld [vmem:[#allocation2 + $0x20] sm:$0xff] }
  0x3a   : > { %v386_v60 = vld [vmem:[#allocation2 + $0x60] sm:$0xff]  ;;  %v381_v63 = vld [vmem:[#allocation2 + $0x38] sm:$0xff]  ;;  %v379_v5 = vld [vmem:[#allocation2 + $0x28] sm:$0xff] }
  0x3b   : > { %1029 = vmatpush3.bf16.msra.mxu0 %v1115_v19  ;;  %1066 = vmatpush3.bf16.msra.mxu1 %v1115_v19  ;;  %v389_v0 = vld [vmem:[#allocation2 + $0x78] sm:$0xff]  ;;  %v387_v6 = vld [vmem:[#allocation2 + $0x68] sm:$0xff]  ;;  %v924_v19 = vld [vmem:[%s1324_s2] ss:$0 sm:$0xff] (!%p923_p11) }
  0x3c   : > { %1030 = vmatprep.subr.bf16.mxu0 %v1116_v20  ;;  %1059 = vmatprep.subr.bf16.mxu1 %v1116_v20 }
  0x3f   : > { %1031 = vmatpush3.bf16.msra.mxu0 %v1116_v20  ;;  %1067 = vmatpush3.bf16.msra.mxu1 %v1116_v20 }
  0x40   : > { %1032 = vmatprep.subr.bf16.mxu0 %v1117_v23  ;;  %1060 = vmatprep.subr.bf16.mxu1 %v1117_v23 }
  0x43   : > { %1033 = vmatpush3.bf16.msra.mxu0 %v1117_v23  ;;  %1068 = vmatpush3.bf16.msra.mxu1 %v1117_v23 }
  0x44   : > { %1034 = vmatprep.subr.bf16.mxu0 %v1118_v24  ;;  %1061 = vmatprep.subr.bf16.mxu1 %v1118_v24 }
  0x47   : > { %1035 = vmatpush3.bf16.msra.mxu0 %v1118_v24  ;;  %1069 = vmatpush3.bf16.msra.mxu1 %v1118_v24 }
  0x48   : > { %1036 = vmatprep.subr.bf16.mxu0 %v1119_v25  ;;  %1062 = vmatprep.subr.bf16.mxu1 %v1119_v25 }
  0x4b   : > { %1037 = vmatpush3.bf16.msra.mxu0 %v1119_v25  ;;  %1070 = vmatpush3.bf16.msra.mxu1 %v1119_v25 }
  0x4c   : > { %1038 = vmatprep.subr.bf16.mxu0 %v1120_v26  ;;  %1063 = vmatprep.subr.bf16.mxu1 %v1120_v26 }
  0x4f   : > { %1039 = vmatpush3.bf16.msra.mxu0 %v1120_v26  ;;  %1071 = vmatpush3.bf16.msra.mxu1 %v1120_v26 }
  0x52   : > { %1041 = vmatmul.mubr.bf16.vlgmr.msra.gmra.mrb[0].mxu0 %v1123_v27  ;;  %1049 = vmatmul.mubr.bf16.vlgmr.msra.gmra.mrb[0].mxu1 %v1124_v28 }
  0x53   : > { %1044 = vmatprep.mubr.bf16.mxu0 %v1125_v29  ;;  %1052 = vmatprep.mubr.bf16.mxu1 %v1126_v30 }
  0x5a   : > { %1045 = vmatmul.mubr.bf16.gmra.mrb[4].mxu0 %v1127_v31  ;;  %1053 = vmatmul.mubr.bf16.gmra.mrb[4].mxu1 %v1128_v32 }
 0x125   : > { %v1042_v37 = vpop.f32.mrb[0].mxu0  ;;  %v1050_v38 = vpop.f32.mrb[0].mxu1 }
 0x126   : > { %v617_v41 = vadd.f32 %v1042_v37, %v376_v33  ;;  %v625_v42 = vadd.f32 %v1050_v38, %v384_v34  ;;  %v552_v43 = vpop.f32.mrb[1].mxu0  ;;  %v584_v44 = vpop.f32.mrb[1].mxu1 }
 0x127   : > { %v615_v47 = vadd.f32 %v552_v43, %v374_v35  ;;  %v623_v48 = vadd.f32 %v584_v44, %v382_v36  ;;  %v1043_v49 = vpop.f32.mrb[2].mxu0  ;;  %v1051_v50 = vpop.f32.mrb[2].mxu1 }
 0x128   : > { %633 = vst [vmem:[#allocation2 + $0x10] sm:$0xff] %v617_v41  ;;  %641 = vst [vmem:[#allocation2 + $0x50] sm:$0xff] %v625_v42  ;;  %v618_v51 = vadd.f32 %v1043_v49, %v377_v39  ;;  %v626_v52 = vadd.f32 %v1051_v50, %v385_v40  ;;  %v555_v53 = vpop.f32.mrb[3].mxu0  ;;  %v587_v54 = vpop.f32.mrb[3].mxu1 }
 0x129   : > { %631 = vst [vmem:[#allocation2] sm:$0xff] %v615_v47  ;;  %639 = vst [vmem:[#allocation2 + $0x40] sm:$0xff] %v623_v48  ;;  %v616_v55 = vadd.f32 %v555_v53, %v375_v45  ;;  %v624_v56 = vadd.f32 %v587_v54, %v383_v46 }
 0x12a   : > { %634 = vst [vmem:[#allocation2 + $0x18] sm:$0xff] %v618_v51  ;;  %642 = vst [vmem:[#allocation2 + $0x58] sm:$0xff] %v626_v52 }
 0x12b   : > { %632 = vst [vmem:[#allocation2 + $0x8] sm:$0xff] %v616_v55  ;;  %640 = vst [vmem:[#allocation2 + $0x48] sm:$0xff] %v624_v56 }
 0x12d   : > { %v1046_v61 = vpop.f32.mrb[4].mxu0  ;;  %v1054_v62 = vpop.f32.mrb[4].mxu1  ;;  %650 = sbr.rel (%p923_p11) target bundleno = 323 (0x143), region = 81 }
 0x12e   : > { %v621_v1 = vadd.f32 %v1046_v61, %v380_v57  ;;  %v629_v2 = vadd.f32 %v1054_v62, %v388_v58  ;;  %v568_v3 = vpop.f32.mrb[5].mxu0  ;;  %v600_v4 = vpop.f32.mrb[5].mxu1 }
 0x12f   : > { %v619_v7 = vadd.f32 %v568_v3, %v378_v59  ;;  %v627_v8 = vadd.f32 %v600_v4, %v386_v60  ;;  %v1047_v9 = vpop.f32.mrb[6].mxu0  ;;  %v1055_v10 = vpop.f32.mrb[6].mxu1  ;;  %v653_v22 = vld [vmem:[#allocation2 + $0x10] sm:$0xff] (!%p923_p11) }
 0x130   : > { %637 = vst [vmem:[#allocation2 + $0x30] sm:$0xff] %v621_v1  ;;  %645 = vst [vmem:[#allocation2 + $0x70] sm:$0xff] %v629_v2  ;;  %v622_v11 = vadd.f32 %v1047_v9, %v381_v63  ;;  %v630_v12 = vadd.f32 %v1055_v10, %v389_v0  ;;  %v571_v13 = vpop.f32.mrb[7].mxu0  ;;  %v603_v14 = vpop.f32.mrb[7].mxu1  ;;  %v651_v17 = vld [vmem:[#allocation2] sm:$0xff] (!%p923_p11)  ;;  %v676_v25 = vadd.f32 (!%p923_p11), %v924_v19, %v653_v22  ;;  %v661_v37 = vld [vmem:[#allocation2 + $0x50] sm:$0xff] (!%p923_p11) }
 0x131   : > { %635 = vst [vmem:[#allocation2 + $0x20] sm:$0xff] %v619_v7  ;;  %643 = vst [vmem:[#allocation2 + $0x60] sm:$0xff] %v627_v8  ;;  %v620_v15 = vadd.f32 %v571_v13, %v379_v5  ;;  %v628_v16 = vadd.f32 %v603_v14, %v387_v6  ;;  %v674_v20 = vadd.f32 (!%p923_p11), %v924_v19, %v651_v17  ;;  %v654_v23 = vld [vmem:[#allocation2 + $0x18] sm:$0xff] (!%p923_p11)  ;;  %v659_v35 = vld [vmem:[#allocation2 + $0x40] sm:$0xff] (!%p923_p11) }
 0x132   : > { %638 = vst [vmem:[#allocation2 + $0x38] sm:$0xff] %v622_v11  ;;  %646 = vst [vmem:[#allocation2 + $0x78] sm:$0xff] %v630_v12  ;;  %v652_v18 = vld [vmem:[#allocation2 + $0x8] sm:$0xff] (!%p923_p11)  ;;  %v677_v26 = vadd.f32 (!%p923_p11), %v924_v19, %v654_v23  ;;  %v692_v38 = vmax.f32 (!%p923_p11), %v676_v25, 0.0  ;;  %v662_v42 = vld [vmem:[#allocation2 + $0x58] sm:$0xff] (!%p923_p11)  ;;  %v682_v47 = vadd.f32 (!%p923_p11), %v924_v19, %v659_v35  ;;  %v684_v52 = vadd.f32 (!%p923_p11), %v924_v19, %v661_v37 }
 0x133   : > { %636 = vst [vmem:[#allocation2 + $0x28] sm:$0xff] %v620_v15  ;;  %644 = vst [vmem:[#allocation2 + $0x68] sm:$0xff] %v628_v16  ;;  %v675_v21 = vadd.f32 (!%p923_p11), %v924_v19, %v652_v18  ;;  %v690_v31 = vmax.f32 (!%p923_p11), %v674_v20, 0.0  ;;  %v660_v36 = vld [vmem:[#allocation2 + $0x48] sm:$0xff] (!%p923_p11)  ;;  %v685_v57 = vadd.f32 (!%p923_p11), %v924_v19, %v662_v42 }
 0x134   : > { %v693_v39 = vmax.f32 %v677_v26, 0.0  ;;  %v683_v51 = vadd.f32 %v924_v19, %v660_v36  ;;  %v698_v56 = vmax.f32 %v682_v47, 0.0  ;;  %v700_v61 = vmax.f32 %v684_v52, 0.0 }
 0x135   : > { %v691_v32 = vmax.f32 %v675_v21, 0.0  ;;  %v701_v63 = vmax.f32 %v685_v57, 0.0 }
 0x136   : > { %v969_v49 = vpack.c.bf16 %v693_v39, %v692_v38  ;;  %v699_v60 = vmax.f32 %v683_v51, 0.0 }
 0x137   : > { %v657_v29 = vld [vmem:[#allocation2 + $0x30] sm:$0xff]  ;;  %v964_v44 = vpack.c.bf16 %v691_v32, %v690_v31  ;;  %v989_v5 = vpack.c.bf16 %v701_v63, %v700_v61 }
 0x138   : > { %v655_v24 = vld [vmem:[#allocation2 + $0x20] sm:$0xff]  ;;  %v680_v34 = vadd.f32 %v924_v19, %v657_v29  ;;  %v665_v53 = vld [vmem:[#allocation2 + $0x70] sm:$0xff]  ;;  %1001 = vst [vmem:[%s1325_s3 + $0x8] sm:$0xff] %v969_v49   ;;  %v984_v3 = vpack.c.bf16 %v699_v60, %v698_v56 }
 0x139   : > { %v678_v28 = vadd.f32 %v924_v19, %v655_v24  ;;  %v658_v30 = vld [vmem:[#allocation2 + $0x38] sm:$0xff]  ;;  %v663_v43 = vld [vmem:[#allocation2 + $0x60] sm:$0xff]  ;;  %965 = vst [vmem:[%s1325_s3] sm:$0xff] %v964_v44   ;;  %v688_v1 = vadd.f32 %v924_v19, %v665_v53  ;;  %1005 = vst [vmem:[%s1325_s3 + $0x28] sm:$0xff] %v989_v5  }
 0x13a   : > { %v656_v27 = vld [vmem:[#allocation2 + $0x28] sm:$0xff]  ;;  %v681_v41 = vadd.f32 %v924_v19, %v658_v30  ;;  %v696_v46 = vmax.f32 %v680_v34, 0.0  ;;  %v666_v54 = vld [vmem:[#allocation2 + $0x78] sm:$0xff]  ;;  %v686_v58 = vadd.f32 %v924_v19, %v663_v43  ;;  %1004 = vst [vmem:[%s1325_s3 + $0x20] sm:$0xff] %v984_v3  }
 0x13b   : > { %v679_v33 = vadd.f32 %v924_v19, %v656_v27  ;;  %v694_v40 = vmax.f32 %v678_v28, 0.0  ;;  %v664_v48 = vld [vmem:[#allocation2 + $0x68] sm:$0xff]  ;;  %v689_v2 = vadd.f32 %v924_v19, %v666_v54  ;;  %v704_v6 = vmax.f32 %v688_v1, 0.0 }
 0x13c   : > { %v697_v50 = vmax.f32 %v681_v41, 0.0  ;;  %v687_v62 = vadd.f32 %v924_v19, %v664_v48  ;;  %v702_v0 = vmax.f32 %v686_v58, 0.0 }
 0x13d   : > { %v695_v45 = vmax.f32 %v679_v33, 0.0  ;;  %v705_v7 = vmax.f32 %v689_v2, 0.0 }
 0x13e   : > { %v979_v59 = vpack.c.bf16 %v697_v50, %v696_v46  ;;  %v703_v4 = vmax.f32 %v687_v62, 0.0 }
 0x13f   : > { %v974_v55 = vpack.c.bf16 %v695_v45, %v694_v40  ;;  %v999_v9 = vpack.c.bf16 %v705_v7, %v704_v6 }
 0x140   : > { %1003 = vst [vmem:[%s1325_s3 + $0x18] sm:$0xff] %v979_v59   ;;  %v994_v8 = vpack.c.bf16 %v703_v4, %v702_v0 }
 0x141   : > { %1002 = vst [vmem:[%s1325_s3 + $0x10] sm:$0xff] %v974_v55   ;;  %1007 = vst [vmem:[%s1325_s3 + $0x38] sm:$0xff] %v999_v9  }
 0x142   : > { %1006 = vst [vmem:[%s1325_s3 + $0x30] sm:$0xff] %v994_v8  }
 0x143 PF: > { %s13_s16 = sadd.s32 1, %s1167_s16   ;;  %s1326_s12 = smov %s1155_s13 }
 0x144   : > { %p10_p12 = scmp.ge.s32.totalorder %s13_s16, 11   ;;  %s1327_s13 = smov %s1225_s20 }
 0x145   : > { %s1328_s14 = smov %s1163_s15  ;;  %s1329_s15 = smov %s1331_s17 }
 0x146   :  { %12 = sbr.rel (!%p10_p12) target bundleno = 3 (0x3), region = 122 }

// kernel: _lambda_.59
= control target key start
LH: loop header
LB: loop body
LE: loop exit
PB: predicated region body
PF: predicated region fallthrough
CT: control target
= control target key end

     0   :  { %s874_s1 = inlined_call_operand.vmem [shape: bf16[128,128], index: 1, kind: input, shape index: {}]   ;;  %s875_s0 = inlined_call_operand.vmem [shape: bf16[128,128], index: 0, kind: input, shape index: {}]   ;;  %s876_s3 = inlined_call_operand.vmem [shape: bf16[128,128], index: 3, kind: input, shape index: {}]   ;;  %s877_s2 = inlined_call_operand.vmem [shape: f32[1,128], index: 2, kind: input, shape index: {}]   ;;  %s878_s4 = inlined_call_operand.vmem [shape: bf16[128,128], index: 4, kind: output, shape index: {}]  }
   0x1   :  { %v700_v0 = vld [vmem:[%s874_s1] sm:$0xff]   ;;  %v701_v1 = vld [vmem:[%s874_s1 + $0x8] sm:$0xff]   ;;  %v702_v2 = vld [vmem:[%s874_s1 + $0x10] sm:$0xff]  }
   0x2   :  { %652 = vmatprep.subr.bf16.mxu0 %v700_v0  ;;  %684 = vmatprep.subr.bf16.mxu1 %v700_v0  ;;  %v703_v3 = vld [vmem:[%s874_s1 + $0x18] sm:$0xff]   ;;  %v708_v4 = vld [vmem:[%s875_s0] sm:$0xff]   ;;  %v705_v7 = vld [vmem:[%s874_s1 + $0x28] sm:$0xff]  }
   0x3   :  { %653 = vmatpush3.bf16.msra.mxu0 %v700_v0  ;;  %692 = vmatpush3.bf16.msra.mxu1 %v700_v0  ;;  %v709_v5 = vld [vmem:[%s875_s0 + $0x20] sm:$0xff]   ;;  %v706_v8 = vld [vmem:[%s874_s1 + $0x30] sm:$0xff]   ;;  %v707_v9 = vld [vmem:[%s874_s1 + $0x38] sm:$0xff]  }
   0x4   :  { %654 = vmatprep.subr.bf16.mxu0 %v701_v1  ;;  %685 = vmatprep.subr.bf16.mxu1 %v701_v1  ;;  %v704_v6 = vld [vmem:[%s874_s1 + $0x20] sm:$0xff]   ;;  %v710_v10 = vld [vmem:[%s875_s0 + $0x8] sm:$0xff]   ;;  %v712_v12 = vld [vmem:[%s875_s0 + $0x10] sm:$0xff]  }
   0x5   :  { %668 = vmatprep.mubr.bf16.mxu0 %v708_v4  ;;  %676 = vmatprep.mubr.bf16.mxu1 %v709_v5  ;;  %v711_v11 = vld [vmem:[%s875_s0 + $0x28] sm:$0xff]   ;;  %v713_v13 = vld [vmem:[%s875_s0 + $0x30] sm:$0xff]   ;;  %v714_v14 = vld [vmem:[%s875_s0 + $0x18] sm:$0xff]  }
   0x6   :  { %v715_v15 = vld [vmem:[%s875_s0 + $0x38] sm:$0xff]   ;;  %v622_v16 = vld [vmem:[%s876_s3 + $0x8] sm:$0xff]   ;;  %v551_v18 = vld [vmem:[%s876_s3] sm:$0xff]  }
   0x7   :  { %655 = vmatpush3.bf16.msra.mxu0 %v701_v1  ;;  %693 = vmatpush3.bf16.msra.mxu1 %v701_v1  ;;  %v626_v17 = vld [vmem:[%s876_s3 + $0x28] sm:$0xff]   ;;  %v625_v19 = vld [vmem:[%s876_s3 + $0x20] sm:$0xff]   ;;  %v809_v21 = vld [vmem:[%s876_s3 + $0x18] sm:$0xff]   ;;  %v556_v23 = vunpack.c.l.bf16 %v622_v16  ;;  %v552_v25 = vunpack.c.l.bf16 %v551_v18  ;;  %v557_v31 = vunpack.c.h.bf16 %v622_v16  ;;  %v553_v33 = vunpack.c.h.bf16 %v551_v18 }
   0x8   :  { %656 = vmatprep.subr.bf16.mxu0 %v702_v2  ;;  %686 = vmatprep.subr.bf16.mxu1 %v702_v2  ;;  %v804_v20 = vld [vmem:[%s877_s2] ss:$0 sm:$0xff]  ;;  %v814_v22 = vld [vmem:[%s876_s3 + $0x38] sm:$0xff]   ;;  %v572_v24 = vunpack.c.l.bf16 %v626_v17  ;;  %v568_v26 = vunpack.c.l.bf16 %v625_v19  ;;  %v819_v27 = vld [vmem:[%s876_s3 + $0x10] sm:$0xff]   ;;  %v573_v32 = vunpack.c.h.bf16 %v626_v17  ;;  %v569_v34 = vunpack.c.h.bf16 %v625_v19 }
   0x9   :  { %v824_v28 = vld [vmem:[%s876_s3 + $0x30] sm:$0xff]   ;;  %v564_v39 = vunpack.c.l.bf16 %v809_v21  ;;  %v580_v40 = vunpack.c.l.bf16 %v814_v22  ;;  %v560_v45 = vunpack.c.l.bf16 %v819_v27  ;;  %v565_v59 = vunpack.c.h.bf16 %v809_v21 }
   0xa   :  { %v576_v46 = vunpack.c.l.bf16 %v824_v28  ;;  %v581_v60 = vunpack.c.h.bf16 %v814_v22  ;;  %v561_v63 = vunpack.c.h.bf16 %v819_v27  ;;  %v577_v0 = vunpack.c.h.bf16 %v824_v28 }
   0xb   :  { %657 = vmatpush3.bf16.msra.mxu0 %v702_v2  ;;  %694 = vmatpush3.bf16.msra.mxu1 %v702_v2 }
   0xc   :  { %658 = vmatprep.subr.bf16.mxu0 %v703_v3  ;;  %687 = vmatprep.subr.bf16.mxu1 %v703_v3 }
   0xf   :  { %659 = vmatpush3.bf16.msra.mxu0 %v703_v3  ;;  %695 = vmatpush3.bf16.msra.mxu1 %v703_v3 }
  0x10   :  { %660 = vmatprep.subr.bf16.mxu0 %v704_v6  ;;  %688 = vmatprep.subr.bf16.mxu1 %v704_v6 }
  0x13   :  { %661 = vmatpush3.bf16.msra.mxu0 %v704_v6  ;;  %696 = vmatpush3.bf16.msra.mxu1 %v704_v6 }
  0x14   :  { %662 = vmatprep.subr.bf16.mxu0 %v705_v7  ;;  %689 = vmatprep.subr.bf16.mxu1 %v705_v7 }
  0x17   :  { %663 = vmatpush3.bf16.msra.mxu0 %v705_v7  ;;  %697 = vmatpush3.bf16.msra.mxu1 %v705_v7 }
  0x18   :  { %664 = vmatprep.subr.bf16.mxu0 %v706_v8  ;;  %690 = vmatprep.subr.bf16.mxu1 %v706_v8 }
  0x1b   :  { %665 = vmatpush3.bf16.msra.mxu0 %v706_v8  ;;  %698 = vmatpush3.bf16.msra.mxu1 %v706_v8 }
  0x1c   :  { %666 = vmatprep.subr.bf16.mxu0 %v707_v9  ;;  %691 = vmatprep.subr.bf16.mxu1 %v707_v9 }
  0x1f   :  { %667 = vmatpush3.bf16.msra.mxu0 %v707_v9  ;;  %699 = vmatpush3.bf16.msra.mxu1 %v707_v9 }
  0x22   :  { %669 = vmatmul.mubr.bf16.vlgmr.msra.gmra.mrb[0].mxu0 %v710_v10  ;;  %677 = vmatmul.mubr.bf16.vlgmr.msra.gmra.mrb[0].mxu1 %v711_v11 }
  0x23   :  { %672 = vmatprep.mubr.bf16.mxu0 %v712_v12  ;;  %680 = vmatprep.mubr.bf16.mxu1 %v713_v13 }
  0x2a   :  { %673 = vmatmul.mubr.bf16.gmra.mrb[4].mxu0 %v714_v14  ;;  %681 = vmatmul.mubr.bf16.gmra.mrb[4].mxu1 %v715_v15 }
  0xf5   :  { %v670_v29 = vpop.f32.mrb[0].mxu0  ;;  %v678_v30 = vpop.f32.mrb[0].mxu1 }
  0xf6   :  { %v339_v35 = vadd.f32 %v670_v29, %v804_v20  ;;  %v347_v36 = vadd.f32 %v678_v30, %v804_v20  ;;  %v216_v37 = vpop.f32.mrb[1].mxu0  ;;  %v248_v38 = vpop.f32.mrb[1].mxu1 }
  0xf7   :  { %v337_v41 = vadd.f32 %v804_v20, %v216_v37  ;;  %v345_v42 = vadd.f32 %v804_v20, %v248_v38  ;;  %v671_v43 = vpop.f32.mrb[2].mxu0  ;;  %v679_v44 = vpop.f32.mrb[2].mxu1 }
  0xf8   :  { %v387_v47 = vadd.f32 %v556_v23, %v339_v35  ;;  %v395_v48 = vadd.f32 %v572_v24, %v347_v36  ;;  %v340_v49 = vadd.f32 %v671_v43, %v804_v20  ;;  %v348_v50 = vadd.f32 %v679_v44, %v804_v20  ;;  %v219_v51 = vpop.f32.mrb[3].mxu0  ;;  %v251_v52 = vpop.f32.mrb[3].mxu1 }
  0xf9   :  { %v385_v53 = vadd.f32 %v552_v25, %v337_v41  ;;  %v393_v54 = vadd.f32 %v568_v26, %v345_v42  ;;  %v338_v55 = vadd.f32 %v804_v20, %v219_v51  ;;  %v346_v56 = vadd.f32 %v804_v20, %v251_v52 }
  0xfa   :  { %v388_v57 = vadd.f32 %v557_v31, %v340_v49  ;;  %v396_v58 = vadd.f32 %v573_v32, %v348_v50  ;;  %v403_v1 = vmax.f32 %v387_v47, 0.0  ;;  %v411_v2 = vmax.f32 %v395_v48, 0.0 }
  0xfb   :  { %v386_v61 = vadd.f32 %v553_v33, %v338_v55  ;;  %v394_v62 = vadd.f32 %v569_v34, %v346_v56  ;;  %v401_v5 = vmax.f32 %v385_v53, 0.0  ;;  %v409_v6 = vmax.f32 %v393_v54, 0.0 }
  0xfc   :  { %v404_v3 = vmax.f32 %v388_v57, 0.0  ;;  %v412_v4 = vmax.f32 %v396_v58, 0.0 }
  0xfd   :  { %v402_v7 = vmax.f32 %v386_v61, 0.0  ;;  %v410_v8 = vmax.f32 %v394_v62, 0.0  ;;  %v674_v9 = vpop.f32.mrb[4].mxu0  ;;  %v682_v10 = vpop.f32.mrb[4].mxu1 }
  0xfe   :  { %v590_v11 = vpack.c.bf16 %v404_v3, %v403_v1  ;;  %v610_v12 = vpack.c.bf16 %v412_v4, %v411_v2  ;;  %v343_v13 = vadd.f32 %v674_v9, %v804_v20  ;;  %v351_v14 = vadd.f32 %v682_v10, %v804_v20  ;;  %v232_v15 = vpop.f32.mrb[5].mxu0  ;;  %v264_v16 = vpop.f32.mrb[5].mxu1 }
  0xff   :  { %v585_v17 = vpack.c.bf16 %v402_v7, %v401_v5  ;;  %v605_v18 = vpack.c.bf16 %v410_v8, %v409_v6  ;;  %v341_v19 = vadd.f32 %v804_v20, %v232_v15  ;;  %v349_v21 = vadd.f32 %v804_v20, %v264_v16  ;;  %v675_v22 = vpop.f32.mrb[6].mxu0  ;;  %v683_v23 = vpop.f32.mrb[6].mxu1 }
 0x100   :  { %629 = vst [vmem:[%s878_s4 + $0x8] sm:$0xff] %v590_v11   ;;  %633 = vst [vmem:[%s878_s4 + $0x28] sm:$0xff] %v610_v12   ;;  %v391_v24 = vadd.f32 %v564_v39, %v343_v13  ;;  %v399_v25 = vadd.f32 %v580_v40, %v351_v14  ;;  %v344_v26 = vadd.f32 %v675_v22, %v804_v20  ;;  %v235_v28 = vpop.f32.mrb[7].mxu0  ;;  %v267_v29 = vpop.f32.mrb[7].mxu1 }
 0x101   :  { %v352_v27 = vadd.f32 %v683_v23, %v804_v20  ;;  %586 = vst [vmem:[%s878_s4] sm:$0xff] %v585_v17   ;;  %632 = vst [vmem:[%s878_s4 + $0x20] sm:$0xff] %v605_v18   ;;  %v389_v30 = vadd.f32 %v560_v45, %v341_v19  ;;  %v397_v31 = vadd.f32 %v576_v46, %v349_v21 }
 0x102   :  { %v342_v32 = vadd.f32 %v804_v20, %v235_v28  ;;  %v350_v33 = vadd.f32 %v804_v20, %v267_v29  ;;  %v392_v34 = vadd.f32 %v565_v59, %v344_v26  ;;  %v407_v38 = vmax.f32 %v391_v24, 0.0 }
 0x103   :  { %v400_v35 = vadd.f32 %v581_v60, %v352_v27  ;;  %v415_v39 = vmax.f32 %v399_v25, 0.0  ;;  %v405_v42 = vmax.f32 %v389_v30, 0.0  ;;  %v413_v43 = vmax.f32 %v397_v31, 0.0 }
 0x104   :  { %v390_v36 = vadd.f32 %v561_v63, %v342_v32  ;;  %v398_v37 = vadd.f32 %v577_v0, %v350_v33  ;;  %v408_v40 = vmax.f32 %v392_v34, 0.0 }
 0x105   :  { %v416_v41 = vmax.f32 %v400_v35, 0.0 }
 0x106   :  { %v406_v44 = vmax.f32 %v390_v36, 0.0  ;;  %v414_v47 = vmax.f32 %v398_v37, 0.0  ;;  %v600_v48 = vpack.c.bf16 %v408_v40, %v407_v38 }
 0x107   :  { %v620_v49 = vpack.c.bf16 %v416_v41, %v415_v39 }
 0x108   :  { %v595_v45 = vpack.c.bf16 %v406_v44, %v405_v42  ;;  %v615_v46 = vpack.c.bf16 %v414_v47, %v413_v43  ;;  %631 = vst [vmem:[%s878_s4 + $0x18] sm:$0xff] %v600_v48  }
 0x109   :  { %635 = vst [vmem:[%s878_s4 + $0x38] sm:$0xff] %v620_v49  }
 0x10a   :  { %630 = vst [vmem:[%s878_s4 + $0x10] sm:$0xff] %v595_v45   ;;  %634 = vst [vmem:[%s878_s4 + $0x30] sm:$0xff] %v615_v46  }

// kernel: _lambda_.58
= control target key start
LH: loop header
LB: loop body
LE: loop exit
PB: predicated region body
PF: predicated region fallthrough
CT: control target
= control target key end

     0   :  { %s705_s1 = inlined_call_operand.vmem [shape: bf16[128,128], index: 1, kind: input, shape index: {}]   ;;  %s706_s0 = inlined_call_operand.vmem [shape: bf16[128,128], index: 0, kind: input, shape index: {}]   ;;  %s707_s2 = inlined_call_operand.vmem [shape: f32[1,128], index: 2, kind: input, shape index: {}]   ;;  %s708_s3 = inlined_call_operand.vmem [shape: bf16[128,128], index: 3, kind: output, shape index: {}]  }
   0x1   :  { %v594_v0 = vld [vmem:[%s705_s1] sm:$0xff]   ;;  %v595_v1 = vld [vmem:[%s705_s1 + $0x8] sm:$0xff]   ;;  %v596_v2 = vld [vmem:[%s705_s1 + $0x10] sm:$0xff]  }
   0x2   :  { %546 = vmatprep.subr.bf16.mxu0 %v594_v0  ;;  %578 = vmatprep.subr.bf16.mxu1 %v594_v0  ;;  %v597_v3 = vld [vmem:[%s705_s1 + $0x18] sm:$0xff]   ;;  %v602_v4 = vld [vmem:[%s706_s0] sm:$0xff]   ;;  %v599_v7 = vld [vmem:[%s705_s1 + $0x28] sm:$0xff]  }
   0x3   :  { %547 = vmatpush3.bf16.msra.mxu0 %v594_v0  ;;  %586 = vmatpush3.bf16.msra.mxu1 %v594_v0  ;;  %v603_v5 = vld [vmem:[%s706_s0 + $0x20] sm:$0xff]   ;;  %v600_v8 = vld [vmem:[%s705_s1 + $0x30] sm:$0xff]   ;;  %v601_v9 = vld [vmem:[%s705_s1 + $0x38] sm:$0xff]  }
   0x4   :  { %548 = vmatprep.subr.bf16.mxu0 %v595_v1  ;;  %579 = vmatprep.subr.bf16.mxu1 %v595_v1  ;;  %v598_v6 = vld [vmem:[%s705_s1 + $0x20] sm:$0xff]   ;;  %v604_v10 = vld [vmem:[%s706_s0 + $0x8] sm:$0xff]   ;;  %v606_v12 = vld [vmem:[%s706_s0 + $0x10] sm:$0xff]  }
   0x5   :  { %562 = vmatprep.mubr.bf16.mxu0 %v602_v4  ;;  %570 = vmatprep.mubr.bf16.mxu1 %v603_v5  ;;  %v605_v11 = vld [vmem:[%s706_s0 + $0x28] sm:$0xff]   ;;  %v607_v13 = vld [vmem:[%s706_s0 + $0x30] sm:$0xff]   ;;  %v608_v14 = vld [vmem:[%s706_s0 + $0x18] sm:$0xff]  }
   0x6   :  { %v609_v15 = vld [vmem:[%s706_s0 + $0x38] sm:$0xff]   ;;  %v450_v17 = vld [vmem:[%s707_s2] ss:$0 sm:$0xff] }
   0x7   :  { %549 = vmatpush3.bf16.msra.mxu0 %v595_v1  ;;  %587 = vmatpush3.bf16.msra.mxu1 %v595_v1 }
   0x8   :  { %550 = vmatprep.subr.bf16.mxu0 %v596_v2  ;;  %580 = vmatprep.subr.bf16.mxu1 %v596_v2 }
   0xb   :  { %551 = vmatpush3.bf16.msra.mxu0 %v596_v2  ;;  %588 = vmatpush3.bf16.msra.mxu1 %v596_v2 }
   0xc   :  { %552 = vmatprep.subr.bf16.mxu0 %v597_v3  ;;  %581 = vmatprep.subr.bf16.mxu1 %v597_v3 }
   0xf   :  { %553 = vmatpush3.bf16.msra.mxu0 %v597_v3  ;;  %589 = vmatpush3.bf16.msra.mxu1 %v597_v3 }
  0x10   :  { %554 = vmatprep.subr.bf16.mxu0 %v598_v6  ;;  %582 = vmatprep.subr.bf16.mxu1 %v598_v6 }
  0x13   :  { %555 = vmatpush3.bf16.msra.mxu0 %v598_v6  ;;  %590 = vmatpush3.bf16.msra.mxu1 %v598_v6 }
  0x14   :  { %556 = vmatprep.subr.bf16.mxu0 %v599_v7  ;;  %583 = vmatprep.subr.bf16.mxu1 %v599_v7 }
  0x17   :  { %557 = vmatpush3.bf16.msra.mxu0 %v599_v7  ;;  %591 = vmatpush3.bf16.msra.mxu1 %v599_v7 }
  0x18   :  { %558 = vmatprep.subr.bf16.mxu0 %v600_v8  ;;  %584 = vmatprep.subr.bf16.mxu1 %v600_v8 }
  0x1b   :  { %559 = vmatpush3.bf16.msra.mxu0 %v600_v8  ;;  %592 = vmatpush3.bf16.msra.mxu1 %v600_v8 }
  0x1c   :  { %560 = vmatprep.subr.bf16.mxu0 %v601_v9  ;;  %585 = vmatprep.subr.bf16.mxu1 %v601_v9 }
  0x1f   :  { %561 = vmatpush3.bf16.msra.mxu0 %v601_v9  ;;  %593 = vmatpush3.bf16.msra.mxu1 %v601_v9 }
  0x22   :  { %563 = vmatmul.mubr.bf16.vlgmr.msra.gmra.mrb[0].mxu0 %v604_v10  ;;  %571 = vmatmul.mubr.bf16.vlgmr.msra.gmra.mrb[0].mxu1 %v605_v11 }
  0x23   :  { %566 = vmatprep.mubr.bf16.mxu0 %v606_v12  ;;  %574 = vmatprep.mubr.bf16.mxu1 %v607_v13 }
  0x2a   :  { %567 = vmatmul.mubr.bf16.gmra.mrb[4].mxu0 %v608_v14  ;;  %575 = vmatmul.mubr.bf16.gmra.mrb[4].mxu1 %v609_v15 }
  0xf5   :  { %v564_v16 = vpop.f32.mrb[0].mxu0  ;;  %v572_v18 = vpop.f32.mrb[0].mxu1 }
  0xf6   :  { %v213_v19 = vpop.f32.mrb[1].mxu0  ;;  %v245_v20 = vpop.f32.mrb[1].mxu1  ;;  %v336_v23 = vadd.f32 %v564_v16, %v450_v17  ;;  %v344_v24 = vadd.f32 %v572_v18, %v450_v17 }
  0xf7   :  { %v565_v21 = vpop.f32.mrb[2].mxu0  ;;  %v573_v22 = vpop.f32.mrb[2].mxu1  ;;  %v334_v29 = vadd.f32 %v450_v17, %v213_v19  ;;  %v342_v30 = vadd.f32 %v450_v17, %v245_v20 }
  0xf8   :  { %v337_v25 = vadd.f32 %v565_v21, %v450_v17  ;;  %v345_v26 = vadd.f32 %v573_v22, %v450_v17  ;;  %v216_v27 = vpop.f32.mrb[3].mxu0  ;;  %v248_v28 = vpop.f32.mrb[3].mxu1 }
  0xf9   :  { %v335_v31 = vadd.f32 %v450_v17, %v216_v27  ;;  %v343_v32 = vadd.f32 %v450_v17, %v248_v28 }
  0xfa   :  { %v491_v33 = vpack.c.bf16 %v337_v25, %v336_v23  ;;  %v511_v34 = vpack.c.bf16 %v345_v26, %v344_v24 }
  0xfb   :  { %v486_v35 = vpack.c.bf16 %v335_v31, %v334_v29  ;;  %v506_v36 = vpack.c.bf16 %v343_v32, %v342_v30 }
  0xfc   :  { %523 = vst [vmem:[%s708_s3 + $0x8] sm:$0xff] %v491_v33   ;;  %527 = vst [vmem:[%s708_s3 + $0x28] sm:$0xff] %v511_v34  }
  0xfd   :  { %487 = vst [vmem:[%s708_s3] sm:$0xff] %v486_v35   ;;  %526 = vst [vmem:[%s708_s3 + $0x20] sm:$0xff] %v506_v36   ;;  %v568_v37 = vpop.f32.mrb[4].mxu0  ;;  %v576_v38 = vpop.f32.mrb[4].mxu1 }
  0xfe   :  { %v229_v39 = vpop.f32.mrb[5].mxu0  ;;  %v261_v40 = vpop.f32.mrb[5].mxu1  ;;  %v340_v43 = vadd.f32 %v568_v37, %v450_v17  ;;  %v348_v44 = vadd.f32 %v576_v38, %v450_v17 }
  0xff   :  { %v569_v41 = vpop.f32.mrb[6].mxu0  ;;  %v577_v42 = vpop.f32.mrb[6].mxu1  ;;  %v338_v49 = vadd.f32 %v450_v17, %v229_v39  ;;  %v346_v50 = vadd.f32 %v450_v17, %v261_v40 }
 0x100   :  { %v341_v45 = vadd.f32 %v569_v41, %v450_v17  ;;  %v349_v46 = vadd.f32 %v577_v42, %v450_v17  ;;  %v232_v47 = vpop.f32.mrb[7].mxu0  ;;  %v264_v48 = vpop.f32.mrb[7].mxu1 }
 0x101   :  { %v339_v51 = vadd.f32 %v450_v17, %v232_v47  ;;  %v347_v52 = vadd.f32 %v450_v17, %v264_v48 }
 0x102   :  { %v501_v53 = vpack.c.bf16 %v341_v45, %v340_v43  ;;  %v521_v54 = vpack.c.bf16 %v349_v46, %v348_v44 }
 0x103   :  { %v496_v55 = vpack.c.bf16 %v339_v51, %v338_v49  ;;  %v516_v56 = vpack.c.bf16 %v347_v52, %v346_v50 }
 0x104   :  { %525 = vst [vmem:[%s708_s3 + $0x18] sm:$0xff] %v501_v53   ;;  %529 = vst [vmem:[%s708_s3 + $0x38] sm:$0xff] %v521_v54  }
 0x105   :  { %524 = vst [vmem:[%s708_s3 + $0x10] sm:$0xff] %v496_v55   ;;  %528 = vst [vmem:[%s708_s3 + $0x30] sm:$0xff] %v516_v56  }

// kernel: _lambda_.67
= control target key start
LH: loop header
LB: loop body
LE: loop exit
PB: predicated region body
PF: predicated region fallthrough
CT: control target
= control target key end

     0   :  { %s796_s12 = smov 0   ;;  %s798_s13 = smov 0   ;;  %s889_s0 = inlined_call_operand.vmem [shape: bf16[32,1152], index: 0, kind: input, shape index: {}]   ;;  %s890_s1 = inlined_call_operand.vmem [shape: bf16[1152,128], index: 1, kind: input, shape index: {}]   ;;  %s891_s2 = inlined_call_operand.vmem [shape: f32[1,128], index: 2, kind: input, shape index: {}]   ;;  %s892_s3 = inlined_call_operand.vmem [shape: bf16[32,128], index: 3, kind: output, shape index: {}]  }
   0x1   :  { %s800_s14 = smov 0   ;;  %s802_s15 = smov 0  }
   0x2   :  { %s804_s16 = smov 0  }
   0x3 LB: > { %s25_s17 = sadd.s32 1, %s769_s15  ;;  %p48_p1 = scmp.ne.s32.totalorder %s761_s13, %s757_s12  ;;  %s773_s16 = sphi %s804_s16, %s13_s16   ;;  %s769_s15 = sphi %s802_s15, %s896_s15   ;;  %s765_s14 = sphi %s800_s14, %s895_s14   ;;  %s761_s13 = sphi %s798_s13, %s894_s13   ;;  %s757_s12 = sphi %s796_s12, %s893_s12  }
   0x4   : > { %p26_p0 = scmp.ge.s32.totalorder %s25_s17, 9  ;;  %p49_p2 = scmp.eq.s32.totalorder %s773_s16, 0 }
   0x5   : > { %s41_s19 = sadd.s32 1, %s761_s13  ;;  %p611_p5 = scmp.ge.s32.totalorder %s773_s16, 9 }
   0x6   : > { %s898_s17 = smov (%p26_p0, %s25_s17), 0  ;;  %p50_p3 = por %p49_p2, %p48_p1 }
   0x7   : > { %s37_s18 = ssub.s32 %s769_s15, %s898_s17  ;;  %162 = sbr.rel (%p611_p5) target bundleno = 21 (0x15), region = 20 }
   0x8   : > { %p39_p4 = scmp.eq.s32.totalorder %s37_s18, 0 }
   0xa   : > { %s831_s20 = scalar_select %p39_p4, %s761_s13, %s41_s19  }
   0xe   : > { %165 = sbr.rel (!%p50_p3) target bundleno = 21 (0x15), region = 24  ;;  %s167_s21 = sand.u32 (%p50_p3), 1, %s761_s13  }
   0xf   : > { %s613_s22 = sshll.u32 (%p50_p3), %s769_s15, 2  ;;  %s612_s23 = sshll.u32 (%p50_p3), %s167_s21, 4 }
  0x10   : > { %s174_s26 = scalar_lea.vmem (%p50_p3), %s889_s0, %s613_s22  ;;  %s169_s27 = scalar_lea.vmem (%p50_p3), [#allocation3], %s612_s23 }
  0x11   : > { %v190_v0 = vld [vmem:[%s174_s26] sm:$0xf] (%p50_p3)  ;;  %v192_v1 = vld [vmem:[%s174_s26 + $0x24] sm:$0xf] (%p50_p3)  ;;  %v194_v2 = vld [vmem:[%s174_s26 + $0x48] sm:$0xf] (%p50_p3) }
  0x12   : > { %191 = vst [vmem:[%s169_s27] sm:$0xf] (%p50_p3), %v190_v0  ;;  %193 = vst [vmem:[%s169_s27 + $0x4] sm:$0xf] (%p50_p3), %v192_v1  ;;  %v196_v3 = vld [vmem:[%s174_s26 + $0x6c] sm:$0xf] (%p50_p3) }
  0x13   : > { %195 = vst [vmem:[%s169_s27 + $0x8] sm:$0xf] (%p50_p3), %v194_v2  ;;  %197 = vst [vmem:[%s169_s27 + $0xc] sm:$0xf] (%p50_p3), %v196_v3 }
  0x15 PF: > { %p614_p6 = scmp.ge.s32.totalorder %s773_s16, 1  ;;  %p239_p7 = scmp.lt.s32.totalorder %s773_s16, 10 }
  0x17   : > { %p240_p8 = pnand %p614_p6, %p239_p7 }
  0x18   : > { %s246_s28 = sand.u32 (!%p240_p8), 1, %s757_s12   ;;  %s616_s29 = sshll.u32 (!%p240_p8), %s765_s14, 4 }
  0x19   : > { %243 = sbr.rel (%p240_p8) target bundleno = 304 (0x130), region = 69  ;;  %s843_s30 = sshll.u32 (!%p240_p8), %s246_s28, 4 }
  0x1a   : > { %p285_p9 = scmp.lt.s32.totalorder (!%p240_p8), %s616_s29, 143  ;;  %s248_s8 = scalar_lea.vmem (!%p240_p8), [#allocation3], %s843_s30 }
  0x1b   : > { %p618_p10 = scmp.ne.s32.totalorder (!%p240_p8), %s765_s14, 0 }
  0x20   : > { %s900_s29 = smov (!%p285_p9, %s616_s29), 143  ;;  %309 = sbr.rel (%p618_p10) target bundleno = 39 (0x27), region = 77 }
  0x21   : > { %s617_s4 = sshll.u32 %s900_s29, 2  ;;  %v775_v4 = vmov (!%p618_p10), 0.0  }
  0x22   : > { %s848_s7 = scalar_lea.vmem %s890_s1, %s617_s4  ;;  %310 = vst [vmem:[#allocation2] sm:$0xff] (!%p618_p10), %v775_v4  ;;  %311 = vst [vmem:[#allocation2 + $0x8] sm:$0xff] (!%p618_p10), %v775_v4 }
  0x23   : > { %312 = vst [vmem:[#allocation2 + $0x10] sm:$0xff] (!%p618_p10), %v775_v4  ;;  %313 = vst [vmem:[#allocation2 + $0x18] sm:$0xff] (!%p618_p10), %v775_v4 }
  0x27 PF: > { %v725_v5 = vld [vmem:[%s848_s7] sm:$0xff]   ;;  %v726_v6 = vld [vmem:[%s848_s7 + $0x8] sm:$0xff]   ;;  %v727_v7 = vld [vmem:[%s848_s7 + $0x10] sm:$0xff]   ;;  %p629_p11 = scmp.ne.s32.totalorder %s765_s14, 8 }
  0x28   : > { %664 = vmatprep.subr.bf16.mxu0 %v725_v5  ;;  %v728_v8 = vld [vmem:[%s848_s7 + $0x18] sm:$0xff]   ;;  %v733_v9 = vld [vmem:[%s248_s8] sm:$0xff]   ;;  %v730_v11 = vld [vmem:[%s848_s7 + $0x28] sm:$0xff]  }
  0x29   : > { %665 = vmatpush3.bf16.msra.mxu0 %v725_v5  ;;  %680 = vmatprep.mubr.bf16.mxu0 %v733_v9  ;;  %v729_v10 = vld [vmem:[%s848_s7 + $0x20] sm:$0xff]   ;;  %v731_v12 = vld [vmem:[%s848_s7 + $0x30] sm:$0xff]   ;;  %v732_v13 = vld [vmem:[%s848_s7 + $0x38] sm:$0xff]  }
  0x2a   : > { %666 = vmatprep.subr.bf16.mxu0 %v726_v6  ;;  %v734_v14 = vld [vmem:[%s248_s8 + $0x8] sm:$0xff]   ;;  %v316_v15 = vld [vmem:[#allocation2 + $0x10] sm:$0xff]  ;;  %v314_v16 = vld [vmem:[#allocation2] sm:$0xff] }
  0x2b   : > { %v317_v18 = vld [vmem:[#allocation2 + $0x18] sm:$0xff]  ;;  %v315_v21 = vld [vmem:[#allocation2 + $0x8] sm:$0xff]  ;;  %v630_v29 = vld [vmem:[%s891_s2] ss:$0 sm:$0xff] (!%p629_p11) }
  0x2d   : > { %667 = vmatpush3.bf16.msra.mxu0 %v726_v6 }
  0x2e   : > { %668 = vmatprep.subr.bf16.mxu0 %v727_v7 }
  0x31   : > { %669 = vmatpush3.bf16.msra.mxu0 %v727_v7 }
  0x32   : > { %670 = vmatprep.subr.bf16.mxu0 %v728_v8 }
  0x35   : > { %671 = vmatpush3.bf16.msra.mxu0 %v728_v8 }
  0x36   : > { %672 = vmatprep.subr.bf16.mxu0 %v729_v10 }
  0x39   : > { %673 = vmatpush3.bf16.msra.mxu0 %v729_v10 }
  0x3a   : > { %674 = vmatprep.subr.bf16.mxu0 %v730_v11 }
  0x3d   : > { %675 = vmatpush3.bf16.msra.mxu0 %v730_v11 }
  0x3e   : > { %676 = vmatprep.subr.bf16.mxu0 %v731_v12 }
  0x41   : > { %677 = vmatpush3.bf16.msra.mxu0 %v731_v12 }
  0x42   : > { %678 = vmatprep.subr.bf16.mxu0 %v732_v13 }
  0x45   : > { %679 = vmatpush3.bf16.msra.mxu0 %v732_v13 }
  0x48   : > { %681 = vmatmul.mubr.bf16.vlgmr.msra.gmra.mrb[0].mxu0 %v734_v14 }
 0x11b   : > { %v682_v17 = vpop.f32.mrb[0].mxu0  ;;  %458 = sbr.rel (%p629_p11) target bundleno = 304 (0x130), region = 81 }
 0x11c   : > { %v449_v19 = vadd.f32 %v682_v17, %v316_v15  ;;  %v432_v20 = vpop.f32.mrb[1].mxu0 }
 0x11d   : > { %v447_v22 = vadd.f32 %v432_v20, %v314_v16  ;;  %v683_v23 = vpop.f32.mrb[2].mxu0 }
 0x11e   : > { %453 = vst [vmem:[#allocation2 + $0x10] sm:$0xff] %v449_v19  ;;  %v450_v24 = vadd.f32 %v683_v23, %v317_v18  ;;  %v435_v25 = vpop.f32.mrb[3].mxu0 }
 0x11f   : > { %451 = vst [vmem:[#allocation2] sm:$0xff] %v447_v22  ;;  %v448_v26 = vadd.f32 %v435_v25, %v315_v21 }
 0x120   : > { %454 = vst [vmem:[#allocation2 + $0x18] sm:$0xff] %v450_v24 }
 0x121   : > { %452 = vst [vmem:[#allocation2 + $0x8] sm:$0xff] %v448_v26 }
 0x125   : > { %v461_v32 = vld [vmem:[#allocation2 + $0x10] sm:$0xff] }
 0x126   : > { %v459_v27 = vld [vmem:[#allocation2] sm:$0xff]  ;;  %v472_v34 = vadd.f32 %v630_v29, %v461_v32 }
 0x127   : > { %v470_v30 = vadd.f32 %v630_v29, %v459_v27  ;;  %v462_v33 = vld [vmem:[#allocation2 + $0x18] sm:$0xff] }
 0x128   : > { %v460_v28 = vld [vmem:[#allocation2 + $0x8] sm:$0xff]  ;;  %v473_v35 = vadd.f32 %v630_v29, %v462_v33  ;;  %v476_v38 = vmax.f32 %v472_v34, 0.0 }
 0x129   : > { %v471_v31 = vadd.f32 %v630_v29, %v460_v28  ;;  %v474_v36 = vmax.f32 %v470_v30, 0.0 }
 0x12a   : > { %v477_v39 = vmax.f32 %v473_v35, 0.0 }
 0x12b   : > { %v475_v37 = vmax.f32 %v471_v31, 0.0 }
 0x12c   : > { %v651_v41 = vpack.c.bf16 %v477_v39, %v476_v38 }
 0x12d   : > { %v646_v40 = vpack.c.bf16 %v475_v37, %v474_v36 }
 0x12e   : > { %653 = vst [vmem:[%s892_s3 + $0x8] sm:$0xff] %v651_v41  }
 0x12f   : > { %647 = vst [vmem:[%s892_s3] sm:$0xff] %v646_v40  }
 0x130 PF: > { %s13_s16 = sadd.s32 1, %s773_s16   ;;  %s893_s12 = smov %s761_s13 }
 0x131   : > { %p10_p12 = scmp.ge.s32.totalorder %s13_s16, 11   ;;  %s894_s13 = smov %s831_s20 }
 0x132   : > { %s895_s14 = smov %s769_s15  ;;  %s896_s15 = smov %s898_s17 }
 0x133   :  { %12 = sbr.rel (!%p10_p12) target bundleno = 3 (0x3), region = 122 }

// kernel: _lambda_.68
= control target key start
LH: loop header
LB: loop body
LE: loop exit
PB: predicated region body
PF: predicated region fallthrough
CT: control target
= control target key end

     0   :  { %s875_s12 = smov 0   ;;  %s877_s13 = smov 0   ;;  %s980_s0 = inlined_call_operand.vmem [shape: bf16[32,128], index: 0, kind: input, shape index: {}]   ;;  %s981_s1 = inlined_call_operand.vmem [shape: bf16[128,256], index: 1, kind: input, shape index: {}]   ;;  %s982_s2 = inlined_call_operand.vmem [shape: f32[1,256], index: 2, kind: input, shape index: {}]   ;;  %s983_s3 = inlined_call_operand.vmem [shape: bf16[32,256], index: 3, kind: output, shape index: {}]  }
   0x1   :  { %s879_s14 = smov 0   ;;  %s881_s15 = smov 0  }
   0x2   :  { %s883_s16 = smov 0  }
   0x3 LB: > { %s28_s17 = sadd.s32 1, %s849_s15  ;;  %s691_s18 = sadd.s32 4294967295, %s853_s16   ;;  %s853_s16 = sphi %s883_s16, %s13_s16   ;;  %s849_s15 = sphi %s881_s15, %s988_s15   ;;  %s845_s14 = sphi %s879_s14, %s987_s14   ;;  %s841_s13 = sphi %s877_s13, %s986_s13   ;;  %s837_s12 = sphi %s875_s12, %s985_s12  }
   0x4   : > { %p30_p0 = scmp.ge.s32.totalorder %s28_s17, 2  ;;  %p76_p1 = scmp.ne.s32.totalorder %s841_s13, %s837_s12 }
   0x5   : > { %p77_p2 = scmp.eq.s32.totalorder %s853_s16, 0  ;;  %p134_p4 = scmp.eq.s32.totalorder %s691_s18, 1 }
   0x6   : > { %s990_s17 = smov (%p30_p0, %s28_s17), 0  ;;  %s69_s20 = sadd.s32 1, %s841_s13 }
   0x7   : > { %p78_p3 = por %p77_p2, %p76_p1  ;;  %s65_s19 = ssub.s32 %s849_s15, %s990_s17 }
   0x8   : > { %p67_p5 = scmp.eq.s32.totalorder %s65_s19, 0  ;;  %p910_p6 = por %p134_p4, %p76_p1 }
   0x9   : > { %p695_p7 = scmp.ge.s32.totalorder %s853_s16, 2 }
   0xa   : > { %s915_s22 = scalar_select %p67_p5, %s841_s13, %s69_s20  }
   0xb   : > { %168 = sbr.rel (%p695_p7) target bundleno = 32 (0x20), region = 20 }
  0x12   : > { %171 = sbr.rel (!%p78_p3) target bundleno = 32 (0x20), region = 24  ;;  %s173_s23 = sand.u32 (%p78_p3), 1, %s841_s13  }
  0x13   : > { %s697_s24 = sshll.u32 (%p78_p3), %s849_s15, 2  ;;  %s696_s25 = sshll.u32 (%p78_p3), %s173_s23, 6 }
  0x14   : > { %s923_s28 = scalar_lea.vmem (%p78_p3), %s981_s1, %s697_s24  ;;  %s175_s29 = scalar_lea.vmem (%p78_p3), [#allocation3], %s696_s25 }
  0x15   : > { %v196_v0 = vld [vmem:[%s923_s28] sm:$0xf] (%p78_p3)  ;;  %v198_v1 = vld [vmem:[%s923_s28 + $0x8] sm:$0xf] (%p78_p3)  ;;  %v200_v2 = vld [vmem:[%s923_s28 + $0x10] sm:$0xf] (%p78_p3) }
  0x16   : > { %197 = vst [vmem:[%s175_s29] sm:$0xf] (%p78_p3), %v196_v0  ;;  %199 = vst [vmem:[%s175_s29 + $0x4] sm:$0xf] (%p78_p3), %v198_v1  ;;  %v202_v3 = vld [vmem:[%s923_s28 + $0x18] sm:$0xf] (%p78_p3) }
  0x17   : > { %v204_v4 = vld [vmem:[%s923_s28 + $0x20] sm:$0xf] (%p78_p3)  ;;  %201 = vst [vmem:[%s175_s29 + $0x8] sm:$0xf] (%p78_p3), %v200_v2  ;;  %203 = vst [vmem:[%s175_s29 + $0xc] sm:$0xf] (%p78_p3), %v202_v3 }
  0x18   : > { %205 = vst [vmem:[%s175_s29 + $0x10] sm:$0xf] (%p78_p3), %v204_v4  ;;  %v206_v5 = vld [vmem:[%s923_s28 + $0x28] sm:$0xf] (%p78_p3)  ;;  %v208_v6 = vld [vmem:[%s923_s28 + $0x30] sm:$0xf] (%p78_p3) }
  0x19   : > { %v210_v7 = vld [vmem:[%s923_s28 + $0x38] sm:$0xf]  ;;  %207 = vst [vmem:[%s175_s29 + $0x14] sm:$0xf] %v206_v5  ;;  %209 = vst [vmem:[%s175_s29 + $0x18] sm:$0xf] %v208_v6 }
  0x1a   : > { %211 = vst [vmem:[%s175_s29 + $0x1c] sm:$0xf] %v210_v7  ;;  %v212_v8 = vld [vmem:[%s923_s28 + $0x40] sm:$0xf]  ;;  %v214_v9 = vld [vmem:[%s923_s28 + $0x48] sm:$0xf] }
  0x1b   : > { %v216_v10 = vld [vmem:[%s923_s28 + $0x50] sm:$0xf]  ;;  %213 = vst [vmem:[%s175_s29 + $0x20] sm:$0xf] %v212_v8  ;;  %215 = vst [vmem:[%s175_s29 + $0x24] sm:$0xf] %v214_v9 }
  0x1c   : > { %217 = vst [vmem:[%s175_s29 + $0x28] sm:$0xf] %v216_v10  ;;  %v218_v11 = vld [vmem:[%s923_s28 + $0x58] sm:$0xf]  ;;  %v220_v12 = vld [vmem:[%s923_s28 + $0x60] sm:$0xf] }
  0x1d   : > { %v222_v13 = vld [vmem:[%s923_s28 + $0x68] sm:$0xf]  ;;  %219 = vst [vmem:[%s175_s29 + $0x2c] sm:$0xf] %v218_v11  ;;  %221 = vst [vmem:[%s175_s29 + $0x30] sm:$0xf] %v220_v12 }
  0x1e   : > { %223 = vst [vmem:[%s175_s29 + $0x34] sm:$0xf] %v222_v13  ;;  %v224_v14 = vld [vmem:[%s923_s28 + $0x70] sm:$0xf]  ;;  %v226_v15 = vld [vmem:[%s923_s28 + $0x78] sm:$0xf] }
  0x1f   : > { %225 = vst [vmem:[%s175_s29 + $0x38] sm:$0xf] %v224_v14  ;;  %227 = vst [vmem:[%s175_s29 + $0x3c] sm:$0xf] %v226_v15 }
  0x20 PF: > { %p698_p8 = scmp.ge.s32.totalorder %s853_s16, 1  ;;  %p287_p9 = scmp.lt.s32.totalorder %s853_s16, 3 }
  0x22   : > { %p288_p10 = pnand %p698_p8, %p287_p9 }
  0x23   : > { %s294_s30 = sand.u32 (!%p288_p10), 1, %s837_s12   ;;  %v813_v16 = vld [vmem:[%s980_s0] sm:$0xff] (!%p288_p10)   ;;  %v814_v25 = vld [vmem:[%s980_s0 + $0x8] sm:$0xff] (!%p288_p10)   ;;  %p337_p11 = scmp.lt.s32.totalorder (!%p288_p10), %s845_s14, 1 }
  0x24   : > { %291 = sbr.rel (%p288_p10) target bundleno = 300 (0x12c), region = 69  ;;  %s699_s6 = sshll.u32 (!%p288_p10), %s294_s30, 6  ;;  %761 = vmatprep.mubr.bf16.mxu0 (!%p288_p10), %v813_v16 }
  0x25   : > { %s296_s7 = scalar_lea.vmem (!%p288_p10), [#allocation3], %s699_s6  ;;  %s700_s20 = sshll.u32 (!%p288_p10), %s294_s30, 4 }
  0x26   : > { %v805_v17 = vld [vmem:[%s296_s7] sm:$0xff] (!%p288_p10)   ;;  %v806_v18 = vld [vmem:[%s296_s7 + $0x8] sm:$0xff] (!%p288_p10)   ;;  %v807_v19 = vld [vmem:[%s296_s7 + $0x10] sm:$0xff] (!%p288_p10)   ;;  %s326_s23 = scalar_lea.vmem (!%p288_p10), [#allocation4], %s700_s20 }
  0x27   : > { %745 = vmatprep.subr.bf16.mxu0 (!%p288_p10), %v805_v17  ;;  %v808_v20 = vld [vmem:[%s296_s7 + $0x18] sm:$0xff] (!%p288_p10)   ;;  %v809_v21 = vld [vmem:[%s296_s7 + $0x20] sm:$0xff] (!%p288_p10)   ;;  %v810_v22 = vld [vmem:[%s296_s7 + $0x28] sm:$0xff] (!%p288_p10)  }
  0x28   : > { %746 = vmatpush3.bf16.msra.mxu0 (!%p288_p10), %v805_v17  ;;  %v811_v23 = vld [vmem:[%s296_s7 + $0x30] sm:$0xff] (!%p288_p10)   ;;  %v812_v24 = vld [vmem:[%s296_s7 + $0x38] sm:$0xff] (!%p288_p10)  }
  0x29   : > { %747 = vmatprep.subr.bf16.mxu0 (!%p288_p10), %v806_v18 }
  0x2b   : > { %s338_s10 = scalar_select %p337_p11, %s845_s14, 1 }
  0x2c   : > { %748 = vmatpush3.bf16.msra.mxu0 %v806_v18  ;;  %s717_s24 = sshll.u32 (%p910_p6), %s845_s14, 2 }
  0x2d   : > { %749 = vmatprep.subr.bf16.mxu0 %v807_v19  ;;  %s339_s19 = scalar_lea.vmem %s982_s2, %s338_s10  ;;  %s540_s26 = scalar_lea.vmem (%p910_p6), %s983_s3, %s717_s24 }
  0x2e   : > { %v711_v27 = vld [vmem:[%s339_s19] ss:$0 sm:$0xff] }
  0x30   : > { %750 = vmatpush3.bf16.msra.mxu0 %v807_v19 }
  0x31   : > { %751 = vmatprep.subr.bf16.mxu0 %v808_v20 }
  0x34   : > { %752 = vmatpush3.bf16.msra.mxu0 %v808_v20 }
  0x35   : > { %753 = vmatprep.subr.bf16.mxu0 %v809_v21 }
  0x38   : > { %754 = vmatpush3.bf16.msra.mxu0 %v809_v21 }
  0x39   : > { %755 = vmatprep.subr.bf16.mxu0 %v810_v22 }
  0x3c   : > { %756 = vmatpush3.bf16.msra.mxu0 %v810_v22 }
  0x3d   : > { %757 = vmatprep.subr.bf16.mxu0 %v811_v23 }
  0x40   : > { %758 = vmatpush3.bf16.msra.mxu0 %v811_v23 }
  0x41   : > { %759 = vmatprep.subr.bf16.mxu0 %v812_v24 }
  0x44   : > { %760 = vmatpush3.bf16.msra.mxu0 %v812_v24 }
  0x47   : > { %762 = vmatmul.mubr.bf16.vlgmr.msra.gmra.mrb[0].mxu0 %v814_v25 }
 0x11a   : > { %v763_v26 = vpop.f32.mrb[0].mxu0 }
 0x11b   : > { %v468_v28 = vpop.f32.mrb[1].mxu0  ;;  %v507_v30 = vadd.f32 %v763_v26, %v711_v27 }
 0x11c   : > { %v764_v29 = vpop.f32.mrb[2].mxu0  ;;  %v505_v33 = vadd.f32 %v711_v27, %v468_v28  ;;  %535 = sbr.rel (!%p910_p6) target bundleno = 300 (0x12c), region = 85 }
 0x11d   : > { %v508_v31 = vadd.f32 %v764_v29, %v711_v27  ;;  %v471_v32 = vpop.f32.mrb[3].mxu0 }
 0x11e   : > { %v506_v34 = vadd.f32 %v711_v27, %v471_v32 }
 0x11f   : > { %v732_v35 = vpack.c.bf16 %v508_v31, %v507_v30 }
 0x120   : > { %v727_v36 = vpack.c.bf16 %v506_v34, %v505_v33 }
 0x121   : > { %734 = vst [vmem:[%s326_s23 + $0x8] sm:$0xff] %v732_v35  }
 0x122   : > { %728 = vst [vmem:[%s326_s23] sm:$0xff] %v727_v36  }
 0x128   : > { %v560_v39 = vld [vmem:[%s326_s23 + $0x8] sm:$0xf]  ;;  %v562_v40 = vld [vmem:[%s326_s23 + $0xc] sm:$0xf] }
 0x129   : > { %v556_v37 = vld [vmem:[%s326_s23] sm:$0xf]  ;;  %v558_v38 = vld [vmem:[%s326_s23 + $0x4] sm:$0xf]  ;;  %561 = vst [vmem:[%s540_s26 + $0x10] sm:$0xf] %v560_v39 }
 0x12a   : > { %557 = vst [vmem:[%s540_s26] sm:$0xf] %v556_v37  ;;  %559 = vst [vmem:[%s540_s26 + $0x8] sm:$0xf] %v558_v38 }
 0x12b   : > { %563 = vst [vmem:[%s540_s26 + $0x18] sm:$0xf] %v562_v40 }
 0x12c PF: > { %s13_s16 = sadd.s32 1, %s853_s16   ;;  %s985_s12 = smov %s841_s13 }
 0x12d   : > { %p10_p12 = scmp.ge.s32.totalorder %s13_s16, 4   ;;  %s986_s13 = smov %s915_s22 }
 0x12e   : > { %s987_s14 = smov %s849_s15  ;;  %s988_s15 = smov %s990_s17 }
 0x12f   :  { %12 = sbr.rel (!%p10_p12) target bundleno = 3 (0x3), region = 163 }

// kernel: _lambda_.69
= control target key start
LH: loop header
LB: loop body
LE: loop exit
PB: predicated region body
PF: predicated region fallthrough
CT: control target
= control target key end

     0   :  { %s1034_s15 = smov 0   ;;  %s1036_s16 = smov 0   ;;  %s1152_s0 = inlined_call_operand.vmem [shape: bf16[32,128], index: 0, kind: input, shape index: {}]   ;;  %s1153_s1 = inlined_call_operand.vmem [shape: bf16[128,256], index: 1, kind: input, shape index: {}]   ;;  %s1154_s2 = inlined_call_operand.vmem [shape: f32[1,256], index: 2, kind: input, shape index: {}]   ;;  %s1155_s3 = inlined_call_operand.vmem [shape: bf16[32,256], index: 3, kind: input, shape index: {}]   ;;  %s1156_s4 = inlined_call_operand.vmem [shape: bf16[32,256], index: 4, kind: output, shape index: {}]  }
   0x1   :  { %s1038_s17 = smov 0   ;;  %s1040_s18 = smov 0  }
   0x2   :  { %s1042_s19 = smov 0  }
   0x3 LB: > { %s29_s20 = sadd.s32 1, %s1003_s18  ;;  %s833_s21 = sadd.s32 4294967295, %s1007_s19   ;;  %s1007_s19 = sphi %s1042_s19, %s14_s19   ;;  %s1003_s18 = sphi %s1040_s18, %s1162_s18   ;;  %s999_s17 = sphi %s1038_s17, %s1161_s17   ;;  %s995_s16 = sphi %s1036_s16, %s1160_s16   ;;  %s991_s15 = sphi %s1034_s15, %s1159_s15  }
   0x4   : > { %p31_p0 = scmp.ge.s32.totalorder %s29_s20, 2  ;;  %p77_p1 = scmp.ne.s32.totalorder %s995_s16, %s991_s15 }
   0x5   : > { %p78_p2 = scmp.eq.s32.totalorder %s1007_s19, 0  ;;  %p163_p4 = scmp.eq.s32.totalorder %s833_s21, 1 }
   0x6   : > { %s1164_s20 = smov (%p31_p0, %s29_s20), 0  ;;  %s70_s24 = sadd.s32 1, %s995_s16 }
   0x7   : > { %p1066_p3 = por %p78_p2, %p77_p1  ;;  %s66_s23 = ssub.s32 %s1003_s18, %s1164_s20 }
   0x8   : > { %p68_p5 = scmp.eq.s32.totalorder %s66_s23, 0  ;;  %p1073_p6 = por %p163_p4, %p77_p1 }
   0x9   : > { %p837_p7 = scmp.ge.s32.totalorder %s1007_s19, 2 }
   0xa   : > { %s1078_s26 = scalar_select %p68_p5, %s995_s16, %s70_s24  }
   0xb   : > { %197 = sbr.rel (%p837_p7) target bundleno = 39 (0x27), region = 20 }
  0x12   : > { %200 = sbr.rel (!%p1066_p3) target bundleno = 32 (0x20), region = 24  ;;  %s202_s27 = sand.u32 (%p1066_p3), 1, %s995_s16  }
  0x13   : > { %s839_s28 = sshll.u32 (%p1066_p3), %s1003_s18, 2  ;;  %s838_s29 = sshll.u32 (%p1066_p3), %s202_s27, 6 }
  0x14   : > { %s1088_s6 = scalar_lea.vmem (%p1066_p3), %s1153_s1, %s839_s28  ;;  %s204_s7 = scalar_lea.vmem (%p1066_p3), [#allocation3], %s838_s29 }
  0x15   : > { %v225_v0 = vld [vmem:[%s1088_s6] sm:$0xf] (%p1066_p3)  ;;  %v227_v1 = vld [vmem:[%s1088_s6 + $0x8] sm:$0xf] (%p1066_p3)  ;;  %v229_v2 = vld [vmem:[%s1088_s6 + $0x10] sm:$0xf] (%p1066_p3) }
  0x16   : > { %226 = vst [vmem:[%s204_s7] sm:$0xf] (%p1066_p3), %v225_v0  ;;  %228 = vst [vmem:[%s204_s7 + $0x4] sm:$0xf] (%p1066_p3), %v227_v1  ;;  %v231_v3 = vld [vmem:[%s1088_s6 + $0x18] sm:$0xf] (%p1066_p3) }
  0x17   : > { %v233_v4 = vld [vmem:[%s1088_s6 + $0x20] sm:$0xf] (%p1066_p3)  ;;  %230 = vst [vmem:[%s204_s7 + $0x8] sm:$0xf] (%p1066_p3), %v229_v2  ;;  %232 = vst [vmem:[%s204_s7 + $0xc] sm:$0xf] (%p1066_p3), %v231_v3 }
  0x18   : > { %234 = vst [vmem:[%s204_s7 + $0x10] sm:$0xf] (%p1066_p3), %v233_v4  ;;  %v235_v5 = vld [vmem:[%s1088_s6 + $0x28] sm:$0xf] (%p1066_p3)  ;;  %v237_v6 = vld [vmem:[%s1088_s6 + $0x30] sm:$0xf] (%p1066_p3) }
  0x19   : > { %v239_v7 = vld [vmem:[%s1088_s6 + $0x38] sm:$0xf]  ;;  %236 = vst [vmem:[%s204_s7 + $0x14] sm:$0xf] %v235_v5  ;;  %238 = vst [vmem:[%s204_s7 + $0x18] sm:$0xf] %v237_v6 }
  0x1a   : > { %240 = vst [vmem:[%s204_s7 + $0x1c] sm:$0xf] %v239_v7  ;;  %v241_v8 = vld [vmem:[%s1088_s6 + $0x40] sm:$0xf]  ;;  %v243_v9 = vld [vmem:[%s1088_s6 + $0x48] sm:$0xf] }
  0x1b   : > { %v245_v10 = vld [vmem:[%s1088_s6 + $0x50] sm:$0xf]  ;;  %242 = vst [vmem:[%s204_s7 + $0x20] sm:$0xf] %v241_v8  ;;  %244 = vst [vmem:[%s204_s7 + $0x24] sm:$0xf] %v243_v9 }
  0x1c   : > { %246 = vst [vmem:[%s204_s7 + $0x28] sm:$0xf] %v245_v10  ;;  %v247_v11 = vld [vmem:[%s1088_s6 + $0x58] sm:$0xf]  ;;  %v249_v12 = vld [vmem:[%s1088_s6 + $0x60] sm:$0xf] }
  0x1d   : > { %v251_v13 = vld [vmem:[%s1088_s6 + $0x68] sm:$0xf]  ;;  %248 = vst [vmem:[%s204_s7 + $0x2c] sm:$0xf] %v247_v11  ;;  %250 = vst [vmem:[%s204_s7 + $0x30] sm:$0xf] %v249_v12 }
  0x1e   : > { %252 = vst [vmem:[%s204_s7 + $0x34] sm:$0xf] %v251_v13  ;;  %v253_v14 = vld [vmem:[%s1088_s6 + $0x70] sm:$0xf]  ;;  %v255_v15 = vld [vmem:[%s1088_s6 + $0x78] sm:$0xf] }
  0x1f   : > { %254 = vst [vmem:[%s204_s7 + $0x38] sm:$0xf] %v253_v14  ;;  %256 = vst [vmem:[%s204_s7 + $0x3c] sm:$0xf] %v255_v15 }
  0x20 PF: > { %317 = sbr.rel (!%p1066_p3) target bundleno = 39 (0x27), region = 69  ;;  %s319_s8 = sand.u32 (%p1066_p3), 1, %s995_s16  }
  0x21   : > { %s841_s9 = sshll.u32 (%p1066_p3), %s1003_s18, 2  ;;  %s840_s10 = sshll.u32 (%p1066_p3), %s319_s8, 4 }
  0x22   : > { %s326_s13 = scalar_lea.vmem (%p1066_p3), %s1155_s3, %s841_s9  ;;  %s321_s14 = scalar_lea.vmem (%p1066_p3), [#allocation4], %s840_s10 }
  0x23   : > { %v342_v16 = vld [vmem:[%s326_s13] sm:$0xf] (%p1066_p3)  ;;  %v344_v17 = vld [vmem:[%s326_s13 + $0x8] sm:$0xf] (%p1066_p3)  ;;  %v346_v18 = vld [vmem:[%s326_s13 + $0x10] sm:$0xf] (%p1066_p3) }
  0x24   : > { %343 = vst [vmem:[%s321_s14] sm:$0xf] (%p1066_p3), %v342_v16  ;;  %345 = vst [vmem:[%s321_s14 + $0x4] sm:$0xf] (%p1066_p3), %v344_v17  ;;  %v348_v19 = vld [vmem:[%s326_s13 + $0x18] sm:$0xf] (%p1066_p3) }
  0x25   : > { %347 = vst [vmem:[%s321_s14 + $0x8] sm:$0xf] (%p1066_p3), %v346_v18  ;;  %349 = vst [vmem:[%s321_s14 + $0xc] sm:$0xf] (%p1066_p3), %v348_v19 }
  0x27 PF: > { %p842_p8 = scmp.ge.s32.totalorder %s1007_s19, 1  ;;  %p379_p9 = scmp.lt.s32.totalorder %s1007_s19, 3 }
  0x29   : > { %p380_p10 = pnand %p842_p8, %p379_p9 }
  0x2a   : > { %s386_s21 = sand.u32 (!%p380_p10), 1, %s991_s15   ;;  %v967_v20 = vld [vmem:[%s1152_s0] sm:$0xff] (!%p380_p10)   ;;  %v968_v29 = vld [vmem:[%s1152_s0 + $0x8] sm:$0xff] (!%p380_p10)   ;;  %p442_p11 = scmp.lt.s32.totalorder (!%p380_p10), %s999_s17, 1 }
  0x2b   : > { %383 = sbr.rel (%p380_p10) target bundleno = 311 (0x137), region = 110  ;;  %s843_s24 = sshll.u32 (!%p380_p10), %s386_s21, 6  ;;  %915 = vmatprep.mubr.bf16.mxu0 (!%p380_p10), %v967_v20 }
  0x2c   : > { %s388_s27 = scalar_lea.vmem (!%p380_p10), [#allocation3], %s843_s24  ;;  %s844_s30 = sshll.u32 (!%p380_p10), %s386_s21, 4 }
  0x2d   : > { %v959_v21 = vld [vmem:[%s388_s27] sm:$0xff] (!%p380_p10)   ;;  %v960_v22 = vld [vmem:[%s388_s27 + $0x8] sm:$0xff] (!%p380_p10)   ;;  %v961_v23 = vld [vmem:[%s388_s27 + $0x10] sm:$0xff] (!%p380_p10)   ;;  %s395_s9 = scalar_lea.vmem (!%p380_p10), [#allocation4], %s844_s30  ;;  %s431_s15 = scalar_lea.vmem (!%p380_p10), [#allocation5], %s844_s30 }
  0x2e   : > { %899 = vmatprep.subr.bf16.mxu0 (!%p380_p10), %v959_v21  ;;  %v962_v24 = vld [vmem:[%s388_s27 + $0x18] sm:$0xff] (!%p380_p10)   ;;  %v963_v25 = vld [vmem:[%s388_s27 + $0x20] sm:$0xff] (!%p380_p10)   ;;  %v964_v26 = vld [vmem:[%s388_s27 + $0x28] sm:$0xff] (!%p380_p10)  }
  0x2f   : > { %900 = vmatpush3.bf16.msra.mxu0 (!%p380_p10), %v959_v21  ;;  %v965_v27 = vld [vmem:[%s388_s27 + $0x30] sm:$0xff] (!%p380_p10)   ;;  %v966_v28 = vld [vmem:[%s388_s27 + $0x38] sm:$0xff] (!%p380_p10)  }
  0x30   : > { %901 = vmatprep.subr.bf16.mxu0 (!%p380_p10), %v960_v22  ;;  %v887_v30 = vld [vmem:[%s395_s9 + $0x8] sm:$0xff] (!%p380_p10)   ;;  %v870_v31 = vld [vmem:[%s395_s9] sm:$0xff] (!%p380_p10)  }
  0x31   : > { %v875_v33 = vunpack.c.l.bf16 (!%p380_p10), %v887_v30  ;;  %v871_v35 = vunpack.c.l.bf16 (!%p380_p10), %v870_v31  ;;  %v876_v38 = vunpack.c.h.bf16 (!%p380_p10), %v887_v30  ;;  %v872_v41 = vunpack.c.h.bf16 (!%p380_p10), %v870_v31 }
  0x32   : > { %s443_s5 = scalar_select %p442_p11, %s999_s17, 1 }
  0x33   : > { %902 = vmatpush3.bf16.msra.mxu0 %v960_v22  ;;  %s862_s10 = sshll.u32 (%p1073_p6), %s999_s17, 2 }
  0x34   : > { %903 = vmatprep.subr.bf16.mxu0 %v961_v23  ;;  %s444_s8 = scalar_lea.vmem %s1154_s2, %s443_s5  ;;  %s662_s13 = scalar_lea.vmem (%p1073_p6), %s1156_s4, %s862_s10 }
  0x35   : > { %v856_v32 = vld [vmem:[%s444_s8] ss:$0 sm:$0xff] }
  0x37   : > { %904 = vmatpush3.bf16.msra.mxu0 %v961_v23 }
  0x38   : > { %905 = vmatprep.subr.bf16.mxu0 %v962_v24 }
  0x3b   : > { %906 = vmatpush3.bf16.msra.mxu0 %v962_v24 }
  0x3c   : > { %907 = vmatprep.subr.bf16.mxu0 %v963_v25 }
  0x3f   : > { %908 = vmatpush3.bf16.msra.mxu0 %v963_v25 }
  0x40   : > { %909 = vmatprep.subr.bf16.mxu0 %v964_v26 }
  0x43   : > { %910 = vmatpush3.bf16.msra.mxu0 %v964_v26 }
  0x44   : > { %911 = vmatprep.subr.bf16.mxu0 %v965_v27 }
  0x47   : > { %912 = vmatpush3.bf16.msra.mxu0 %v965_v27 }
  0x48   : > { %913 = vmatprep.subr.bf16.mxu0 %v966_v28 }
  0x4b   : > { %914 = vmatpush3.bf16.msra.mxu0 %v966_v28 }
  0x4e   : > { %916 = vmatmul.mubr.bf16.vlgmr.msra.gmra.mrb[0].mxu0 %v968_v29 }
 0x121   : > { %v917_v34 = vpop.f32.mrb[0].mxu0 }
 0x122   : > { %v613_v36 = vadd.f32 %v917_v34, %v856_v32  ;;  %v574_v37 = vpop.f32.mrb[1].mxu0 }
 0x123   : > { %v611_v39 = vadd.f32 %v856_v32, %v574_v37  ;;  %v918_v40 = vpop.f32.mrb[2].mxu0 }
 0x124   : > { %v625_v42 = vadd.f32 %v875_v33, %v613_v36  ;;  %v614_v43 = vadd.f32 %v918_v40, %v856_v32  ;;  %v577_v44 = vpop.f32.mrb[3].mxu0 }
 0x125   : > { %v623_v45 = vadd.f32 %v871_v35, %v611_v39  ;;  %v612_v46 = vadd.f32 %v856_v32, %v577_v44 }
 0x126   : > { %v626_v47 = vadd.f32 %v876_v38, %v614_v43  ;;  %v629_v49 = vmax.f32 %v625_v42, 0.0 }
 0x127   : > { %v624_v48 = vadd.f32 %v872_v41, %v612_v46  ;;  %v627_v51 = vmax.f32 %v623_v45, 0.0  ;;  %657 = sbr.rel (!%p1073_p6) target bundleno = 311 (0x137), region = 130 }
 0x128   : > { %v630_v50 = vmax.f32 %v626_v47, 0.0 }
 0x129   : > { %v628_v52 = vmax.f32 %v624_v48, 0.0 }
 0x12a   : > { %v885_v53 = vpack.c.bf16 %v630_v50, %v629_v49 }
 0x12b   : > { %v880_v54 = vpack.c.bf16 %v628_v52, %v627_v51 }
 0x12c   : > { %888 = vst [vmem:[%s431_s15 + $0x8] sm:$0xff] %v885_v53  }
 0x12d   : > { %881 = vst [vmem:[%s431_s15] sm:$0xff] %v880_v54  }
 0x133   : > { %v682_v57 = vld [vmem:[%s431_s15 + $0x8] sm:$0xf]  ;;  %v684_v58 = vld [vmem:[%s431_s15 + $0xc] sm:$0xf] }
 0x134   : > { %v678_v55 = vld [vmem:[%s431_s15] sm:$0xf]  ;;  %v680_v56 = vld [vmem:[%s431_s15 + $0x4] sm:$0xf]  ;;  %683 = vst [vmem:[%s662_s13 + $0x10] sm:$0xf] %v682_v57 }
 0x135   : > { %679 = vst [vmem:[%s662_s13] sm:$0xf] %v678_v55  ;;  %681 = vst [vmem:[%s662_s13 + $0x8] sm:$0xf] %v680_v56 }
 0x136   : > { %685 = vst [vmem:[%s662_s13 + $0x18] sm:$0xf] %v684_v58 }
 0x137 PF: > { %s14_s19 = sadd.s32 1, %s1007_s19   ;;  %s1159_s15 = smov %s995_s16 }
 0x138   : > { %p11_p12 = scmp.ge.s32.totalorder %s14_s19, 4   ;;  %s1160_s16 = smov %s1078_s26 }
 0x139   : > { %s1161_s17 = smov %s1003_s18  ;;  %s1162_s18 = smov %s1164_s20 }
 0x13a   :  { %13 = sbr.rel (!%p11_p12) target bundleno = 3 (0x3), region = 216 }

// kernel: _lambda_.70
= control target key start
LH: loop header
LB: loop body
LE: loop exit
PB: predicated region body
PF: predicated region fallthrough
CT: control target
= control target key end

     0   :  { %s477_s1 = inlined_call_operand.vmem [shape: bf16[256,128], index: 1, kind: input, shape index: {}]   ;;  %s478_s0 = inlined_call_operand.vmem [shape: bf16[32,256], index: 0, kind: input, shape index: {}]   ;;  %s479_s2 = inlined_call_operand.vmem [shape: f32[1,128], index: 2, kind: input, shape index: {}]   ;;  %s480_s3 = inlined_call_operand.vmem [shape: bf16[32,128], index: 3, kind: output, shape index: {}]  }
   0x1   :  { %v366_v0 = vld [vmem:[%s477_s1 + $0x40] sm:$0xff]   ;;  %v368_v2 = vld [vmem:[%s477_s1 + $0x48] sm:$0xff]   ;;  %v370_v4 = vld [vmem:[%s477_s1 + $0x50] sm:$0xff]  }
   0x2   :  { %v367_v1 = vld [vmem:[%s477_s1] sm:$0xff]   ;;  %322 = vmatprep.subr.bf16.mxu0 %v366_v0  ;;  %350 = vmatprep.subr.bf16.mxu1 %v366_v0  ;;  %v369_v3 = vld [vmem:[%s477_s1 + $0x8] sm:$0xff]   ;;  %v371_v5 = vld [vmem:[%s477_s1 + $0x10] sm:$0xff]  }
   0x3   :  { %323 = vmatpush3.bf16.msra.mxu0 %v367_v1  ;;  %358 = vmatpush3.bf16.msra.mxu1 %v367_v1  ;;  %v372_v6 = vld [vmem:[%s477_s1 + $0x58] sm:$0xff]   ;;  %v374_v8 = vld [vmem:[%s477_s1 + $0x60] sm:$0xff]   ;;  %v376_v10 = vld [vmem:[%s477_s1 + $0x68] sm:$0xff]  }
   0x4   :  { %324 = vmatprep.subr.bf16.mxu0 %v368_v2  ;;  %351 = vmatprep.subr.bf16.mxu1 %v368_v2  ;;  %v373_v7 = vld [vmem:[%s477_s1 + $0x18] sm:$0xff]   ;;  %v375_v9 = vld [vmem:[%s477_s1 + $0x20] sm:$0xff]   ;;  %v377_v13 = vld [vmem:[%s477_s1 + $0x28] sm:$0xff]  }
   0x5   :  { %v384_v11 = vld [vmem:[%s478_s0 + $0x4] ss:$8 sps:$4 sm:$0xff]   ;;  %v387_v12 = vld [vmem:[%s478_s0 + $0x14] ss:$8 sps:$4 sm:$0xff]   ;;  %v382_v18 = vld [vmem:[%s478_s0] ss:$8 sps:$4 sm:$0xff]  }
   0x6   :  { %v378_v14 = vld [vmem:[%s477_s1 + $0x70] sm:$0xff]   ;;  %211 = vmatprep.mubr.bf16.mxu0 %v384_v11  ;;  %219 = vmatprep.mubr.bf16.mxu1 %v387_v12  ;;  %v380_v16 = vld [vmem:[%s477_s1 + $0x78] sm:$0xff]   ;;  %v302_v23 = vld [vmem:[%s479_s2] ss:$0 sm:$0xff] }
   0x7   :  { %325 = vmatpush3.bf16.msra.mxu0 %v369_v3  ;;  %359 = vmatpush3.bf16.msra.mxu1 %v369_v3  ;;  %v379_v15 = vld [vmem:[%s477_s1 + $0x30] sm:$0xff]   ;;  %v381_v17 = vld [vmem:[%s477_s1 + $0x38] sm:$0xff]  }
   0x8   :  { %326 = vmatprep.subr.bf16.mxu0 %v370_v4  ;;  %352 = vmatprep.subr.bf16.mxu1 %v370_v4  ;;  %v385_v19 = vld [vmem:[%s478_s0 + $0x10] ss:$8 sps:$4 sm:$0xff]  }
   0xb   :  { %327 = vmatpush3.bf16.msra.mxu0 %v371_v5  ;;  %360 = vmatpush3.bf16.msra.mxu1 %v371_v5 }
   0xc   :  { %328 = vmatprep.subr.bf16.mxu0 %v372_v6  ;;  %353 = vmatprep.subr.bf16.mxu1 %v372_v6 }
   0xf   :  { %329 = vmatpush3.bf16.msra.mxu0 %v373_v7  ;;  %361 = vmatpush3.bf16.msra.mxu1 %v373_v7 }
  0x10   :  { %330 = vmatprep.subr.bf16.mxu0 %v374_v8  ;;  %354 = vmatprep.subr.bf16.mxu1 %v374_v8 }
  0x13   :  { %331 = vmatpush3.bf16.msra.mxu0 %v375_v9  ;;  %362 = vmatpush3.bf16.msra.mxu1 %v375_v9 }
  0x14   :  { %332 = vmatprep.subr.bf16.mxu0 %v376_v10  ;;  %355 = vmatprep.subr.bf16.mxu1 %v376_v10 }
  0x17   :  { %333 = vmatpush3.bf16.msra.mxu0 %v377_v13  ;;  %363 = vmatpush3.bf16.msra.mxu1 %v377_v13 }
  0x18   :  { %334 = vmatprep.subr.bf16.mxu0 %v378_v14  ;;  %356 = vmatprep.subr.bf16.mxu1 %v378_v14 }
  0x1b   :  { %335 = vmatpush3.bf16.msra.mxu0 %v379_v15  ;;  %364 = vmatpush3.bf16.msra.mxu1 %v379_v15 }
  0x1c   :  { %336 = vmatprep.subr.bf16.mxu0 %v380_v16  ;;  %357 = vmatprep.subr.bf16.mxu1 %v380_v16 }
  0x1f   :  { %337 = vmatpush3.bf16.msra.mxu0 %v381_v17  ;;  %365 = vmatpush3.bf16.msra.mxu1 %v381_v17 }
  0x22   :  { %212 = vmatmul.mubr.bf16.vlgmr.msra.gmra.mrb[0].mxu0 %v382_v18  ;;  %220 = vmatmul.mubr.bf16.vlgmr.msra.gmra.mrb[0].mxu1 %v385_v19 }
  0xf5   :  { %v338_v20 = vpop.f32.mrb[0].mxu0  ;;  %v344_v21 = vpop.f32.mrb[0].mxu1 }
  0xf6   :  { %v339_v22 = vpop.f32.mrb[1].mxu0  ;;  %v345_v24 = vpop.f32.mrb[1].mxu1 }
  0xf7   :  { %v340_v25 = vadd.f32 %v339_v22, %v338_v20  ;;  %v346_v26 = vadd.f32 %v345_v24, %v344_v21  ;;  %v341_v27 = vpop.f32.mrb[2].mxu0  ;;  %v347_v28 = vpop.f32.mrb[2].mxu1 }
  0xf8   :  { %v342_v29 = vpop.f32.mrb[3].mxu0  ;;  %v348_v30 = vpop.f32.mrb[3].mxu1 }
  0xf9   :  { %v250_v31 = vadd.f32 %v340_v25, %v302_v23  ;;  %v252_v32 = vadd.f32 %v346_v26, %v302_v23  ;;  %v343_v33 = vadd.f32 %v342_v29, %v341_v27  ;;  %v349_v34 = vadd.f32 %v348_v30, %v347_v28 }
  0xfb   :  { %v251_v35 = vadd.f32 %v343_v33, %v302_v23  ;;  %v253_v36 = vadd.f32 %v349_v34, %v302_v23  ;;  %v254_v37 = vmax.f32 %v250_v31, 0.0  ;;  %v256_v38 = vmax.f32 %v252_v32, 0.0 }
  0xfd   :  { %v255_v39 = vmax.f32 %v251_v35, 0.0  ;;  %v257_v40 = vmax.f32 %v253_v36, 0.0 }
  0xff   :  { %v314_v41 = vpack.c.bf16 %v255_v39, %v254_v37  ;;  %v319_v42 = vpack.c.bf16 %v257_v40, %v256_v38 }
 0x101   :  { %315 = vst [vmem:[%s480_s3] sm:$0xff] %v314_v41   ;;  %321 = vst [vmem:[%s480_s3 + $0x8] sm:$0xff] %v319_v42  }

// kernel: _lambda_.81
= control target key start
LH: loop header
LB: loop body
LE: loop exit
PB: predicated region body
PF: predicated region fallthrough
CT: control target
= control target key end

     0   :  { %s908_s12 = smov 0   ;;  %s910_s13 = smov 0   ;;  %s1066_s0 = inlined_call_operand.vmem [shape: bf16[8,256], index: 0, kind: input, shape index: {}]   ;;  %s1067_s1 = inlined_call_operand.vmem [shape: bf16[256,512], index: 1, kind: input, shape index: {}]   ;;  %s1068_s2 = inlined_call_operand.vmem [shape: f32[1,512], index: 2, kind: input, shape index: {}]   ;;  %s1069_s3 = inlined_call_operand.vmem [shape: bf16[8,512], index: 3, kind: output, shape index: {}]  }
   0x1   :  { %s912_s14 = smov 0   ;;  %s914_s15 = smov 0  }
   0x2   :  { %s916_s16 = smov 0  }
   0x3 LB: > { %s28_s17 = sadd.s32 1, %s882_s15  ;;  %p76_p1 = scmp.ne.s32.totalorder %s874_s13, %s870_s12  ;;  %s886_s16 = sphi %s916_s16, %s13_s16   ;;  %s882_s15 = sphi %s914_s15, %s1073_s15   ;;  %s878_s14 = sphi %s912_s14, %s1072_s14   ;;  %s874_s13 = sphi %s910_s13, %s1071_s13   ;;  %s870_s12 = sphi %s908_s12, %s1070_s12  }
   0x4   : > { %p30_p0 = scmp.ge.s32.totalorder %s28_s17, 4  ;;  %p77_p2 = scmp.eq.s32.totalorder %s886_s16, 0 }
   0x5   : > { %s69_s19 = sadd.s32 1, %s874_s13  ;;  %p741_p5 = scmp.ge.s32.totalorder %s886_s16, 4 }
   0x6   : > { %s1075_s17 = smov (%p30_p0, %s28_s17), 0  ;;  %p78_p3 = por %p77_p2, %p76_p1 }
   0x7   : > { %s65_s18 = ssub.s32 %s882_s15, %s1075_s17  ;;  %169 = sbr.rel (%p741_p5) target bundleno = 39 (0x27), region = 20 }
   0x8   : > { %p67_p4 = scmp.eq.s32.totalorder %s65_s18, 0 }
   0xa   : > { %s943_s20 = scalar_select %p67_p4, %s874_s13, %s69_s19  }
   0xe   : > { %172 = sbr.rel (!%p78_p3) target bundleno = 39 (0x27), region = 24  ;;  %s174_s21 = sand.u32 (%p78_p3), 1, %s874_s13  }
   0xf   : > { %s743_s22 = sshll.u32 (%p78_p3), %s882_s15, 2  ;;  %s742_s23 = sshll.u32 (%p78_p3), %s174_s21, 7 }
  0x10   : > { %s951_s26 = scalar_lea.vmem (%p78_p3), %s1067_s1, %s743_s22  ;;  %s955_s27 = scalar_lea.vmem (%p78_p3), [#allocation3], %s742_s23 }
  0x11   : > { %v197_v0 = vld [vmem:[%s951_s26] sm:$0xf] (%p78_p3)  ;;  %v199_v1 = vld [vmem:[%s951_s26 + $0x10] sm:$0xf] (%p78_p3) }
  0x12   : > { %198 = vst [vmem:[%s955_s27] sm:$0xf] (%p78_p3), %v197_v0  ;;  %200 = vst [vmem:[%s955_s27 + $0x4] sm:$0xf] (%p78_p3), %v199_v1  ;;  %v201_v2 = vld [vmem:[%s951_s26 + $0x20] sm:$0xf] (%p78_p3) }
  0x13   : > { %v203_v3 = vld [vmem:[%s951_s26 + $0x30] sm:$0xf] (%p78_p3)  ;;  %v205_v4 = vld [vmem:[%s951_s26 + $0x40] sm:$0xf] (%p78_p3)  ;;  %202 = vst [vmem:[%s955_s27 + $0x8] sm:$0xf] (%p78_p3), %v201_v2 }
  0x14   : > { %204 = vst [vmem:[%s955_s27 + $0xc] sm:$0xf] (%p78_p3), %v203_v3  ;;  %206 = vst [vmem:[%s955_s27 + $0x10] sm:$0xf] (%p78_p3), %v205_v4  ;;  %v207_v5 = vld [vmem:[%s951_s26 + $0x50] sm:$0xf] (%p78_p3) }
  0x15   : > { %v209_v6 = vld [vmem:[%s951_s26 + $0x60] sm:$0xf]  ;;  %v211_v7 = vld [vmem:[%s951_s26 + $0x70] sm:$0xf]  ;;  %208 = vst [vmem:[%s955_s27 + $0x14] sm:$0xf] %v207_v5 }
  0x16   : > { %210 = vst [vmem:[%s955_s27 + $0x18] sm:$0xf] %v209_v6  ;;  %212 = vst [vmem:[%s955_s27 + $0x1c] sm:$0xf] %v211_v7  ;;  %v213_v8 = vld [vmem:[%s951_s26 + $0x80] sm:$0xf] }
  0x17   : > { %v215_v9 = vld [vmem:[%s951_s26 + $0x90] sm:$0xf]  ;;  %v217_v10 = vld [vmem:[%s951_s26 + $0xa0] sm:$0xf]  ;;  %214 = vst [vmem:[%s955_s27 + $0x20] sm:$0xf] %v213_v8 }
  0x18   : > { %216 = vst [vmem:[%s955_s27 + $0x24] sm:$0xf] %v215_v9  ;;  %218 = vst [vmem:[%s955_s27 + $0x28] sm:$0xf] %v217_v10  ;;  %v219_v11 = vld [vmem:[%s951_s26 + $0xb0] sm:$0xf] }
  0x19   : > { %v221_v12 = vld [vmem:[%s951_s26 + $0xc0] sm:$0xf]  ;;  %v223_v13 = vld [vmem:[%s951_s26 + $0xd0] sm:$0xf]  ;;  %220 = vst [vmem:[%s955_s27 + $0x2c] sm:$0xf] %v219_v11 }
  0x1a   : > { %222 = vst [vmem:[%s955_s27 + $0x30] sm:$0xf] %v221_v12  ;;  %224 = vst [vmem:[%s955_s27 + $0x34] sm:$0xf] %v223_v13  ;;  %v225_v14 = vld [vmem:[%s951_s26 + $0xe0] sm:$0xf] }
  0x1b   : > { %v227_v15 = vld [vmem:[%s951_s26 + $0xf0] sm:$0xf]  ;;  %v229_v16 = vld [vmem:[%s951_s26 + $0x100] sm:$0xf]  ;;  %226 = vst [vmem:[%s955_s27 + $0x38] sm:$0xf] %v225_v14 }
  0x1c   : > { %228 = vst [vmem:[%s955_s27 + $0x3c] sm:$0xf] %v227_v15  ;;  %230 = vst [vmem:[%s955_s27 + $0x40] sm:$0xf] %v229_v16  ;;  %v231_v17 = vld [vmem:[%s951_s26 + $0x110] sm:$0xf] }
  0x1d   : > { %v233_v18 = vld [vmem:[%s951_s26 + $0x120] sm:$0xf]  ;;  %v235_v19 = vld [vmem:[%s951_s26 + $0x130] sm:$0xf]  ;;  %232 = vst [vmem:[%s955_s27 + $0x44] sm:$0xf] %v231_v17 }
  0x1e   : > { %234 = vst [vmem:[%s955_s27 + $0x48] sm:$0xf] %v233_v18  ;;  %236 = vst [vmem:[%s955_s27 + $0x4c] sm:$0xf] %v235_v19  ;;  %v237_v20 = vld [vmem:[%s951_s26 + $0x140] sm:$0xf] }
  0x1f   : > { %v239_v21 = vld [vmem:[%s951_s26 + $0x150] sm:$0xf]  ;;  %v241_v22 = vld [vmem:[%s951_s26 + $0x160] sm:$0xf]  ;;  %238 = vst [vmem:[%s955_s27 + $0x50] sm:$0xf] %v237_v20 }
  0x20   : > { %240 = vst [vmem:[%s955_s27 + $0x54] sm:$0xf] %v239_v21  ;;  %242 = vst [vmem:[%s955_s27 + $0x58] sm:$0xf] %v241_v22  ;;  %v243_v23 = vld [vmem:[%s951_s26 + $0x170] sm:$0xf] }
  0x21   : > { %v245_v24 = vld [vmem:[%s951_s26 + $0x180] sm:$0xf]  ;;  %v247_v25 = vld [vmem:[%s951_s26 + $0x190] sm:$0xf]  ;;  %244 = vst [vmem:[%s955_s27 + $0x5c] sm:$0xf] %v243_v23 }
  0x22   : > { %246 = vst [vmem:[%s955_s27 + $0x60] sm:$0xf] %v245_v24  ;;  %248 = vst [vmem:[%s955_s27 + $0x64] sm:$0xf] %v247_v25  ;;  %v249_v26 = vld [vmem:[%s951_s26 + $0x1a0] sm:$0xf] }
  0x23   : > { %v251_v27 = vld [vmem:[%s951_s26 + $0x1b0] sm:$0xf]  ;;  %v253_v28 = vld [vmem:[%s951_s26 + $0x1c0] sm:$0xf]  ;;  %250 = vst [vmem:[%s955_s27 + $0x68] sm:$0xf] %v249_v26 }
  0x24   : > { %252 = vst [vmem:[%s955_s27 + $0x6c] sm:$0xf] %v251_v27  ;;  %254 = vst [vmem:[%s955_s27 + $0x70] sm:$0xf] %v253_v28  ;;  %v255_v29 = vld [vmem:[%s951_s26 + $0x1d0] sm:$0xf] }
  0x25   : > { %v257_v30 = vld [vmem:[%s951_s26 + $0x1e0] sm:$0xf]  ;;  %v259_v31 = vld [vmem:[%s951_s26 + $0x1f0] sm:$0xf]  ;;  %256 = vst [vmem:[%s955_s27 + $0x74] sm:$0xf] %v255_v29 }
  0x26   : > { %258 = vst [vmem:[%s955_s27 + $0x78] sm:$0xf] %v257_v30  ;;  %260 = vst [vmem:[%s955_s27 + $0x7c] sm:$0xf] %v259_v31 }
  0x27 PF: > { %p744_p6 = scmp.ge.s32.totalorder %s886_s16, 1  ;;  %p352_p7 = scmp.lt.s32.totalorder %s886_s16, 5 }
  0x29   : > { %p353_p8 = pnand %p744_p6, %p352_p7 }
  0x2a   : > { %s359_s28 = sand.u32 (!%p353_p8), 1, %s870_s12   ;;  %v426_v32 = vld [vmem:[%s1066_s0] sm:$0xff] (!%p353_p8)  ;;  %p408_p9 = scmp.lt.s32.totalorder (!%p353_p8), %s878_s14, 3 }
  0x2b   : > { %356 = sbr.rel (%p353_p8) target bundleno = 298 (0x12a), region = 69  ;;  %s745_s4 = sshll.u32 (!%p353_p8), %s359_s28, 7  ;;  %v748_v33 = vcombine.high (!%p353_p8), %v426_v32, %v426_v32  ;;  %v747_v50 = vcombine.low (!%p353_p8), %v426_v32, %v426_v32 }
  0x2c   : > { %s1025_s5 = scalar_lea.vmem (!%p353_p8), [#allocation3], %s745_s4 }
  0x2d   : > { %v830_v34 = vld [vmem:[%s1025_s5 + $0x40] sm:$0xff] (!%p353_p8)   ;;  %594 = vmatprep.mubr.bf16.mxu0 (!%p353_p8), %v748_v33  ;;  %v832_v36 = vld [vmem:[%s1025_s5 + $0x48] sm:$0xff] (!%p353_p8)   ;;  %v834_v38 = vld [vmem:[%s1025_s5 + $0x50] sm:$0xff] (!%p353_p8)  }
  0x2e   : > { %v831_v35 = vld [vmem:[%s1025_s5] sm:$0xff] (!%p353_p8)   ;;  %768 = vmatprep.subr.bf16.mxu0 (!%p353_p8), %v830_v34  ;;  %v833_v37 = vld [vmem:[%s1025_s5 + $0x8] sm:$0xff] (!%p353_p8)   ;;  %v835_v39 = vld [vmem:[%s1025_s5 + $0x10] sm:$0xff] (!%p353_p8)  }
  0x2f   : > { %769 = vmatpush3.bf16.msra.mxu0 (!%p353_p8), %v831_v35  ;;  %v836_v40 = vld [vmem:[%s1025_s5 + $0x58] sm:$0xff] (!%p353_p8)   ;;  %v838_v42 = vld [vmem:[%s1025_s5 + $0x60] sm:$0xff] (!%p353_p8)   ;;  %v840_v44 = vld [vmem:[%s1025_s5 + $0x68] sm:$0xff] (!%p353_p8)  }
  0x30   : > { %770 = vmatprep.subr.bf16.mxu0 (!%p353_p8), %v832_v36  ;;  %v837_v41 = vld [vmem:[%s1025_s5 + $0x18] sm:$0xff] (!%p353_p8)   ;;  %v839_v43 = vld [vmem:[%s1025_s5 + $0x20] sm:$0xff] (!%p353_p8)   ;;  %v841_v45 = vld [vmem:[%s1025_s5 + $0x28] sm:$0xff] (!%p353_p8)  }
  0x31   : > { %v842_v46 = vld [vmem:[%s1025_s5 + $0x70] sm:$0xff] (!%p353_p8)   ;;  %v844_v48 = vld [vmem:[%s1025_s5 + $0x78] sm:$0xff] (!%p353_p8)  }
  0x32   : > { %v843_v47 = vld [vmem:[%s1025_s5 + $0x30] sm:$0xff]   ;;  %v845_v49 = vld [vmem:[%s1025_s5 + $0x38] sm:$0xff]   ;;  %s1077_s14 = smov (!%p408_p9, %s878_s14), 3 }
  0x33   : > { %771 = vmatpush3.bf16.msra.mxu0 %v833_v37  ;;  %s410_s8 = scalar_lea.vmem %s1068_s2, %s1077_s14  ;;  %s746_s9 = sshll.u32 %s1077_s14, 2 }
  0x34   : > { %772 = vmatprep.subr.bf16.mxu0 %v834_v38  ;;  %v765_v53 = vld [vmem:[%s410_s8] ss:$0 sm:$0xff]  ;;  %s418_s12 = scalar_lea.vmem %s1069_s3, %s746_s9 }
  0x37   : > { %773 = vmatpush3.bf16.msra.mxu0 %v835_v39 }
  0x38   : > { %774 = vmatprep.subr.bf16.mxu0 %v836_v40 }
  0x3b   : > { %775 = vmatpush3.bf16.msra.mxu0 %v837_v41 }
  0x3c   : > { %776 = vmatprep.subr.bf16.mxu0 %v838_v42 }
  0x3f   : > { %777 = vmatpush3.bf16.msra.mxu0 %v839_v43 }
  0x40   : > { %778 = vmatprep.subr.bf16.mxu0 %v840_v44 }
  0x43   : > { %779 = vmatpush3.bf16.msra.mxu0 %v841_v45 }
  0x44   : > { %780 = vmatprep.subr.bf16.mxu0 %v842_v46 }
  0x47   : > { %781 = vmatpush3.bf16.msra.mxu0 %v843_v47 }
  0x48   : > { %782 = vmatprep.subr.bf16.mxu0 %v844_v48 }
  0x4b   : > { %783 = vmatpush3.bf16.msra.mxu0 %v845_v49 }
  0x4e   : > { %595 = vmatmul.mubr.bf16.vlgmr.msra.gmra.mrb[0].mxu0 %v747_v50 }
 0x121   : > { %v784_v51 = vpop.f32.mrb[0].mxu0 }
 0x122   : > { %v785_v52 = vpop.f32.mrb[1].mxu0 }
 0x123   : > { %v786_v54 = vadd.f32 %v785_v52, %v784_v51  ;;  %v787_v55 = vpop.f32.mrb[2].mxu0 }
 0x124   : > { %v788_v56 = vpop.f32.mrb[3].mxu0 }
 0x125   : > { %v615_v57 = vadd.f32 %v786_v54, %v765_v53 }
 0x127   : > { %v616_v58 = vpack.c.bf16 %v615_v57, %v615_v57 }
 0x129   : > { %617 = vst [vmem:[%s418_s12] sm:$0xf] %v616_v58 }
 0x12a PF: > { %s13_s16 = sadd.s32 1, %s886_s16   ;;  %s1070_s12 = smov %s874_s13 }
 0x12b   : > { %p10_p10 = scmp.ge.s32.totalorder %s13_s16, 6   ;;  %s1071_s13 = smov %s943_s20 }
 0x12c   : > { %s1072_s14 = smov %s882_s15  ;;  %s1073_s15 = smov %s1075_s17 }
 0x12d   :  { %12 = sbr.rel (!%p10_p10) target bundleno = 3 (0x3), region = 122 }

// kernel: _lambda_.80
= control target key start
LH: loop header
LB: loop body
LE: loop exit
PB: predicated region body
PF: predicated region fallthrough
CT: control target
= control target key end

     0   :  { %s622_s12 = smov 0   ;;  %s624_s13 = smov 0   ;;  %s671_s0 = inlined_call_operand.vmem [shape: bf16[8,1152], index: 0, kind: input, shape index: {}]   ;;  %s672_s1 = inlined_call_operand.vmem [shape: bf16[1152,128], index: 1, kind: input, shape index: {}]   ;;  %s673_s2 = inlined_call_operand.vmem [shape: f32[1,128], index: 2, kind: input, shape index: {}]   ;;  %s674_s3 = inlined_call_operand.vmem [shape: bf16[8,128], index: 3, kind: output, shape index: {}]  }
   0x1   :  { %s626_s14 = smov 0  }
   0x2 LB: > { %s25_s15 = sadd.s32 1, %s593_s13  ;;  %p493_p0 = scmp.ge.s32.totalorder %s597_s14, 1  ;;  %s597_s14 = sphi %s626_s14, %s13_s14   ;;  %s593_s13 = sphi %s624_s13, %s676_s13   ;;  %s589_s12 = sphi %s622_s12, %s675_s12  }
   0x3   : > { %p26_p1 = scmp.ge.s32.totalorder %s25_s15, 9  ;;  %p187_p2 = scmp.lt.s32.totalorder %s597_s14, 10 }
   0x5   : > { %s678_s15 = smov (%p26_p1, %s25_s15), 0  ;;  %p188_p3 = pnand %p493_p0, %p187_p2 }
   0x6   : > { %p229_p4 = scmp.lt.s32.totalorder (!%p188_p3), %s589_s12, 8  ;;  %s495_s16 = sshll.u32 (!%p188_p3), %s589_s12, 4 }
   0x7   : > { %191 = sbr.rel (%p188_p3) target bundleno = 284 (0x11c), region = 32  ;;  %p236_p5 = scmp.lt.s32.totalorder (!%p188_p3), %s495_s16, 143 }
   0x8   : > { %p497_p6 = scmp.ne.s32.totalorder (!%p188_p3), %s589_s12, 0 }
   0xe   : > { %s230_s17 = scalar_select %p229_p4, %s589_s12, 8 }
   0xf   : > { %s680_s16 = smov (!%p236_p5, %s495_s16), 143  ;;  %258 = sbr.rel (%p497_p6) target bundleno = 22 (0x16), region = 36 }
  0x10   : > { %s494_s18 = sshll.u32 %s230_s17, 2  ;;  %s496_s22 = sshll.u32 %s680_s16, 2  ;;  %v599_v0 = vmov (!%p497_p6), 0.0  }
  0x11   : > { %s648_s21 = scalar_lea.vmem %s671_s0, %s494_s18  ;;  %s242_s25 = scalar_lea.vmem %s672_s1, %s496_s22  ;;  %259 = vst [vmem:[#allocation2] sm:$0xff] (!%p497_p6), %v599_v0 }
  0x16 PF: > { %v567_v1 = vld [vmem:[%s242_s25] sm:$0xff]   ;;  %v600_v2 = vmov 0.0   ;;  %v568_v3 = vld [vmem:[%s242_s25 + $0x8] sm:$0xff]   ;;  %vm601_vm0 = vmmov 0   ;;  %v569_v4 = vld [vmem:[%s242_s25 + $0x10] sm:$0xff]   ;;  %p506_p7 = scmp.ne.s32.totalorder %s589_s12, 8 }
  0x17   : > { %520 = vmatprep.subr.bf16.mxu0 %v600_v2  ;;  %536 = vmatprep.mubr.msk.bf16.mxu0 %vm601_vm0, %v600_v2  ;;  %v570_v5 = vld [vmem:[%s242_s25 + $0x18] sm:$0xff]   ;;  %v571_v6 = vld [vmem:[%s242_s25 + $0x20] sm:$0xff]   ;;  %v572_v7 = vld [vmem:[%s242_s25 + $0x28] sm:$0xff]  }
  0x18   : > { %521 = vmatpush3.bf16.msra.mxu0 %v567_v1  ;;  %v573_v8 = vld [vmem:[%s242_s25 + $0x30] sm:$0xff]   ;;  %v574_v9 = vld [vmem:[%s242_s25 + $0x38] sm:$0xff]   ;;  %v261_v10 = vld [vmem:[%s648_s21] sm:$0xf] }
  0x19   : > { %522 = vmatprep.subr.bf16.mxu0 %v600_v2  ;;  %v260_v11 = vld [vmem:[#allocation2] sm:$0xff] }
  0x1a   : > { %v507_v18 = vld [vmem:[%s673_s2] ss:$0 sm:$0xff] (!%p506_p7) }
  0x1c   : > { %523 = vmatpush3.bf16.msra.mxu0 %v568_v3 }
  0x1d   : > { %524 = vmatprep.subr.bf16.mxu0 %v600_v2 }
  0x20   : > { %525 = vmatpush3.bf16.msra.mxu0 %v569_v4 }
  0x21   : > { %526 = vmatprep.subr.bf16.mxu0 %v600_v2 }
  0x24   : > { %527 = vmatpush3.bf16.msra.mxu0 %v570_v5 }
  0x25   : > { %528 = vmatprep.subr.bf16.mxu0 %v600_v2 }
  0x28   : > { %529 = vmatpush3.bf16.msra.mxu0 %v571_v6 }
  0x29   : > { %530 = vmatprep.subr.bf16.mxu0 %v600_v2 }
  0x2c   : > { %531 = vmatpush3.bf16.msra.mxu0 %v572_v7 }
  0x2d   : > { %532 = vmatprep.subr.bf16.mxu0 %v600_v2 }
  0x30   : > { %533 = vmatpush3.bf16.msra.mxu0 %v573_v8 }
  0x31   : > { %534 = vmatprep.subr.bf16.mxu0 %v600_v2 }
  0x34   : > { %535 = vmatpush3.bf16.msra.mxu0 %v574_v9 }
  0x37   : > { %537 = vmatmul.mubr.bf16.vlgmr.msra.gmra.mrb[0].mxu0 %v261_v10 }
 0x107   : > { %371 = sbr.rel (%p506_p7) target bundleno = 284 (0x11c), region = 40 }
 0x10a   : > { %v360_v12 = vpop.f32.mrb[0].mxu0 }
 0x10b   : > { %v366_v13 = vadd.f32 %v360_v12, %v260_v11  ;;  %v538_v14 = vpop.f32.mrb[1].mxu0 }
 0x10c   : > { %v363_v15 = vpop.f32.mrb[2].mxu0 }
 0x10d   : > { %367 = vst [vmem:[#allocation2] sm:$0xff] %v366_v13  ;;  %v539_v16 = vpop.f32.mrb[3].mxu0 }
 0x114   : > { %v372_v17 = vld [vmem:[#allocation2] sm:$0xff] }
 0x115   : > { %v380_v19 = vadd.f32 %v507_v18, %v372_v17 }
 0x117   : > { %v381_v20 = vmax.f32 %v380_v19, 0.0 }
 0x119   : > { %v382_v21 = vpack.c.bf16 %v381_v20, %v381_v20 }
 0x11b   : > { %383 = vst [vmem:[%s674_s3] sm:$0xf] %v382_v21 }
 0x11c PF: > { %s13_s14 = sadd.s32 1, %s597_s14   ;;  %s675_s12 = smov %s593_s13 }
 0x11d   : > { %p10_p8 = scmp.ge.s32.totalorder %s13_s14, 11   ;;  %s676_s13 = smov %s678_s15 }
 0x11f   :  { %12 = sbr.rel (!%p10_p8) target bundleno = 2 (0x2), region = 76 }

// kernel: _lambda_.82
= control target key start
LH: loop header
LB: loop body
LE: loop exit
PB: predicated region body
PF: predicated region fallthrough
CT: control target
= control target key end

     0   :  { %s839_s15 = smov 0   ;;  %s841_s16 = smov 0   ;;  %s932_s0 = inlined_call_operand.vmem [shape: bf16[8,128], index: 0, kind: input, shape index: {}]   ;;  %s933_s1 = inlined_call_operand.vmem [shape: bf16[128,512], index: 1, kind: input, shape index: {}]   ;;  %s934_s2 = inlined_call_operand.vmem [shape: f32[1,512], index: 2, kind: input, shape index: {}]   ;;  %s935_s3 = inlined_call_operand.vmem [shape: bf16[8,512], index: 3, kind: input, shape index: {}]   ;;  %s936_s4 = inlined_call_operand.vmem [shape: bf16[8,512], index: 4, kind: output, shape index: {}]  }
   0x1   :  { %s843_s17 = smov 0   ;;  %s845_s18 = smov 0  }
   0x2   :  { %s847_s19 = smov 0  }
   0x3 LB: > { %s29_s20 = sadd.s32 1, %s806_s18  ;;  %p77_p1 = scmp.ne.s32.totalorder %s798_s16, %s794_s15  ;;  %s810_s19 = sphi %s847_s19, %s14_s19   ;;  %s806_s18 = sphi %s845_s18, %s940_s18   ;;  %s802_s17 = sphi %s843_s17, %s939_s17   ;;  %s798_s16 = sphi %s841_s16, %s938_s16   ;;  %s794_s15 = sphi %s839_s15, %s937_s15  }
   0x4   : > { %p31_p0 = scmp.ge.s32.totalorder %s29_s20, 4  ;;  %p78_p2 = scmp.eq.s32.totalorder %s810_s19, 0 }
   0x5   : > { %s70_s22 = sadd.s32 1, %s798_s16  ;;  %p675_p5 = scmp.ge.s32.totalorder %s810_s19, 4 }
   0x6   : > { %s942_s20 = smov (%p31_p0, %s29_s20), 0  ;;  %p79_p3 = por %p78_p2, %p77_p1 }
   0x7   : > { %s66_s21 = ssub.s32 %s806_s18, %s942_s20  ;;  %195 = sbr.rel (%p675_p5) target bundleno = 29 (0x1d), region = 20 }
   0x8   : > { %p68_p4 = scmp.eq.s32.totalorder %s66_s21, 0 }
   0xa   : > { %s874_s23 = scalar_select %p68_p4, %s798_s16, %s70_s22  }
   0xe   : > { %198 = sbr.rel (!%p79_p3) target bundleno = 29 (0x1d), region = 24  ;;  %s200_s24 = sand.u32 (%p79_p3), 1, %s798_s16  }
   0xf   : > { %s677_s25 = sshll.u32 (%p79_p3), %s806_s18, 2  ;;  %s676_s26 = sshll.u32 (%p79_p3), %s200_s24, 6 }
  0x10   : > { %s882_s29 = scalar_lea.vmem (%p79_p3), %s933_s1, %s677_s25  ;;  %s202_s30 = scalar_lea.vmem (%p79_p3), [#allocation3], %s676_s26 }
  0x11   : > { %v223_v0 = vld [vmem:[%s882_s29] sm:$0xf] (%p79_p3)  ;;  %v225_v1 = vld [vmem:[%s882_s29 + $0x10] sm:$0xf] (%p79_p3) }
  0x12   : > { %224 = vst [vmem:[%s202_s30] sm:$0xf] (%p79_p3), %v223_v0  ;;  %226 = vst [vmem:[%s202_s30 + $0x4] sm:$0xf] (%p79_p3), %v225_v1  ;;  %v227_v2 = vld [vmem:[%s882_s29 + $0x20] sm:$0xf] (%p79_p3) }
  0x13   : > { %v229_v3 = vld [vmem:[%s882_s29 + $0x30] sm:$0xf] (%p79_p3)  ;;  %v231_v4 = vld [vmem:[%s882_s29 + $0x40] sm:$0xf] (%p79_p3)  ;;  %228 = vst [vmem:[%s202_s30 + $0x8] sm:$0xf] (%p79_p3), %v227_v2 }
  0x14   : > { %230 = vst [vmem:[%s202_s30 + $0xc] sm:$0xf] (%p79_p3), %v229_v3  ;;  %232 = vst [vmem:[%s202_s30 + $0x10] sm:$0xf] (%p79_p3), %v231_v4  ;;  %v233_v5 = vld [vmem:[%s882_s29 + $0x50] sm:$0xf] (%p79_p3) }
  0x15   : > { %v235_v6 = vld [vmem:[%s882_s29 + $0x60] sm:$0xf]  ;;  %v237_v7 = vld [vmem:[%s882_s29 + $0x70] sm:$0xf]  ;;  %234 = vst [vmem:[%s202_s30 + $0x14] sm:$0xf] %v233_v5 }
  0x16   : > { %236 = vst [vmem:[%s202_s30 + $0x18] sm:$0xf] %v235_v6  ;;  %238 = vst [vmem:[%s202_s30 + $0x1c] sm:$0xf] %v237_v7  ;;  %v239_v8 = vld [vmem:[%s882_s29 + $0x80] sm:$0xf] }
  0x17   : > { %v241_v9 = vld [vmem:[%s882_s29 + $0x90] sm:$0xf]  ;;  %v243_v10 = vld [vmem:[%s882_s29 + $0xa0] sm:$0xf]  ;;  %240 = vst [vmem:[%s202_s30 + $0x20] sm:$0xf] %v239_v8 }
  0x18   : > { %242 = vst [vmem:[%s202_s30 + $0x24] sm:$0xf] %v241_v9  ;;  %244 = vst [vmem:[%s202_s30 + $0x28] sm:$0xf] %v243_v10  ;;  %v245_v11 = vld [vmem:[%s882_s29 + $0xb0] sm:$0xf] }
  0x19   : > { %v247_v12 = vld [vmem:[%s882_s29 + $0xc0] sm:$0xf]  ;;  %v249_v13 = vld [vmem:[%s882_s29 + $0xd0] sm:$0xf]  ;;  %246 = vst [vmem:[%s202_s30 + $0x2c] sm:$0xf] %v245_v11 }
  0x1a   : > { %248 = vst [vmem:[%s202_s30 + $0x30] sm:$0xf] %v247_v12  ;;  %250 = vst [vmem:[%s202_s30 + $0x34] sm:$0xf] %v249_v13  ;;  %v251_v14 = vld [vmem:[%s882_s29 + $0xe0] sm:$0xf] }
  0x1b   : > { %v253_v15 = vld [vmem:[%s882_s29 + $0xf0] sm:$0xf]  ;;  %252 = vst [vmem:[%s202_s30 + $0x38] sm:$0xf] %v251_v14 }
  0x1c   : > { %254 = vst [vmem:[%s202_s30 + $0x3c] sm:$0xf] %v253_v15 }
  0x1d PF: > { %p678_p6 = scmp.ge.s32.totalorder %s810_s19, 1  ;;  %p325_p7 = scmp.lt.s32.totalorder %s810_s19, 5 }
  0x1f   : > { %p326_p8 = pnand %p678_p6, %p325_p7 }
  0x20   : > { %s332_s5 = sand.u32 (!%p326_p8), 1, %s794_s15   ;;  %v812_v16 = vmov (!%p326_p8), 0.0   ;;  %vm813_vm0 = vmmov (!%p326_p8), 0   ;;  %v412_v25 = vld [vmem:[%s932_s0] sm:$0xf] (!%p326_p8)  ;;  %p386_p9 = scmp.lt.s32.totalorder (!%p326_p8), %s802_s17, 3 }
  0x21   : > { %329 = sbr.rel (%p326_p8) target bundleno = 288 (0x120), region = 73  ;;  %702 = vmatprep.subr.bf16.mxu0 (!%p326_p8), %v812_v16  ;;  %s679_s6 = sshll.u32 (!%p326_p8), %s332_s5, 6  ;;  %718 = vmatprep.mubr.msk.bf16.mxu0 (!%p326_p8), %vm813_vm0, %v812_v16 }
  0x22   : > { %s334_s7 = scalar_lea.vmem (!%p326_p8), [#allocation3], %s679_s6 }
  0x23   : > { %v764_v17 = vld [vmem:[%s334_s7] sm:$0xff] (!%p326_p8)   ;;  %v765_v18 = vld [vmem:[%s334_s7 + $0x8] sm:$0xff] (!%p326_p8)   ;;  %v766_v19 = vld [vmem:[%s334_s7 + $0x10] sm:$0xff] (!%p326_p8)  }
  0x24   : > { %703 = vmatpush3.bf16.msra.mxu0 (!%p326_p8), %v764_v17  ;;  %v767_v20 = vld [vmem:[%s334_s7 + $0x18] sm:$0xff] (!%p326_p8)   ;;  %v768_v21 = vld [vmem:[%s334_s7 + $0x20] sm:$0xff] (!%p326_p8)   ;;  %v769_v22 = vld [vmem:[%s334_s7 + $0x28] sm:$0xff] (!%p326_p8)  }
  0x25   : > { %704 = vmatprep.subr.bf16.mxu0 (!%p326_p8), %v812_v16  ;;  %v770_v23 = vld [vmem:[%s334_s7 + $0x30] sm:$0xff] (!%p326_p8)   ;;  %v771_v24 = vld [vmem:[%s334_s7 + $0x38] sm:$0xff] (!%p326_p8)  }
  0x28   : > { %705 = vmatpush3.bf16.msra.mxu0 %v765_v18  ;;  %s944_s17 = smov (!%p386_p9, %s802_s17), 3 }
  0x29   : > { %706 = vmatprep.subr.bf16.mxu0 %v812_v16  ;;  %s680_s10 = sshll.u32 %s944_s17, 2  ;;  %s388_s21 = scalar_lea.vmem %s934_s2, %s944_s17 }
  0x2a   : > { %s396_s13 = scalar_lea.vmem %s935_s3, %s680_s10  ;;  %v690_v27 = vld [vmem:[%s388_s21] ss:$0 sm:$0xff]  ;;  %s404_s25 = scalar_lea.vmem %s936_s4, %s680_s10 }
  0x2b   : > { %v531_v26 = vld [vmem:[%s396_s13] sm:$0xf] }
  0x2c   : > { %707 = vmatpush3.bf16.msra.mxu0 %v766_v19  ;;  %v532_v28 = vunpack.c.l.bf16 %v531_v26 }
  0x2d   : > { %708 = vmatprep.subr.bf16.mxu0 %v812_v16 }
  0x30   : > { %709 = vmatpush3.bf16.msra.mxu0 %v767_v20 }
  0x31   : > { %710 = vmatprep.subr.bf16.mxu0 %v812_v16 }
  0x34   : > { %711 = vmatpush3.bf16.msra.mxu0 %v768_v21 }
  0x35   : > { %712 = vmatprep.subr.bf16.mxu0 %v812_v16 }
  0x38   : > { %713 = vmatpush3.bf16.msra.mxu0 %v769_v22 }
  0x39   : > { %714 = vmatprep.subr.bf16.mxu0 %v812_v16 }
  0x3c   : > { %715 = vmatpush3.bf16.msra.mxu0 %v770_v23 }
  0x3d   : > { %716 = vmatprep.subr.bf16.mxu0 %v812_v16 }
  0x40   : > { %717 = vmatpush3.bf16.msra.mxu0 %v771_v24 }
  0x43   : > { %719 = vmatmul.mubr.bf16.vlgmr.msra.gmra.mrb[0].mxu0 %v412_v25 }
 0x116   : > { %v511_v29 = vpop.f32.mrb[0].mxu0 }
 0x117   : > { %v530_v30 = vadd.f32 %v690_v27, %v511_v29  ;;  %v720_v31 = vpop.f32.mrb[1].mxu0 }
 0x118   : > { %v514_v32 = vpop.f32.mrb[2].mxu0 }
 0x119   : > { %v533_v33 = vadd.f32 %v532_v28, %v530_v30  ;;  %v721_v34 = vpop.f32.mrb[3].mxu0 }
 0x11b   : > { %v534_v35 = vmax.f32 %v533_v33, 0.0 }
 0x11d   : > { %v535_v36 = vpack.c.bf16 %v534_v35, %v534_v35 }
 0x11f   : > { %536 = vst [vmem:[%s404_s25] sm:$0xf] %v535_v36 }
 0x120 PF: > { %s14_s19 = sadd.s32 1, %s810_s19   ;;  %s937_s15 = smov %s798_s16 }
 0x121   : > { %p11_p10 = scmp.ge.s32.totalorder %s14_s19, 6   ;;  %s938_s16 = smov %s874_s23 }
 0x122   : > { %s939_s17 = smov %s806_s18  ;;  %s940_s18 = smov %s942_s20 }
 0x123   :  { %13 = sbr.rel (!%p11_p10) target bundleno = 3 (0x3), region = 129 }

// kernel: _lambda_.83
= control target key start
LH: loop header
LB: loop body
LE: loop exit
PB: predicated region body
PF: predicated region fallthrough
CT: control target
= control target key end

     0   :  { %s639_s1 = inlined_call_operand.vmem [shape: bf16[512,128], index: 1, kind: input, shape index: {}]   ;;  %s640_s0 = inlined_call_operand.vmem [shape: bf16[8,512], index: 0, kind: input, shape index: {}]   ;;  %s641_s2 = inlined_call_operand.vmem [shape: f32[1,128], index: 2, kind: input, shape index: {}]   ;;  %s642_s3 = inlined_call_operand.vmem [shape: bf16[8,128], index: 3, kind: output, shape index: {}]  }
   0x1   :  { %v475_v0 = vld [vmem:[%s639_s1 + $0x40] sm:$0xff]   ;;  %v479_v4 = vld [vmem:[%s639_s1 + $0x48] sm:$0xff]   ;;  %v483_v8 = vld [vmem:[%s639_s1 + $0x50] sm:$0xff]  }
   0x2   :  { %v476_v1 = vld [vmem:[%s639_s1 + $0xc0] sm:$0xff]   ;;  %431 = vmatprep.subr.bf16.mxu0 %v475_v0  ;;  %v480_v5 = vld [vmem:[%s639_s1 + $0xc8] sm:$0xff]   ;;  %v484_v9 = vld [vmem:[%s639_s1 + $0xd0] sm:$0xff]  }
   0x3   :  { %v477_v2 = vld [vmem:[%s639_s1] sm:$0xff]   ;;  %453 = vmatprep.subr.bf16.mxu1 %v476_v1  ;;  %v481_v6 = vld [vmem:[%s639_s1 + $0x8] sm:$0xff]   ;;  %v485_v10 = vld [vmem:[%s639_s1 + $0x10] sm:$0xff]  }
   0x4   :  { %v478_v3 = vld [vmem:[%s639_s1 + $0x80] sm:$0xff]   ;;  %432 = vmatpush3.bf16.msra.mxu0 %v477_v2  ;;  %v482_v7 = vld [vmem:[%s639_s1 + $0x88] sm:$0xff]   ;;  %v486_v11 = vld [vmem:[%s639_s1 + $0x90] sm:$0xff]  }
   0x5   :  { %454 = vmatpush3.bf16.msra.mxu1 %v478_v3  ;;  %433 = vmatprep.subr.bf16.mxu0 %v479_v4  ;;  %v487_v12 = vld [vmem:[%s639_s1 + $0x58] sm:$0xff]   ;;  %v491_v16 = vld [vmem:[%s639_s1 + $0x60] sm:$0xff]   ;;  %v495_v20 = vld [vmem:[%s639_s1 + $0x68] sm:$0xff]  }
   0x6   :  { %455 = vmatprep.subr.bf16.mxu1 %v480_v5  ;;  %v488_v13 = vld [vmem:[%s639_s1 + $0xd8] sm:$0xff]   ;;  %v492_v17 = vld [vmem:[%s639_s1 + $0xe0] sm:$0xff]   ;;  %v496_v21 = vld [vmem:[%s639_s1 + $0xe8] sm:$0xff]  }
   0x7   :  { %v489_v14 = vld [vmem:[%s639_s1 + $0x18] sm:$0xff]   ;;  %v493_v18 = vld [vmem:[%s639_s1 + $0x20] sm:$0xff]   ;;  %v497_v22 = vld [vmem:[%s639_s1 + $0x28] sm:$0xff]  }
   0x8   :  { %434 = vmatpush3.bf16.msra.mxu0 %v481_v6  ;;  %v490_v15 = vld [vmem:[%s639_s1 + $0x98] sm:$0xff]   ;;  %v494_v19 = vld [vmem:[%s639_s1 + $0xa0] sm:$0xff]   ;;  %v498_v23 = vld [vmem:[%s639_s1 + $0xa8] sm:$0xff]  }
   0x9   :  { %456 = vmatpush3.bf16.msra.mxu1 %v482_v7  ;;  %435 = vmatprep.subr.bf16.mxu0 %v483_v8  ;;  %v499_v24 = vld [vmem:[%s639_s1 + $0x70] sm:$0xff]   ;;  %v503_v28 = vld [vmem:[%s639_s1 + $0x78] sm:$0xff]   ;;  %v21_v32 = vld [vmem:[%s640_s0] sm:$0xff] }
   0xa   :  { %457 = vmatprep.subr.bf16.mxu1 %v484_v9  ;;  %v500_v25 = vld [vmem:[%s639_s1 + $0xf0] sm:$0xff]   ;;  %v504_v29 = vld [vmem:[%s639_s1 + $0xf8] sm:$0xff]   ;;  %v22_v33 = vld [vmem:[%s640_s0 + $0x8] sm:$0xff]  ;;  %v394_v34 = vcombine.low %v21_v32, %v21_v32  ;;  %v395_v35 = vcombine.high %v21_v32, %v21_v32 }
   0xb   :  { %v501_v26 = vld [vmem:[%s639_s1 + $0x30] sm:$0xff]   ;;  %v505_v30 = vld [vmem:[%s639_s1 + $0x38] sm:$0xff]   ;;  %v396_v36 = vcombine.low %v22_v33, %v22_v33  ;;  %v397_v37 = vcombine.high %v22_v33, %v22_v33  ;;  %v430_v46 = vld [vmem:[%s641_s2] ss:$0 sm:$0xff] }
   0xc   :  { %436 = vmatpush3.bf16.msra.mxu0 %v485_v10  ;;  %v502_v27 = vld [vmem:[%s639_s1 + $0xb0] sm:$0xff]   ;;  %v506_v31 = vld [vmem:[%s639_s1 + $0xb8] sm:$0xff]   ;;  %325 = vmatprep.mubr.bf16.mxu0 %v395_v35 }
   0xd   :  { %458 = vmatpush3.bf16.msra.mxu1 %v486_v11  ;;  %437 = vmatprep.subr.bf16.mxu0 %v487_v12 }
   0xe   :  { %459 = vmatprep.subr.bf16.mxu1 %v488_v13  ;;  %365 = vmatprep.mubr.bf16.mxu1 %v397_v37 }
  0x10   :  { %438 = vmatpush3.bf16.msra.mxu0 %v489_v14 }
  0x11   :  { %460 = vmatpush3.bf16.msra.mxu1 %v490_v15  ;;  %439 = vmatprep.subr.bf16.mxu0 %v491_v16 }
  0x12   :  { %461 = vmatprep.subr.bf16.mxu1 %v492_v17 }
  0x14   :  { %440 = vmatpush3.bf16.msra.mxu0 %v493_v18 }
  0x15   :  { %462 = vmatpush3.bf16.msra.mxu1 %v494_v19  ;;  %441 = vmatprep.subr.bf16.mxu0 %v495_v20 }
  0x16   :  { %463 = vmatprep.subr.bf16.mxu1 %v496_v21 }
  0x18   :  { %442 = vmatpush3.bf16.msra.mxu0 %v497_v22 }
  0x19   :  { %464 = vmatpush3.bf16.msra.mxu1 %v498_v23  ;;  %443 = vmatprep.subr.bf16.mxu0 %v499_v24 }
  0x1a   :  { %465 = vmatprep.subr.bf16.mxu1 %v500_v25 }
  0x1c   :  { %444 = vmatpush3.bf16.msra.mxu0 %v501_v26 }
  0x1d   :  { %466 = vmatpush3.bf16.msra.mxu1 %v502_v27  ;;  %445 = vmatprep.subr.bf16.mxu0 %v503_v28 }
  0x1e   :  { %467 = vmatprep.subr.bf16.mxu1 %v504_v29 }
  0x20   :  { %446 = vmatpush3.bf16.msra.mxu0 %v505_v30 }
  0x21   :  { %468 = vmatpush3.bf16.msra.mxu1 %v506_v31 }
  0x23   :  { %326 = vmatmul.mubr.bf16.vlgmr.msra.gmra.mrb[0].mxu0 %v394_v34 }
  0x24   :  { %366 = vmatmul.mubr.bf16.vlgmr.msra.gmra.mrb[0].mxu1 %v396_v36 }
  0xf6   :  { %v447_v38 = vpop.f32.mrb[0].mxu0 }
  0xf7   :  { %v469_v39 = vpop.f32.mrb[0].mxu1  ;;  %v448_v40 = vpop.f32.mrb[1].mxu0 }
  0xf8   :  { %v470_v41 = vpop.f32.mrb[1].mxu1  ;;  %v449_v42 = vadd.f32 %v448_v40, %v447_v38  ;;  %v450_v44 = vpop.f32.mrb[2].mxu0 }
  0xf9   :  { %v471_v43 = vadd.f32 %v470_v41, %v469_v39  ;;  %v472_v45 = vpop.f32.mrb[2].mxu1  ;;  %v451_v47 = vpop.f32.mrb[3].mxu0 }
  0xfa   :  { %v473_v48 = vpop.f32.mrb[3].mxu1 }
  0xfb   :  { %v368_v49 = vadd.f32 %v471_v43, %v449_v42 }
  0xfd   :  { %v386_v50 = vadd.f32 %v430_v46, %v368_v49 }
  0xff   :  { %v387_v51 = vmax.f32 %v386_v50, 0.0 }
 0x101   :  { %v388_v52 = vpack.c.bf16 %v387_v51, %v387_v51 }
 0x103   :  { %389 = vst [vmem:[%s642_s3] sm:$0xf] %v388_v52 }

// kernel: _lambda_.98
= control target key start
LH: loop header
LB: loop body
LE: loop exit
PB: predicated region body
PF: predicated region fallthrough
CT: control target
= control target key end

     0   :  { %s1271_s12 = smov 0   ;;  %s1273_s13 = smov 0   ;;  %s1524_s0 = inlined_call_operand.vmem [shape: bf16[8,512], index: 0, kind: input, shape index: {}]   ;;  %s1525_s1 = inlined_call_operand.vmem [shape: bf16[512,256], index: 1, kind: input, shape index: {}]   ;;  %s1526_s2 = inlined_call_operand.vmem [shape: f32[1,256], index: 2, kind: input, shape index: {}]   ;;  %s1527_s3 = inlined_call_operand.vmem [shape: bf16[8,256], index: 3, kind: output, shape index: {}]  }
   0x1   :  { %s1275_s14 = smov 0   ;;  %s1277_s15 = smov 0  }
   0x2   :  { %s1279_s16 = smov 0  }
   0x3 LB: > { %s28_s17 = sadd.s32 1, %s1245_s15  ;;  %p76_p1 = scmp.ne.s32.totalorder %s1237_s13, %s1233_s12  ;;  %s1249_s16 = sphi %s1279_s16, %s13_s16   ;;  %s1245_s15 = sphi %s1277_s15, %s1531_s15   ;;  %s1241_s14 = sphi %s1275_s14, %s1530_s14   ;;  %s1237_s13 = sphi %s1273_s13, %s1529_s13   ;;  %s1233_s12 = sphi %s1271_s12, %s1528_s12  }
   0x4   : > { %p30_p0 = scmp.ge.s32.totalorder %s28_s17, 2  ;;  %p77_p2 = scmp.eq.s32.totalorder %s1249_s16, 0 }
   0x5   : > { %s69_s19 = sadd.s32 1, %s1237_s13  ;;  %p1046_p5 = scmp.ge.s32.totalorder %s1249_s16, 2 }
   0x6   : > { %s1533_s17 = smov (%p30_p0, %s28_s17), 0  ;;  %p78_p3 = por %p77_p2, %p76_p1 }
   0x7   : > { %s65_s18 = ssub.s32 %s1245_s15, %s1533_s17  ;;  %169 = sbr.rel (%p1046_p5) target bundleno = 60 (0x3c), region = 20 }
   0x8   : > { %p67_p4 = scmp.eq.s32.totalorder %s65_s18, 0 }
   0xa   : > { %s1306_s20 = scalar_select %p67_p4, %s1237_s13, %s69_s19  }
   0xe   : > { %172 = sbr.rel (!%p78_p3) target bundleno = 60 (0x3c), region = 24  ;;  %s174_s21 = sand.u32 (%p78_p3), 1, %s1237_s13  }
   0xf   : > { %s1048_s22 = sshll.u32 (%p78_p3), %s1245_s15, 2  ;;  %s1047_s23 = sshll.u32 (%p78_p3), %s174_s21, 8 }
  0x10   : > { %s1314_s26 = scalar_lea.vmem (%p78_p3), %s1525_s1, %s1048_s22  ;;  %s1318_s27 = scalar_lea.vmem (%p78_p3), [#allocation3], %s1047_s23 }
  0x11   : > { %v197_v0 = vld [vmem:[%s1314_s26] sm:$0xf] (%p78_p3)  ;;  %v199_v1 = vld [vmem:[%s1314_s26 + $0x8] sm:$0xf] (%p78_p3)  ;;  %v201_v2 = vld [vmem:[%s1314_s26 + $0x10] sm:$0xf] (%p78_p3) }
  0x12   : > { %198 = vst [vmem:[%s1318_s27] sm:$0xf] (%p78_p3), %v197_v0  ;;  %200 = vst [vmem:[%s1318_s27 + $0x4] sm:$0xf] (%p78_p3), %v199_v1  ;;  %v203_v3 = vld [vmem:[%s1314_s26 + $0x18] sm:$0xf] (%p78_p3) }
  0x13   : > { %v205_v4 = vld [vmem:[%s1314_s26 + $0x20] sm:$0xf] (%p78_p3)  ;;  %202 = vst [vmem:[%s1318_s27 + $0x8] sm:$0xf] (%p78_p3), %v201_v2  ;;  %204 = vst [vmem:[%s1318_s27 + $0xc] sm:$0xf] (%p78_p3), %v203_v3 }
  0x14   : > { %206 = vst [vmem:[%s1318_s27 + $0x10] sm:$0xf] (%p78_p3), %v205_v4  ;;  %v207_v5 = vld [vmem:[%s1314_s26 + $0x28] sm:$0xf] (%p78_p3)  ;;  %v209_v6 = vld [vmem:[%s1314_s26 + $0x30] sm:$0xf] (%p78_p3) }
  0x15   : > { %v211_v7 = vld [vmem:[%s1314_s26 + $0x38] sm:$0xf]  ;;  %208 = vst [vmem:[%s1318_s27 + $0x14] sm:$0xf] %v207_v5  ;;  %210 = vst [vmem:[%s1318_s27 + $0x18] sm:$0xf] %v209_v6 }
  0x16   : > { %212 = vst [vmem:[%s1318_s27 + $0x1c] sm:$0xf] %v211_v7  ;;  %v213_v8 = vld [vmem:[%s1314_s26 + $0x40] sm:$0xf]  ;;  %v215_v9 = vld [vmem:[%s1314_s26 + $0x48] sm:$0xf] }
  0x17   : > { %v217_v10 = vld [vmem:[%s1314_s26 + $0x50] sm:$0xf]  ;;  %214 = vst [vmem:[%s1318_s27 + $0x20] sm:$0xf] %v213_v8  ;;  %216 = vst [vmem:[%s1318_s27 + $0x24] sm:$0xf] %v215_v9 }
  0x18   : > { %218 = vst [vmem:[%s1318_s27 + $0x28] sm:$0xf] %v217_v10  ;;  %v219_v11 = vld [vmem:[%s1314_s26 + $0x58] sm:$0xf]  ;;  %v221_v12 = vld [vmem:[%s1314_s26 + $0x60] sm:$0xf] }
  0x19   : > { %v223_v13 = vld [vmem:[%s1314_s26 + $0x68] sm:$0xf]  ;;  %220 = vst [vmem:[%s1318_s27 + $0x2c] sm:$0xf] %v219_v11  ;;  %222 = vst [vmem:[%s1318_s27 + $0x30] sm:$0xf] %v221_v12 }
  0x1a   : > { %224 = vst [vmem:[%s1318_s27 + $0x34] sm:$0xf] %v223_v13  ;;  %v225_v14 = vld [vmem:[%s1314_s26 + $0x70] sm:$0xf]  ;;  %v227_v15 = vld [vmem:[%s1314_s26 + $0x78] sm:$0xf] }
  0x1b   : > { %v229_v16 = vld [vmem:[%s1314_s26 + $0x80] sm:$0xf]  ;;  %226 = vst [vmem:[%s1318_s27 + $0x38] sm:$0xf] %v225_v14  ;;  %228 = vst [vmem:[%s1318_s27 + $0x3c] sm:$0xf] %v227_v15 }
  0x1c   : > { %230 = vst [vmem:[%s1318_s27 + $0x40] sm:$0xf] %v229_v16  ;;  %v231_v17 = vld [vmem:[%s1314_s26 + $0x88] sm:$0xf]  ;;  %v233_v18 = vld [vmem:[%s1314_s26 + $0x90] sm:$0xf] }
  0x1d   : > { %v235_v19 = vld [vmem:[%s1314_s26 + $0x98] sm:$0xf]  ;;  %232 = vst [vmem:[%s1318_s27 + $0x44] sm:$0xf] %v231_v17  ;;  %234 = vst [vmem:[%s1318_s27 + $0x48] sm:$0xf] %v233_v18 }
  0x1e   : > { %236 = vst [vmem:[%s1318_s27 + $0x4c] sm:$0xf] %v235_v19  ;;  %v237_v20 = vld [vmem:[%s1314_s26 + $0xa0] sm:$0xf]  ;;  %v239_v21 = vld [vmem:[%s1314_s26 + $0xa8] sm:$0xf] }
  0x1f   : > { %v241_v22 = vld [vmem:[%s1314_s26 + $0xb0] sm:$0xf]  ;;  %238 = vst [vmem:[%s1318_s27 + $0x50] sm:$0xf] %v237_v20  ;;  %240 = vst [vmem:[%s1318_s27 + $0x54] sm:$0xf] %v239_v21 }
  0x20   : > { %242 = vst [vmem:[%s1318_s27 + $0x58] sm:$0xf] %v241_v22  ;;  %v243_v23 = vld [vmem:[%s1314_s26 + $0xb8] sm:$0xf]  ;;  %v245_v24 = vld [vmem:[%s1314_s26 + $0xc0] sm:$0xf] }
  0x21   : > { %v247_v25 = vld [vmem:[%s1314_s26 + $0xc8] sm:$0xf]  ;;  %244 = vst [vmem:[%s1318_s27 + $0x5c] sm:$0xf] %v243_v23  ;;  %246 = vst [vmem:[%s1318_s27 + $0x60] sm:$0xf] %v245_v24 }
  0x22   : > { %248 = vst [vmem:[%s1318_s27 + $0x64] sm:$0xf] %v247_v25  ;;  %v249_v26 = vld [vmem:[%s1314_s26 + $0xd0] sm:$0xf]  ;;  %v251_v27 = vld [vmem:[%s1314_s26 + $0xd8] sm:$0xf] }
  0x23   : > { %v253_v28 = vld [vmem:[%s1314_s26 + $0xe0] sm:$0xf]  ;;  %250 = vst [vmem:[%s1318_s27 + $0x68] sm:$0xf] %v249_v26  ;;  %252 = vst [vmem:[%s1318_s27 + $0x6c] sm:$0xf] %v251_v27 }
  0x24   : > { %254 = vst [vmem:[%s1318_s27 + $0x70] sm:$0xf] %v253_v28  ;;  %v255_v29 = vld [vmem:[%s1314_s26 + $0xe8] sm:$0xf]  ;;  %v257_v30 = vld [vmem:[%s1314_s26 + $0xf0] sm:$0xf] }
  0x25   : > { %v259_v31 = vld [vmem:[%s1314_s26 + $0xf8] sm:$0xf]  ;;  %256 = vst [vmem:[%s1318_s27 + $0x74] sm:$0xf] %v255_v29  ;;  %258 = vst [vmem:[%s1318_s27 + $0x78] sm:$0xf] %v257_v30 }
  0x26   : > { %260 = vst [vmem:[%s1318_s27 + $0x7c] sm:$0xf] %v259_v31  ;;  %v261_v32 = vld [vmem:[%s1314_s26 + $0x100] sm:$0xf]  ;;  %v263_v33 = vld [vmem:[%s1314_s26 + $0x108] sm:$0xf] }
  0x27   : > { %v265_v34 = vld [vmem:[%s1314_s26 + $0x110] sm:$0xf]  ;;  %262 = vst [vmem:[%s1318_s27 + $0x80] sm:$0xf] %v261_v32  ;;  %264 = vst [vmem:[%s1318_s27 + $0x84] sm:$0xf] %v263_v33 }
  0x28   : > { %266 = vst [vmem:[%s1318_s27 + $0x88] sm:$0xf] %v265_v34  ;;  %v267_v35 = vld [vmem:[%s1314_s26 + $0x118] sm:$0xf]  ;;  %v269_v36 = vld [vmem:[%s1314_s26 + $0x120] sm:$0xf] }
  0x29   : > { %v271_v37 = vld [vmem:[%s1314_s26 + $0x128] sm:$0xf]  ;;  %268 = vst [vmem:[%s1318_s27 + $0x8c] sm:$0xf] %v267_v35  ;;  %270 = vst [vmem:[%s1318_s27 + $0x90] sm:$0xf] %v269_v36 }
  0x2a   : > { %272 = vst [vmem:[%s1318_s27 + $0x94] sm:$0xf] %v271_v37  ;;  %v273_v38 = vld [vmem:[%s1314_s26 + $0x130] sm:$0xf]  ;;  %v275_v39 = vld [vmem:[%s1314_s26 + $0x138] sm:$0xf] }
  0x2b   : > { %v277_v40 = vld [vmem:[%s1314_s26 + $0x140] sm:$0xf]  ;;  %274 = vst [vmem:[%s1318_s27 + $0x98] sm:$0xf] %v273_v38  ;;  %276 = vst [vmem:[%s1318_s27 + $0x9c] sm:$0xf] %v275_v39 }
  0x2c   : > { %278 = vst [vmem:[%s1318_s27 + $0xa0] sm:$0xf] %v277_v40  ;;  %v279_v41 = vld [vmem:[%s1314_s26 + $0x148] sm:$0xf]  ;;  %v281_v42 = vld [vmem:[%s1314_s26 + $0x150] sm:$0xf] }
  0x2d   : > { %v283_v43 = vld [vmem:[%s1314_s26 + $0x158] sm:$0xf]  ;;  %280 = vst [vmem:[%s1318_s27 + $0xa4] sm:$0xf] %v279_v41  ;;  %282 = vst [vmem:[%s1318_s27 + $0xa8] sm:$0xf] %v281_v42 }
  0x2e   : > { %284 = vst [vmem:[%s1318_s27 + $0xac] sm:$0xf] %v283_v43  ;;  %v285_v44 = vld [vmem:[%s1314_s26 + $0x160] sm:$0xf]  ;;  %v287_v45 = vld [vmem:[%s1314_s26 + $0x168] sm:$0xf] }
  0x2f   : > { %v289_v46 = vld [vmem:[%s1314_s26 + $0x170] sm:$0xf]  ;;  %286 = vst [vmem:[%s1318_s27 + $0xb0] sm:$0xf] %v285_v44  ;;  %288 = vst [vmem:[%s1318_s27 + $0xb4] sm:$0xf] %v287_v45 }
  0x30   : > { %290 = vst [vmem:[%s1318_s27 + $0xb8] sm:$0xf] %v289_v46  ;;  %v291_v47 = vld [vmem:[%s1314_s26 + $0x178] sm:$0xf]  ;;  %v293_v48 = vld [vmem:[%s1314_s26 + $0x180] sm:$0xf] }
  0x31   : > { %v295_v49 = vld [vmem:[%s1314_s26 + $0x188] sm:$0xf]  ;;  %292 = vst [vmem:[%s1318_s27 + $0xbc] sm:$0xf] %v291_v47  ;;  %294 = vst [vmem:[%s1318_s27 + $0xc0] sm:$0xf] %v293_v48 }
  0x32   : > { %296 = vst [vmem:[%s1318_s27 + $0xc4] sm:$0xf] %v295_v49  ;;  %v297_v50 = vld [vmem:[%s1314_s26 + $0x190] sm:$0xf]  ;;  %v299_v51 = vld [vmem:[%s1314_s26 + $0x198] sm:$0xf] }
  0x33   : > { %v301_v52 = vld [vmem:[%s1314_s26 + $0x1a0] sm:$0xf]  ;;  %298 = vst [vmem:[%s1318_s27 + $0xc8] sm:$0xf] %v297_v50  ;;  %300 = vst [vmem:[%s1318_s27 + $0xcc] sm:$0xf] %v299_v51 }
  0x34   : > { %302 = vst [vmem:[%s1318_s27 + $0xd0] sm:$0xf] %v301_v52  ;;  %v303_v53 = vld [vmem:[%s1314_s26 + $0x1a8] sm:$0xf]  ;;  %v305_v54 = vld [vmem:[%s1314_s26 + $0x1b0] sm:$0xf] }
  0x35   : > { %v307_v55 = vld [vmem:[%s1314_s26 + $0x1b8] sm:$0xf]  ;;  %304 = vst [vmem:[%s1318_s27 + $0xd4] sm:$0xf] %v303_v53  ;;  %306 = vst [vmem:[%s1318_s27 + $0xd8] sm:$0xf] %v305_v54 }
  0x36   : > { %308 = vst [vmem:[%s1318_s27 + $0xdc] sm:$0xf] %v307_v55  ;;  %v309_v56 = vld [vmem:[%s1314_s26 + $0x1c0] sm:$0xf]  ;;  %v311_v57 = vld [vmem:[%s1314_s26 + $0x1c8] sm:$0xf] }
  0x37   : > { %v313_v58 = vld [vmem:[%s1314_s26 + $0x1d0] sm:$0xf]  ;;  %310 = vst [vmem:[%s1318_s27 + $0xe0] sm:$0xf] %v309_v56  ;;  %312 = vst [vmem:[%s1318_s27 + $0xe4] sm:$0xf] %v311_v57 }
  0x38   : > { %314 = vst [vmem:[%s1318_s27 + $0xe8] sm:$0xf] %v313_v58  ;;  %v315_v59 = vld [vmem:[%s1314_s26 + $0x1d8] sm:$0xf]  ;;  %v317_v60 = vld [vmem:[%s1314_s26 + $0x1e0] sm:$0xf] }
  0x39   : > { %v319_v61 = vld [vmem:[%s1314_s26 + $0x1e8] sm:$0xf]  ;;  %316 = vst [vmem:[%s1318_s27 + $0xec] sm:$0xf] %v315_v59  ;;  %318 = vst [vmem:[%s1318_s27 + $0xf0] sm:$0xf] %v317_v60 }
  0x3a   : > { %320 = vst [vmem:[%s1318_s27 + $0xf4] sm:$0xf] %v319_v61  ;;  %v321_v62 = vld [vmem:[%s1314_s26 + $0x1f0] sm:$0xf]  ;;  %v323_v63 = vld [vmem:[%s1314_s26 + $0x1f8] sm:$0xf] }
  0x3b   : > { %322 = vst [vmem:[%s1318_s27 + $0xf8] sm:$0xf] %v321_v62  ;;  %324 = vst [vmem:[%s1318_s27 + $0xfc] sm:$0xf] %v323_v63 }
  0x3c PF: > { %p1049_p6 = scmp.ge.s32.totalorder %s1249_s16, 1  ;;  %p480_p7 = scmp.lt.s32.totalorder %s1249_s16, 3 }
  0x3e   : > { %p481_p8 = pnand %p1049_p6, %p480_p7 }
  0x3f   : > { %s487_s28 = sand.u32 (!%p481_p8), 1, %s1233_s12   ;;  %v1452_v0 = vld [vmem:[%s1524_s0] sm:$0xff] (!%p481_p8)  ;;  %v1457_v1 = vld [vmem:[%s1524_s0 + $0x8] sm:$0xff] (!%p481_p8)  ;;  %p536_p9 = scmp.lt.s32.totalorder (!%p481_p8), %s1241_s14, 1 }
  0x40   : > { %484 = sbr.rel (%p481_p8) target bundleno = 325 (0x145), region = 69  ;;  %s1050_s6 = sshll.u32 (!%p481_p8), %s487_s28, 8  ;;  %v1053_v2 = vcombine.high (!%p481_p8), %v1452_v0, %v1452_v0  ;;  %v1055_v3 = vcombine.high (!%p481_p8), %v1457_v1, %v1457_v1  ;;  %v1052_v36 = vcombine.low (!%p481_p8), %v1452_v0, %v1452_v0  ;;  %v1054_v37 = vcombine.low (!%p481_p8), %v1457_v1, %v1457_v1 }
  0x41   : > { %s1463_s7 = scalar_lea.vmem (!%p481_p8), [#allocation3], %s1050_s6 }
  0x42   : > { %v1175_v4 = vld [vmem:[%s1463_s7 + $0x40] sm:$0xff] (!%p481_p8)   ;;  %858 = vmatprep.mubr.bf16.mxu0 (!%p481_p8), %v1053_v2  ;;  %898 = vmatprep.mubr.bf16.mxu1 (!%p481_p8), %v1055_v3  ;;  %v1179_v8 = vld [vmem:[%s1463_s7 + $0x48] sm:$0xff] (!%p481_p8)   ;;  %v1183_v12 = vld [vmem:[%s1463_s7 + $0x50] sm:$0xff] (!%p481_p8)  }
  0x43   : > { %v1176_v5 = vld [vmem:[%s1463_s7 + $0xc0] sm:$0xff] (!%p481_p8)   ;;  %1091 = vmatprep.subr.bf16.mxu0 (!%p481_p8), %v1175_v4  ;;  %v1180_v9 = vld [vmem:[%s1463_s7 + $0xc8] sm:$0xff] (!%p481_p8)   ;;  %v1184_v13 = vld [vmem:[%s1463_s7 + $0xd0] sm:$0xff] (!%p481_p8)  }
  0x44   : > { %v1177_v6 = vld [vmem:[%s1463_s7] sm:$0xff] (!%p481_p8)   ;;  %1113 = vmatprep.subr.bf16.mxu1 (!%p481_p8), %v1176_v5  ;;  %v1181_v10 = vld [vmem:[%s1463_s7 + $0x8] sm:$0xff] (!%p481_p8)   ;;  %v1185_v14 = vld [vmem:[%s1463_s7 + $0x10] sm:$0xff] (!%p481_p8)  }
  0x45   : > { %v1178_v7 = vld [vmem:[%s1463_s7 + $0x80] sm:$0xff] (!%p481_p8)   ;;  %1092 = vmatpush3.bf16.msra.mxu0 (!%p481_p8), %v1177_v6  ;;  %v1182_v11 = vld [vmem:[%s1463_s7 + $0x88] sm:$0xff] (!%p481_p8)   ;;  %v1186_v15 = vld [vmem:[%s1463_s7 + $0x90] sm:$0xff] (!%p481_p8)  }
  0x46   : > { %1114 = vmatpush3.bf16.msra.mxu1 (!%p481_p8), %v1178_v7  ;;  %1093 = vmatprep.subr.bf16.mxu0 (!%p481_p8), %v1179_v8  ;;  %v1187_v16 = vld [vmem:[%s1463_s7 + $0x58] sm:$0xff] (!%p481_p8)   ;;  %v1191_v20 = vld [vmem:[%s1463_s7 + $0x60] sm:$0xff] (!%p481_p8)   ;;  %v1195_v24 = vld [vmem:[%s1463_s7 + $0x68] sm:$0xff] (!%p481_p8)  }
  0x47   : > { %1115 = vmatprep.subr.bf16.mxu1 %v1180_v9  ;;  %v1188_v17 = vld [vmem:[%s1463_s7 + $0xd8] sm:$0xff]   ;;  %v1192_v21 = vld [vmem:[%s1463_s7 + $0xe0] sm:$0xff]   ;;  %v1196_v25 = vld [vmem:[%s1463_s7 + $0xe8] sm:$0xff]   ;;  %s1535_s14 = smov (!%p536_p9, %s1241_s14), 1 }
  0x48   : > { %v1189_v18 = vld [vmem:[%s1463_s7 + $0x18] sm:$0xff]   ;;  %v1193_v22 = vld [vmem:[%s1463_s7 + $0x20] sm:$0xff]   ;;  %v1197_v26 = vld [vmem:[%s1463_s7 + $0x28] sm:$0xff]   ;;  %s538_s10 = scalar_lea.vmem %s1526_s2, %s1535_s14  ;;  %s1051_s11 = sshll.u32 %s1535_s14, 2 }
  0x49   : > { %1094 = vmatpush3.bf16.msra.mxu0 %v1181_v10  ;;  %v1190_v19 = vld [vmem:[%s1463_s7 + $0x98] sm:$0xff]   ;;  %v1194_v23 = vld [vmem:[%s1463_s7 + $0xa0] sm:$0xff]   ;;  %v1198_v27 = vld [vmem:[%s1463_s7 + $0xa8] sm:$0xff]   ;;  %s546_s19 = scalar_lea.vmem %s1527_s3, %s1051_s11 }
  0x4a   : > { %1116 = vmatpush3.bf16.msra.mxu1 %v1182_v11  ;;  %1095 = vmatprep.subr.bf16.mxu0 %v1183_v12  ;;  %v1199_v28 = vld [vmem:[%s1463_s7 + $0x70] sm:$0xff]   ;;  %v1203_v32 = vld [vmem:[%s1463_s7 + $0x78] sm:$0xff]   ;;  %v1088_v47 = vld [vmem:[%s538_s10] ss:$0 sm:$0xff] }
  0x4b   : > { %1117 = vmatprep.subr.bf16.mxu1 %v1184_v13  ;;  %v1200_v29 = vld [vmem:[%s1463_s7 + $0xf0] sm:$0xff]   ;;  %v1204_v33 = vld [vmem:[%s1463_s7 + $0xf8] sm:$0xff]  }
  0x4c   : > { %v1201_v30 = vld [vmem:[%s1463_s7 + $0x30] sm:$0xff]   ;;  %v1205_v34 = vld [vmem:[%s1463_s7 + $0x38] sm:$0xff]  }
  0x4d   : > { %1096 = vmatpush3.bf16.msra.mxu0 %v1185_v14  ;;  %v1202_v31 = vld [vmem:[%s1463_s7 + $0xb0] sm:$0xff]   ;;  %v1206_v35 = vld [vmem:[%s1463_s7 + $0xb8] sm:$0xff]  }
  0x4e   : > { %1118 = vmatpush3.bf16.msra.mxu1 %v1186_v15  ;;  %1097 = vmatprep.subr.bf16.mxu0 %v1187_v16 }
  0x4f   : > { %1119 = vmatprep.subr.bf16.mxu1 %v1188_v17 }
  0x51   : > { %1098 = vmatpush3.bf16.msra.mxu0 %v1189_v18 }
  0x52   : > { %1120 = vmatpush3.bf16.msra.mxu1 %v1190_v19  ;;  %1099 = vmatprep.subr.bf16.mxu0 %v1191_v20 }
  0x53   : > { %1121 = vmatprep.subr.bf16.mxu1 %v1192_v21 }
  0x55   : > { %1100 = vmatpush3.bf16.msra.mxu0 %v1193_v22 }
  0x56   : > { %1122 = vmatpush3.bf16.msra.mxu1 %v1194_v23  ;;  %1101 = vmatprep.subr.bf16.mxu0 %v1195_v24 }
  0x57   : > { %1123 = vmatprep.subr.bf16.mxu1 %v1196_v25 }
  0x59   : > { %1102 = vmatpush3.bf16.msra.mxu0 %v1197_v26 }
  0x5a   : > { %1124 = vmatpush3.bf16.msra.mxu1 %v1198_v27  ;;  %1103 = vmatprep.subr.bf16.mxu0 %v1199_v28 }
  0x5b   : > { %1125 = vmatprep.subr.bf16.mxu1 %v1200_v29 }
  0x5d   : > { %1104 = vmatpush3.bf16.msra.mxu0 %v1201_v30 }
  0x5e   : > { %1126 = vmatpush3.bf16.msra.mxu1 %v1202_v31  ;;  %1105 = vmatprep.subr.bf16.mxu0 %v1203_v32 }
  0x5f   : > { %1127 = vmatprep.subr.bf16.mxu1 %v1204_v33 }
  0x61   : > { %1106 = vmatpush3.bf16.msra.mxu0 %v1205_v34 }
  0x62   : > { %1128 = vmatpush3.bf16.msra.mxu1 %v1206_v35 }
  0x64   : > { %859 = vmatmul.mubr.bf16.vlgmr.msra.gmra.mrb[0].mxu0 %v1052_v36 }
  0x65   : > { %899 = vmatmul.mubr.bf16.vlgmr.msra.gmra.mrb[0].mxu1 %v1054_v37 }
 0x137   : > { %v1107_v38 = vpop.f32.mrb[0].mxu0 }
 0x138   : > { %v1129_v39 = vpop.f32.mrb[0].mxu1  ;;  %v1108_v40 = vpop.f32.mrb[1].mxu0 }
 0x139   : > { %v1109_v41 = vadd.f32 %v1108_v40, %v1107_v38  ;;  %v1130_v42 = vpop.f32.mrb[1].mxu1  ;;  %v1110_v43 = vpop.f32.mrb[2].mxu0 }
 0x13a   : > { %v1131_v44 = vadd.f32 %v1130_v42, %v1129_v39  ;;  %v1132_v45 = vpop.f32.mrb[2].mxu1  ;;  %v1111_v46 = vpop.f32.mrb[3].mxu0 }
 0x13b   : > { %v1133_v48 = vpop.f32.mrb[3].mxu1 }
 0x13c   : > { %v901_v49 = vadd.f32 %v1131_v44, %v1109_v41 }
 0x13e   : > { %v919_v50 = vadd.f32 %v1088_v47, %v901_v49 }
 0x140   : > { %v920_v51 = vmax.f32 %v919_v50, 0.0 }
 0x142   : > { %v921_v52 = vpack.c.bf16 %v920_v51, %v920_v51 }
 0x144   : > { %922 = vst [vmem:[%s546_s19] sm:$0xf] %v921_v52 }
 0x145 PF: > { %s13_s16 = sadd.s32 1, %s1249_s16   ;;  %s1528_s12 = smov %s1237_s13 }
 0x146   : > { %p10_p10 = scmp.ge.s32.totalorder %s13_s16, 4   ;;  %s1529_s13 = smov %s1306_s20 }
 0x147   : > { %s1530_s14 = smov %s1245_s15  ;;  %s1531_s15 = smov %s1533_s17 }
 0x148   :  { %12 = sbr.rel (!%p10_p10) target bundleno = 3 (0x3), region = 122 }

// kernel: _lambda_.99
= control target key start
LH: loop header
LB: loop body
LE: loop exit
PB: predicated region body
PF: predicated region fallthrough
CT: control target
= control target key end

     0   :  { %s950_s12 = smov 0   ;;  %s952_s13 = smov 0   ;;  %s1151_s0 = inlined_call_operand.vmem [shape: bf16[2,2304], index: 0, kind: input, shape index: {}]   ;;  %s1152_s1 = inlined_call_operand.vmem [shape: bf16[2304,256], index: 1, kind: input, shape index: {}]   ;;  %s1153_s2 = inlined_call_operand.vmem [shape: f32[1,256], index: 2, kind: input, shape index: {}]   ;;  %s1154_s3 = inlined_call_operand.vmem [shape: bf16[2,256], index: 3, kind: output, shape index: {}]  }
   0x1   :  { %s954_s14 = smov 0   ;;  %s956_s15 = smov 0  }
   0x2   :  { %s958_s16 = smov 0   ;;  %s960_s17 = smov 0  }
   0x3   :  { %s962_s18 = smov 0  }
   0x4 LB: > { %s25_s19 = sadd.s32 1, %s918_s16  ;;  %s28_s20 = sadd.s32 1, %s922_s17  ;;  %s926_s18 = sphi %s962_s18, %s13_s18   ;;  %s922_s17 = sphi %s960_s17, %s1160_s17   ;;  %s918_s16 = sphi %s958_s16, %s1159_s16   ;;  %s914_s15 = sphi %s956_s15, %s1158_s15   ;;  %s910_s14 = sphi %s954_s14, %s1157_s14   ;;  %s906_s13 = sphi %s952_s13, %s1156_s13   ;;  %s902_s12 = sphi %s950_s12, %s1155_s12  }
   0x5   : > { %p26_p0 = scmp.ge.s32.totalorder %s25_s19, 9  ;;  %p76_p1 = scmp.ne.s32.totalorder %s906_s13, %s902_s12 }
   0x6   : > { %p77_p2 = scmp.eq.s32.totalorder %s926_s18, 0  ;;  %s69_s24 = sadd.s32 1, %s906_s13 }
   0x7   : > { %s1162_s19 = smov (%p26_p0, %s25_s19), 0  ;;  %s1164_s20 = smov (!%p26_p0, %s28_s20), %s922_s17 }
   0x8   : > { %p78_p3 = por %p77_p2, %p76_p1  ;;  %p30_p4 = scmp.ge.s32.totalorder %s1164_s20, 2 }
   0x9   : > { %s64_s21 = ssub.s32 %s918_s16, %s1162_s19  ;;  %p745_p6 = scmp.ge.s32.totalorder %s926_s18, 18 }
   0xa   : > { %s1166_s20 = smov (%p30_p4, %s1164_s20), 0 }
   0xb   : > { %s65_s22 = ssub.s32 %s922_s17, %s1166_s20  ;;  %156 = sbr.rel (%p745_p6) target bundleno = 45 (0x2d), region = 16 }
   0xc   : > { %s66_s23 = sor.u32 %s65_s22, %s64_s21 }
   0xd   : > { %p67_p5 = scmp.eq.s32.totalorder %s66_s23, 0 }
   0xf   : > { %s1001_s25 = scalar_select %p67_p5, %s906_s13, %s69_s24  }
  0x12   : > { %171 = sbr.rel (!%p78_p3) target bundleno = 45 (0x2d), region = 24  ;;  %s173_s26 = sand.u32 (%p78_p3), 1, %s906_s13  }
  0x13   : > { %s775_s27 = sshll.u32 (%p78_p3), %s918_s16, 6  ;;  %s746_s28 = sshll.u32 (%p78_p3), %s173_s26, 7 }
  0x14   : > { %s178_s29 = sadd.s32 (%p78_p3), %s922_s17, %s775_s27  ;;  %s1015_s7 = scalar_lea.vmem (%p78_p3), [#allocation3], %s746_s28 }
  0x15   : > { %s749_s30 = sshll.u32 (%p78_p3), %s178_s29, 2 }
  0x16   : > { %s1010_s6 = scalar_lea.vmem (%p78_p3), %s1152_s1, %s749_s30 }
  0x17   : > { %v196_v0 = vld [vmem:[%s1010_s6] sm:$0xf] (%p78_p3)  ;;  %v198_v1 = vld [vmem:[%s1010_s6 + $0x8] sm:$0xf] (%p78_p3)  ;;  %v200_v2 = vld [vmem:[%s1010_s6 + $0x10] sm:$0xf] (%p78_p3) }
  0x18   : > { %197 = vst [vmem:[%s1015_s7] sm:$0xf] (%p78_p3), %v196_v0  ;;  %199 = vst [vmem:[%s1015_s7 + $0x4] sm:$0xf] (%p78_p3), %v198_v1  ;;  %v202_v3 = vld [vmem:[%s1010_s6 + $0x18] sm:$0xf] (%p78_p3) }
  0x19   : > { %201 = vst [vmem:[%s1015_s7 + $0x8] sm:$0xf] %v200_v2  ;;  %v204_v4 = vld [vmem:[%s1010_s6 + $0x20] sm:$0xf]  ;;  %v206_v5 = vld [vmem:[%s1010_s6 + $0x28] sm:$0xf] }
  0x1a   : > { %203 = vst [vmem:[%s1015_s7 + $0xc] sm:$0xf] %v202_v3  ;;  %205 = vst [vmem:[%s1015_s7 + $0x10] sm:$0xf] %v204_v4  ;;  %v208_v6 = vld [vmem:[%s1010_s6 + $0x30] sm:$0xf] }
  0x1b   : > { %207 = vst [vmem:[%s1015_s7 + $0x14] sm:$0xf] %v206_v5  ;;  %v210_v7 = vld [vmem:[%s1010_s6 + $0x38] sm:$0xf]  ;;  %v212_v8 = vld [vmem:[%s1010_s6 + $0x40] sm:$0xf] }
  0x1c   : > { %209 = vst [vmem:[%s1015_s7 + $0x18] sm:$0xf] %v208_v6  ;;  %211 = vst [vmem:[%s1015_s7 + $0x1c] sm:$0xf] %v210_v7  ;;  %v214_v9 = vld [vmem:[%s1010_s6 + $0x48] sm:$0xf] }
  0x1d   : > { %213 = vst [vmem:[%s1015_s7 + $0x20] sm:$0xf] %v212_v8  ;;  %v216_v10 = vld [vmem:[%s1010_s6 + $0x50] sm:$0xf]  ;;  %v218_v11 = vld [vmem:[%s1010_s6 + $0x58] sm:$0xf] }
  0x1e   : > { %215 = vst [vmem:[%s1015_s7 + $0x24] sm:$0xf] %v214_v9  ;;  %217 = vst [vmem:[%s1015_s7 + $0x28] sm:$0xf] %v216_v10  ;;  %v220_v12 = vld [vmem:[%s1010_s6 + $0x60] sm:$0xf] }
  0x1f   : > { %219 = vst [vmem:[%s1015_s7 + $0x2c] sm:$0xf] %v218_v11  ;;  %v222_v13 = vld [vmem:[%s1010_s6 + $0x68] sm:$0xf]  ;;  %v224_v14 = vld [vmem:[%s1010_s6 + $0x70] sm:$0xf] }
  0x20   : > { %221 = vst [vmem:[%s1015_s7 + $0x30] sm:$0xf] %v220_v12  ;;  %223 = vst [vmem:[%s1015_s7 + $0x34] sm:$0xf] %v222_v13  ;;  %v226_v15 = vld [vmem:[%s1010_s6 + $0x78] sm:$0xf] }
  0x21   : > { %225 = vst [vmem:[%s1015_s7 + $0x38] sm:$0xf] %v224_v14  ;;  %v228_v16 = vld [vmem:[%s1010_s6 + $0x80] sm:$0xf]  ;;  %v230_v17 = vld [vmem:[%s1010_s6 + $0x88] sm:$0xf] }
  0x22   : > { %227 = vst [vmem:[%s1015_s7 + $0x3c] sm:$0xf] %v226_v15  ;;  %229 = vst [vmem:[%s1015_s7 + $0x40] sm:$0xf] %v228_v16  ;;  %v232_v18 = vld [vmem:[%s1010_s6 + $0x90] sm:$0xf] }
  0x23   : > { %231 = vst [vmem:[%s1015_s7 + $0x44] sm:$0xf] %v230_v17  ;;  %v234_v19 = vld [vmem:[%s1010_s6 + $0x98] sm:$0xf]  ;;  %v236_v20 = vld [vmem:[%s1010_s6 + $0xa0] sm:$0xf] }
  0x24   : > { %233 = vst [vmem:[%s1015_s7 + $0x48] sm:$0xf] %v232_v18  ;;  %235 = vst [vmem:[%s1015_s7 + $0x4c] sm:$0xf] %v234_v19  ;;  %v238_v21 = vld [vmem:[%s1010_s6 + $0xa8] sm:$0xf] }
  0x25   : > { %237 = vst [vmem:[%s1015_s7 + $0x50] sm:$0xf] %v236_v20  ;;  %v240_v22 = vld [vmem:[%s1010_s6 + $0xb0] sm:$0xf]  ;;  %v242_v23 = vld [vmem:[%s1010_s6 + $0xb8] sm:$0xf] }
  0x26   : > { %239 = vst [vmem:[%s1015_s7 + $0x54] sm:$0xf] %v238_v21  ;;  %241 = vst [vmem:[%s1015_s7 + $0x58] sm:$0xf] %v240_v22  ;;  %v244_v24 = vld [vmem:[%s1010_s6 + $0xc0] sm:$0xf] }
  0x27   : > { %243 = vst [vmem:[%s1015_s7 + $0x5c] sm:$0xf] %v242_v23  ;;  %v246_v25 = vld [vmem:[%s1010_s6 + $0xc8] sm:$0xf]  ;;  %v248_v26 = vld [vmem:[%s1010_s6 + $0xd0] sm:$0xf] }
  0x28   : > { %245 = vst [vmem:[%s1015_s7 + $0x60] sm:$0xf] %v244_v24  ;;  %247 = vst [vmem:[%s1015_s7 + $0x64] sm:$0xf] %v246_v25  ;;  %v250_v27 = vld [vmem:[%s1010_s6 + $0xd8] sm:$0xf] }
  0x29   : > { %249 = vst [vmem:[%s1015_s7 + $0x68] sm:$0xf] %v248_v26  ;;  %v252_v28 = vld [vmem:[%s1010_s6 + $0xe0] sm:$0xf]  ;;  %v254_v29 = vld [vmem:[%s1010_s6 + $0xe8] sm:$0xf] }
  0x2a   : > { %251 = vst [vmem:[%s1015_s7 + $0x6c] sm:$0xf] %v250_v27  ;;  %253 = vst [vmem:[%s1015_s7 + $0x70] sm:$0xf] %v252_v28  ;;  %v256_v30 = vld [vmem:[%s1010_s6 + $0xf0] sm:$0xf] }
  0x2b   : > { %255 = vst [vmem:[%s1015_s7 + $0x74] sm:$0xf] %v254_v29  ;;  %v258_v31 = vld [vmem:[%s1010_s6 + $0xf8] sm:$0xf]  ;;  %257 = vst [vmem:[%s1015_s7 + $0x78] sm:$0xf] %v256_v30 }
  0x2c   : > { %259 = vst [vmem:[%s1015_s7 + $0x7c] sm:$0xf] %v258_v31 }
  0x2d PF: > { %p750_p7 = scmp.ge.s32.totalorder %s926_s18, 1  ;;  %p351_p8 = scmp.lt.s32.totalorder %s926_s18, 19 }
  0x2f   : > { %p352_p9 = pnand %p750_p7, %p351_p8 }
  0x30   : > { %s358_s8 = sand.u32 (!%p352_p9), 1, %s902_s12   ;;  %s752_s9 = sshll.u32 (!%p352_p9), %s910_s14, 1 }
  0x31   : > { %355 = sbr.rel (%p352_p9) target bundleno = 330 (0x14a), region = 69  ;;  %s751_s10 = sshll.u32 (!%p352_p9), %s358_s8, 7 }
  0x32   : > { %p397_p10 = scmp.lt.s32.totalorder (!%p352_p9), %s752_s9, 17  ;;  %p404_p11 = scmp.lt.s32.totalorder (!%p352_p9), %s914_s15, 1 }
  0x33   : > { %s1100_s29 = scalar_lea.vmem (!%p352_p9), [#allocation3], %s751_s10  ;;  %p753_p12 = scmp.ne.s32.totalorder (!%p352_p9), %s910_s14, 0 }
  0x38   : > { %s1168_s9 = smov (!%p397_p10, %s752_s9), 17  ;;  %s1170_s15 = smov (!%p404_p11, %s914_s15), 1 }
  0x39   : > { %s401_s22 = scalar_lea.vmem %s1151_s0, %s1168_s9  ;;  %s406_s26 = scalar_lea.vmem %s1153_s2, %s1170_s15  ;;  %v928_v32 = vmov (!%p753_p12), 0.0  }
  0x3a   : > { %s413_s28 = scalar_lea.vmem %s1154_s3, %s1170_s15  ;;  %418 = sbr.rel (%p753_p12) target bundleno = 65 (0x41), region = 77  ;;  %419 = vst [vmem:[#allocation2] sm:$0x3] (!%p753_p12), %v928_v32 }
  0x41 PF: > { %v856_v33 = vld [vmem:[%s1100_s29 + $0x40] sm:$0xff]   ;;  %v858_v35 = vld [vmem:[%s1100_s29 + $0x48] sm:$0xff]   ;;  %v860_v37 = vld [vmem:[%s1100_s29 + $0x50] sm:$0xff]   ;;  %v466_v42 = vlaneseq  ;;  %v929_v46 = vmov 1966171168   ;;  %p771_p13 = scmp.ne.s32.totalorder %s910_s14, 8 }
  0x42   : > { %v857_v34 = vld [vmem:[%s1100_s29] sm:$0xff]   ;;  %776 = vmatprep.subr.bf16.mxu0 %v856_v33  ;;  %v859_v36 = vld [vmem:[%s1100_s29 + $0x8] sm:$0xff]   ;;  %v861_v38 = vld [vmem:[%s1100_s29 + $0x10] sm:$0xff]   ;;  %v464_v47 = vunpack.c.l.s4 %v929_v46 }
  0x43   : > { %777 = vmatpush3.bf16.msra.mxu0 %v857_v34  ;;  %v862_v39 = vld [vmem:[%s1100_s29 + $0x58] sm:$0xff]   ;;  %v864_v41 = vld [vmem:[%s1100_s29 + $0x60] sm:$0xff]   ;;  %v866_v44 = vld [vmem:[%s1100_s29 + $0x68] sm:$0xff]   ;;  %v467_v48 = vshrl.u32 %v466_v42, 7 }
  0x44   : > { %778 = vmatprep.subr.bf16.mxu0 %v858_v35  ;;  %v863_v40 = vld [vmem:[%s1100_s29 + $0x18] sm:$0xff]   ;;  %v865_v43 = vld [vmem:[%s1100_s29 + $0x20] sm:$0xff]   ;;  %v867_v49 = vld [vmem:[%s1100_s29 + $0x28] sm:$0xff]   ;;  %v465_v51 = vunpack.c.0.s8 %v464_v47 }
  0x45   : > { %v754_v45 = vld.sshfl [vmem:[%s401_s22] sm:$0x11 pattern:$0x75316420]  ;;  %v868_v52 = vld [vmem:[%s1100_s29 + $0x70] sm:$0xff]  }
  0x46   : > { %v462_v50 = vcombine.high %v754_v45, %v754_v45  ;;  %v468_v53 = vsub.s32 %v465_v51, %v467_v48  ;;  %v869_v54 = vld [vmem:[%s1100_s29 + $0x30] sm:$0xff]   ;;  %v870_v56 = vld [vmem:[%s1100_s29 + $0x78] sm:$0xff]  }
  0x47   : > { %779 = vmatpush3.bf16.msra.mxu0 %v859_v36  ;;  %v871_v57 = vld [vmem:[%s1100_s29 + $0x38] sm:$0xff]  }
  0x48   : > { %780 = vmatprep.subr.bf16.mxu0 %v860_v37  ;;  %v476_v55 = vrot.slane %v462_v50, %v468_v53  ;;  %v469_v58 = vrot.slane %v754_v45, %v468_v53  ;;  %v420_v60 = vld [vmem:[#allocation2] sm:$0x3] }
  0x49   : > { %v772_v3 = vld [vmem:[%s406_s26] ss:$0 sm:$0xff] (!%p771_p13) }
  0x4a   : > { %607 = vmatprep.mubr.bf16.mxu0 %v476_v55 }
  0x4b   : > { %781 = vmatpush3.bf16.msra.mxu0 %v861_v38 }
  0x4c   : > { %782 = vmatprep.subr.bf16.mxu0 %v862_v39 }
  0x4f   : > { %783 = vmatpush3.bf16.msra.mxu0 %v863_v40 }
  0x50   : > { %784 = vmatprep.subr.bf16.mxu0 %v864_v41 }
  0x53   : > { %785 = vmatpush3.bf16.msra.mxu0 %v865_v43 }
  0x54   : > { %786 = vmatprep.subr.bf16.mxu0 %v866_v44 }
  0x57   : > { %787 = vmatpush3.bf16.msra.mxu0 %v867_v49 }
  0x58   : > { %788 = vmatprep.subr.bf16.mxu0 %v868_v52 }
  0x5b   : > { %789 = vmatpush3.bf16.msra.mxu0 %v869_v54 }
  0x5c   : > { %790 = vmatprep.subr.bf16.mxu0 %v870_v56 }
  0x5f   : > { %791 = vmatpush3.bf16.msra.mxu0 %v871_v57 }
  0x62   : > { %608 = vmatmul.mubr.bf16.vlgmr.msra.gmra.mrb[0].mxu0 %v469_v58 }
 0x135   : > { %v792_v59 = vpop.f32.mrb[0].mxu0  ;;  %620 = sbr.rel (%p771_p13) target bundleno = 330 (0x14a), region = 81 }
 0x136   : > { %v793_v61 = vpop.f32.mrb[1].mxu0 }
 0x137   : > { %v794_v62 = vadd.f32 %v793_v61, %v792_v59  ;;  %v795_v63 = vpop.f32.mrb[2].mxu0 }
 0x138   : > { %v796_v0 = vpop.f32.mrb[3].mxu0 }
 0x139   : > { %v615_v1 = vadd.f32 %v794_v62, %v420_v60 }
 0x13b   : > { %616 = vst [vmem:[#allocation2] sm:$0x3] %v615_v1 }
 0x142   : > { %v621_v2 = vld [vmem:[#allocation2] sm:$0x3] }
 0x143   : > { %v629_v4 = vadd.f32 %v772_v3, %v621_v2 }
 0x145   : > { %v630_v5 = vmax.f32 %v629_v4, 0.0 }
 0x147   : > { %v631_v6 = vpack.c.bf16 %v630_v5, %v630_v5 }
 0x149   : > { %632 = vst [vmem:[%s413_s28] sm:$0x1] %v631_v6 }
 0x14a PF: > { %s13_s18 = sadd.s32 1, %s926_s18   ;;  %s1155_s12 = smov %s906_s13 }
 0x14b   : > { %p10_p0 = scmp.ge.s32.totalorder %s13_s18, 20   ;;  %s1156_s13 = smov %s1001_s25 }
 0x14c   : > { %s1157_s14 = smov %s918_s16  ;;  %s1158_s15 = smov %s922_s17 }
 0x14d   : > { %s1159_s16 = smov %s1162_s19  ;;  %s1160_s17 = smov %s1166_s20 }
 0x14e   :  { %12 = sbr.rel (!%p10_p0) target bundleno = 4 (0x4), region = 122 }

// kernel: _lambda_.100
= control target key start
LH: loop header
LB: loop body
LE: loop exit
PB: predicated region body
PF: predicated region fallthrough
CT: control target
= control target key end

     0   :  { %s1266_s12 = smov 0   ;;  %s1268_s13 = smov 0   ;;  %s1509_s0 = inlined_call_operand.vmem [shape: bf16[2,512], index: 0, kind: input, shape index: {}]   ;;  %s1510_s1 = inlined_call_operand.vmem [shape: bf16[512,1024], index: 1, kind: input, shape index: {}]   ;;  %s1511_s2 = inlined_call_operand.vmem [shape: f32[1,1024], index: 2, kind: input, shape index: {}]   ;;  %s1512_s3 = inlined_call_operand.vmem [shape: bf16[2,1024], index: 3, kind: output, shape index: {}]  }
   0x1   :  { %s1270_s14 = smov 0   ;;  %s1272_s15 = smov 0  }
   0x2   :  { %s1274_s16 = smov 0  }
   0x3 LB: > { %s28_s17 = sadd.s32 1, %s1238_s15  ;;  %p76_p1 = scmp.ne.s32.totalorder %s1230_s13, %s1226_s12  ;;  %s1242_s16 = sphi %s1274_s16, %s13_s16   ;;  %s1238_s15 = sphi %s1272_s15, %s1516_s15   ;;  %s1234_s14 = sphi %s1270_s14, %s1515_s14   ;;  %s1230_s13 = sphi %s1268_s13, %s1514_s13   ;;  %s1226_s12 = sphi %s1266_s12, %s1513_s12  }
   0x4   : > { %p30_p0 = scmp.ge.s32.totalorder %s28_s17, 8  ;;  %p77_p2 = scmp.eq.s32.totalorder %s1242_s16, 0 }
   0x5   : > { %s69_s19 = sadd.s32 1, %s1230_s13  ;;  %p1045_p5 = scmp.ge.s32.totalorder %s1242_s16, 8 }
   0x6   : > { %s1518_s17 = smov (%p30_p0, %s28_s17), 0  ;;  %p78_p3 = por %p77_p2, %p76_p1 }
   0x7   : > { %s65_s18 = ssub.s32 %s1238_s15, %s1518_s17  ;;  %168 = sbr.rel (%p1045_p5) target bundleno = 82 (0x52), region = 20 }
   0x8   : > { %p67_p4 = scmp.eq.s32.totalorder %s65_s18, 0 }
   0xa   : > { %s1301_s20 = scalar_select %p67_p4, %s1230_s13, %s69_s19  }
   0xe   : > { %171 = sbr.rel (!%p78_p3) target bundleno = 82 (0x52), region = 24  ;;  %s173_s21 = sand.u32 (%p78_p3), 1, %s1230_s13  }
   0xf   : > { %s1047_s22 = sshll.u32 (%p78_p3), %s1238_s15, 2  ;;  %s1046_s23 = sshll.u32 (%p78_p3), %s173_s21, 8 }
  0x10   : > { %s1309_s26 = scalar_lea.vmem (%p78_p3), %s1510_s1, %s1047_s22  ;;  %s1313_s27 = scalar_lea.vmem (%p78_p3), [#allocation3], %s1046_s23 }
  0x11   : > { %v196_v0 = vld [vmem:[%s1309_s26] sm:$0xf] (%p78_p3) }
  0x12   : > { %v198_v1 = vld [vmem:[%s1309_s26 + $0x20] sm:$0xf] (%p78_p3)  ;;  %197 = vst [vmem:[%s1313_s27] sm:$0xf] (%p78_p3), %v196_v0 }
  0x13   : > { %199 = vst [vmem:[%s1313_s27 + $0x4] sm:$0xf] (%p78_p3), %v198_v1  ;;  %v200_v2 = vld [vmem:[%s1309_s26 + $0x40] sm:$0xf] (%p78_p3) }
  0x14   : > { %v202_v3 = vld [vmem:[%s1309_s26 + $0x60] sm:$0xf] (%p78_p3)  ;;  %201 = vst [vmem:[%s1313_s27 + $0x8] sm:$0xf] (%p78_p3), %v200_v2 }
  0x15   : > { %v204_v4 = vld [vmem:[%s1309_s26 + $0x80] sm:$0xf]  ;;  %203 = vst [vmem:[%s1313_s27 + $0xc] sm:$0xf] %v202_v3 }
  0x16   : > { %205 = vst [vmem:[%s1313_s27 + $0x10] sm:$0xf] %v204_v4  ;;  %v206_v5 = vld [vmem:[%s1309_s26 + $0xa0] sm:$0xf] }
  0x17   : > { %v208_v6 = vld [vmem:[%s1309_s26 + $0xc0] sm:$0xf]  ;;  %207 = vst [vmem:[%s1313_s27 + $0x14] sm:$0xf] %v206_v5 }
  0x18   : > { %v210_v7 = vld [vmem:[%s1309_s26 + $0xe0] sm:$0xf]  ;;  %209 = vst [vmem:[%s1313_s27 + $0x18] sm:$0xf] %v208_v6 }
  0x19   : > { %211 = vst [vmem:[%s1313_s27 + $0x1c] sm:$0xf] %v210_v7  ;;  %v212_v8 = vld [vmem:[%s1309_s26 + $0x100] sm:$0xf] }
  0x1a   : > { %v214_v9 = vld [vmem:[%s1309_s26 + $0x120] sm:$0xf]  ;;  %213 = vst [vmem:[%s1313_s27 + $0x20] sm:$0xf] %v212_v8 }
  0x1b   : > { %v216_v10 = vld [vmem:[%s1309_s26 + $0x140] sm:$0xf]  ;;  %215 = vst [vmem:[%s1313_s27 + $0x24] sm:$0xf] %v214_v9 }
  0x1c   : > { %217 = vst [vmem:[%s1313_s27 + $0x28] sm:$0xf] %v216_v10  ;;  %v218_v11 = vld [vmem:[%s1309_s26 + $0x160] sm:$0xf] }
  0x1d   : > { %v220_v12 = vld [vmem:[%s1309_s26 + $0x180] sm:$0xf]  ;;  %219 = vst [vmem:[%s1313_s27 + $0x2c] sm:$0xf] %v218_v11 }
  0x1e   : > { %v222_v13 = vld [vmem:[%s1309_s26 + $0x1a0] sm:$0xf]  ;;  %221 = vst [vmem:[%s1313_s27 + $0x30] sm:$0xf] %v220_v12 }
  0x1f   : > { %223 = vst [vmem:[%s1313_s27 + $0x34] sm:$0xf] %v222_v13  ;;  %v224_v14 = vld [vmem:[%s1309_s26 + $0x1c0] sm:$0xf] }
  0x20   : > { %v226_v15 = vld [vmem:[%s1309_s26 + $0x1e0] sm:$0xf]  ;;  %225 = vst [vmem:[%s1313_s27 + $0x38] sm:$0xf] %v224_v14 }
  0x21   : > { %v228_v16 = vld [vmem:[%s1309_s26 + $0x200] sm:$0xf]  ;;  %227 = vst [vmem:[%s1313_s27 + $0x3c] sm:$0xf] %v226_v15 }
  0x22   : > { %229 = vst [vmem:[%s1313_s27 + $0x40] sm:$0xf] %v228_v16  ;;  %v230_v17 = vld [vmem:[%s1309_s26 + $0x220] sm:$0xf] }
  0x23   : > { %v232_v18 = vld [vmem:[%s1309_s26 + $0x240] sm:$0xf]  ;;  %231 = vst [vmem:[%s1313_s27 + $0x44] sm:$0xf] %v230_v17 }
  0x24   : > { %v234_v19 = vld [vmem:[%s1309_s26 + $0x260] sm:$0xf]  ;;  %233 = vst [vmem:[%s1313_s27 + $0x48] sm:$0xf] %v232_v18 }
  0x25   : > { %235 = vst [vmem:[%s1313_s27 + $0x4c] sm:$0xf] %v234_v19  ;;  %v236_v20 = vld [vmem:[%s1309_s26 + $0x280] sm:$0xf] }
  0x26   : > { %v238_v21 = vld [vmem:[%s1309_s26 + $0x2a0] sm:$0xf]  ;;  %237 = vst [vmem:[%s1313_s27 + $0x50] sm:$0xf] %v236_v20 }
  0x27   : > { %v240_v22 = vld [vmem:[%s1309_s26 + $0x2c0] sm:$0xf]  ;;  %239 = vst [vmem:[%s1313_s27 + $0x54] sm:$0xf] %v238_v21 }
  0x28   : > { %241 = vst [vmem:[%s1313_s27 + $0x58] sm:$0xf] %v240_v22  ;;  %v242_v23 = vld [vmem:[%s1309_s26 + $0x2e0] sm:$0xf] }
  0x29   : > { %v244_v24 = vld [vmem:[%s1309_s26 + $0x300] sm:$0xf]  ;;  %243 = vst [vmem:[%s1313_s27 + $0x5c] sm:$0xf] %v242_v23 }
  0x2a   : > { %v246_v25 = vld [vmem:[%s1309_s26 + $0x320] sm:$0xf]  ;;  %245 = vst [vmem:[%s1313_s27 + $0x60] sm:$0xf] %v244_v24 }
  0x2b   : > { %247 = vst [vmem:[%s1313_s27 + $0x64] sm:$0xf] %v246_v25  ;;  %v248_v26 = vld [vmem:[%s1309_s26 + $0x340] sm:$0xf] }
  0x2c   : > { %v250_v27 = vld [vmem:[%s1309_s26 + $0x360] sm:$0xf]  ;;  %249 = vst [vmem:[%s1313_s27 + $0x68] sm:$0xf] %v248_v26 }
  0x2d   : > { %v252_v28 = vld [vmem:[%s1309_s26 + $0x380] sm:$0xf]  ;;  %251 = vst [vmem:[%s1313_s27 + $0x6c] sm:$0xf] %v250_v27 }
  0x2e   : > { %253 = vst [vmem:[%s1313_s27 + $0x70] sm:$0xf] %v252_v28  ;;  %v254_v29 = vld [vmem:[%s1309_s26 + $0x3a0] sm:$0xf] }
  0x2f   : > { %v256_v30 = vld [vmem:[%s1309_s26 + $0x3c0] sm:$0xf]  ;;  %255 = vst [vmem:[%s1313_s27 + $0x74] sm:$0xf] %v254_v29 }
  0x30   : > { %v258_v31 = vld [vmem:[%s1309_s26 + $0x3e0] sm:$0xf]  ;;  %257 = vst [vmem:[%s1313_s27 + $0x78] sm:$0xf] %v256_v30 }
  0x31   : > { %259 = vst [vmem:[%s1313_s27 + $0x7c] sm:$0xf] %v258_v31  ;;  %v260_v32 = vld [vmem:[%s1309_s26 + $0x400] sm:$0xf] }
  0x32   : > { %v262_v33 = vld [vmem:[%s1309_s26 + $0x420] sm:$0xf]  ;;  %261 = vst [vmem:[%s1313_s27 + $0x80] sm:$0xf] %v260_v32 }
  0x33   : > { %v264_v34 = vld [vmem:[%s1309_s26 + $0x440] sm:$0xf]  ;;  %263 = vst [vmem:[%s1313_s27 + $0x84] sm:$0xf] %v262_v33 }
  0x34   : > { %265 = vst [vmem:[%s1313_s27 + $0x88] sm:$0xf] %v264_v34  ;;  %v266_v35 = vld [vmem:[%s1309_s26 + $0x460] sm:$0xf] }
  0x35   : > { %v268_v36 = vld [vmem:[%s1309_s26 + $0x480] sm:$0xf]  ;;  %267 = vst [vmem:[%s1313_s27 + $0x8c] sm:$0xf] %v266_v35 }
  0x36   : > { %v270_v37 = vld [vmem:[%s1309_s26 + $0x4a0] sm:$0xf]  ;;  %269 = vst [vmem:[%s1313_s27 + $0x90] sm:$0xf] %v268_v36 }
  0x37   : > { %271 = vst [vmem:[%s1313_s27 + $0x94] sm:$0xf] %v270_v37  ;;  %v272_v38 = vld [vmem:[%s1309_s26 + $0x4c0] sm:$0xf] }
  0x38   : > { %v274_v39 = vld [vmem:[%s1309_s26 + $0x4e0] sm:$0xf]  ;;  %273 = vst [vmem:[%s1313_s27 + $0x98] sm:$0xf] %v272_v38 }
  0x39   : > { %v276_v40 = vld [vmem:[%s1309_s26 + $0x500] sm:$0xf]  ;;  %275 = vst [vmem:[%s1313_s27 + $0x9c] sm:$0xf] %v274_v39 }
  0x3a   : > { %277 = vst [vmem:[%s1313_s27 + $0xa0] sm:$0xf] %v276_v40  ;;  %v278_v41 = vld [vmem:[%s1309_s26 + $0x520] sm:$0xf] }
  0x3b   : > { %v280_v42 = vld [vmem:[%s1309_s26 + $0x540] sm:$0xf]  ;;  %279 = vst [vmem:[%s1313_s27 + $0xa4] sm:$0xf] %v278_v41 }
  0x3c   : > { %v282_v43 = vld [vmem:[%s1309_s26 + $0x560] sm:$0xf]  ;;  %281 = vst [vmem:[%s1313_s27 + $0xa8] sm:$0xf] %v280_v42 }
  0x3d   : > { %283 = vst [vmem:[%s1313_s27 + $0xac] sm:$0xf] %v282_v43  ;;  %v284_v44 = vld [vmem:[%s1309_s26 + $0x580] sm:$0xf] }
  0x3e   : > { %v286_v45 = vld [vmem:[%s1309_s26 + $0x5a0] sm:$0xf]  ;;  %285 = vst [vmem:[%s1313_s27 + $0xb0] sm:$0xf] %v284_v44 }
  0x3f   : > { %v288_v46 = vld [vmem:[%s1309_s26 + $0x5c0] sm:$0xf]  ;;  %287 = vst [vmem:[%s1313_s27 + $0xb4] sm:$0xf] %v286_v45 }
  0x40   : > { %289 = vst [vmem:[%s1313_s27 + $0xb8] sm:$0xf] %v288_v46  ;;  %v290_v47 = vld [vmem:[%s1309_s26 + $0x5e0] sm:$0xf] }
  0x41   : > { %v292_v48 = vld [vmem:[%s1309_s26 + $0x600] sm:$0xf]  ;;  %291 = vst [vmem:[%s1313_s27 + $0xbc] sm:$0xf] %v290_v47 }
  0x42   : > { %v294_v49 = vld [vmem:[%s1309_s26 + $0x620] sm:$0xf]  ;;  %293 = vst [vmem:[%s1313_s27 + $0xc0] sm:$0xf] %v292_v48 }
  0x43   : > { %295 = vst [vmem:[%s1313_s27 + $0xc4] sm:$0xf] %v294_v49  ;;  %v296_v50 = vld [vmem:[%s1309_s26 + $0x640] sm:$0xf] }
  0x44   : > { %v298_v51 = vld [vmem:[%s1309_s26 + $0x660] sm:$0xf]  ;;  %297 = vst [vmem:[%s1313_s27 + $0xc8] sm:$0xf] %v296_v50 }
  0x45   : > { %v300_v52 = vld [vmem:[%s1309_s26 + $0x680] sm:$0xf]  ;;  %299 = vst [vmem:[%s1313_s27 + $0xcc] sm:$0xf] %v298_v51 }
  0x46   : > { %301 = vst [vmem:[%s1313_s27 + $0xd0] sm:$0xf] %v300_v52  ;;  %v302_v53 = vld [vmem:[%s1309_s26 + $0x6a0] sm:$0xf] }
  0x47   : > { %v304_v54 = vld [vmem:[%s1309_s26 + $0x6c0] sm:$0xf]  ;;  %303 = vst [vmem:[%s1313_s27 + $0xd4] sm:$0xf] %v302_v53 }
  0x48   : > { %v306_v55 = vld [vmem:[%s1309_s26 + $0x6e0] sm:$0xf]  ;;  %305 = vst [vmem:[%s1313_s27 + $0xd8] sm:$0xf] %v304_v54 }
  0x49   : > { %307 = vst [vmem:[%s1313_s27 + $0xdc] sm:$0xf] %v306_v55  ;;  %v308_v56 = vld [vmem:[%s1309_s26 + $0x700] sm:$0xf] }
  0x4a   : > { %v310_v57 = vld [vmem:[%s1309_s26 + $0x720] sm:$0xf]  ;;  %309 = vst [vmem:[%s1313_s27 + $0xe0] sm:$0xf] %v308_v56 }
  0x4b   : > { %v312_v58 = vld [vmem:[%s1309_s26 + $0x740] sm:$0xf]  ;;  %311 = vst [vmem:[%s1313_s27 + $0xe4] sm:$0xf] %v310_v57 }
  0x4c   : > { %313 = vst [vmem:[%s1313_s27 + $0xe8] sm:$0xf] %v312_v58  ;;  %v314_v59 = vld [vmem:[%s1309_s26 + $0x760] sm:$0xf] }
  0x4d   : > { %v316_v60 = vld [vmem:[%s1309_s26 + $0x780] sm:$0xf]  ;;  %315 = vst [vmem:[%s1313_s27 + $0xec] sm:$0xf] %v314_v59 }
  0x4e   : > { %v318_v61 = vld [vmem:[%s1309_s26 + $0x7a0] sm:$0xf]  ;;  %317 = vst [vmem:[%s1313_s27 + $0xf0] sm:$0xf] %v316_v60 }
  0x4f   : > { %319 = vst [vmem:[%s1313_s27 + $0xf4] sm:$0xf] %v318_v61  ;;  %v320_v62 = vld [vmem:[%s1309_s26 + $0x7c0] sm:$0xf] }
  0x50   : > { %v322_v63 = vld [vmem:[%s1309_s26 + $0x7e0] sm:$0xf]  ;;  %321 = vst [vmem:[%s1313_s27 + $0xf8] sm:$0xf] %v320_v62 }
  0x51   : > { %323 = vst [vmem:[%s1313_s27 + $0xfc] sm:$0xf] %v322_v63 }
  0x52 PF: > { %p1048_p6 = scmp.ge.s32.totalorder %s1242_s16, 1  ;;  %p479_p7 = scmp.lt.s32.totalorder %s1242_s16, 9 }
  0x54   : > { %p480_p8 = pnand %p1048_p6, %p479_p7 }
  0x55   : > { %s486_s28 = sand.u32 (!%p480_p8), 1, %s1226_s12   ;;  %v1447_v0 = vld.sshfl [vmem:[%s1509_s0] sm:$0x33 pattern:$0x75316420] (!%p480_p8)  ;;  %v626_v1 = vlaneseq (!%p480_p8)  ;;  %v1245_v44 = vmov (!%p480_p8), 0.0  }
  0x56   : > { %483 = sbr.rel (%p480_p8) target bundleno = 355 (0x163), region = 69  ;;  %s1049_s4 = sshll.u32 (!%p480_p8), %s486_s28, 8  ;;  %v1244_v2 = vmov (!%p480_p8), 1966171168   ;;  %v622_v7 = vcombine.high (!%p480_p8), %v1447_v0, %v1447_v0  ;;  %547 = vst [vmem:[#allocation2] sm:$0x3] (!%p480_p8), %v1245_v44 }
  0x57   : > { %v624_v3 = vunpack.c.l.s4 (!%p480_p8), %v1244_v2  ;;  %v627_v4 = vshrl.u32 (!%p480_p8), %v626_v1, 7  ;;  %s1449_s5 = scalar_lea.vmem (!%p480_p8), [#allocation3], %s1049_s4  ;;  %p532_p9 = scmp.lt.s32.totalorder (!%p480_p8), %s1234_s14, 7 }
  0x58   : > { %v1172_v5 = vld [vmem:[%s1449_s5 + $0x40] sm:$0xff] (!%p480_p8)   ;;  %v1176_v12 = vld [vmem:[%s1449_s5 + $0x48] sm:$0xff] (!%p480_p8)   ;;  %v1180_v18 = vld [vmem:[%s1449_s5 + $0x50] sm:$0xff] (!%p480_p8)  }
  0x59   : > { %v1173_v6 = vld [vmem:[%s1449_s5 + $0xc0] sm:$0xff] (!%p480_p8)   ;;  %v625_v8 = vunpack.c.0.s8 (!%p480_p8), %v624_v3  ;;  %1086 = vmatprep.subr.bf16.mxu0 (!%p480_p8), %v1172_v5  ;;  %v1177_v13 = vld [vmem:[%s1449_s5 + $0xc8] sm:$0xff] (!%p480_p8)   ;;  %v1181_v19 = vld [vmem:[%s1449_s5 + $0xd0] sm:$0xff] (!%p480_p8)  }
  0x5a   : > { %v1174_v9 = vld [vmem:[%s1449_s5] sm:$0xff] (!%p480_p8)   ;;  %1108 = vmatprep.subr.bf16.mxu1 (!%p480_p8), %v1173_v6  ;;  %v1178_v15 = vld [vmem:[%s1449_s5 + $0x8] sm:$0xff] (!%p480_p8)   ;;  %v1182_v20 = vld [vmem:[%s1449_s5 + $0x10] sm:$0xff] (!%p480_p8)  }
  0x5b   : > { %v1175_v10 = vld [vmem:[%s1449_s5 + $0x80] sm:$0xff] (!%p480_p8)   ;;  %v628_v11 = vsub.s32 (!%p480_p8), %v625_v8, %v627_v4  ;;  %1087 = vmatpush3.bf16.msra.mxu0 (!%p480_p8), %v1174_v9  ;;  %v1179_v16 = vld [vmem:[%s1449_s5 + $0x88] sm:$0xff] (!%p480_p8)   ;;  %v1183_v21 = vld [vmem:[%s1449_s5 + $0x90] sm:$0xff] (!%p480_p8)  }
  0x5c   : > { %1109 = vmatpush3.bf16.msra.mxu1 (!%p480_p8), %v1175_v10  ;;  %1088 = vmatprep.subr.bf16.mxu0 (!%p480_p8), %v1176_v12  ;;  %v1184_v22 = vld [vmem:[%s1449_s5 + $0x58] sm:$0xff] (!%p480_p8)   ;;  %v1188_v26 = vld [vmem:[%s1449_s5 + $0x60] sm:$0xff] (!%p480_p8)   ;;  %v1192_v30 = vld [vmem:[%s1449_s5 + $0x68] sm:$0xff] (!%p480_p8)  }
  0x5d   : > { %v636_v14 = vrot.slane %v622_v7, %v628_v11  ;;  %1110 = vmatprep.subr.bf16.mxu1 %v1177_v13  ;;  %v1185_v23 = vld [vmem:[%s1449_s5 + $0xd8] sm:$0xff]   ;;  %v1189_v27 = vld [vmem:[%s1449_s5 + $0xe0] sm:$0xff]   ;;  %v1193_v31 = vld [vmem:[%s1449_s5 + $0xe8] sm:$0xff]   ;;  %v629_v39 = vrot.slane %v1447_v0, %v628_v11  ;;  %s1520_s14 = smov (!%p532_p9, %s1234_s14), 7 }
  0x5e   : > { %v1186_v24 = vld [vmem:[%s1449_s5 + $0x18] sm:$0xff]   ;;  %v1190_v28 = vld [vmem:[%s1449_s5 + $0x20] sm:$0xff]   ;;  %v1194_v32 = vld [vmem:[%s1449_s5 + $0x28] sm:$0xff]   ;;  %s534_s8 = scalar_lea.vmem %s1511_s2, %s1520_s14  ;;  %s541_s11 = scalar_lea.vmem %s1512_s3, %s1520_s14 }
  0x5f   : > { %867 = vmatprep.mubr.bf16.mxu0 %v636_v14  ;;  %v638_v17 = vcombine.high %v636_v14, %v636_v14  ;;  %1089 = vmatpush3.bf16.msra.mxu0 %v1178_v15  ;;  %v1187_v25 = vld [vmem:[%s1449_s5 + $0x98] sm:$0xff]   ;;  %v1191_v29 = vld [vmem:[%s1449_s5 + $0xa0] sm:$0xff]   ;;  %v1195_v33 = vld [vmem:[%s1449_s5 + $0xa8] sm:$0xff]   ;;  %v637_v43 = vcombine.high %v629_v39, %v629_v39 }
  0x60   : > { %1111 = vmatpush3.bf16.msra.mxu1 %v1179_v16  ;;  %1090 = vmatprep.subr.bf16.mxu0 %v1180_v18  ;;  %v1196_v34 = vld [vmem:[%s1449_s5 + $0x70] sm:$0xff]   ;;  %v1200_v38 = vld [vmem:[%s1449_s5 + $0x78] sm:$0xff]  }
  0x61   : > { %907 = vmatprep.mubr.bf16.mxu1 %v638_v17  ;;  %1112 = vmatprep.subr.bf16.mxu1 %v1181_v19  ;;  %v1197_v35 = vld [vmem:[%s1449_s5 + $0xf0] sm:$0xff]   ;;  %v1201_v40 = vld [vmem:[%s1449_s5 + $0xf8] sm:$0xff]  }
  0x62   : > { %v1198_v36 = vld [vmem:[%s1449_s5 + $0x30] sm:$0xff]   ;;  %v1202_v41 = vld [vmem:[%s1449_s5 + $0x38] sm:$0xff]  }
  0x63   : > { %1091 = vmatpush3.bf16.msra.mxu0 %v1182_v20  ;;  %v1199_v37 = vld [vmem:[%s1449_s5 + $0xb0] sm:$0xff]   ;;  %v1203_v42 = vld [vmem:[%s1449_s5 + $0xb8] sm:$0xff]  }
  0x64   : > { %1113 = vmatpush3.bf16.msra.mxu1 %v1183_v21  ;;  %1092 = vmatprep.subr.bf16.mxu0 %v1184_v22  ;;  %v548_v54 = vld [vmem:[#allocation2] sm:$0x3] }
  0x65   : > { %1114 = vmatprep.subr.bf16.mxu1 %v1185_v23  ;;  %v1083_v58 = vld [vmem:[%s534_s8] ss:$0 sm:$0xff] }
  0x67   : > { %1093 = vmatpush3.bf16.msra.mxu0 %v1186_v24 }
  0x68   : > { %1115 = vmatpush3.bf16.msra.mxu1 %v1187_v25  ;;  %1094 = vmatprep.subr.bf16.mxu0 %v1188_v26 }
  0x69   : > { %1116 = vmatprep.subr.bf16.mxu1 %v1189_v27 }
  0x6b   : > { %1095 = vmatpush3.bf16.msra.mxu0 %v1190_v28 }
  0x6c   : > { %1117 = vmatpush3.bf16.msra.mxu1 %v1191_v29  ;;  %1096 = vmatprep.subr.bf16.mxu0 %v1192_v30 }
  0x6d   : > { %1118 = vmatprep.subr.bf16.mxu1 %v1193_v31 }
  0x6f   : > { %1097 = vmatpush3.bf16.msra.mxu0 %v1194_v32 }
  0x70   : > { %1119 = vmatpush3.bf16.msra.mxu1 %v1195_v33  ;;  %1098 = vmatprep.subr.bf16.mxu0 %v1196_v34 }
  0x71   : > { %1120 = vmatprep.subr.bf16.mxu1 %v1197_v35 }
  0x73   : > { %1099 = vmatpush3.bf16.msra.mxu0 %v1198_v36 }
  0x74   : > { %1121 = vmatpush3.bf16.msra.mxu1 %v1199_v37  ;;  %1100 = vmatprep.subr.bf16.mxu0 %v1200_v38 }
  0x75   : > { %1122 = vmatprep.subr.bf16.mxu1 %v1201_v40 }
  0x77   : > { %1101 = vmatpush3.bf16.msra.mxu0 %v1202_v41 }
  0x78   : > { %1123 = vmatpush3.bf16.msra.mxu1 %v1203_v42 }
  0x7a   : > { %868 = vmatmul.mubr.bf16.vlgmr.msra.gmra.mrb[0].mxu0 %v629_v39 }
  0x7b   : > { %908 = vmatmul.mubr.bf16.vlgmr.msra.gmra.mrb[0].mxu1 %v637_v43 }
 0x14d   : > { %v1102_v45 = vpop.f32.mrb[0].mxu0 }
 0x14e   : > { %v1124_v46 = vpop.f32.mrb[0].mxu1  ;;  %v1103_v47 = vpop.f32.mrb[1].mxu0 }
 0x14f   : > { %v1104_v48 = vadd.f32 %v1103_v47, %v1102_v45  ;;  %v1125_v49 = vpop.f32.mrb[1].mxu1  ;;  %v1105_v50 = vpop.f32.mrb[2].mxu0 }
 0x150   : > { %v1126_v51 = vadd.f32 %v1125_v49, %v1124_v46  ;;  %v1127_v52 = vpop.f32.mrb[2].mxu1  ;;  %v1106_v53 = vpop.f32.mrb[3].mxu0 }
 0x151   : > { %v1128_v55 = vpop.f32.mrb[3].mxu1 }
 0x152   : > { %v910_v56 = vadd.f32 %v1126_v51, %v1104_v48 }
 0x154   : > { %v915_v57 = vadd.f32 %v910_v56, %v548_v54 }
 0x156   : > { %916 = vst [vmem:[#allocation2] sm:$0x3] %v915_v57 }
 0x15d   : > { %v920_v59 = vld [vmem:[#allocation2] sm:$0x3] }
 0x15e   : > { %v928_v60 = vadd.f32 %v1083_v58, %v920_v59 }
 0x160   : > { %v929_v61 = vpack.c.bf16 %v928_v60, %v928_v60 }
 0x162   : > { %930 = vst [vmem:[%s541_s11] sm:$0x1] %v929_v61 }
 0x163 PF: > { %s13_s16 = sadd.s32 1, %s1242_s16   ;;  %s1513_s12 = smov %s1230_s13 }
 0x164   : > { %p10_p10 = scmp.ge.s32.totalorder %s13_s16, 10   ;;  %s1514_s13 = smov %s1301_s20 }
 0x165   : > { %s1515_s14 = smov %s1238_s15  ;;  %s1516_s15 = smov %s1518_s17 }
 0x166   :  { %12 = sbr.rel (!%p10_p10) target bundleno = 3 (0x3), region = 122 }

// kernel: _lambda_.101
= control target key start
LH: loop header
LB: loop body
LE: loop exit
PB: predicated region body
PF: predicated region fallthrough
CT: control target
= control target key end

     0   :  { %s991_s15 = smov 0   ;;  %s993_s16 = smov 0   ;;  %s1152_s0 = inlined_call_operand.vmem [shape: bf16[2,256], index: 0, kind: input, shape index: {}]   ;;  %s1153_s1 = inlined_call_operand.vmem [shape: bf16[256,1024], index: 1, kind: input, shape index: {}]   ;;  %s1154_s2 = inlined_call_operand.vmem [shape: f32[1,1024], index: 2, kind: input, shape index: {}]   ;;  %s1155_s3 = inlined_call_operand.vmem [shape: bf16[2,1024], index: 3, kind: input, shape index: {}]   ;;  %s1156_s4 = inlined_call_operand.vmem [shape: bf16[2,1024], index: 4, kind: output, shape index: {}]  }
   0x1   :  { %s995_s17 = smov 0   ;;  %s997_s18 = smov 0  }
   0x2   :  { %s999_s19 = smov 0  }
   0x3 LB: > { %s29_s20 = sadd.s32 1, %s958_s18  ;;  %p77_p1 = scmp.ne.s32.totalorder %s950_s16, %s946_s15  ;;  %s962_s19 = sphi %s999_s19, %s14_s19   ;;  %s958_s18 = sphi %s997_s18, %s1160_s18   ;;  %s954_s17 = sphi %s995_s17, %s1159_s17   ;;  %s950_s16 = sphi %s993_s16, %s1158_s16   ;;  %s946_s15 = sphi %s991_s15, %s1157_s15  }
   0x4   : > { %p31_p0 = scmp.ge.s32.totalorder %s29_s20, 8  ;;  %p78_p2 = scmp.eq.s32.totalorder %s962_s19, 0 }
   0x5   : > { %s70_s22 = sadd.s32 1, %s950_s16  ;;  %p819_p5 = scmp.ge.s32.totalorder %s962_s19, 8 }
   0x6   : > { %s1162_s20 = smov (%p31_p0, %s29_s20), 0  ;;  %p79_p3 = por %p78_p2, %p77_p1 }
   0x7   : > { %s66_s21 = ssub.s32 %s958_s18, %s1162_s20  ;;  %197 = sbr.rel (%p819_p5) target bundleno = 50 (0x32), region = 20 }
   0x8   : > { %p68_p4 = scmp.eq.s32.totalorder %s66_s21, 0 }
   0xa   : > { %s1026_s23 = scalar_select %p68_p4, %s950_s16, %s70_s22  }
   0xe   : > { %200 = sbr.rel (!%p79_p3) target bundleno = 50 (0x32), region = 24  ;;  %s202_s24 = sand.u32 (%p79_p3), 1, %s950_s16  }
   0xf   : > { %s821_s25 = sshll.u32 (%p79_p3), %s958_s18, 2  ;;  %s820_s26 = sshll.u32 (%p79_p3), %s202_s24, 7 }
  0x10   : > { %s1034_s29 = scalar_lea.vmem (%p79_p3), %s1153_s1, %s821_s25  ;;  %s1038_s30 = scalar_lea.vmem (%p79_p3), [#allocation3], %s820_s26 }
  0x11   : > { %v225_v0 = vld [vmem:[%s1034_s29] sm:$0xf] (%p79_p3) }
  0x12   : > { %v227_v1 = vld [vmem:[%s1034_s29 + $0x20] sm:$0xf] (%p79_p3)  ;;  %226 = vst [vmem:[%s1038_s30] sm:$0xf] (%p79_p3), %v225_v0 }
  0x13   : > { %228 = vst [vmem:[%s1038_s30 + $0x4] sm:$0xf] (%p79_p3), %v227_v1  ;;  %v229_v2 = vld [vmem:[%s1034_s29 + $0x40] sm:$0xf] (%p79_p3) }
  0x14   : > { %v231_v3 = vld [vmem:[%s1034_s29 + $0x60] sm:$0xf] (%p79_p3)  ;;  %230 = vst [vmem:[%s1038_s30 + $0x8] sm:$0xf] (%p79_p3), %v229_v2 }
  0x15   : > { %v233_v4 = vld [vmem:[%s1034_s29 + $0x80] sm:$0xf]  ;;  %232 = vst [vmem:[%s1038_s30 + $0xc] sm:$0xf] %v231_v3 }
  0x16   : > { %234 = vst [vmem:[%s1038_s30 + $0x10] sm:$0xf] %v233_v4  ;;  %v235_v5 = vld [vmem:[%s1034_s29 + $0xa0] sm:$0xf] }
  0x17   : > { %v237_v6 = vld [vmem:[%s1034_s29 + $0xc0] sm:$0xf]  ;;  %236 = vst [vmem:[%s1038_s30 + $0x14] sm:$0xf] %v235_v5 }
  0x18   : > { %v239_v7 = vld [vmem:[%s1034_s29 + $0xe0] sm:$0xf]  ;;  %238 = vst [vmem:[%s1038_s30 + $0x18] sm:$0xf] %v237_v6 }
  0x19   : > { %240 = vst [vmem:[%s1038_s30 + $0x1c] sm:$0xf] %v239_v7  ;;  %v241_v8 = vld [vmem:[%s1034_s29 + $0x100] sm:$0xf] }
  0x1a   : > { %v243_v9 = vld [vmem:[%s1034_s29 + $0x120] sm:$0xf]  ;;  %242 = vst [vmem:[%s1038_s30 + $0x20] sm:$0xf] %v241_v8 }
  0x1b   : > { %v245_v10 = vld [vmem:[%s1034_s29 + $0x140] sm:$0xf]  ;;  %244 = vst [vmem:[%s1038_s30 + $0x24] sm:$0xf] %v243_v9 }
  0x1c   : > { %246 = vst [vmem:[%s1038_s30 + $0x28] sm:$0xf] %v245_v10  ;;  %v247_v11 = vld [vmem:[%s1034_s29 + $0x160] sm:$0xf] }
  0x1d   : > { %v249_v12 = vld [vmem:[%s1034_s29 + $0x180] sm:$0xf]  ;;  %248 = vst [vmem:[%s1038_s30 + $0x2c] sm:$0xf] %v247_v11 }
  0x1e   : > { %v251_v13 = vld [vmem:[%s1034_s29 + $0x1a0] sm:$0xf]  ;;  %250 = vst [vmem:[%s1038_s30 + $0x30] sm:$0xf] %v249_v12 }
  0x1f   : > { %252 = vst [vmem:[%s1038_s30 + $0x34] sm:$0xf] %v251_v13  ;;  %v253_v14 = vld [vmem:[%s1034_s29 + $0x1c0] sm:$0xf] }
  0x20   : > { %v255_v15 = vld [vmem:[%s1034_s29 + $0x1e0] sm:$0xf]  ;;  %254 = vst [vmem:[%s1038_s30 + $0x38] sm:$0xf] %v253_v14 }
  0x21   : > { %v257_v16 = vld [vmem:[%s1034_s29 + $0x200] sm:$0xf]  ;;  %256 = vst [vmem:[%s1038_s30 + $0x3c] sm:$0xf] %v255_v15 }
  0x22   : > { %258 = vst [vmem:[%s1038_s30 + $0x40] sm:$0xf] %v257_v16  ;;  %v259_v17 = vld [vmem:[%s1034_s29 + $0x220] sm:$0xf] }
  0x23   : > { %v261_v18 = vld [vmem:[%s1034_s29 + $0x240] sm:$0xf]  ;;  %260 = vst [vmem:[%s1038_s30 + $0x44] sm:$0xf] %v259_v17 }
  0x24   : > { %v263_v19 = vld [vmem:[%s1034_s29 + $0x260] sm:$0xf]  ;;  %262 = vst [vmem:[%s1038_s30 + $0x48] sm:$0xf] %v261_v18 }
  0x25   : > { %264 = vst [vmem:[%s1038_s30 + $0x4c] sm:$0xf] %v263_v19  ;;  %v265_v20 = vld [vmem:[%s1034_s29 + $0x280] sm:$0xf] }
  0x26   : > { %v267_v21 = vld [vmem:[%s1034_s29 + $0x2a0] sm:$0xf]  ;;  %266 = vst [vmem:[%s1038_s30 + $0x50] sm:$0xf] %v265_v20 }
  0x27   : > { %v269_v22 = vld [vmem:[%s1034_s29 + $0x2c0] sm:$0xf]  ;;  %268 = vst [vmem:[%s1038_s30 + $0x54] sm:$0xf] %v267_v21 }
  0x28   : > { %270 = vst [vmem:[%s1038_s30 + $0x58] sm:$0xf] %v269_v22  ;;  %v271_v23 = vld [vmem:[%s1034_s29 + $0x2e0] sm:$0xf] }
  0x29   : > { %v273_v24 = vld [vmem:[%s1034_s29 + $0x300] sm:$0xf]  ;;  %272 = vst [vmem:[%s1038_s30 + $0x5c] sm:$0xf] %v271_v23 }
  0x2a   : > { %v275_v25 = vld [vmem:[%s1034_s29 + $0x320] sm:$0xf]  ;;  %274 = vst [vmem:[%s1038_s30 + $0x60] sm:$0xf] %v273_v24 }
  0x2b   : > { %276 = vst [vmem:[%s1038_s30 + $0x64] sm:$0xf] %v275_v25  ;;  %v277_v26 = vld [vmem:[%s1034_s29 + $0x340] sm:$0xf] }
  0x2c   : > { %v279_v27 = vld [vmem:[%s1034_s29 + $0x360] sm:$0xf]  ;;  %278 = vst [vmem:[%s1038_s30 + $0x68] sm:$0xf] %v277_v26 }
  0x2d   : > { %v281_v28 = vld [vmem:[%s1034_s29 + $0x380] sm:$0xf]  ;;  %280 = vst [vmem:[%s1038_s30 + $0x6c] sm:$0xf] %v279_v27 }
  0x2e   : > { %282 = vst [vmem:[%s1038_s30 + $0x70] sm:$0xf] %v281_v28  ;;  %v283_v29 = vld [vmem:[%s1034_s29 + $0x3a0] sm:$0xf] }
  0x2f   : > { %v285_v30 = vld [vmem:[%s1034_s29 + $0x3c0] sm:$0xf]  ;;  %284 = vst [vmem:[%s1038_s30 + $0x74] sm:$0xf] %v283_v29 }
  0x30   : > { %v287_v31 = vld [vmem:[%s1034_s29 + $0x3e0] sm:$0xf]  ;;  %286 = vst [vmem:[%s1038_s30 + $0x78] sm:$0xf] %v285_v30 }
  0x31   : > { %288 = vst [vmem:[%s1038_s30 + $0x7c] sm:$0xf] %v287_v31 }
  0x32 PF: > { %p822_p6 = scmp.ge.s32.totalorder %s962_s19, 1  ;;  %p390_p7 = scmp.lt.s32.totalorder %s962_s19, 9 }
  0x34   : > { %p391_p8 = pnand %p822_p6, %p390_p7 }
  0x35   : > { %s397_s5 = sand.u32 (!%p391_p8), 1, %s946_s15   ;;  %v824_v32 = vld.sshfl [vmem:[%s1152_s0] sm:$0x11 pattern:$0x75316420] (!%p391_p8)  ;;  %v521_v33 = vlaneseq (!%p391_p8)  ;;  %v965_v58 = vmov (!%p391_p8), 0.0  }
  0x36   : > { %394 = sbr.rel (%p391_p8) target bundleno = 323 (0x143), region = 73  ;;  %s823_s8 = sshll.u32 (!%p391_p8), %s397_s5, 7  ;;  %v964_v34 = vmov (!%p391_p8), 1966171168   ;;  %v517_v39 = vcombine.high (!%p391_p8), %v824_v32, %v824_v32  ;;  %474 = vst [vmem:[#allocation2] sm:$0x3] (!%p391_p8), %v965_v58 }
  0x37   : > { %v519_v35 = vunpack.c.l.s4 (!%p391_p8), %v964_v34  ;;  %v522_v36 = vshrl.u32 (!%p391_p8), %v521_v33, 7  ;;  %s1108_s9 = scalar_lea.vmem (!%p391_p8), [#allocation3], %s823_s8  ;;  %p452_p9 = scmp.lt.s32.totalorder (!%p391_p8), %s954_s17, 7 }
  0x38   : > { %v908_v37 = vld [vmem:[%s1108_s9 + $0x40] sm:$0xff] (!%p391_p8)   ;;  %v910_v41 = vld [vmem:[%s1108_s9 + $0x48] sm:$0xff] (!%p391_p8)   ;;  %v912_v44 = vld [vmem:[%s1108_s9 + $0x50] sm:$0xff] (!%p391_p8)  }
  0x39   : > { %v909_v38 = vld [vmem:[%s1108_s9] sm:$0xff] (!%p391_p8)   ;;  %v520_v40 = vunpack.c.0.s8 (!%p391_p8), %v519_v35  ;;  %844 = vmatprep.subr.bf16.mxu0 (!%p391_p8), %v908_v37  ;;  %v911_v42 = vld [vmem:[%s1108_s9 + $0x8] sm:$0xff] (!%p391_p8)   ;;  %v913_v46 = vld [vmem:[%s1108_s9 + $0x10] sm:$0xff] (!%p391_p8)  }
  0x3a   : > { %845 = vmatpush3.bf16.msra.mxu0 (!%p391_p8), %v909_v38  ;;  %v914_v47 = vld [vmem:[%s1108_s9 + $0x58] sm:$0xff] (!%p391_p8)   ;;  %v916_v49 = vld [vmem:[%s1108_s9 + $0x60] sm:$0xff] (!%p391_p8)   ;;  %v918_v51 = vld [vmem:[%s1108_s9 + $0x68] sm:$0xff] (!%p391_p8)  }
  0x3b   : > { %v523_v43 = vsub.s32 (!%p391_p8), %v520_v40, %v522_v36  ;;  %846 = vmatprep.subr.bf16.mxu0 (!%p391_p8), %v910_v41  ;;  %v915_v48 = vld [vmem:[%s1108_s9 + $0x18] sm:$0xff] (!%p391_p8)   ;;  %v917_v50 = vld [vmem:[%s1108_s9 + $0x20] sm:$0xff] (!%p391_p8)   ;;  %v919_v52 = vld [vmem:[%s1108_s9 + $0x28] sm:$0xff] (!%p391_p8)  }
  0x3c   : > { %v920_v53 = vld [vmem:[%s1108_s9 + $0x70] sm:$0xff] (!%p391_p8)   ;;  %v922_v55 = vld [vmem:[%s1108_s9 + $0x78] sm:$0xff] (!%p391_p8)  }
  0x3d   : > { %v531_v45 = vrot.slane %v517_v39, %v523_v43  ;;  %v921_v54 = vld [vmem:[%s1108_s9 + $0x30] sm:$0xff]   ;;  %v923_v56 = vld [vmem:[%s1108_s9 + $0x38] sm:$0xff]   ;;  %v524_v57 = vrot.slane %v824_v32, %v523_v43  ;;  %s1164_s17 = smov (!%p452_p9, %s954_s17), 7 }
  0x3e   : > { %847 = vmatpush3.bf16.msra.mxu0 %v911_v42  ;;  %v475_v60 = vld [vmem:[#allocation2] sm:$0x3]  ;;  %s461_s12 = scalar_lea.vmem %s1155_s3, %s1164_s17  ;;  %s454_s15 = scalar_lea.vmem %s1154_s2, %s1164_s17 }
  0x3f   : > { %662 = vmatprep.mubr.bf16.mxu0 %v531_v45  ;;  %848 = vmatprep.subr.bf16.mxu0 %v912_v44  ;;  %v684_v2 = vld [vmem:[%s461_s12] sm:$0x1]  ;;  %s468_s24 = scalar_lea.vmem %s1156_s4, %s1164_s17 }
  0x40   : > { %v841_v3 = vld [vmem:[%s454_s15] ss:$0 sm:$0xff]  ;;  %v685_v4 = vunpack.c.l.bf16 %v684_v2 }
  0x42   : > { %849 = vmatpush3.bf16.msra.mxu0 %v913_v46 }
  0x43   : > { %850 = vmatprep.subr.bf16.mxu0 %v914_v47 }
  0x46   : > { %851 = vmatpush3.bf16.msra.mxu0 %v915_v48 }
  0x47   : > { %852 = vmatprep.subr.bf16.mxu0 %v916_v49 }
  0x4a   : > { %853 = vmatpush3.bf16.msra.mxu0 %v917_v50 }
  0x4b   : > { %854 = vmatprep.subr.bf16.mxu0 %v918_v51 }
  0x4e   : > { %855 = vmatpush3.bf16.msra.mxu0 %v919_v52 }
  0x4f   : > { %856 = vmatprep.subr.bf16.mxu0 %v920_v53 }
  0x52   : > { %857 = vmatpush3.bf16.msra.mxu0 %v921_v54 }
  0x53   : > { %858 = vmatprep.subr.bf16.mxu0 %v922_v55 }
  0x56   : > { %859 = vmatpush3.bf16.msra.mxu0 %v923_v56 }
  0x59   : > { %663 = vmatmul.mubr.bf16.vlgmr.msra.gmra.mrb[0].mxu0 %v524_v57 }
 0x12c   : > { %v860_v59 = vpop.f32.mrb[0].mxu0 }
 0x12d   : > { %v861_v61 = vpop.f32.mrb[1].mxu0 }
 0x12e   : > { %v862_v62 = vadd.f32 %v861_v61, %v860_v59  ;;  %v863_v63 = vpop.f32.mrb[2].mxu0 }
 0x12f   : > { %v864_v0 = vpop.f32.mrb[3].mxu0 }
 0x130   : > { %v670_v1 = vadd.f32 %v862_v62, %v475_v60 }
 0x132   : > { %671 = vst [vmem:[#allocation2] sm:$0x3] %v670_v1 }
 0x139   : > { %v675_v5 = vld [vmem:[#allocation2] sm:$0x3] }
 0x13a   : > { %v683_v6 = vadd.f32 %v841_v3, %v675_v5 }
 0x13c   : > { %v686_v7 = vadd.f32 %v685_v4, %v683_v6 }
 0x13e   : > { %v687_v8 = vmax.f32 %v686_v7, 0.0 }
 0x140   : > { %v688_v9 = vpack.c.bf16 %v687_v8, %v687_v8 }
 0x142   : > { %689 = vst [vmem:[%s468_s24] sm:$0x1] %v688_v9 }
 0x143 PF: > { %s14_s19 = sadd.s32 1, %s962_s19   ;;  %s1157_s15 = smov %s950_s16 }
 0x144   : > { %p11_p10 = scmp.ge.s32.totalorder %s14_s19, 10   ;;  %s1158_s16 = smov %s1026_s23 }
 0x145   : > { %s1159_s17 = smov %s958_s18  ;;  %s1160_s18 = smov %s1162_s20 }
 0x146   :  { %13 = sbr.rel (!%p11_p10) target bundleno = 3 (0x3), region = 129 }

// kernel: _lambda_.102
= control target key start
LH: loop header
LB: loop body
LE: loop exit
PB: predicated region body
PF: predicated region fallthrough
CT: control target
= control target key end

     0   :  { %s1304_s12 = smov 0   ;;  %s1306_s13 = smov 0   ;;  %s1590_s0 = inlined_call_operand.vmem [shape: bf16[2,1024], index: 0, kind: input, shape index: {}]   ;;  %s1591_s1 = inlined_call_operand.vmem [shape: bf16[1024,256], index: 1, kind: input, shape index: {}]   ;;  %s1592_s2 = inlined_call_operand.vmem [shape: f32[1,256], index: 2, kind: input, shape index: {}]   ;;  %s1593_s3 = inlined_call_operand.vmem [shape: bf16[2,256], index: 3, kind: output, shape index: {}]  }
   0x1   :  { %s1308_s14 = smov 0   ;;  %s1310_s15 = smov 0  }
   0x2   :  { %s1312_s16 = smov 0   ;;  %s1314_s17 = smov 0  }
   0x3   :  { %s1316_s18 = smov 0  }
   0x4 LB: > { %s25_s19 = sadd.s32 1, %s1272_s16  ;;  %s28_s20 = sadd.s32 1, %s1276_s17  ;;  %s1280_s18 = sphi %s1316_s18, %s13_s18   ;;  %s1276_s17 = sphi %s1314_s17, %s1599_s17   ;;  %s1272_s16 = sphi %s1312_s16, %s1598_s16   ;;  %s1268_s15 = sphi %s1310_s15, %s1597_s15   ;;  %s1264_s14 = sphi %s1308_s14, %s1596_s14   ;;  %s1260_s13 = sphi %s1306_s13, %s1595_s13   ;;  %s1256_s12 = sphi %s1304_s12, %s1594_s12  }
   0x5   : > { %p26_p0 = scmp.ge.s32.totalorder %s25_s19, 2  ;;  %p76_p1 = scmp.ne.s32.totalorder %s1260_s13, %s1256_s12 }
   0x6   : > { %p77_p2 = scmp.eq.s32.totalorder %s1280_s18, 0  ;;  %s69_s24 = sadd.s32 1, %s1260_s13 }
   0x7   : > { %s1601_s19 = smov (%p26_p0, %s25_s19), 0  ;;  %s1603_s20 = smov (!%p26_p0, %s28_s20), %s1276_s17 }
   0x8   : > { %p78_p3 = por %p77_p2, %p76_p1  ;;  %p30_p4 = scmp.ge.s32.totalorder %s1603_s20, 2 }
   0x9   : > { %s64_s21 = ssub.s32 %s1272_s16, %s1601_s19  ;;  %p1045_p6 = scmp.ge.s32.totalorder %s1280_s18, 4 }
   0xa   : > { %s1605_s20 = smov (%p30_p4, %s1603_s20), 0 }
   0xb   : > { %s65_s22 = ssub.s32 %s1276_s17, %s1605_s20  ;;  %156 = sbr.rel (%p1045_p6) target bundleno = 66 (0x42), region = 16 }
   0xc   : > { %s66_s23 = sor.u32 %s65_s22, %s64_s21 }
   0xd   : > { %p67_p5 = scmp.eq.s32.totalorder %s66_s23, 0 }
   0xf   : > { %s1355_s25 = scalar_select %p67_p5, %s1260_s13, %s69_s24  }
  0x12   : > { %171 = sbr.rel (!%p78_p3) target bundleno = 66 (0x42), region = 24  ;;  %s173_s26 = sand.u32 (%p78_p3), 1, %s1260_s13  }
  0x13   : > { %s1091_s27 = sshll.u32 (%p78_p3), %s1272_s16, 7  ;;  %s1046_s28 = sshll.u32 (%p78_p3), %s173_s26, 8 }
  0x14   : > { %s178_s29 = sadd.s32 (%p78_p3), %s1276_s17, %s1091_s27  ;;  %s1369_s7 = scalar_lea.vmem (%p78_p3), [#allocation3], %s1046_s28 }
  0x15   : > { %s1049_s30 = sshll.u32 (%p78_p3), %s178_s29, 2 }
  0x16   : > { %s1364_s6 = scalar_lea.vmem (%p78_p3), %s1591_s1, %s1049_s30 }
  0x17   : > { %v196_v0 = vld [vmem:[%s1364_s6] sm:$0xf] (%p78_p3)  ;;  %v198_v1 = vld [vmem:[%s1364_s6 + $0x8] sm:$0xf] (%p78_p3)  ;;  %v200_v2 = vld [vmem:[%s1364_s6 + $0x10] sm:$0xf] (%p78_p3) }
  0x18   : > { %197 = vst [vmem:[%s1369_s7] sm:$0xf] (%p78_p3), %v196_v0  ;;  %199 = vst [vmem:[%s1369_s7 + $0x4] sm:$0xf] (%p78_p3), %v198_v1  ;;  %v202_v3 = vld [vmem:[%s1364_s6 + $0x18] sm:$0xf] (%p78_p3) }
  0x19   : > { %201 = vst [vmem:[%s1369_s7 + $0x8] sm:$0xf] %v200_v2  ;;  %v204_v4 = vld [vmem:[%s1364_s6 + $0x20] sm:$0xf]  ;;  %v206_v5 = vld [vmem:[%s1364_s6 + $0x28] sm:$0xf] }
  0x1a   : > { %203 = vst [vmem:[%s1369_s7 + $0xc] sm:$0xf] %v202_v3  ;;  %205 = vst [vmem:[%s1369_s7 + $0x10] sm:$0xf] %v204_v4  ;;  %v208_v6 = vld [vmem:[%s1364_s6 + $0x30] sm:$0xf] }
  0x1b   : > { %207 = vst [vmem:[%s1369_s7 + $0x14] sm:$0xf] %v206_v5  ;;  %v210_v7 = vld [vmem:[%s1364_s6 + $0x38] sm:$0xf]  ;;  %v212_v8 = vld [vmem:[%s1364_s6 + $0x40] sm:$0xf] }
  0x1c   : > { %209 = vst [vmem:[%s1369_s7 + $0x18] sm:$0xf] %v208_v6  ;;  %211 = vst [vmem:[%s1369_s7 + $0x1c] sm:$0xf] %v210_v7  ;;  %v214_v9 = vld [vmem:[%s1364_s6 + $0x48] sm:$0xf] }
  0x1d   : > { %213 = vst [vmem:[%s1369_s7 + $0x20] sm:$0xf] %v212_v8  ;;  %v216_v10 = vld [vmem:[%s1364_s6 + $0x50] sm:$0xf]  ;;  %v218_v11 = vld [vmem:[%s1364_s6 + $0x58] sm:$0xf] }
  0x1e   : > { %215 = vst [vmem:[%s1369_s7 + $0x24] sm:$0xf] %v214_v9  ;;  %217 = vst [vmem:[%s1369_s7 + $0x28] sm:$0xf] %v216_v10  ;;  %v220_v12 = vld [vmem:[%s1364_s6 + $0x60] sm:$0xf] }
  0x1f   : > { %219 = vst [vmem:[%s1369_s7 + $0x2c] sm:$0xf] %v218_v11  ;;  %v222_v13 = vld [vmem:[%s1364_s6 + $0x68] sm:$0xf]  ;;  %v224_v14 = vld [vmem:[%s1364_s6 + $0x70] sm:$0xf] }
  0x20   : > { %221 = vst [vmem:[%s1369_s7 + $0x30] sm:$0xf] %v220_v12  ;;  %223 = vst [vmem:[%s1369_s7 + $0x34] sm:$0xf] %v222_v13  ;;  %v226_v15 = vld [vmem:[%s1364_s6 + $0x78] sm:$0xf] }
  0x21   : > { %225 = vst [vmem:[%s1369_s7 + $0x38] sm:$0xf] %v224_v14  ;;  %v228_v16 = vld [vmem:[%s1364_s6 + $0x80] sm:$0xf]  ;;  %v230_v17 = vld [vmem:[%s1364_s6 + $0x88] sm:$0xf] }
  0x22   : > { %227 = vst [vmem:[%s1369_s7 + $0x3c] sm:$0xf] %v226_v15  ;;  %229 = vst [vmem:[%s1369_s7 + $0x40] sm:$0xf] %v228_v16  ;;  %v232_v18 = vld [vmem:[%s1364_s6 + $0x90] sm:$0xf] }
  0x23   : > { %231 = vst [vmem:[%s1369_s7 + $0x44] sm:$0xf] %v230_v17  ;;  %v234_v19 = vld [vmem:[%s1364_s6 + $0x98] sm:$0xf]  ;;  %v236_v20 = vld [vmem:[%s1364_s6 + $0xa0] sm:$0xf] }
  0x24   : > { %233 = vst [vmem:[%s1369_s7 + $0x48] sm:$0xf] %v232_v18  ;;  %235 = vst [vmem:[%s1369_s7 + $0x4c] sm:$0xf] %v234_v19  ;;  %v238_v21 = vld [vmem:[%s1364_s6 + $0xa8] sm:$0xf] }
  0x25   : > { %237 = vst [vmem:[%s1369_s7 + $0x50] sm:$0xf] %v236_v20  ;;  %v240_v22 = vld [vmem:[%s1364_s6 + $0xb0] sm:$0xf]  ;;  %v242_v23 = vld [vmem:[%s1364_s6 + $0xb8] sm:$0xf] }
  0x26   : > { %239 = vst [vmem:[%s1369_s7 + $0x54] sm:$0xf] %v238_v21  ;;  %241 = vst [vmem:[%s1369_s7 + $0x58] sm:$0xf] %v240_v22  ;;  %v244_v24 = vld [vmem:[%s1364_s6 + $0xc0] sm:$0xf] }
  0x27   : > { %243 = vst [vmem:[%s1369_s7 + $0x5c] sm:$0xf] %v242_v23  ;;  %v246_v25 = vld [vmem:[%s1364_s6 + $0xc8] sm:$0xf]  ;;  %v248_v26 = vld [vmem:[%s1364_s6 + $0xd0] sm:$0xf] }
  0x28   : > { %245 = vst [vmem:[%s1369_s7 + $0x60] sm:$0xf] %v244_v24  ;;  %247 = vst [vmem:[%s1369_s7 + $0x64] sm:$0xf] %v246_v25  ;;  %v250_v27 = vld [vmem:[%s1364_s6 + $0xd8] sm:$0xf] }
  0x29   : > { %249 = vst [vmem:[%s1369_s7 + $0x68] sm:$0xf] %v248_v26  ;;  %v252_v28 = vld [vmem:[%s1364_s6 + $0xe0] sm:$0xf]  ;;  %v254_v29 = vld [vmem:[%s1364_s6 + $0xe8] sm:$0xf] }
  0x2a   : > { %251 = vst [vmem:[%s1369_s7 + $0x6c] sm:$0xf] %v250_v27  ;;  %253 = vst [vmem:[%s1369_s7 + $0x70] sm:$0xf] %v252_v28  ;;  %v256_v30 = vld [vmem:[%s1364_s6 + $0xf0] sm:$0xf] }
  0x2b   : > { %255 = vst [vmem:[%s1369_s7 + $0x74] sm:$0xf] %v254_v29  ;;  %v258_v31 = vld [vmem:[%s1364_s6 + $0xf8] sm:$0xf]  ;;  %v260_v32 = vld [vmem:[%s1364_s6 + $0x100] sm:$0xf] }
  0x2c   : > { %257 = vst [vmem:[%s1369_s7 + $0x78] sm:$0xf] %v256_v30  ;;  %259 = vst [vmem:[%s1369_s7 + $0x7c] sm:$0xf] %v258_v31  ;;  %v262_v33 = vld [vmem:[%s1364_s6 + $0x108] sm:$0xf] }
  0x2d   : > { %261 = vst [vmem:[%s1369_s7 + $0x80] sm:$0xf] %v260_v32  ;;  %v264_v34 = vld [vmem:[%s1364_s6 + $0x110] sm:$0xf]  ;;  %v266_v35 = vld [vmem:[%s1364_s6 + $0x118] sm:$0xf] }
  0x2e   : > { %263 = vst [vmem:[%s1369_s7 + $0x84] sm:$0xf] %v262_v33  ;;  %265 = vst [vmem:[%s1369_s7 + $0x88] sm:$0xf] %v264_v34  ;;  %v268_v36 = vld [vmem:[%s1364_s6 + $0x120] sm:$0xf] }
  0x2f   : > { %267 = vst [vmem:[%s1369_s7 + $0x8c] sm:$0xf] %v266_v35  ;;  %v270_v37 = vld [vmem:[%s1364_s6 + $0x128] sm:$0xf]  ;;  %v272_v38 = vld [vmem:[%s1364_s6 + $0x130] sm:$0xf] }
  0x30   : > { %269 = vst [vmem:[%s1369_s7 + $0x90] sm:$0xf] %v268_v36  ;;  %271 = vst [vmem:[%s1369_s7 + $0x94] sm:$0xf] %v270_v37  ;;  %v274_v39 = vld [vmem:[%s1364_s6 + $0x138] sm:$0xf] }
  0x31   : > { %273 = vst [vmem:[%s1369_s7 + $0x98] sm:$0xf] %v272_v38  ;;  %v276_v40 = vld [vmem:[%s1364_s6 + $0x140] sm:$0xf]  ;;  %v278_v41 = vld [vmem:[%s1364_s6 + $0x148] sm:$0xf] }
  0x32   : > { %275 = vst [vmem:[%s1369_s7 + $0x9c] sm:$0xf] %v274_v39  ;;  %277 = vst [vmem:[%s1369_s7 + $0xa0] sm:$0xf] %v276_v40  ;;  %v280_v42 = vld [vmem:[%s1364_s6 + $0x150] sm:$0xf] }
  0x33   : > { %279 = vst [vmem:[%s1369_s7 + $0xa4] sm:$0xf] %v278_v41  ;;  %v282_v43 = vld [vmem:[%s1364_s6 + $0x158] sm:$0xf]  ;;  %v284_v44 = vld [vmem:[%s1364_s6 + $0x160] sm:$0xf] }
  0x34   : > { %281 = vst [vmem:[%s1369_s7 + $0xa8] sm:$0xf] %v280_v42  ;;  %283 = vst [vmem:[%s1369_s7 + $0xac] sm:$0xf] %v282_v43  ;;  %v286_v45 = vld [vmem:[%s1364_s6 + $0x168] sm:$0xf] }
  0x35   : > { %285 = vst [vmem:[%s1369_s7 + $0xb0] sm:$0xf] %v284_v44  ;;  %v288_v46 = vld [vmem:[%s1364_s6 + $0x170] sm:$0xf]  ;;  %v290_v47 = vld [vmem:[%s1364_s6 + $0x178] sm:$0xf] }
  0x36   : > { %287 = vst [vmem:[%s1369_s7 + $0xb4] sm:$0xf] %v286_v45  ;;  %289 = vst [vmem:[%s1369_s7 + $0xb8] sm:$0xf] %v288_v46  ;;  %v292_v48 = vld [vmem:[%s1364_s6 + $0x180] sm:$0xf] }
  0x37   : > { %291 = vst [vmem:[%s1369_s7 + $0xbc] sm:$0xf] %v290_v47  ;;  %v294_v49 = vld [vmem:[%s1364_s6 + $0x188] sm:$0xf]  ;;  %v296_v50 = vld [vmem:[%s1364_s6 + $0x190] sm:$0xf] }
  0x38   : > { %293 = vst [vmem:[%s1369_s7 + $0xc0] sm:$0xf] %v292_v48  ;;  %295 = vst [vmem:[%s1369_s7 + $0xc4] sm:$0xf] %v294_v49  ;;  %v298_v51 = vld [vmem:[%s1364_s6 + $0x198] sm:$0xf] }
  0x39   : > { %297 = vst [vmem:[%s1369_s7 + $0xc8] sm:$0xf] %v296_v50  ;;  %v300_v52 = vld [vmem:[%s1364_s6 + $0x1a0] sm:$0xf]  ;;  %v302_v53 = vld [vmem:[%s1364_s6 + $0x1a8] sm:$0xf] }
  0x3a   : > { %299 = vst [vmem:[%s1369_s7 + $0xcc] sm:$0xf] %v298_v51  ;;  %301 = vst [vmem:[%s1369_s7 + $0xd0] sm:$0xf] %v300_v52  ;;  %v304_v54 = vld [vmem:[%s1364_s6 + $0x1b0] sm:$0xf] }
  0x3b   : > { %303 = vst [vmem:[%s1369_s7 + $0xd4] sm:$0xf] %v302_v53  ;;  %v306_v55 = vld [vmem:[%s1364_s6 + $0x1b8] sm:$0xf]  ;;  %v308_v56 = vld [vmem:[%s1364_s6 + $0x1c0] sm:$0xf] }
  0x3c   : > { %305 = vst [vmem:[%s1369_s7 + $0xd8] sm:$0xf] %v304_v54  ;;  %307 = vst [vmem:[%s1369_s7 + $0xdc] sm:$0xf] %v306_v55  ;;  %v310_v57 = vld [vmem:[%s1364_s6 + $0x1c8] sm:$0xf] }
  0x3d   : > { %309 = vst [vmem:[%s1369_s7 + $0xe0] sm:$0xf] %v308_v56  ;;  %v312_v58 = vld [vmem:[%s1364_s6 + $0x1d0] sm:$0xf]  ;;  %v314_v59 = vld [vmem:[%s1364_s6 + $0x1d8] sm:$0xf] }
  0x3e   : > { %311 = vst [vmem:[%s1369_s7 + $0xe4] sm:$0xf] %v310_v57  ;;  %313 = vst [vmem:[%s1369_s7 + $0xe8] sm:$0xf] %v312_v58  ;;  %v316_v60 = vld [vmem:[%s1364_s6 + $0x1e0] sm:$0xf] }
  0x3f   : > { %315 = vst [vmem:[%s1369_s7 + $0xec] sm:$0xf] %v314_v59  ;;  %v318_v61 = vld [vmem:[%s1364_s6 + $0x1e8] sm:$0xf]  ;;  %v320_v62 = vld [vmem:[%s1364_s6 + $0x1f0] sm:$0xf] }
  0x40   : > { %317 = vst [vmem:[%s1369_s7 + $0xf0] sm:$0xf] %v316_v60  ;;  %319 = vst [vmem:[%s1369_s7 + $0xf4] sm:$0xf] %v318_v61  ;;  %v322_v63 = vld [vmem:[%s1364_s6 + $0x1f8] sm:$0xf] }
  0x41   : > { %321 = vst [vmem:[%s1369_s7 + $0xf8] sm:$0xf] %v320_v62  ;;  %323 = vst [vmem:[%s1369_s7 + $0xfc] sm:$0xf] %v322_v63 }
  0x42 PF: > { %p1050_p7 = scmp.ge.s32.totalorder %s1280_s18, 1  ;;  %p479_p8 = scmp.lt.s32.totalorder %s1280_s18, 5 }
  0x44   : > { %p480_p9 = pnand %p1050_p7, %p479_p8 }
  0x45   : > { %s486_s8 = sand.u32 (!%p480_p9), 1, %s1256_s12   ;;  %s1052_s9 = sshll.u32 (!%p480_p9), %s1264_s14, 2 }
  0x46   : > { %483 = sbr.rel (%p480_p9) target bundleno = 355 (0x163), region = 69  ;;  %s1051_s10 = sshll.u32 (!%p480_p9), %s486_s8, 8 }
  0x47   : > { %p525_p10 = scmp.lt.s32.totalorder (!%p480_p9), %s1052_s9, 7  ;;  %p532_p11 = scmp.lt.s32.totalorder (!%p480_p9), %s1268_s15, 1 }
  0x48   : > { %s1518_s29 = scalar_lea.vmem (!%p480_p9), [#allocation3], %s1051_s10  ;;  %p1053_p12 = scmp.ne.s32.totalorder (!%p480_p9), %s1264_s14, 0 }
  0x4d   : > { %s1607_s9 = smov (!%p525_p10, %s1052_s9), 7  ;;  %s1609_s15 = smov (!%p532_p11, %s1268_s15), 1 }
  0x4e   : > { %s529_s22 = scalar_lea.vmem %s1590_s0, %s1607_s9  ;;  %s534_s26 = scalar_lea.vmem %s1592_s2, %s1609_s15  ;;  %v1282_v0 = vmov (!%p1053_p12), 0.0  }
  0x4f   : > { %s541_s28 = scalar_lea.vmem %s1593_s3, %s1609_s15  ;;  %546 = sbr.rel (%p1053_p12) target bundleno = 86 (0x56), region = 77  ;;  %547 = vst [vmem:[#allocation2] sm:$0x3] (!%p1053_p12), %v1282_v0 }
  0x56 PF: > { %v1194_v1 = vld [vmem:[%s1518_s29 + $0x40] sm:$0xff]   ;;  %v1198_v5 = vld [vmem:[%s1518_s29 + $0x48] sm:$0xff]   ;;  %v1202_v9 = vld [vmem:[%s1518_s29 + $0x50] sm:$0xff]   ;;  %v626_v31 = vlaneseq  ;;  %v1283_v35 = vmov 1966171168   ;;  %p1087_p13 = scmp.ne.s32.totalorder %s1264_s14, 1 }
  0x57   : > { %v1195_v2 = vld [vmem:[%s1518_s29 + $0xc0] sm:$0xff]   ;;  %1092 = vmatprep.subr.bf16.mxu0 %v1194_v1  ;;  %v1199_v6 = vld [vmem:[%s1518_s29 + $0xc8] sm:$0xff]   ;;  %v1203_v10 = vld [vmem:[%s1518_s29 + $0xd0] sm:$0xff]   ;;  %v624_v36 = vunpack.c.l.s4 %v1283_v35 }
  0x58   : > { %v1196_v3 = vld [vmem:[%s1518_s29] sm:$0xff]   ;;  %1114 = vmatprep.subr.bf16.mxu1 %v1195_v2  ;;  %v1200_v7 = vld [vmem:[%s1518_s29 + $0x8] sm:$0xff]   ;;  %v1204_v11 = vld [vmem:[%s1518_s29 + $0x10] sm:$0xff]   ;;  %v627_v37 = vshrl.u32 %v626_v31, 7 }
  0x59   : > { %v1197_v4 = vld [vmem:[%s1518_s29 + $0x80] sm:$0xff]   ;;  %1093 = vmatpush3.bf16.msra.mxu0 %v1196_v3  ;;  %v1201_v8 = vld [vmem:[%s1518_s29 + $0x88] sm:$0xff]   ;;  %v1205_v12 = vld [vmem:[%s1518_s29 + $0x90] sm:$0xff]   ;;  %v625_v39 = vunpack.c.0.s8 %v624_v36 }
  0x5a   : > { %1115 = vmatpush3.bf16.msra.mxu1 %v1197_v4  ;;  %1094 = vmatprep.subr.bf16.mxu0 %v1198_v5  ;;  %v1206_v13 = vld [vmem:[%s1518_s29 + $0x58] sm:$0xff]   ;;  %v1210_v17 = vld [vmem:[%s1518_s29 + $0x60] sm:$0xff]   ;;  %v1214_v21 = vld [vmem:[%s1518_s29 + $0x68] sm:$0xff]  }
  0x5b   : > { %1116 = vmatprep.subr.bf16.mxu1 %v1199_v6  ;;  %v1207_v14 = vld [vmem:[%s1518_s29 + $0xd8] sm:$0xff]   ;;  %v1211_v18 = vld [vmem:[%s1518_s29 + $0xe0] sm:$0xff]   ;;  %v1215_v22 = vld [vmem:[%s1518_s29 + $0xe8] sm:$0xff]   ;;  %v628_v40 = vsub.s32 %v625_v39, %v627_v37 }
  0x5c   : > { %v1208_v15 = vld [vmem:[%s1518_s29 + $0x18] sm:$0xff]   ;;  %v1212_v19 = vld [vmem:[%s1518_s29 + $0x20] sm:$0xff]   ;;  %v1216_v23 = vld [vmem:[%s1518_s29 + $0x28] sm:$0xff]  }
  0x5d   : > { %1095 = vmatpush3.bf16.msra.mxu0 %v1200_v7  ;;  %v1209_v16 = vld [vmem:[%s1518_s29 + $0x98] sm:$0xff]   ;;  %v1213_v20 = vld [vmem:[%s1518_s29 + $0xa0] sm:$0xff]   ;;  %v1217_v24 = vld [vmem:[%s1518_s29 + $0xa8] sm:$0xff]  }
  0x5e   : > { %1117 = vmatpush3.bf16.msra.mxu1 %v1201_v8  ;;  %1096 = vmatprep.subr.bf16.mxu0 %v1202_v9  ;;  %v1218_v25 = vld [vmem:[%s1518_s29 + $0x70] sm:$0xff]   ;;  %v1222_v29 = vld [vmem:[%s1518_s29 + $0x78] sm:$0xff]  }
  0x5f   : > { %1118 = vmatprep.subr.bf16.mxu1 %v1203_v10  ;;  %v1219_v26 = vld [vmem:[%s1518_s29 + $0xf0] sm:$0xff]   ;;  %v1223_v30 = vld [vmem:[%s1518_s29 + $0xf8] sm:$0xff]  }
  0x60   : > { %v1220_v27 = vld [vmem:[%s1518_s29 + $0x30] sm:$0xff]   ;;  %v1224_v32 = vld [vmem:[%s1518_s29 + $0x38] sm:$0xff]  }
  0x61   : > { %1097 = vmatpush3.bf16.msra.mxu0 %v1204_v11  ;;  %v1221_v28 = vld [vmem:[%s1518_s29 + $0xb0] sm:$0xff]   ;;  %v1225_v33 = vld [vmem:[%s1518_s29 + $0xb8] sm:$0xff]  }
  0x62   : > { %1119 = vmatpush3.bf16.msra.mxu1 %v1205_v12  ;;  %1098 = vmatprep.subr.bf16.mxu0 %v1206_v13  ;;  %v1054_v34 = vld.sshfl [vmem:[%s529_s22] sm:$0x33 pattern:$0x75316420] }
  0x63   : > { %1120 = vmatprep.subr.bf16.mxu1 %v1207_v14  ;;  %v622_v38 = vcombine.high %v1054_v34, %v1054_v34  ;;  %v629_v42 = vrot.slane %v1054_v34, %v628_v40  ;;  %v548_v54 = vld [vmem:[#allocation2] sm:$0x3] }
  0x64   : > { %v1088_v59 = vld [vmem:[%s534_s26] ss:$0 sm:$0xff] (!%p1087_p13) }
  0x65   : > { %1099 = vmatpush3.bf16.msra.mxu0 %v1208_v15  ;;  %v636_v41 = vrot.slane %v622_v38, %v628_v40  ;;  %v637_v44 = vcombine.high %v629_v42, %v629_v42 }
  0x66   : > { %1121 = vmatpush3.bf16.msra.mxu1 %v1209_v16  ;;  %1100 = vmatprep.subr.bf16.mxu0 %v1210_v17 }
  0x67   : > { %1122 = vmatprep.subr.bf16.mxu1 %v1211_v18  ;;  %867 = vmatprep.mubr.bf16.mxu0 %v636_v41  ;;  %v638_v43 = vcombine.high %v636_v41, %v636_v41 }
  0x69   : > { %1101 = vmatpush3.bf16.msra.mxu0 %v1212_v19  ;;  %907 = vmatprep.mubr.bf16.mxu1 %v638_v43 }
  0x6a   : > { %1123 = vmatpush3.bf16.msra.mxu1 %v1213_v20  ;;  %1102 = vmatprep.subr.bf16.mxu0 %v1214_v21 }
  0x6b   : > { %1124 = vmatprep.subr.bf16.mxu1 %v1215_v22 }
  0x6d   : > { %1103 = vmatpush3.bf16.msra.mxu0 %v1216_v23 }
  0x6e   : > { %1125 = vmatpush3.bf16.msra.mxu1 %v1217_v24  ;;  %1104 = vmatprep.subr.bf16.mxu0 %v1218_v25 }
  0x6f   : > { %1126 = vmatprep.subr.bf16.mxu1 %v1219_v26 }
  0x71   : > { %1105 = vmatpush3.bf16.msra.mxu0 %v1220_v27 }
  0x72   : > { %1127 = vmatpush3.bf16.msra.mxu1 %v1221_v28  ;;  %1106 = vmatprep.subr.bf16.mxu0 %v1222_v29 }
  0x73   : > { %1128 = vmatprep.subr.bf16.mxu1 %v1223_v30 }
  0x75   : > { %1107 = vmatpush3.bf16.msra.mxu0 %v1224_v32 }
  0x76   : > { %1129 = vmatpush3.bf16.msra.mxu1 %v1225_v33 }
  0x78   : > { %868 = vmatmul.mubr.bf16.vlgmr.msra.gmra.mrb[0].mxu0 %v629_v42 }
  0x79   : > { %908 = vmatmul.mubr.bf16.vlgmr.msra.gmra.mrb[0].mxu1 %v637_v44 }
 0x14b   : > { %v1108_v45 = vpop.f32.mrb[0].mxu0 }
 0x14c   : > { %v1109_v46 = vpop.f32.mrb[1].mxu0  ;;  %v1130_v47 = vpop.f32.mrb[0].mxu1 }
 0x14d   : > { %v1110_v48 = vadd.f32 %v1109_v46, %v1108_v45  ;;  %v1111_v49 = vpop.f32.mrb[2].mxu0  ;;  %v1131_v50 = vpop.f32.mrb[1].mxu1 }
 0x14e   : > { %v1112_v51 = vpop.f32.mrb[3].mxu0  ;;  %v1132_v52 = vadd.f32 %v1131_v50, %v1130_v47  ;;  %v1133_v53 = vpop.f32.mrb[2].mxu1  ;;  %920 = sbr.rel (%p1087_p13) target bundleno = 355 (0x163), region = 81 }
 0x14f   : > { %v1134_v55 = vpop.f32.mrb[3].mxu1 }
 0x150   : > { %v910_v56 = vadd.f32 %v1132_v52, %v1110_v48 }
 0x152   : > { %v915_v57 = vadd.f32 %v910_v56, %v548_v54 }
 0x154   : > { %916 = vst [vmem:[#allocation2] sm:$0x3] %v915_v57 }
 0x15b   : > { %v921_v58 = vld [vmem:[#allocation2] sm:$0x3] }
 0x15c   : > { %v929_v60 = vadd.f32 %v1088_v59, %v921_v58 }
 0x15e   : > { %v930_v61 = vmax.f32 %v929_v60, 0.0 }
 0x160   : > { %v931_v62 = vpack.c.bf16 %v930_v61, %v930_v61 }
 0x162   : > { %932 = vst [vmem:[%s541_s28] sm:$0x1] %v931_v62 }
 0x163 PF: > { %s13_s18 = sadd.s32 1, %s1280_s18   ;;  %s1594_s12 = smov %s1260_s13 }
 0x164   : > { %p10_p0 = scmp.ge.s32.totalorder %s13_s18, 6   ;;  %s1595_s13 = smov %s1355_s25 }
 0x165   : > { %s1596_s14 = smov %s1272_s16  ;;  %s1597_s15 = smov %s1276_s17 }
 0x166   : > { %s1598_s16 = smov %s1601_s19  ;;  %s1599_s17 = smov %s1605_s20 }
 0x167   :  { %12 = sbr.rel (!%p10_p0) target bundleno = 4 (0x4), region = 122 }

</bundles_post_ra>
